<compile_context>
chip_gen: v6e
topology: v6e:2x2x1
jax: 0.10.0
libtpu: 0.0.40
codegen_flags: <defaults>
</compile_context>

<pallas_src>
import jax
import jax.numpy as jnp
from jax import lax
from jax.experimental import pallas as pl
from jax.experimental.pallas import tpu as pltpu


# Output-channel sizes of the 1x1-conv chain used in forward: cnn1..cnn4, cnn7.
_CH = (15, 13, 9, 4, 4)
_SUB = 8  # inner batch sub-tile (one sublane group) -> bounds vreg live ranges


def _round_up(x, m):
    return ((x + m - 1) // m) * m


def _make_kernel(c_in, block_b):
    chans = (c_in,) + _CH
    n_sub = block_b // _SUB

    def kernel(x_ref,
               w1_ref, b1_ref, w2_ref, b2_ref, w3_ref, b3_ref,
               w4_ref, b4_ref, w7_ref, b7_ref,
               out_ref):
        # x_ref:   (c_in, block_b, 121) VMEM, channel-major: x_ref[c] is a
        #          contiguous lane-dense (block_b, 121) slab.
        # out_ref: (4, block_b, 121) VMEM, channel-major lane-dense stores.
        # w*_ref / b*_ref: flat f32 parameter vectors in SMEM (scalar reads).

        # ---- Hoist ALL weight/bias scalar reads out of the inner batch loop
        # (read once per grid step; loop-invariant values -> stay in sregs).
        def read_params(w_ref, b_ref, cout, cin):
            W = [[w_ref[o * cin + c] for c in range(cin)] for o in range(cout)]
            Bv = [b_ref[o] for o in range(cout)]
            return W, Bv

        W1, B1 = read_params(w1_ref, b1_ref, chans[1], chans[0])
        W2, B2 = read_params(w2_ref, b2_ref, chans[2], chans[1])
        W3, B3 = read_params(w3_ref, b3_ref, chans[3], chans[2])
        W4, B4 = read_params(w4_ref, b4_ref, chans[4], chans[3])
        W7, B7 = read_params(w7_ref, b7_ref, chans[5], chans[4])

        def conv1x1(h_in, W, Bv, relu):
            # y[o] = sum_c W[o][c] * h_in[c] + Bv[o]   (scalar * slab MACs on VPU)
            h_out = []
            for o in range(len(W)):
                acc = h_in[0] * W[o][0]
                for c in range(1, len(h_in)):
                    acc = acc + h_in[c] * W[o][c]
                acc = acc + Bv[o]
                if relu:
                    acc = jnp.maximum(acc, 0.0)
                h_out.append(acc)
            return h_out

        # ---- Inner loop over 8-row batch sub-tiles: every intermediate is a
        # single (8, 121) vreg, so the conv chain stays register-resident.
        def body(i, carry):
            r = pl.multiple_of(i * _SUB, _SUB)
            h = [x_ref[c, pl.ds(r, _SUB), :] for c in range(chans[0])]

            h = conv1x1(h, W1, B1, True)        # cnn1 + relu
            # dropout -> identity (eval mode)
            h = conv1x1(h, W2, B2, True)        # cnn2 + relu
            h = conv1x1(h, W3, B3, True)        # cnn3 + relu
            # dropout -> identity (eval mode)
            h = conv1x1(h, W4, B4, True)        # cnn4 + relu
            logits = conv1x1(h, W7, B7, False)  # cnn7 (no relu)

            # Softmax over the 121 positions (lane axis) per (row, channel).
            for o in range(chans[5]):
                lg = logits[o]                                  # (8, 121)
                m = jnp.max(lg, axis=-1, keepdims=True)
                e = jnp.exp(lg - m)
                s = jnp.sum(e, axis=-1, keepdims=True)
                out_ref[o, pl.ds(r, _SUB), :] = e / s           # exact divide
            return carry

        if n_sub == 1:
            body(0, None)
        else:
            lax.fori_loop(0, n_sub, body, None, unroll=min(2, n_sub))

    return kernel


def position_prediction(obs_nchw, last_obs_nchw, params, *, block_b=None):
    """obs: (B, C, 11, 11) f32 NCHW -> (B, 4, 11, 11) softmax over the 121 positions."""
    del last_obs_nchw  # accepted but unused by the reference forward
    B, C, H, W = obs_nchw.shape
    assert (H, W) == (11, 11), "forward's .view(B, 4, 121, 1) requires 11x11 spatial"
    P = H * W  # 121

    # Channel-major (C, B, P): each channel is a contiguous lane-dense slab in
    # the kernel.  The transpose is a few hundred KB of HBM traffic at most.
    x = obs_nchw.reshape(B, C, P).astype(jnp.float32).transpose(1, 0, 2)

    if block_b is None:
        # >= 2 grid steps when possible (v7x: 2 TensorCores), capped at 512
        # rows/step; multiple of the 8-row inner sub-tile.
        block_b = min(512, _round_up(max(1, -(-B // 2)), _SUB))
    assert block_b % _SUB == 0
    n_blocks = -(-B // block_b)
    Bp = n_blocks * block_b
    if Bp != B:
        x = jnp.pad(x, ((0, 0), (0, Bp - B), (0, 0)))

    (w1, b1, w2, b2, w3, b3, w4, b4, w7, b7) = params
    # Flatten params to 1-D f32 (row-major (out, in), matching Conv2d weights)
    # so they sit in SMEM without 2-D padding and are read as scalars.
    flat = [a.reshape(-1).astype(jnp.float32)
            for a in (w1, b1, w2, b2, w3, b3, w4, b4, w7, b7)]

    smem_spec = pl.BlockSpec(memory_space=pltpu.MemorySpace.SMEM)

    out = pl.pallas_call(
        _make_kernel(C, block_b),
        out_shape=jax.ShapeDtypeStruct((4, Bp, P), jnp.float32),
        grid=(n_blocks,),
        in_specs=[pl.BlockSpec((C, block_b, P), lambda i: (0, i, 0))]
                 + [smem_spec] * 10,
        out_specs=pl.BlockSpec((4, block_b, P), lambda i: (0, i, 0)),
        compiler_params=pltpu.CompilerParams(
            dimension_semantics=("parallel",),
            vmem_limit_bytes=32 * 1024 * 1024,
        ),
    )(x, *flat)

    out = out[:, :B]                                   # drop batch padding
    return out.transpose(1, 0, 2).reshape(B, 4, H, W)  # back to NCHW


def init_params(input_dim, key):
    """Deterministic synthetic parameters (same shapes as the nn.Conv2d layers)."""
    keys = jax.random.split(key, 10)

    def lin(kw, kb, out_ch, in_ch):
        scale = 1.0 / jnp.sqrt(jnp.float32(in_ch))
        w = jax.random.uniform(kw, (out_ch, in_ch), jnp.float32, -scale, scale)
        b = jax.random.uniform(kb, (out_ch,), jnp.float32, -scale, scale)
        return w, b

    w1, b1 = lin(keys[0], keys[1], 15, input_dim)   # cnn1: 1x1
    w2, b2 = lin(keys[2], keys[3], 13, 15)          # cnn2: 1x1
    w3, b3 = lin(keys[4], keys[5], 9, 13)           # cnn3: 1x1
    w4, b4 = lin(keys[6], keys[7], 4, 9)            # cnn4: 1x1
    w7, b7 = lin(keys[8], keys[9], 4, 4)            # cnn7: 1x1
    return (w1, b1, w2, b2, w3, b3, w4, b4, w7, b7)


def reference_forward(obs, params):
    """Pure-JAX reference of the PyTorch forward (eval-mode dropout)."""
    w1, b1, w2, b2, w3, b3, w4, b4, w7, b7 = params
    B, C, H, W = obs.shape
    x = obs.reshape(B, C, H * W)

    def conv(h, w, b, relu=True):
        y = jnp.einsum('oc,bcp->bop', w, h,
                       precision=jax.lax.Precision.HIGHEST) + b[None, :, None]
        return jnp.maximum(y, 0.0) if relu else y

    h = conv(x, w1, b1)
    h = conv(h, w2, b2)
    h = conv(h, w3, b3)
    h = conv(h, w4, b4)
    logits = conv(h, w7, b7, relu=False)
    probs = jax.nn.softmax(logits, axis=-1)
    return probs.reshape(B, 4, H, W)


if __name__ == "__main__":
    input_dim = 4
    batch_size = 2

    key = jax.random.PRNGKey(0)
    k_obs, k_last, k_par = jax.random.split(key, 3)

    obs = jax.random.normal(k_obs, (batch_size, input_dim, 11, 11), jnp.float32)
    last_obs = jax.random.normal(k_last, (batch_size, input_dim, 11, 11), jnp.float32)
    params = init_params(input_dim, k_par)

    out = position_prediction(obs, last_obs, params)
    out = jax.block_until_ready(out)

    assert out.shape == (batch_size, 4, 11, 11)
    # Softmax over the 121 positions: every (b, c) plane sums to ~1 exactly
    # (exact divide; only f32 rounding remains).
    sums = jnp.sum(out.reshape(batch_size, 4, 121), axis=-1)
    assert jnp.allclose(sums, 1.0, atol=1e-4), sums

    ref = reference_forward(obs, params)
    assert jnp.allclose(out, ref, atol=1e-3), float(jnp.max(jnp.abs(out - ref)))

    print("KERNEL_OK")
</pallas_src>

<mosaic_0001>
module attributes {stable_mosaic.version = 11 : i64} {
  func.func @kernel(%arg0: i32, %arg1: memref<4x8x121xf32, #tpu.memory_space<vmem>>, %arg2: memref<60xf32, #tpu.memory_space<smem>>, %arg3: memref<15xf32, #tpu.memory_space<smem>>, %arg4: memref<195xf32, #tpu.memory_space<smem>>, %arg5: memref<13xf32, #tpu.memory_space<smem>>, %arg6: memref<117xf32, #tpu.memory_space<smem>>, %arg7: memref<9xf32, #tpu.memory_space<smem>>, %arg8: memref<36xf32, #tpu.memory_space<smem>>, %arg9: memref<4xf32, #tpu.memory_space<smem>>, %arg10: memref<16xf32, #tpu.memory_space<smem>>, %arg11: memref<4xf32, #tpu.memory_space<smem>>, %arg12: memref<4x8x121xf32, #tpu.memory_space<vmem>>) attributes {dimension_semantics = [#tpu.dimension_semantics<parallel>], iteration_bounds = array<i64: 1>, scalar_prefetch = 0 : i64, scratch_operands = 0 : i64, tpu.core_type = #tpu.core_type<tc>, window_params = [{transform_indices = @transform_0, window_bounds = array<i64: 4, 8, 121>}, {transform_indices = @transform_1, window_bounds = array<i64: 60>}, {transform_indices = @transform_2, window_bounds = array<i64: 15>}, {transform_indices = @transform_3, window_bounds = array<i64: 195>}, {transform_indices = @transform_4, window_bounds = array<i64: 13>}, {transform_indices = @transform_5, window_bounds = array<i64: 117>}, {transform_indices = @transform_6, window_bounds = array<i64: 9>}, {transform_indices = @transform_7, window_bounds = array<i64: 36>}, {transform_indices = @transform_8, window_bounds = array<i64: 4>}, {transform_indices = @transform_9, window_bounds = array<i64: 16>}, {transform_indices = @transform_10, window_bounds = array<i64: 4>}, {transform_indices = @transform_11, window_bounds = array<i64: 4, 8, 121>}]} {
    %c0 = arith.constant 0 : index
    %0 = memref.load %arg2[%c0] : memref<60xf32, #tpu.memory_space<smem>>
    %c1 = arith.constant 1 : index
    %1 = memref.load %arg2[%c1] : memref<60xf32, #tpu.memory_space<smem>>
    %c2 = arith.constant 2 : index
    %2 = memref.load %arg2[%c2] : memref<60xf32, #tpu.memory_space<smem>>
    %c3 = arith.constant 3 : index
    %3 = memref.load %arg2[%c3] : memref<60xf32, #tpu.memory_space<smem>>
    %c4 = arith.constant 4 : index
    %4 = memref.load %arg2[%c4] : memref<60xf32, #tpu.memory_space<smem>>
    %c5 = arith.constant 5 : index
    %5 = memref.load %arg2[%c5] : memref<60xf32, #tpu.memory_space<smem>>
    %c6 = arith.constant 6 : index
    %6 = memref.load %arg2[%c6] : memref<60xf32, #tpu.memory_space<smem>>
    %c7 = arith.constant 7 : index
    %7 = memref.load %arg2[%c7] : memref<60xf32, #tpu.memory_space<smem>>
    %c8 = arith.constant 8 : index
    %8 = memref.load %arg2[%c8] : memref<60xf32, #tpu.memory_space<smem>>
    %c9 = arith.constant 9 : index
    %9 = memref.load %arg2[%c9] : memref<60xf32, #tpu.memory_space<smem>>
    %c10 = arith.constant 10 : index
    %10 = memref.load %arg2[%c10] : memref<60xf32, #tpu.memory_space<smem>>
    %c11 = arith.constant 11 : index
    %11 = memref.load %arg2[%c11] : memref<60xf32, #tpu.memory_space<smem>>
    %c12 = arith.constant 12 : index
    %12 = memref.load %arg2[%c12] : memref<60xf32, #tpu.memory_space<smem>>
    %c13 = arith.constant 13 : index
    %13 = memref.load %arg2[%c13] : memref<60xf32, #tpu.memory_space<smem>>
    %c14 = arith.constant 14 : index
    %14 = memref.load %arg2[%c14] : memref<60xf32, #tpu.memory_space<smem>>
    %c15 = arith.constant 15 : index
    %15 = memref.load %arg2[%c15] : memref<60xf32, #tpu.memory_space<smem>>
    %c16 = arith.constant 16 : index
    %16 = memref.load %arg2[%c16] : memref<60xf32, #tpu.memory_space<smem>>
    %c17 = arith.constant 17 : index
    %17 = memref.load %arg2[%c17] : memref<60xf32, #tpu.memory_space<smem>>
    %c18 = arith.constant 18 : index
    %18 = memref.load %arg2[%c18] : memref<60xf32, #tpu.memory_space<smem>>
    %c19 = arith.constant 19 : index
    %19 = memref.load %arg2[%c19] : memref<60xf32, #tpu.memory_space<smem>>
    %c20 = arith.constant 20 : index
    %20 = memref.load %arg2[%c20] : memref<60xf32, #tpu.memory_space<smem>>
    %c21 = arith.constant 21 : index
    %21 = memref.load %arg2[%c21] : memref<60xf32, #tpu.memory_space<smem>>
    %c22 = arith.constant 22 : index
    %22 = memref.load %arg2[%c22] : memref<60xf32, #tpu.memory_space<smem>>
    %c23 = arith.constant 23 : index
    %23 = memref.load %arg2[%c23] : memref<60xf32, #tpu.memory_space<smem>>
    %c24 = arith.constant 24 : index
    %24 = memref.load %arg2[%c24] : memref<60xf32, #tpu.memory_space<smem>>
    %c25 = arith.constant 25 : index
    %25 = memref.load %arg2[%c25] : memref<60xf32, #tpu.memory_space<smem>>
    %c26 = arith.constant 26 : index
    %26 = memref.load %arg2[%c26] : memref<60xf32, #tpu.memory_space<smem>>
    %c27 = arith.constant 27 : index
    %27 = memref.load %arg2[%c27] : memref<60xf32, #tpu.memory_space<smem>>
    %c28 = arith.constant 28 : index
    %28 = memref.load %arg2[%c28] : memref<60xf32, #tpu.memory_space<smem>>
    %c29 = arith.constant 29 : index
    %29 = memref.load %arg2[%c29] : memref<60xf32, #tpu.memory_space<smem>>
    %c30 = arith.constant 30 : index
    %30 = memref.load %arg2[%c30] : memref<60xf32, #tpu.memory_space<smem>>
    %c31 = arith.constant 31 : index
    %31 = memref.load %arg2[%c31] : memref<60xf32, #tpu.memory_space<smem>>
    %c32 = arith.constant 32 : index
    %32 = memref.load %arg2[%c32] : memref<60xf32, #tpu.memory_space<smem>>
    %c33 = arith.constant 33 : index
    %33 = memref.load %arg2[%c33] : memref<60xf32, #tpu.memory_space<smem>>
    %c34 = arith.constant 34 : index
    %34 = memref.load %arg2[%c34] : memref<60xf32, #tpu.memory_space<smem>>
    %c35 = arith.constant 35 : index
    %35 = memref.load %arg2[%c35] : memref<60xf32, #tpu.memory_space<smem>>
    %c36 = arith.constant 36 : index
    %36 = memref.load %arg2[%c36] : memref<60xf32, #tpu.memory_space<smem>>
    %c37 = arith.constant 37 : index
    %37 = memref.load %arg2[%c37] : memref<60xf32, #tpu.memory_space<smem>>
    %c38 = arith.constant 38 : index
    %38 = memref.load %arg2[%c38] : memref<60xf32, #tpu.memory_space<smem>>
    %c39 = arith.constant 39 : index
    %39 = memref.load %arg2[%c39] : memref<60xf32, #tpu.memory_space<smem>>
    %c40 = arith.constant 40 : index
    %40 = memref.load %arg2[%c40] : memref<60xf32, #tpu.memory_space<smem>>
    %c41 = arith.constant 41 : index
    %41 = memref.load %arg2[%c41] : memref<60xf32, #tpu.memory_space<smem>>
    %c42 = arith.constant 42 : index
    %42 = memref.load %arg2[%c42] : memref<60xf32, #tpu.memory_space<smem>>
    %c43 = arith.constant 43 : index
    %43 = memref.load %arg2[%c43] : memref<60xf32, #tpu.memory_space<smem>>
    %c44 = arith.constant 44 : index
    %44 = memref.load %arg2[%c44] : memref<60xf32, #tpu.memory_space<smem>>
    %c45 = arith.constant 45 : index
    %45 = memref.load %arg2[%c45] : memref<60xf32, #tpu.memory_space<smem>>
    %c46 = arith.constant 46 : index
    %46 = memref.load %arg2[%c46] : memref<60xf32, #tpu.memory_space<smem>>
    %c47 = arith.constant 47 : index
    %47 = memref.load %arg2[%c47] : memref<60xf32, #tpu.memory_space<smem>>
    %c48 = arith.constant 48 : index
    %48 = memref.load %arg2[%c48] : memref<60xf32, #tpu.memory_space<smem>>
    %c49 = arith.constant 49 : index
    %49 = memref.load %arg2[%c49] : memref<60xf32, #tpu.memory_space<smem>>
    %c50 = arith.constant 50 : index
    %50 = memref.load %arg2[%c50] : memref<60xf32, #tpu.memory_space<smem>>
    %c51 = arith.constant 51 : index
    %51 = memref.load %arg2[%c51] : memref<60xf32, #tpu.memory_space<smem>>
    %c52 = arith.constant 52 : index
    %52 = memref.load %arg2[%c52] : memref<60xf32, #tpu.memory_space<smem>>
    %c53 = arith.constant 53 : index
    %53 = memref.load %arg2[%c53] : memref<60xf32, #tpu.memory_space<smem>>
    %c54 = arith.constant 54 : index
    %54 = memref.load %arg2[%c54] : memref<60xf32, #tpu.memory_space<smem>>
    %c55 = arith.constant 55 : index
    %55 = memref.load %arg2[%c55] : memref<60xf32, #tpu.memory_space<smem>>
    %c56 = arith.constant 56 : index
    %56 = memref.load %arg2[%c56] : memref<60xf32, #tpu.memory_space<smem>>
    %c57 = arith.constant 57 : index
    %57 = memref.load %arg2[%c57] : memref<60xf32, #tpu.memory_space<smem>>
    %c58 = arith.constant 58 : index
    %58 = memref.load %arg2[%c58] : memref<60xf32, #tpu.memory_space<smem>>
    %c59 = arith.constant 59 : index
    %59 = memref.load %arg2[%c59] : memref<60xf32, #tpu.memory_space<smem>>
    %c0_0 = arith.constant 0 : index
    %60 = memref.load %arg3[%c0_0] : memref<15xf32, #tpu.memory_space<smem>>
    %c1_1 = arith.constant 1 : index
    %61 = memref.load %arg3[%c1_1] : memref<15xf32, #tpu.memory_space<smem>>
    %c2_2 = arith.constant 2 : index
    %62 = memref.load %arg3[%c2_2] : memref<15xf32, #tpu.memory_space<smem>>
    %c3_3 = arith.constant 3 : index
    %63 = memref.load %arg3[%c3_3] : memref<15xf32, #tpu.memory_space<smem>>
    %c4_4 = arith.constant 4 : index
    %64 = memref.load %arg3[%c4_4] : memref<15xf32, #tpu.memory_space<smem>>
    %c5_5 = arith.constant 5 : index
    %65 = memref.load %arg3[%c5_5] : memref<15xf32, #tpu.memory_space<smem>>
    %c6_6 = arith.constant 6 : index
    %66 = memref.load %arg3[%c6_6] : memref<15xf32, #tpu.memory_space<smem>>
    %c7_7 = arith.constant 7 : index
    %67 = memref.load %arg3[%c7_7] : memref<15xf32, #tpu.memory_space<smem>>
    %c8_8 = arith.constant 8 : index
    %68 = memref.load %arg3[%c8_8] : memref<15xf32, #tpu.memory_space<smem>>
    %c9_9 = arith.constant 9 : index
    %69 = memref.load %arg3[%c9_9] : memref<15xf32, #tpu.memory_space<smem>>
    %c10_10 = arith.constant 10 : index
    %70 = memref.load %arg3[%c10_10] : memref<15xf32, #tpu.memory_space<smem>>
    %c11_11 = arith.constant 11 : index
    %71 = memref.load %arg3[%c11_11] : memref<15xf32, #tpu.memory_space<smem>>
    %c12_12 = arith.constant 12 : index
    %72 = memref.load %arg3[%c12_12] : memref<15xf32, #tpu.memory_space<smem>>
    %c13_13 = arith.constant 13 : index
    %73 = memref.load %arg3[%c13_13] : memref<15xf32, #tpu.memory_space<smem>>
    %c14_14 = arith.constant 14 : index
    %74 = memref.load %arg3[%c14_14] : memref<15xf32, #tpu.memory_space<smem>>
    %c0_15 = arith.constant 0 : index
    %75 = memref.load %arg4[%c0_15] : memref<195xf32, #tpu.memory_space<smem>>
    %c1_16 = arith.constant 1 : index
    %76 = memref.load %arg4[%c1_16] : memref<195xf32, #tpu.memory_space<smem>>
    %c2_17 = arith.constant 2 : index
    %77 = memref.load %arg4[%c2_17] : memref<195xf32, #tpu.memory_space<smem>>
    %c3_18 = arith.constant 3 : index
    %78 = memref.load %arg4[%c3_18] : memref<195xf32, #tpu.memory_space<smem>>
    %c4_19 = arith.constant 4 : index
    %79 = memref.load %arg4[%c4_19] : memref<195xf32, #tpu.memory_space<smem>>
    %c5_20 = arith.constant 5 : index
    %80 = memref.load %arg4[%c5_20] : memref<195xf32, #tpu.memory_space<smem>>
    %c6_21 = arith.constant 6 : index
    %81 = memref.load %arg4[%c6_21] : memref<195xf32, #tpu.memory_space<smem>>
    %c7_22 = arith.constant 7 : index
    %82 = memref.load %arg4[%c7_22] : memref<195xf32, #tpu.memory_space<smem>>
    %c8_23 = arith.constant 8 : index
    %83 = memref.load %arg4[%c8_23] : memref<195xf32, #tpu.memory_space<smem>>
    %c9_24 = arith.constant 9 : index
    %84 = memref.load %arg4[%c9_24] : memref<195xf32, #tpu.memory_space<smem>>
    %c10_25 = arith.constant 10 : index
    %85 = memref.load %arg4[%c10_25] : memref<195xf32, #tpu.memory_space<smem>>
    %c11_26 = arith.constant 11 : index
    %86 = memref.load %arg4[%c11_26] : memref<195xf32, #tpu.memory_space<smem>>
    %c12_27 = arith.constant 12 : index
    %87 = memref.load %arg4[%c12_27] : memref<195xf32, #tpu.memory_space<smem>>
    %c13_28 = arith.constant 13 : index
    %88 = memref.load %arg4[%c13_28] : memref<195xf32, #tpu.memory_space<smem>>
    %c14_29 = arith.constant 14 : index
    %89 = memref.load %arg4[%c14_29] : memref<195xf32, #tpu.memory_space<smem>>
    %c15_30 = arith.constant 15 : index
    %90 = memref.load %arg4[%c15_30] : memref<195xf32, #tpu.memory_space<smem>>
    %c16_31 = arith.constant 16 : index
    %91 = memref.load %arg4[%c16_31] : memref<195xf32, #tpu.memory_space<smem>>
    %c17_32 = arith.constant 17 : index
    %92 = memref.load %arg4[%c17_32] : memref<195xf32, #tpu.memory_space<smem>>
    %c18_33 = arith.constant 18 : index
    %93 = memref.load %arg4[%c18_33] : memref<195xf32, #tpu.memory_space<smem>>
    %c19_34 = arith.constant 19 : index
    %94 = memref.load %arg4[%c19_34] : memref<195xf32, #tpu.memory_space<smem>>
    %c20_35 = arith.constant 20 : index
    %95 = memref.load %arg4[%c20_35] : memref<195xf32, #tpu.memory_space<smem>>
    %c21_36 = arith.constant 21 : index
    %96 = memref.load %arg4[%c21_36] : memref<195xf32, #tpu.memory_space<smem>>
    %c22_37 = arith.constant 22 : index
    %97 = memref.load %arg4[%c22_37] : memref<195xf32, #tpu.memory_space<smem>>
    %c23_38 = arith.constant 23 : index
    %98 = memref.load %arg4[%c23_38] : memref<195xf32, #tpu.memory_space<smem>>
    %c24_39 = arith.constant 24 : index
    %99 = memref.load %arg4[%c24_39] : memref<195xf32, #tpu.memory_space<smem>>
    %c25_40 = arith.constant 25 : index
    %100 = memref.load %arg4[%c25_40] : memref<195xf32, #tpu.memory_space<smem>>
    %c26_41 = arith.constant 26 : index
    %101 = memref.load %arg4[%c26_41] : memref<195xf32, #tpu.memory_space<smem>>
    %c27_42 = arith.constant 27 : index
    %102 = memref.load %arg4[%c27_42] : memref<195xf32, #tpu.memory_space<smem>>
    %c28_43 = arith.constant 28 : index
    %103 = memref.load %arg4[%c28_43] : memref<195xf32, #tpu.memory_space<smem>>
    %c29_44 = arith.constant 29 : index
    %104 = memref.load %arg4[%c29_44] : memref<195xf32, #tpu.memory_space<smem>>
    %c30_45 = arith.constant 30 : index
    %105 = memref.load %arg4[%c30_45] : memref<195xf32, #tpu.memory_space<smem>>
    %c31_46 = arith.constant 31 : index
    %106 = memref.load %arg4[%c31_46] : memref<195xf32, #tpu.memory_space<smem>>
    %c32_47 = arith.constant 32 : index
    %107 = memref.load %arg4[%c32_47] : memref<195xf32, #tpu.memory_space<smem>>
    %c33_48 = arith.constant 33 : index
    %108 = memref.load %arg4[%c33_48] : memref<195xf32, #tpu.memory_space<smem>>
    %c34_49 = arith.constant 34 : index
    %109 = memref.load %arg4[%c34_49] : memref<195xf32, #tpu.memory_space<smem>>
    %c35_50 = arith.constant 35 : index
    %110 = memref.load %arg4[%c35_50] : memref<195xf32, #tpu.memory_space<smem>>
    %c36_51 = arith.constant 36 : index
    %111 = memref.load %arg4[%c36_51] : memref<195xf32, #tpu.memory_space<smem>>
    %c37_52 = arith.constant 37 : index
    %112 = memref.load %arg4[%c37_52] : memref<195xf32, #tpu.memory_space<smem>>
    %c38_53 = arith.constant 38 : index
    %113 = memref.load %arg4[%c38_53] : memref<195xf32, #tpu.memory_space<smem>>
    %c39_54 = arith.constant 39 : index
    %114 = memref.load %arg4[%c39_54] : memref<195xf32, #tpu.memory_space<smem>>
    %c40_55 = arith.constant 40 : index
    %115 = memref.load %arg4[%c40_55] : memref<195xf32, #tpu.memory_space<smem>>
    %c41_56 = arith.constant 41 : index
    %116 = memref.load %arg4[%c41_56] : memref<195xf32, #tpu.memory_space<smem>>
    %c42_57 = arith.constant 42 : index
    %117 = memref.load %arg4[%c42_57] : memref<195xf32, #tpu.memory_space<smem>>
    %c43_58 = arith.constant 43 : index
    %118 = memref.load %arg4[%c43_58] : memref<195xf32, #tpu.memory_space<smem>>
    %c44_59 = arith.constant 44 : index
    %119 = memref.load %arg4[%c44_59] : memref<195xf32, #tpu.memory_space<smem>>
    %c45_60 = arith.constant 45 : index
    %120 = memref.load %arg4[%c45_60] : memref<195xf32, #tpu.memory_space<smem>>
    %c46_61 = arith.constant 46 : index
    %121 = memref.load %arg4[%c46_61] : memref<195xf32, #tpu.memory_space<smem>>
    %c47_62 = arith.constant 47 : index
    %122 = memref.load %arg4[%c47_62] : memref<195xf32, #tpu.memory_space<smem>>
    %c48_63 = arith.constant 48 : index
    %123 = memref.load %arg4[%c48_63] : memref<195xf32, #tpu.memory_space<smem>>
    %c49_64 = arith.constant 49 : index
    %124 = memref.load %arg4[%c49_64] : memref<195xf32, #tpu.memory_space<smem>>
    %c50_65 = arith.constant 50 : index
    %125 = memref.load %arg4[%c50_65] : memref<195xf32, #tpu.memory_space<smem>>
    %c51_66 = arith.constant 51 : index
    %126 = memref.load %arg4[%c51_66] : memref<195xf32, #tpu.memory_space<smem>>
    %c52_67 = arith.constant 52 : index
    %127 = memref.load %arg4[%c52_67] : memref<195xf32, #tpu.memory_space<smem>>
    %c53_68 = arith.constant 53 : index
    %128 = memref.load %arg4[%c53_68] : memref<195xf32, #tpu.memory_space<smem>>
    %c54_69 = arith.constant 54 : index
    %129 = memref.load %arg4[%c54_69] : memref<195xf32, #tpu.memory_space<smem>>
    %c55_70 = arith.constant 55 : index
    %130 = memref.load %arg4[%c55_70] : memref<195xf32, #tpu.memory_space<smem>>
    %c56_71 = arith.constant 56 : index
    %131 = memref.load %arg4[%c56_71] : memref<195xf32, #tpu.memory_space<smem>>
    %c57_72 = arith.constant 57 : index
    %132 = memref.load %arg4[%c57_72] : memref<195xf32, #tpu.memory_space<smem>>
    %c58_73 = arith.constant 58 : index
    %133 = memref.load %arg4[%c58_73] : memref<195xf32, #tpu.memory_space<smem>>
    %c59_74 = arith.constant 59 : index
    %134 = memref.load %arg4[%c59_74] : memref<195xf32, #tpu.memory_space<smem>>
    %c60 = arith.constant 60 : index
    %135 = memref.load %arg4[%c60] : memref<195xf32, #tpu.memory_space<smem>>
    %c61 = arith.constant 61 : index
    %136 = memref.load %arg4[%c61] : memref<195xf32, #tpu.memory_space<smem>>
    %c62 = arith.constant 62 : index
    %137 = memref.load %arg4[%c62] : memref<195xf32, #tpu.memory_space<smem>>
    %c63 = arith.constant 63 : index
    %138 = memref.load %arg4[%c63] : memref<195xf32, #tpu.memory_space<smem>>
    %c64 = arith.constant 64 : index
    %139 = memref.load %arg4[%c64] : memref<195xf32, #tpu.memory_space<smem>>
    %c65 = arith.constant 65 : index
    %140 = memref.load %arg4[%c65] : memref<195xf32, #tpu.memory_space<smem>>
    %c66 = arith.constant 66 : index
    %141 = memref.load %arg4[%c66] : memref<195xf32, #tpu.memory_space<smem>>
    %c67 = arith.constant 67 : index
    %142 = memref.load %arg4[%c67] : memref<195xf32, #tpu.memory_space<smem>>
    %c68 = arith.constant 68 : index
    %143 = memref.load %arg4[%c68] : memref<195xf32, #tpu.memory_space<smem>>
    %c69 = arith.constant 69 : index
    %144 = memref.load %arg4[%c69] : memref<195xf32, #tpu.memory_space<smem>>
    %c70 = arith.constant 70 : index
    %145 = memref.load %arg4[%c70] : memref<195xf32, #tpu.memory_space<smem>>
    %c71 = arith.constant 71 : index
    %146 = memref.load %arg4[%c71] : memref<195xf32, #tpu.memory_space<smem>>
    %c72 = arith.constant 72 : index
    %147 = memref.load %arg4[%c72] : memref<195xf32, #tpu.memory_space<smem>>
    %c73 = arith.constant 73 : index
    %148 = memref.load %arg4[%c73] : memref<195xf32, #tpu.memory_space<smem>>
    %c74 = arith.constant 74 : index
    %149 = memref.load %arg4[%c74] : memref<195xf32, #tpu.memory_space<smem>>
    %c75 = arith.constant 75 : index
    %150 = memref.load %arg4[%c75] : memref<195xf32, #tpu.memory_space<smem>>
    %c76 = arith.constant 76 : index
    %151 = memref.load %arg4[%c76] : memref<195xf32, #tpu.memory_space<smem>>
    %c77 = arith.constant 77 : index
    %152 = memref.load %arg4[%c77] : memref<195xf32, #tpu.memory_space<smem>>
    %c78 = arith.constant 78 : index
    %153 = memref.load %arg4[%c78] : memref<195xf32, #tpu.memory_space<smem>>
    %c79 = arith.constant 79 : index
    %154 = memref.load %arg4[%c79] : memref<195xf32, #tpu.memory_space<smem>>
    %c80 = arith.constant 80 : index
    %155 = memref.load %arg4[%c80] : memref<195xf32, #tpu.memory_space<smem>>
    %c81 = arith.constant 81 : index
    %156 = memref.load %arg4[%c81] : memref<195xf32, #tpu.memory_space<smem>>
    %c82 = arith.constant 82 : index
    %157 = memref.load %arg4[%c82] : memref<195xf32, #tpu.memory_space<smem>>
    %c83 = arith.constant 83 : index
    %158 = memref.load %arg4[%c83] : memref<195xf32, #tpu.memory_space<smem>>
    %c84 = arith.constant 84 : index
    %159 = memref.load %arg4[%c84] : memref<195xf32, #tpu.memory_space<smem>>
    %c85 = arith.constant 85 : index
    %160 = memref.load %arg4[%c85] : memref<195xf32, #tpu.memory_space<smem>>
    %c86 = arith.constant 86 : index
    %161 = memref.load %arg4[%c86] : memref<195xf32, #tpu.memory_space<smem>>
    %c87 = arith.constant 87 : index
    %162 = memref.load %arg4[%c87] : memref<195xf32, #tpu.memory_space<smem>>
    %c88 = arith.constant 88 : index
    %163 = memref.load %arg4[%c88] : memref<195xf32, #tpu.memory_space<smem>>
    %c89 = arith.constant 89 : index
    %164 = memref.load %arg4[%c89] : memref<195xf32, #tpu.memory_space<smem>>
    %c90 = arith.constant 90 : index
    %165 = memref.load %arg4[%c90] : memref<195xf32, #tpu.memory_space<smem>>
    %c91 = arith.constant 91 : index
    %166 = memref.load %arg4[%c91] : memref<195xf32, #tpu.memory_space<smem>>
    %c92 = arith.constant 92 : index
    %167 = memref.load %arg4[%c92] : memref<195xf32, #tpu.memory_space<smem>>
    %c93 = arith.constant 93 : index
    %168 = memref.load %arg4[%c93] : memref<195xf32, #tpu.memory_space<smem>>
    %c94 = arith.constant 94 : index
    %169 = memref.load %arg4[%c94] : memref<195xf32, #tpu.memory_space<smem>>
    %c95 = arith.constant 95 : index
    %170 = memref.load %arg4[%c95] : memref<195xf32, #tpu.memory_space<smem>>
    %c96 = arith.constant 96 : index
    %171 = memref.load %arg4[%c96] : memref<195xf32, #tpu.memory_space<smem>>
    %c97 = arith.constant 97 : index
    %172 = memref.load %arg4[%c97] : memref<195xf32, #tpu.memory_space<smem>>
    %c98 = arith.constant 98 : index
    %173 = memref.load %arg4[%c98] : memref<195xf32, #tpu.memory_space<smem>>
    %c99 = arith.constant 99 : index
    %174 = memref.load %arg4[%c99] : memref<195xf32, #tpu.memory_space<smem>>
    %c100 = arith.constant 100 : index
    %175 = memref.load %arg4[%c100] : memref<195xf32, #tpu.memory_space<smem>>
    %c101 = arith.constant 101 : index
    %176 = memref.load %arg4[%c101] : memref<195xf32, #tpu.memory_space<smem>>
    %c102 = arith.constant 102 : index
    %177 = memref.load %arg4[%c102] : memref<195xf32, #tpu.memory_space<smem>>
    %c103 = arith.constant 103 : index
    %178 = memref.load %arg4[%c103] : memref<195xf32, #tpu.memory_space<smem>>
    %c104 = arith.constant 104 : index
    %179 = memref.load %arg4[%c104] : memref<195xf32, #tpu.memory_space<smem>>
    %c105 = arith.constant 105 : index
    %180 = memref.load %arg4[%c105] : memref<195xf32, #tpu.memory_space<smem>>
    %c106 = arith.constant 106 : index
    %181 = memref.load %arg4[%c106] : memref<195xf32, #tpu.memory_space<smem>>
    %c107 = arith.constant 107 : index
    %182 = memref.load %arg4[%c107] : memref<195xf32, #tpu.memory_space<smem>>
    %c108 = arith.constant 108 : index
    %183 = memref.load %arg4[%c108] : memref<195xf32, #tpu.memory_space<smem>>
    %c109 = arith.constant 109 : index
    %184 = memref.load %arg4[%c109] : memref<195xf32, #tpu.memory_space<smem>>
    %c110 = arith.constant 110 : index
    %185 = memref.load %arg4[%c110] : memref<195xf32, #tpu.memory_space<smem>>
    %c111 = arith.constant 111 : index
    %186 = memref.load %arg4[%c111] : memref<195xf32, #tpu.memory_space<smem>>
    %c112 = arith.constant 112 : index
    %187 = memref.load %arg4[%c112] : memref<195xf32, #tpu.memory_space<smem>>
    %c113 = arith.constant 113 : index
    %188 = memref.load %arg4[%c113] : memref<195xf32, #tpu.memory_space<smem>>
    %c114 = arith.constant 114 : index
    %189 = memref.load %arg4[%c114] : memref<195xf32, #tpu.memory_space<smem>>
    %c115 = arith.constant 115 : index
    %190 = memref.load %arg4[%c115] : memref<195xf32, #tpu.memory_space<smem>>
    %c116 = arith.constant 116 : index
    %191 = memref.load %arg4[%c116] : memref<195xf32, #tpu.memory_space<smem>>
    %c117 = arith.constant 117 : index
    %192 = memref.load %arg4[%c117] : memref<195xf32, #tpu.memory_space<smem>>
    %c118 = arith.constant 118 : index
    %193 = memref.load %arg4[%c118] : memref<195xf32, #tpu.memory_space<smem>>
    %c119 = arith.constant 119 : index
    %194 = memref.load %arg4[%c119] : memref<195xf32, #tpu.memory_space<smem>>
    %c120 = arith.constant 120 : index
    %195 = memref.load %arg4[%c120] : memref<195xf32, #tpu.memory_space<smem>>
    %c121 = arith.constant 121 : index
    %196 = memref.load %arg4[%c121] : memref<195xf32, #tpu.memory_space<smem>>
    %c122 = arith.constant 122 : index
    %197 = memref.load %arg4[%c122] : memref<195xf32, #tpu.memory_space<smem>>
    %c123 = arith.constant 123 : index
    %198 = memref.load %arg4[%c123] : memref<195xf32, #tpu.memory_space<smem>>
    %c124 = arith.constant 124 : index
    %199 = memref.load %arg4[%c124] : memref<195xf32, #tpu.memory_space<smem>>
    %c125 = arith.constant 125 : index
    %200 = memref.load %arg4[%c125] : memref<195xf32, #tpu.memory_space<smem>>
    %c126 = arith.constant 126 : index
    %201 = memref.load %arg4[%c126] : memref<195xf32, #tpu.memory_space<smem>>
    %c127 = arith.constant 127 : index
    %202 = memref.load %arg4[%c127] : memref<195xf32, #tpu.memory_space<smem>>
    %c128 = arith.constant 128 : index
    %203 = memref.load %arg4[%c128] : memref<195xf32, #tpu.memory_space<smem>>
    %c129 = arith.constant 129 : index
    %204 = memref.load %arg4[%c129] : memref<195xf32, #tpu.memory_space<smem>>
    %c130 = arith.constant 130 : index
    %205 = memref.load %arg4[%c130] : memref<195xf32, #tpu.memory_space<smem>>
    %c131 = arith.constant 131 : index
    %206 = memref.load %arg4[%c131] : memref<195xf32, #tpu.memory_space<smem>>
    %c132 = arith.constant 132 : index
    %207 = memref.load %arg4[%c132] : memref<195xf32, #tpu.memory_space<smem>>
    %c133 = arith.constant 133 : index
    %208 = memref.load %arg4[%c133] : memref<195xf32, #tpu.memory_space<smem>>
    %c134 = arith.constant 134 : index
    %209 = memref.load %arg4[%c134] : memref<195xf32, #tpu.memory_space<smem>>
    %c135 = arith.constant 135 : index
    %210 = memref.load %arg4[%c135] : memref<195xf32, #tpu.memory_space<smem>>
    %c136 = arith.constant 136 : index
    %211 = memref.load %arg4[%c136] : memref<195xf32, #tpu.memory_space<smem>>
    %c137 = arith.constant 137 : index
    %212 = memref.load %arg4[%c137] : memref<195xf32, #tpu.memory_space<smem>>
    %c138 = arith.constant 138 : index
    %213 = memref.load %arg4[%c138] : memref<195xf32, #tpu.memory_space<smem>>
    %c139 = arith.constant 139 : index
    %214 = memref.load %arg4[%c139] : memref<195xf32, #tpu.memory_space<smem>>
    %c140 = arith.constant 140 : index
    %215 = memref.load %arg4[%c140] : memref<195xf32, #tpu.memory_space<smem>>
    %c141 = arith.constant 141 : index
    %216 = memref.load %arg4[%c141] : memref<195xf32, #tpu.memory_space<smem>>
    %c142 = arith.constant 142 : index
    %217 = memref.load %arg4[%c142] : memref<195xf32, #tpu.memory_space<smem>>
    %c143 = arith.constant 143 : index
    %218 = memref.load %arg4[%c143] : memref<195xf32, #tpu.memory_space<smem>>
    %c144 = arith.constant 144 : index
    %219 = memref.load %arg4[%c144] : memref<195xf32, #tpu.memory_space<smem>>
    %c145 = arith.constant 145 : index
    %220 = memref.load %arg4[%c145] : memref<195xf32, #tpu.memory_space<smem>>
    %c146 = arith.constant 146 : index
    %221 = memref.load %arg4[%c146] : memref<195xf32, #tpu.memory_space<smem>>
    %c147 = arith.constant 147 : index
    %222 = memref.load %arg4[%c147] : memref<195xf32, #tpu.memory_space<smem>>
    %c148 = arith.constant 148 : index
    %223 = memref.load %arg4[%c148] : memref<195xf32, #tpu.memory_space<smem>>
    %c149 = arith.constant 149 : index
    %224 = memref.load %arg4[%c149] : memref<195xf32, #tpu.memory_space<smem>>
    %c150 = arith.constant 150 : index
    %225 = memref.load %arg4[%c150] : memref<195xf32, #tpu.memory_space<smem>>
    %c151 = arith.constant 151 : index
    %226 = memref.load %arg4[%c151] : memref<195xf32, #tpu.memory_space<smem>>
    %c152 = arith.constant 152 : index
    %227 = memref.load %arg4[%c152] : memref<195xf32, #tpu.memory_space<smem>>
    %c153 = arith.constant 153 : index
    %228 = memref.load %arg4[%c153] : memref<195xf32, #tpu.memory_space<smem>>
    %c154 = arith.constant 154 : index
    %229 = memref.load %arg4[%c154] : memref<195xf32, #tpu.memory_space<smem>>
    %c155 = arith.constant 155 : index
    %230 = memref.load %arg4[%c155] : memref<195xf32, #tpu.memory_space<smem>>
    %c156 = arith.constant 156 : index
    %231 = memref.load %arg4[%c156] : memref<195xf32, #tpu.memory_space<smem>>
    %c157 = arith.constant 157 : index
    %232 = memref.load %arg4[%c157] : memref<195xf32, #tpu.memory_space<smem>>
    %c158 = arith.constant 158 : index
    %233 = memref.load %arg4[%c158] : memref<195xf32, #tpu.memory_space<smem>>
    %c159 = arith.constant 159 : index
    %234 = memref.load %arg4[%c159] : memref<195xf32, #tpu.memory_space<smem>>
    %c160 = arith.constant 160 : index
    %235 = memref.load %arg4[%c160] : memref<195xf32, #tpu.memory_space<smem>>
    %c161 = arith.constant 161 : index
    %236 = memref.load %arg4[%c161] : memref<195xf32, #tpu.memory_space<smem>>
    %c162 = arith.constant 162 : index
    %237 = memref.load %arg4[%c162] : memref<195xf32, #tpu.memory_space<smem>>
    %c163 = arith.constant 163 : index
    %238 = memref.load %arg4[%c163] : memref<195xf32, #tpu.memory_space<smem>>
    %c164 = arith.constant 164 : index
    %239 = memref.load %arg4[%c164] : memref<195xf32, #tpu.memory_space<smem>>
    %c165 = arith.constant 165 : index
    %240 = memref.load %arg4[%c165] : memref<195xf32, #tpu.memory_space<smem>>
    %c166 = arith.constant 166 : index
    %241 = memref.load %arg4[%c166] : memref<195xf32, #tpu.memory_space<smem>>
    %c167 = arith.constant 167 : index
    %242 = memref.load %arg4[%c167] : memref<195xf32, #tpu.memory_space<smem>>
    %c168 = arith.constant 168 : index
    %243 = memref.load %arg4[%c168] : memref<195xf32, #tpu.memory_space<smem>>
    %c169 = arith.constant 169 : index
    %244 = memref.load %arg4[%c169] : memref<195xf32, #tpu.memory_space<smem>>
    %c170 = arith.constant 170 : index
    %245 = memref.load %arg4[%c170] : memref<195xf32, #tpu.memory_space<smem>>
    %c171 = arith.constant 171 : index
    %246 = memref.load %arg4[%c171] : memref<195xf32, #tpu.memory_space<smem>>
    %c172 = arith.constant 172 : index
    %247 = memref.load %arg4[%c172] : memref<195xf32, #tpu.memory_space<smem>>
    %c173 = arith.constant 173 : index
    %248 = memref.load %arg4[%c173] : memref<195xf32, #tpu.memory_space<smem>>
    %c174 = arith.constant 174 : index
    %249 = memref.load %arg4[%c174] : memref<195xf32, #tpu.memory_space<smem>>
    %c175 = arith.constant 175 : index
    %250 = memref.load %arg4[%c175] : memref<195xf32, #tpu.memory_space<smem>>
    %c176 = arith.constant 176 : index
    %251 = memref.load %arg4[%c176] : memref<195xf32, #tpu.memory_space<smem>>
    %c177 = arith.constant 177 : index
    %252 = memref.load %arg4[%c177] : memref<195xf32, #tpu.memory_space<smem>>
    %c178 = arith.constant 178 : index
    %253 = memref.load %arg4[%c178] : memref<195xf32, #tpu.memory_space<smem>>
    %c179 = arith.constant 179 : index
    %254 = memref.load %arg4[%c179] : memref<195xf32, #tpu.memory_space<smem>>
    %c180 = arith.constant 180 : index
    %255 = memref.load %arg4[%c180] : memref<195xf32, #tpu.memory_space<smem>>
    %c181 = arith.constant 181 : index
    %256 = memref.load %arg4[%c181] : memref<195xf32, #tpu.memory_space<smem>>
    %c182 = arith.constant 182 : index
    %257 = memref.load %arg4[%c182] : memref<195xf32, #tpu.memory_space<smem>>
    %c183 = arith.constant 183 : index
    %258 = memref.load %arg4[%c183] : memref<195xf32, #tpu.memory_space<smem>>
    %c184 = arith.constant 184 : index
    %259 = memref.load %arg4[%c184] : memref<195xf32, #tpu.memory_space<smem>>
    %c185 = arith.constant 185 : index
    %260 = memref.load %arg4[%c185] : memref<195xf32, #tpu.memory_space<smem>>
    %c186 = arith.constant 186 : index
    %261 = memref.load %arg4[%c186] : memref<195xf32, #tpu.memory_space<smem>>
    %c187 = arith.constant 187 : index
    %262 = memref.load %arg4[%c187] : memref<195xf32, #tpu.memory_space<smem>>
    %c188 = arith.constant 188 : index
    %263 = memref.load %arg4[%c188] : memref<195xf32, #tpu.memory_space<smem>>
    %c189 = arith.constant 189 : index
    %264 = memref.load %arg4[%c189] : memref<195xf32, #tpu.memory_space<smem>>
    %c190 = arith.constant 190 : index
    %265 = memref.load %arg4[%c190] : memref<195xf32, #tpu.memory_space<smem>>
    %c191 = arith.constant 191 : index
    %266 = memref.load %arg4[%c191] : memref<195xf32, #tpu.memory_space<smem>>
    %c192 = arith.constant 192 : index
    %267 = memref.load %arg4[%c192] : memref<195xf32, #tpu.memory_space<smem>>
    %c193 = arith.constant 193 : index
    %268 = memref.load %arg4[%c193] : memref<195xf32, #tpu.memory_space<smem>>
    %c194 = arith.constant 194 : index
    %269 = memref.load %arg4[%c194] : memref<195xf32, #tpu.memory_space<smem>>
    %c0_75 = arith.constant 0 : index
    %270 = memref.load %arg5[%c0_75] : memref<13xf32, #tpu.memory_space<smem>>
    %c1_76 = arith.constant 1 : index
    %271 = memref.load %arg5[%c1_76] : memref<13xf32, #tpu.memory_space<smem>>
    %c2_77 = arith.constant 2 : index
    %272 = memref.load %arg5[%c2_77] : memref<13xf32, #tpu.memory_space<smem>>
    %c3_78 = arith.constant 3 : index
    %273 = memref.load %arg5[%c3_78] : memref<13xf32, #tpu.memory_space<smem>>
    %c4_79 = arith.constant 4 : index
    %274 = memref.load %arg5[%c4_79] : memref<13xf32, #tpu.memory_space<smem>>
    %c5_80 = arith.constant 5 : index
    %275 = memref.load %arg5[%c5_80] : memref<13xf32, #tpu.memory_space<smem>>
    %c6_81 = arith.constant 6 : index
    %276 = memref.load %arg5[%c6_81] : memref<13xf32, #tpu.memory_space<smem>>
    %c7_82 = arith.constant 7 : index
    %277 = memref.load %arg5[%c7_82] : memref<13xf32, #tpu.memory_space<smem>>
    %c8_83 = arith.constant 8 : index
    %278 = memref.load %arg5[%c8_83] : memref<13xf32, #tpu.memory_space<smem>>
    %c9_84 = arith.constant 9 : index
    %279 = memref.load %arg5[%c9_84] : memref<13xf32, #tpu.memory_space<smem>>
    %c10_85 = arith.constant 10 : index
    %280 = memref.load %arg5[%c10_85] : memref<13xf32, #tpu.memory_space<smem>>
    %c11_86 = arith.constant 11 : index
    %281 = memref.load %arg5[%c11_86] : memref<13xf32, #tpu.memory_space<smem>>
    %c12_87 = arith.constant 12 : index
    %282 = memref.load %arg5[%c12_87] : memref<13xf32, #tpu.memory_space<smem>>
    %c0_88 = arith.constant 0 : index
    %283 = memref.load %arg6[%c0_88] : memref<117xf32, #tpu.memory_space<smem>>
    %c1_89 = arith.constant 1 : index
    %284 = memref.load %arg6[%c1_89] : memref<117xf32, #tpu.memory_space<smem>>
    %c2_90 = arith.constant 2 : index
    %285 = memref.load %arg6[%c2_90] : memref<117xf32, #tpu.memory_space<smem>>
    %c3_91 = arith.constant 3 : index
    %286 = memref.load %arg6[%c3_91] : memref<117xf32, #tpu.memory_space<smem>>
    %c4_92 = arith.constant 4 : index
    %287 = memref.load %arg6[%c4_92] : memref<117xf32, #tpu.memory_space<smem>>
    %c5_93 = arith.constant 5 : index
    %288 = memref.load %arg6[%c5_93] : memref<117xf32, #tpu.memory_space<smem>>
    %c6_94 = arith.constant 6 : index
    %289 = memref.load %arg6[%c6_94] : memref<117xf32, #tpu.memory_space<smem>>
    %c7_95 = arith.constant 7 : index
    %290 = memref.load %arg6[%c7_95] : memref<117xf32, #tpu.memory_space<smem>>
    %c8_96 = arith.constant 8 : index
    %291 = memref.load %arg6[%c8_96] : memref<117xf32, #tpu.memory_space<smem>>
    %c9_97 = arith.constant 9 : index
    %292 = memref.load %arg6[%c9_97] : memref<117xf32, #tpu.memory_space<smem>>
    %c10_98 = arith.constant 10 : index
    %293 = memref.load %arg6[%c10_98] : memref<117xf32, #tpu.memory_space<smem>>
    %c11_99 = arith.constant 11 : index
    %294 = memref.load %arg6[%c11_99] : memref<117xf32, #tpu.memory_space<smem>>
    %c12_100 = arith.constant 12 : index
    %295 = memref.load %arg6[%c12_100] : memref<117xf32, #tpu.memory_space<smem>>
    %c13_101 = arith.constant 13 : index
    %296 = memref.load %arg6[%c13_101] : memref<117xf32, #tpu.memory_space<smem>>
    %c14_102 = arith.constant 14 : index
    %297 = memref.load %arg6[%c14_102] : memref<117xf32, #tpu.memory_space<smem>>
    %c15_103 = arith.constant 15 : index
    %298 = memref.load %arg6[%c15_103] : memref<117xf32, #tpu.memory_space<smem>>
    %c16_104 = arith.constant 16 : index
    %299 = memref.load %arg6[%c16_104] : memref<117xf32, #tpu.memory_space<smem>>
    %c17_105 = arith.constant 17 : index
    %300 = memref.load %arg6[%c17_105] : memref<117xf32, #tpu.memory_space<smem>>
    %c18_106 = arith.constant 18 : index
    %301 = memref.load %arg6[%c18_106] : memref<117xf32, #tpu.memory_space<smem>>
    %c19_107 = arith.constant 19 : index
    %302 = memref.load %arg6[%c19_107] : memref<117xf32, #tpu.memory_space<smem>>
    %c20_108 = arith.constant 20 : index
    %303 = memref.load %arg6[%c20_108] : memref<117xf32, #tpu.memory_space<smem>>
    %c21_109 = arith.constant 21 : index
    %304 = memref.load %arg6[%c21_109] : memref<117xf32, #tpu.memory_space<smem>>
    %c22_110 = arith.constant 22 : index
    %305 = memref.load %arg6[%c22_110] : memref<117xf32, #tpu.memory_space<smem>>
    %c23_111 = arith.constant 23 : index
    %306 = memref.load %arg6[%c23_111] : memref<117xf32, #tpu.memory_space<smem>>
    %c24_112 = arith.constant 24 : index
    %307 = memref.load %arg6[%c24_112] : memref<117xf32, #tpu.memory_space<smem>>
    %c25_113 = arith.constant 25 : index
    %308 = memref.load %arg6[%c25_113] : memref<117xf32, #tpu.memory_space<smem>>
    %c26_114 = arith.constant 26 : index
    %309 = memref.load %arg6[%c26_114] : memref<117xf32, #tpu.memory_space<smem>>
    %c27_115 = arith.constant 27 : index
    %310 = memref.load %arg6[%c27_115] : memref<117xf32, #tpu.memory_space<smem>>
    %c28_116 = arith.constant 28 : index
    %311 = memref.load %arg6[%c28_116] : memref<117xf32, #tpu.memory_space<smem>>
    %c29_117 = arith.constant 29 : index
    %312 = memref.load %arg6[%c29_117] : memref<117xf32, #tpu.memory_space<smem>>
    %c30_118 = arith.constant 30 : index
    %313 = memref.load %arg6[%c30_118] : memref<117xf32, #tpu.memory_space<smem>>
    %c31_119 = arith.constant 31 : index
    %314 = memref.load %arg6[%c31_119] : memref<117xf32, #tpu.memory_space<smem>>
    %c32_120 = arith.constant 32 : index
    %315 = memref.load %arg6[%c32_120] : memref<117xf32, #tpu.memory_space<smem>>
    %c33_121 = arith.constant 33 : index
    %316 = memref.load %arg6[%c33_121] : memref<117xf32, #tpu.memory_space<smem>>
    %c34_122 = arith.constant 34 : index
    %317 = memref.load %arg6[%c34_122] : memref<117xf32, #tpu.memory_space<smem>>
    %c35_123 = arith.constant 35 : index
    %318 = memref.load %arg6[%c35_123] : memref<117xf32, #tpu.memory_space<smem>>
    %c36_124 = arith.constant 36 : index
    %319 = memref.load %arg6[%c36_124] : memref<117xf32, #tpu.memory_space<smem>>
    %c37_125 = arith.constant 37 : index
    %320 = memref.load %arg6[%c37_125] : memref<117xf32, #tpu.memory_space<smem>>
    %c38_126 = arith.constant 38 : index
    %321 = memref.load %arg6[%c38_126] : memref<117xf32, #tpu.memory_space<smem>>
    %c39_127 = arith.constant 39 : index
    %322 = memref.load %arg6[%c39_127] : memref<117xf32, #tpu.memory_space<smem>>
    %c40_128 = arith.constant 40 : index
    %323 = memref.load %arg6[%c40_128] : memref<117xf32, #tpu.memory_space<smem>>
    %c41_129 = arith.constant 41 : index
    %324 = memref.load %arg6[%c41_129] : memref<117xf32, #tpu.memory_space<smem>>
    %c42_130 = arith.constant 42 : index
    %325 = memref.load %arg6[%c42_130] : memref<117xf32, #tpu.memory_space<smem>>
    %c43_131 = arith.constant 43 : index
    %326 = memref.load %arg6[%c43_131] : memref<117xf32, #tpu.memory_space<smem>>
    %c44_132 = arith.constant 44 : index
    %327 = memref.load %arg6[%c44_132] : memref<117xf32, #tpu.memory_space<smem>>
    %c45_133 = arith.constant 45 : index
    %328 = memref.load %arg6[%c45_133] : memref<117xf32, #tpu.memory_space<smem>>
    %c46_134 = arith.constant 46 : index
    %329 = memref.load %arg6[%c46_134] : memref<117xf32, #tpu.memory_space<smem>>
    %c47_135 = arith.constant 47 : index
    %330 = memref.load %arg6[%c47_135] : memref<117xf32, #tpu.memory_space<smem>>
    %c48_136 = arith.constant 48 : index
    %331 = memref.load %arg6[%c48_136] : memref<117xf32, #tpu.memory_space<smem>>
    %c49_137 = arith.constant 49 : index
    %332 = memref.load %arg6[%c49_137] : memref<117xf32, #tpu.memory_space<smem>>
    %c50_138 = arith.constant 50 : index
    %333 = memref.load %arg6[%c50_138] : memref<117xf32, #tpu.memory_space<smem>>
    %c51_139 = arith.constant 51 : index
    %334 = memref.load %arg6[%c51_139] : memref<117xf32, #tpu.memory_space<smem>>
    %c52_140 = arith.constant 52 : index
    %335 = memref.load %arg6[%c52_140] : memref<117xf32, #tpu.memory_space<smem>>
    %c53_141 = arith.constant 53 : index
    %336 = memref.load %arg6[%c53_141] : memref<117xf32, #tpu.memory_space<smem>>
    %c54_142 = arith.constant 54 : index
    %337 = memref.load %arg6[%c54_142] : memref<117xf32, #tpu.memory_space<smem>>
    %c55_143 = arith.constant 55 : index
    %338 = memref.load %arg6[%c55_143] : memref<117xf32, #tpu.memory_space<smem>>
    %c56_144 = arith.constant 56 : index
    %339 = memref.load %arg6[%c56_144] : memref<117xf32, #tpu.memory_space<smem>>
    %c57_145 = arith.constant 57 : index
    %340 = memref.load %arg6[%c57_145] : memref<117xf32, #tpu.memory_space<smem>>
    %c58_146 = arith.constant 58 : index
    %341 = memref.load %arg6[%c58_146] : memref<117xf32, #tpu.memory_space<smem>>
    %c59_147 = arith.constant 59 : index
    %342 = memref.load %arg6[%c59_147] : memref<117xf32, #tpu.memory_space<smem>>
    %c60_148 = arith.constant 60 : index
    %343 = memref.load %arg6[%c60_148] : memref<117xf32, #tpu.memory_space<smem>>
    %c61_149 = arith.constant 61 : index
    %344 = memref.load %arg6[%c61_149] : memref<117xf32, #tpu.memory_space<smem>>
    %c62_150 = arith.constant 62 : index
    %345 = memref.load %arg6[%c62_150] : memref<117xf32, #tpu.memory_space<smem>>
    %c63_151 = arith.constant 63 : index
    %346 = memref.load %arg6[%c63_151] : memref<117xf32, #tpu.memory_space<smem>>
    %c64_152 = arith.constant 64 : index
    %347 = memref.load %arg6[%c64_152] : memref<117xf32, #tpu.memory_space<smem>>
    %c65_153 = arith.constant 65 : index
    %348 = memref.load %arg6[%c65_153] : memref<117xf32, #tpu.memory_space<smem>>
    %c66_154 = arith.constant 66 : index
    %349 = memref.load %arg6[%c66_154] : memref<117xf32, #tpu.memory_space<smem>>
    %c67_155 = arith.constant 67 : index
    %350 = memref.load %arg6[%c67_155] : memref<117xf32, #tpu.memory_space<smem>>
    %c68_156 = arith.constant 68 : index
    %351 = memref.load %arg6[%c68_156] : memref<117xf32, #tpu.memory_space<smem>>
    %c69_157 = arith.constant 69 : index
    %352 = memref.load %arg6[%c69_157] : memref<117xf32, #tpu.memory_space<smem>>
    %c70_158 = arith.constant 70 : index
    %353 = memref.load %arg6[%c70_158] : memref<117xf32, #tpu.memory_space<smem>>
    %c71_159 = arith.constant 71 : index
    %354 = memref.load %arg6[%c71_159] : memref<117xf32, #tpu.memory_space<smem>>
    %c72_160 = arith.constant 72 : index
    %355 = memref.load %arg6[%c72_160] : memref<117xf32, #tpu.memory_space<smem>>
    %c73_161 = arith.constant 73 : index
    %356 = memref.load %arg6[%c73_161] : memref<117xf32, #tpu.memory_space<smem>>
    %c74_162 = arith.constant 74 : index
    %357 = memref.load %arg6[%c74_162] : memref<117xf32, #tpu.memory_space<smem>>
    %c75_163 = arith.constant 75 : index
    %358 = memref.load %arg6[%c75_163] : memref<117xf32, #tpu.memory_space<smem>>
    %c76_164 = arith.constant 76 : index
    %359 = memref.load %arg6[%c76_164] : memref<117xf32, #tpu.memory_space<smem>>
    %c77_165 = arith.constant 77 : index
    %360 = memref.load %arg6[%c77_165] : memref<117xf32, #tpu.memory_space<smem>>
    %c78_166 = arith.constant 78 : index
    %361 = memref.load %arg6[%c78_166] : memref<117xf32, #tpu.memory_space<smem>>
    %c79_167 = arith.constant 79 : index
    %362 = memref.load %arg6[%c79_167] : memref<117xf32, #tpu.memory_space<smem>>
    %c80_168 = arith.constant 80 : index
    %363 = memref.load %arg6[%c80_168] : memref<117xf32, #tpu.memory_space<smem>>
    %c81_169 = arith.constant 81 : index
    %364 = memref.load %arg6[%c81_169] : memref<117xf32, #tpu.memory_space<smem>>
    %c82_170 = arith.constant 82 : index
    %365 = memref.load %arg6[%c82_170] : memref<117xf32, #tpu.memory_space<smem>>
    %c83_171 = arith.constant 83 : index
    %366 = memref.load %arg6[%c83_171] : memref<117xf32, #tpu.memory_space<smem>>
    %c84_172 = arith.constant 84 : index
    %367 = memref.load %arg6[%c84_172] : memref<117xf32, #tpu.memory_space<smem>>
    %c85_173 = arith.constant 85 : index
    %368 = memref.load %arg6[%c85_173] : memref<117xf32, #tpu.memory_space<smem>>
    %c86_174 = arith.constant 86 : index
    %369 = memref.load %arg6[%c86_174] : memref<117xf32, #tpu.memory_space<smem>>
    %c87_175 = arith.constant 87 : index
    %370 = memref.load %arg6[%c87_175] : memref<117xf32, #tpu.memory_space<smem>>
    %c88_176 = arith.constant 88 : index
    %371 = memref.load %arg6[%c88_176] : memref<117xf32, #tpu.memory_space<smem>>
    %c89_177 = arith.constant 89 : index
    %372 = memref.load %arg6[%c89_177] : memref<117xf32, #tpu.memory_space<smem>>
    %c90_178 = arith.constant 90 : index
    %373 = memref.load %arg6[%c90_178] : memref<117xf32, #tpu.memory_space<smem>>
    %c91_179 = arith.constant 91 : index
    %374 = memref.load %arg6[%c91_179] : memref<117xf32, #tpu.memory_space<smem>>
    %c92_180 = arith.constant 92 : index
    %375 = memref.load %arg6[%c92_180] : memref<117xf32, #tpu.memory_space<smem>>
    %c93_181 = arith.constant 93 : index
    %376 = memref.load %arg6[%c93_181] : memref<117xf32, #tpu.memory_space<smem>>
    %c94_182 = arith.constant 94 : index
    %377 = memref.load %arg6[%c94_182] : memref<117xf32, #tpu.memory_space<smem>>
    %c95_183 = arith.constant 95 : index
    %378 = memref.load %arg6[%c95_183] : memref<117xf32, #tpu.memory_space<smem>>
    %c96_184 = arith.constant 96 : index
    %379 = memref.load %arg6[%c96_184] : memref<117xf32, #tpu.memory_space<smem>>
    %c97_185 = arith.constant 97 : index
    %380 = memref.load %arg6[%c97_185] : memref<117xf32, #tpu.memory_space<smem>>
    %c98_186 = arith.constant 98 : index
    %381 = memref.load %arg6[%c98_186] : memref<117xf32, #tpu.memory_space<smem>>
    %c99_187 = arith.constant 99 : index
    %382 = memref.load %arg6[%c99_187] : memref<117xf32, #tpu.memory_space<smem>>
    %c100_188 = arith.constant 100 : index
    %383 = memref.load %arg6[%c100_188] : memref<117xf32, #tpu.memory_space<smem>>
    %c101_189 = arith.constant 101 : index
    %384 = memref.load %arg6[%c101_189] : memref<117xf32, #tpu.memory_space<smem>>
    %c102_190 = arith.constant 102 : index
    %385 = memref.load %arg6[%c102_190] : memref<117xf32, #tpu.memory_space<smem>>
    %c103_191 = arith.constant 103 : index
    %386 = memref.load %arg6[%c103_191] : memref<117xf32, #tpu.memory_space<smem>>
    %c104_192 = arith.constant 104 : index
    %387 = memref.load %arg6[%c104_192] : memref<117xf32, #tpu.memory_space<smem>>
    %c105_193 = arith.constant 105 : index
    %388 = memref.load %arg6[%c105_193] : memref<117xf32, #tpu.memory_space<smem>>
    %c106_194 = arith.constant 106 : index
    %389 = memref.load %arg6[%c106_194] : memref<117xf32, #tpu.memory_space<smem>>
    %c107_195 = arith.constant 107 : index
    %390 = memref.load %arg6[%c107_195] : memref<117xf32, #tpu.memory_space<smem>>
    %c108_196 = arith.constant 108 : index
    %391 = memref.load %arg6[%c108_196] : memref<117xf32, #tpu.memory_space<smem>>
    %c109_197 = arith.constant 109 : index
    %392 = memref.load %arg6[%c109_197] : memref<117xf32, #tpu.memory_space<smem>>
    %c110_198 = arith.constant 110 : index
    %393 = memref.load %arg6[%c110_198] : memref<117xf32, #tpu.memory_space<smem>>
    %c111_199 = arith.constant 111 : index
    %394 = memref.load %arg6[%c111_199] : memref<117xf32, #tpu.memory_space<smem>>
    %c112_200 = arith.constant 112 : index
    %395 = memref.load %arg6[%c112_200] : memref<117xf32, #tpu.memory_space<smem>>
    %c113_201 = arith.constant 113 : index
    %396 = memref.load %arg6[%c113_201] : memref<117xf32, #tpu.memory_space<smem>>
    %c114_202 = arith.constant 114 : index
    %397 = memref.load %arg6[%c114_202] : memref<117xf32, #tpu.memory_space<smem>>
    %c115_203 = arith.constant 115 : index
    %398 = memref.load %arg6[%c115_203] : memref<117xf32, #tpu.memory_space<smem>>
    %c116_204 = arith.constant 116 : index
    %399 = memref.load %arg6[%c116_204] : memref<117xf32, #tpu.memory_space<smem>>
    %c0_205 = arith.constant 0 : index
    %400 = memref.load %arg7[%c0_205] : memref<9xf32, #tpu.memory_space<smem>>
    %c1_206 = arith.constant 1 : index
    %401 = memref.load %arg7[%c1_206] : memref<9xf32, #tpu.memory_space<smem>>
    %c2_207 = arith.constant 2 : index
    %402 = memref.load %arg7[%c2_207] : memref<9xf32, #tpu.memory_space<smem>>
    %c3_208 = arith.constant 3 : index
    %403 = memref.load %arg7[%c3_208] : memref<9xf32, #tpu.memory_space<smem>>
    %c4_209 = arith.constant 4 : index
    %404 = memref.load %arg7[%c4_209] : memref<9xf32, #tpu.memory_space<smem>>
    %c5_210 = arith.constant 5 : index
    %405 = memref.load %arg7[%c5_210] : memref<9xf32, #tpu.memory_space<smem>>
    %c6_211 = arith.constant 6 : index
    %406 = memref.load %arg7[%c6_211] : memref<9xf32, #tpu.memory_space<smem>>
    %c7_212 = arith.constant 7 : index
    %407 = memref.load %arg7[%c7_212] : memref<9xf32, #tpu.memory_space<smem>>
    %c8_213 = arith.constant 8 : index
    %408 = memref.load %arg7[%c8_213] : memref<9xf32, #tpu.memory_space<smem>>
    %c0_214 = arith.constant 0 : index
    %409 = memref.load %arg8[%c0_214] : memref<36xf32, #tpu.memory_space<smem>>
    %c1_215 = arith.constant 1 : index
    %410 = memref.load %arg8[%c1_215] : memref<36xf32, #tpu.memory_space<smem>>
    %c2_216 = arith.constant 2 : index
    %411 = memref.load %arg8[%c2_216] : memref<36xf32, #tpu.memory_space<smem>>
    %c3_217 = arith.constant 3 : index
    %412 = memref.load %arg8[%c3_217] : memref<36xf32, #tpu.memory_space<smem>>
    %c4_218 = arith.constant 4 : index
    %413 = memref.load %arg8[%c4_218] : memref<36xf32, #tpu.memory_space<smem>>
    %c5_219 = arith.constant 5 : index
    %414 = memref.load %arg8[%c5_219] : memref<36xf32, #tpu.memory_space<smem>>
    %c6_220 = arith.constant 6 : index
    %415 = memref.load %arg8[%c6_220] : memref<36xf32, #tpu.memory_space<smem>>
    %c7_221 = arith.constant 7 : index
    %416 = memref.load %arg8[%c7_221] : memref<36xf32, #tpu.memory_space<smem>>
    %c8_222 = arith.constant 8 : index
    %417 = memref.load %arg8[%c8_222] : memref<36xf32, #tpu.memory_space<smem>>
    %c9_223 = arith.constant 9 : index
    %418 = memref.load %arg8[%c9_223] : memref<36xf32, #tpu.memory_space<smem>>
    %c10_224 = arith.constant 10 : index
    %419 = memref.load %arg8[%c10_224] : memref<36xf32, #tpu.memory_space<smem>>
    %c11_225 = arith.constant 11 : index
    %420 = memref.load %arg8[%c11_225] : memref<36xf32, #tpu.memory_space<smem>>
    %c12_226 = arith.constant 12 : index
    %421 = memref.load %arg8[%c12_226] : memref<36xf32, #tpu.memory_space<smem>>
    %c13_227 = arith.constant 13 : index
    %422 = memref.load %arg8[%c13_227] : memref<36xf32, #tpu.memory_space<smem>>
    %c14_228 = arith.constant 14 : index
    %423 = memref.load %arg8[%c14_228] : memref<36xf32, #tpu.memory_space<smem>>
    %c15_229 = arith.constant 15 : index
    %424 = memref.load %arg8[%c15_229] : memref<36xf32, #tpu.memory_space<smem>>
    %c16_230 = arith.constant 16 : index
    %425 = memref.load %arg8[%c16_230] : memref<36xf32, #tpu.memory_space<smem>>
    %c17_231 = arith.constant 17 : index
    %426 = memref.load %arg8[%c17_231] : memref<36xf32, #tpu.memory_space<smem>>
    %c18_232 = arith.constant 18 : index
    %427 = memref.load %arg8[%c18_232] : memref<36xf32, #tpu.memory_space<smem>>
    %c19_233 = arith.constant 19 : index
    %428 = memref.load %arg8[%c19_233] : memref<36xf32, #tpu.memory_space<smem>>
    %c20_234 = arith.constant 20 : index
    %429 = memref.load %arg8[%c20_234] : memref<36xf32, #tpu.memory_space<smem>>
    %c21_235 = arith.constant 21 : index
    %430 = memref.load %arg8[%c21_235] : memref<36xf32, #tpu.memory_space<smem>>
    %c22_236 = arith.constant 22 : index
    %431 = memref.load %arg8[%c22_236] : memref<36xf32, #tpu.memory_space<smem>>
    %c23_237 = arith.constant 23 : index
    %432 = memref.load %arg8[%c23_237] : memref<36xf32, #tpu.memory_space<smem>>
    %c24_238 = arith.constant 24 : index
    %433 = memref.load %arg8[%c24_238] : memref<36xf32, #tpu.memory_space<smem>>
    %c25_239 = arith.constant 25 : index
    %434 = memref.load %arg8[%c25_239] : memref<36xf32, #tpu.memory_space<smem>>
    %c26_240 = arith.constant 26 : index
    %435 = memref.load %arg8[%c26_240] : memref<36xf32, #tpu.memory_space<smem>>
    %c27_241 = arith.constant 27 : index
    %436 = memref.load %arg8[%c27_241] : memref<36xf32, #tpu.memory_space<smem>>
    %c28_242 = arith.constant 28 : index
    %437 = memref.load %arg8[%c28_242] : memref<36xf32, #tpu.memory_space<smem>>
    %c29_243 = arith.constant 29 : index
    %438 = memref.load %arg8[%c29_243] : memref<36xf32, #tpu.memory_space<smem>>
    %c30_244 = arith.constant 30 : index
    %439 = memref.load %arg8[%c30_244] : memref<36xf32, #tpu.memory_space<smem>>
    %c31_245 = arith.constant 31 : index
    %440 = memref.load %arg8[%c31_245] : memref<36xf32, #tpu.memory_space<smem>>
    %c32_246 = arith.constant 32 : index
    %441 = memref.load %arg8[%c32_246] : memref<36xf32, #tpu.memory_space<smem>>
    %c33_247 = arith.constant 33 : index
    %442 = memref.load %arg8[%c33_247] : memref<36xf32, #tpu.memory_space<smem>>
    %c34_248 = arith.constant 34 : index
    %443 = memref.load %arg8[%c34_248] : memref<36xf32, #tpu.memory_space<smem>>
    %c35_249 = arith.constant 35 : index
    %444 = memref.load %arg8[%c35_249] : memref<36xf32, #tpu.memory_space<smem>>
    %c0_250 = arith.constant 0 : index
    %445 = memref.load %arg9[%c0_250] : memref<4xf32, #tpu.memory_space<smem>>
    %c1_251 = arith.constant 1 : index
    %446 = memref.load %arg9[%c1_251] : memref<4xf32, #tpu.memory_space<smem>>
    %c2_252 = arith.constant 2 : index
    %447 = memref.load %arg9[%c2_252] : memref<4xf32, #tpu.memory_space<smem>>
    %c3_253 = arith.constant 3 : index
    %448 = memref.load %arg9[%c3_253] : memref<4xf32, #tpu.memory_space<smem>>
    %c0_254 = arith.constant 0 : index
    %449 = memref.load %arg10[%c0_254] : memref<16xf32, #tpu.memory_space<smem>>
    %c1_255 = arith.constant 1 : index
    %450 = memref.load %arg10[%c1_255] : memref<16xf32, #tpu.memory_space<smem>>
    %c2_256 = arith.constant 2 : index
    %451 = memref.load %arg10[%c2_256] : memref<16xf32, #tpu.memory_space<smem>>
    %c3_257 = arith.constant 3 : index
    %452 = memref.load %arg10[%c3_257] : memref<16xf32, #tpu.memory_space<smem>>
    %c4_258 = arith.constant 4 : index
    %453 = memref.load %arg10[%c4_258] : memref<16xf32, #tpu.memory_space<smem>>
    %c5_259 = arith.constant 5 : index
    %454 = memref.load %arg10[%c5_259] : memref<16xf32, #tpu.memory_space<smem>>
    %c6_260 = arith.constant 6 : index
    %455 = memref.load %arg10[%c6_260] : memref<16xf32, #tpu.memory_space<smem>>
    %c7_261 = arith.constant 7 : index
    %456 = memref.load %arg10[%c7_261] : memref<16xf32, #tpu.memory_space<smem>>
    %c8_262 = arith.constant 8 : index
    %457 = memref.load %arg10[%c8_262] : memref<16xf32, #tpu.memory_space<smem>>
    %c9_263 = arith.constant 9 : index
    %458 = memref.load %arg10[%c9_263] : memref<16xf32, #tpu.memory_space<smem>>
    %c10_264 = arith.constant 10 : index
    %459 = memref.load %arg10[%c10_264] : memref<16xf32, #tpu.memory_space<smem>>
    %c11_265 = arith.constant 11 : index
    %460 = memref.load %arg10[%c11_265] : memref<16xf32, #tpu.memory_space<smem>>
    %c12_266 = arith.constant 12 : index
    %461 = memref.load %arg10[%c12_266] : memref<16xf32, #tpu.memory_space<smem>>
    %c13_267 = arith.constant 13 : index
    %462 = memref.load %arg10[%c13_267] : memref<16xf32, #tpu.memory_space<smem>>
    %c14_268 = arith.constant 14 : index
    %463 = memref.load %arg10[%c14_268] : memref<16xf32, #tpu.memory_space<smem>>
    %c15_269 = arith.constant 15 : index
    %464 = memref.load %arg10[%c15_269] : memref<16xf32, #tpu.memory_space<smem>>
    %c0_270 = arith.constant 0 : index
    %465 = memref.load %arg11[%c0_270] : memref<4xf32, #tpu.memory_space<smem>>
    %c1_271 = arith.constant 1 : index
    %466 = memref.load %arg11[%c1_271] : memref<4xf32, #tpu.memory_space<smem>>
    %c2_272 = arith.constant 2 : index
    %467 = memref.load %arg11[%c2_272] : memref<4xf32, #tpu.memory_space<smem>>
    %c3_273 = arith.constant 3 : index
    %468 = memref.load %arg11[%c3_273] : memref<4xf32, #tpu.memory_space<smem>>
    %c0_i32 = arith.constant 0 : i32
    %469 = tpu.assume_multiple %c0_i32, 8 : i32
    %c0_274 = arith.constant 0 : index
    %470 = arith.index_cast %469 : i32 to index
    %c0_275 = arith.constant 0 : index
    %471 = vector.load %arg1[%c0_274, %470, %c0_275] : memref<4x8x121xf32, #tpu.memory_space<vmem>>, vector<1x8x121xf32>
    %472 = vector.shape_cast %471 : vector<1x8x121xf32> to vector<8x121xf32>
    %c1_276 = arith.constant 1 : index
    %473 = arith.index_cast %469 : i32 to index
    %c0_277 = arith.constant 0 : index
    %474 = vector.load %arg1[%c1_276, %473, %c0_277] : memref<4x8x121xf32, #tpu.memory_space<vmem>>, vector<1x8x121xf32>
    %475 = vector.shape_cast %474 : vector<1x8x121xf32> to vector<8x121xf32>
    %c2_278 = arith.constant 2 : index
    %476 = arith.index_cast %469 : i32 to index
    %c0_279 = arith.constant 0 : index
    %477 = vector.load %arg1[%c2_278, %476, %c0_279] : memref<4x8x121xf32, #tpu.memory_space<vmem>>, vector<1x8x121xf32>
    %478 = vector.shape_cast %477 : vector<1x8x121xf32> to vector<8x121xf32>
    %c3_280 = arith.constant 3 : index
    %479 = arith.index_cast %469 : i32 to index
    %c0_281 = arith.constant 0 : index
    %480 = vector.load %arg1[%c3_280, %479, %c0_281] : memref<4x8x121xf32, #tpu.memory_space<vmem>>, vector<1x8x121xf32>
    %481 = vector.shape_cast %480 : vector<1x8x121xf32> to vector<8x121xf32>
    %482 = vector.broadcast %0 : f32 to vector<8x121xf32>
    %483 = arith.mulf %472, %482 : vector<8x121xf32>
    %484 = vector.broadcast %1 : f32 to vector<8x121xf32>
    %485 = arith.mulf %475, %484 : vector<8x121xf32>
    %486 = arith.addf %483, %485 : vector<8x121xf32>
    %487 = vector.broadcast %2 : f32 to vector<8x121xf32>
    %488 = arith.mulf %478, %487 : vector<8x121xf32>
    %489 = arith.addf %486, %488 : vector<8x121xf32>
    %490 = vector.broadcast %3 : f32 to vector<8x121xf32>
    %491 = arith.mulf %481, %490 : vector<8x121xf32>
    %492 = arith.addf %489, %491 : vector<8x121xf32>
    %493 = vector.broadcast %60 : f32 to vector<8x121xf32>
    %494 = arith.addf %492, %493 : vector<8x121xf32>
    %cst = arith.constant 0.000000e+00 : f32
    %495 = vector.broadcast %cst : f32 to vector<8x121xf32>
    %496 = arith.maximumf %494, %495 : vector<8x121xf32>
    %497 = vector.broadcast %4 : f32 to vector<8x121xf32>
    %498 = arith.mulf %472, %497 : vector<8x121xf32>
    %499 = vector.broadcast %5 : f32 to vector<8x121xf32>
    %500 = arith.mulf %475, %499 : vector<8x121xf32>
    %501 = arith.addf %498, %500 : vector<8x121xf32>
    %502 = vector.broadcast %6 : f32 to vector<8x121xf32>
    %503 = arith.mulf %478, %502 : vector<8x121xf32>
    %504 = arith.addf %501, %503 : vector<8x121xf32>
    %505 = vector.broadcast %7 : f32 to vector<8x121xf32>
    %506 = arith.mulf %481, %505 : vector<8x121xf32>
    %507 = arith.addf %504, %506 : vector<8x121xf32>
    %508 = vector.broadcast %61 : f32 to vector<8x121xf32>
    %509 = arith.addf %507, %508 : vector<8x121xf32>
    %cst_282 = arith.constant 0.000000e+00 : f32
    %510 = vector.broadcast %cst_282 : f32 to vector<8x121xf32>
    %511 = arith.maximumf %509, %510 : vector<8x121xf32>
    %512 = vector.broadcast %8 : f32 to vector<8x121xf32>
    %513 = arith.mulf %472, %512 : vector<8x121xf32>
    %514 = vector.broadcast %9 : f32 to vector<8x121xf32>
    %515 = arith.mulf %475, %514 : vector<8x121xf32>
    %516 = arith.addf %513, %515 : vector<8x121xf32>
    %517 = vector.broadcast %10 : f32 to vector<8x121xf32>
    %518 = arith.mulf %478, %517 : vector<8x121xf32>
    %519 = arith.addf %516, %518 : vector<8x121xf32>
    %520 = vector.broadcast %11 : f32 to vector<8x121xf32>
    %521 = arith.mulf %481, %520 : vector<8x121xf32>
    %522 = arith.addf %519, %521 : vector<8x121xf32>
    %523 = vector.broadcast %62 : f32 to vector<8x121xf32>
    %524 = arith.addf %522, %523 : vector<8x121xf32>
    %cst_283 = arith.constant 0.000000e+00 : f32
    %525 = vector.broadcast %cst_283 : f32 to vector<8x121xf32>
    %526 = arith.maximumf %524, %525 : vector<8x121xf32>
    %527 = vector.broadcast %12 : f32 to vector<8x121xf32>
    %528 = arith.mulf %472, %527 : vector<8x121xf32>
    %529 = vector.broadcast %13 : f32 to vector<8x121xf32>
    %530 = arith.mulf %475, %529 : vector<8x121xf32>
    %531 = arith.addf %528, %530 : vector<8x121xf32>
    %532 = vector.broadcast %14 : f32 to vector<8x121xf32>
    %533 = arith.mulf %478, %532 : vector<8x121xf32>
    %534 = arith.addf %531, %533 : vector<8x121xf32>
    %535 = vector.broadcast %15 : f32 to vector<8x121xf32>
    %536 = arith.mulf %481, %535 : vector<8x121xf32>
    %537 = arith.addf %534, %536 : vector<8x121xf32>
    %538 = vector.broadcast %63 : f32 to vector<8x121xf32>
    %539 = arith.addf %537, %538 : vector<8x121xf32>
    %cst_284 = arith.constant 0.000000e+00 : f32
    %540 = vector.broadcast %cst_284 : f32 to vector<8x121xf32>
    %541 = arith.maximumf %539, %540 : vector<8x121xf32>
    %542 = vector.broadcast %16 : f32 to vector<8x121xf32>
    %543 = arith.mulf %472, %542 : vector<8x121xf32>
    %544 = vector.broadcast %17 : f32 to vector<8x121xf32>
    %545 = arith.mulf %475, %544 : vector<8x121xf32>
    %546 = arith.addf %543, %545 : vector<8x121xf32>
    %547 = vector.broadcast %18 : f32 to vector<8x121xf32>
    %548 = arith.mulf %478, %547 : vector<8x121xf32>
    %549 = arith.addf %546, %548 : vector<8x121xf32>
    %550 = vector.broadcast %19 : f32 to vector<8x121xf32>
    %551 = arith.mulf %481, %550 : vector<8x121xf32>
    %552 = arith.addf %549, %551 : vector<8x121xf32>
    %553 = vector.broadcast %64 : f32 to vector<8x121xf32>
    %554 = arith.addf %552, %553 : vector<8x121xf32>
    %cst_285 = arith.constant 0.000000e+00 : f32
    %555 = vector.broadcast %cst_285 : f32 to vector<8x121xf32>
    %556 = arith.maximumf %554, %555 : vector<8x121xf32>
    %557 = vector.broadcast %20 : f32 to vector<8x121xf32>
    %558 = arith.mulf %472, %557 : vector<8x121xf32>
    %559 = vector.broadcast %21 : f32 to vector<8x121xf32>
    %560 = arith.mulf %475, %559 : vector<8x121xf32>
    %561 = arith.addf %558, %560 : vector<8x121xf32>
    %562 = vector.broadcast %22 : f32 to vector<8x121xf32>
    %563 = arith.mulf %478, %562 : vector<8x121xf32>
    %564 = arith.addf %561, %563 : vector<8x121xf32>
    %565 = vector.broadcast %23 : f32 to vector<8x121xf32>
    %566 = arith.mulf %481, %565 : vector<8x121xf32>
    %567 = arith.addf %564, %566 : vector<8x121xf32>
    %568 = vector.broadcast %65 : f32 to vector<8x121xf32>
    %569 = arith.addf %567, %568 : vector<8x121xf32>
    %cst_286 = arith.constant 0.000000e+00 : f32
    %570 = vector.broadcast %cst_286 : f32 to vector<8x121xf32>
    %571 = arith.maximumf %569, %570 : vector<8x121xf32>
    %572 = vector.broadcast %24 : f32 to vector<8x121xf32>
    %573 = arith.mulf %472, %572 : vector<8x121xf32>
    %574 = vector.broadcast %25 : f32 to vector<8x121xf32>
    %575 = arith.mulf %475, %574 : vector<8x121xf32>
    %576 = arith.addf %573, %575 : vector<8x121xf32>
    %577 = vector.broadcast %26 : f32 to vector<8x121xf32>
    %578 = arith.mulf %478, %577 : vector<8x121xf32>
    %579 = arith.addf %576, %578 : vector<8x121xf32>
    %580 = vector.broadcast %27 : f32 to vector<8x121xf32>
    %581 = arith.mulf %481, %580 : vector<8x121xf32>
    %582 = arith.addf %579, %581 : vector<8x121xf32>
    %583 = vector.broadcast %66 : f32 to vector<8x121xf32>
    %584 = arith.addf %582, %583 : vector<8x121xf32>
    %cst_287 = arith.constant 0.000000e+00 : f32
    %585 = vector.broadcast %cst_287 : f32 to vector<8x121xf32>
    %586 = arith.maximumf %584, %585 : vector<8x121xf32>
    %587 = vector.broadcast %28 : f32 to vector<8x121xf32>
    %588 = arith.mulf %472, %587 : vector<8x121xf32>
    %589 = vector.broadcast %29 : f32 to vector<8x121xf32>
    %590 = arith.mulf %475, %589 : vector<8x121xf32>
    %591 = arith.addf %588, %590 : vector<8x121xf32>
    %592 = vector.broadcast %30 : f32 to vector<8x121xf32>
    %593 = arith.mulf %478, %592 : vector<8x121xf32>
    %594 = arith.addf %591, %593 : vector<8x121xf32>
    %595 = vector.broadcast %31 : f32 to vector<8x121xf32>
    %596 = arith.mulf %481, %595 : vector<8x121xf32>
    %597 = arith.addf %594, %596 : vector<8x121xf32>
    %598 = vector.broadcast %67 : f32 to vector<8x121xf32>
    %599 = arith.addf %597, %598 : vector<8x121xf32>
    %cst_288 = arith.constant 0.000000e+00 : f32
    %600 = vector.broadcast %cst_288 : f32 to vector<8x121xf32>
    %601 = arith.maximumf %599, %600 : vector<8x121xf32>
    %602 = vector.broadcast %32 : f32 to vector<8x121xf32>
    %603 = arith.mulf %472, %602 : vector<8x121xf32>
    %604 = vector.broadcast %33 : f32 to vector<8x121xf32>
    %605 = arith.mulf %475, %604 : vector<8x121xf32>
    %606 = arith.addf %603, %605 : vector<8x121xf32>
    %607 = vector.broadcast %34 : f32 to vector<8x121xf32>
    %608 = arith.mulf %478, %607 : vector<8x121xf32>
    %609 = arith.addf %606, %608 : vector<8x121xf32>
    %610 = vector.broadcast %35 : f32 to vector<8x121xf32>
    %611 = arith.mulf %481, %610 : vector<8x121xf32>
    %612 = arith.addf %609, %611 : vector<8x121xf32>
    %613 = vector.broadcast %68 : f32 to vector<8x121xf32>
    %614 = arith.addf %612, %613 : vector<8x121xf32>
    %cst_289 = arith.constant 0.000000e+00 : f32
    %615 = vector.broadcast %cst_289 : f32 to vector<8x121xf32>
    %616 = arith.maximumf %614, %615 : vector<8x121xf32>
    %617 = vector.broadcast %36 : f32 to vector<8x121xf32>
    %618 = arith.mulf %472, %617 : vector<8x121xf32>
    %619 = vector.broadcast %37 : f32 to vector<8x121xf32>
    %620 = arith.mulf %475, %619 : vector<8x121xf32>
    %621 = arith.addf %618, %620 : vector<8x121xf32>
    %622 = vector.broadcast %38 : f32 to vector<8x121xf32>
    %623 = arith.mulf %478, %622 : vector<8x121xf32>
    %624 = arith.addf %621, %623 : vector<8x121xf32>
    %625 = vector.broadcast %39 : f32 to vector<8x121xf32>
    %626 = arith.mulf %481, %625 : vector<8x121xf32>
    %627 = arith.addf %624, %626 : vector<8x121xf32>
    %628 = vector.broadcast %69 : f32 to vector<8x121xf32>
    %629 = arith.addf %627, %628 : vector<8x121xf32>
    %cst_290 = arith.constant 0.000000e+00 : f32
    %630 = vector.broadcast %cst_290 : f32 to vector<8x121xf32>
    %631 = arith.maximumf %629, %630 : vector<8x121xf32>
    %632 = vector.broadcast %40 : f32 to vector<8x121xf32>
    %633 = arith.mulf %472, %632 : vector<8x121xf32>
    %634 = vector.broadcast %41 : f32 to vector<8x121xf32>
    %635 = arith.mulf %475, %634 : vector<8x121xf32>
    %636 = arith.addf %633, %635 : vector<8x121xf32>
    %637 = vector.broadcast %42 : f32 to vector<8x121xf32>
    %638 = arith.mulf %478, %637 : vector<8x121xf32>
    %639 = arith.addf %636, %638 : vector<8x121xf32>
    %640 = vector.broadcast %43 : f32 to vector<8x121xf32>
    %641 = arith.mulf %481, %640 : vector<8x121xf32>
    %642 = arith.addf %639, %641 : vector<8x121xf32>
    %643 = vector.broadcast %70 : f32 to vector<8x121xf32>
    %644 = arith.addf %642, %643 : vector<8x121xf32>
    %cst_291 = arith.constant 0.000000e+00 : f32
    %645 = vector.broadcast %cst_291 : f32 to vector<8x121xf32>
    %646 = arith.maximumf %644, %645 : vector<8x121xf32>
    %647 = vector.broadcast %44 : f32 to vector<8x121xf32>
    %648 = arith.mulf %472, %647 : vector<8x121xf32>
    %649 = vector.broadcast %45 : f32 to vector<8x121xf32>
    %650 = arith.mulf %475, %649 : vector<8x121xf32>
    %651 = arith.addf %648, %650 : vector<8x121xf32>
    %652 = vector.broadcast %46 : f32 to vector<8x121xf32>
    %653 = arith.mulf %478, %652 : vector<8x121xf32>
    %654 = arith.addf %651, %653 : vector<8x121xf32>
    %655 = vector.broadcast %47 : f32 to vector<8x121xf32>
    %656 = arith.mulf %481, %655 : vector<8x121xf32>
    %657 = arith.addf %654, %656 : vector<8x121xf32>
    %658 = vector.broadcast %71 : f32 to vector<8x121xf32>
    %659 = arith.addf %657, %658 : vector<8x121xf32>
    %cst_292 = arith.constant 0.000000e+00 : f32
    %660 = vector.broadcast %cst_292 : f32 to vector<8x121xf32>
    %661 = arith.maximumf %659, %660 : vector<8x121xf32>
    %662 = vector.broadcast %48 : f32 to vector<8x121xf32>
    %663 = arith.mulf %472, %662 : vector<8x121xf32>
    %664 = vector.broadcast %49 : f32 to vector<8x121xf32>
    %665 = arith.mulf %475, %664 : vector<8x121xf32>
    %666 = arith.addf %663, %665 : vector<8x121xf32>
    %667 = vector.broadcast %50 : f32 to vector<8x121xf32>
    %668 = arith.mulf %478, %667 : vector<8x121xf32>
    %669 = arith.addf %666, %668 : vector<8x121xf32>
    %670 = vector.broadcast %51 : f32 to vector<8x121xf32>
    %671 = arith.mulf %481, %670 : vector<8x121xf32>
    %672 = arith.addf %669, %671 : vector<8x121xf32>
    %673 = vector.broadcast %72 : f32 to vector<8x121xf32>
    %674 = arith.addf %672, %673 : vector<8x121xf32>
    %cst_293 = arith.constant 0.000000e+00 : f32
    %675 = vector.broadcast %cst_293 : f32 to vector<8x121xf32>
    %676 = arith.maximumf %674, %675 : vector<8x121xf32>
    %677 = vector.broadcast %52 : f32 to vector<8x121xf32>
    %678 = arith.mulf %472, %677 : vector<8x121xf32>
    %679 = vector.broadcast %53 : f32 to vector<8x121xf32>
    %680 = arith.mulf %475, %679 : vector<8x121xf32>
    %681 = arith.addf %678, %680 : vector<8x121xf32>
    %682 = vector.broadcast %54 : f32 to vector<8x121xf32>
    %683 = arith.mulf %478, %682 : vector<8x121xf32>
    %684 = arith.addf %681, %683 : vector<8x121xf32>
    %685 = vector.broadcast %55 : f32 to vector<8x121xf32>
    %686 = arith.mulf %481, %685 : vector<8x121xf32>
    %687 = arith.addf %684, %686 : vector<8x121xf32>
    %688 = vector.broadcast %73 : f32 to vector<8x121xf32>
    %689 = arith.addf %687, %688 : vector<8x121xf32>
    %cst_294 = arith.constant 0.000000e+00 : f32
    %690 = vector.broadcast %cst_294 : f32 to vector<8x121xf32>
    %691 = arith.maximumf %689, %690 : vector<8x121xf32>
    %692 = vector.broadcast %56 : f32 to vector<8x121xf32>
    %693 = arith.mulf %472, %692 : vector<8x121xf32>
    %694 = vector.broadcast %57 : f32 to vector<8x121xf32>
    %695 = arith.mulf %475, %694 : vector<8x121xf32>
    %696 = arith.addf %693, %695 : vector<8x121xf32>
    %697 = vector.broadcast %58 : f32 to vector<8x121xf32>
    %698 = arith.mulf %478, %697 : vector<8x121xf32>
    %699 = arith.addf %696, %698 : vector<8x121xf32>
    %700 = vector.broadcast %59 : f32 to vector<8x121xf32>
    %701 = arith.mulf %481, %700 : vector<8x121xf32>
    %702 = arith.addf %699, %701 : vector<8x121xf32>
    %703 = vector.broadcast %74 : f32 to vector<8x121xf32>
    %704 = arith.addf %702, %703 : vector<8x121xf32>
    %cst_295 = arith.constant 0.000000e+00 : f32
    %705 = vector.broadcast %cst_295 : f32 to vector<8x121xf32>
    %706 = arith.maximumf %704, %705 : vector<8x121xf32>
    %707 = vector.broadcast %75 : f32 to vector<8x121xf32>
    %708 = arith.mulf %496, %707 : vector<8x121xf32>
    %709 = vector.broadcast %76 : f32 to vector<8x121xf32>
    %710 = arith.mulf %511, %709 : vector<8x121xf32>
    %711 = arith.addf %708, %710 : vector<8x121xf32>
    %712 = vector.broadcast %77 : f32 to vector<8x121xf32>
    %713 = arith.mulf %526, %712 : vector<8x121xf32>
    %714 = arith.addf %711, %713 : vector<8x121xf32>
    %715 = vector.broadcast %78 : f32 to vector<8x121xf32>
    %716 = arith.mulf %541, %715 : vector<8x121xf32>
    %717 = arith.addf %714, %716 : vector<8x121xf32>
    %718 = vector.broadcast %79 : f32 to vector<8x121xf32>
    %719 = arith.mulf %556, %718 : vector<8x121xf32>
    %720 = arith.addf %717, %719 : vector<8x121xf32>
    %721 = vector.broadcast %80 : f32 to vector<8x121xf32>
    %722 = arith.mulf %571, %721 : vector<8x121xf32>
    %723 = arith.addf %720, %722 : vector<8x121xf32>
    %724 = vector.broadcast %81 : f32 to vector<8x121xf32>
    %725 = arith.mulf %586, %724 : vector<8x121xf32>
    %726 = arith.addf %723, %725 : vector<8x121xf32>
    %727 = vector.broadcast %82 : f32 to vector<8x121xf32>
    %728 = arith.mulf %601, %727 : vector<8x121xf32>
    %729 = arith.addf %726, %728 : vector<8x121xf32>
    %730 = vector.broadcast %83 : f32 to vector<8x121xf32>
    %731 = arith.mulf %616, %730 : vector<8x121xf32>
    %732 = arith.addf %729, %731 : vector<8x121xf32>
    %733 = vector.broadcast %84 : f32 to vector<8x121xf32>
    %734 = arith.mulf %631, %733 : vector<8x121xf32>
    %735 = arith.addf %732, %734 : vector<8x121xf32>
    %736 = vector.broadcast %85 : f32 to vector<8x121xf32>
    %737 = arith.mulf %646, %736 : vector<8x121xf32>
    %738 = arith.addf %735, %737 : vector<8x121xf32>
    %739 = vector.broadcast %86 : f32 to vector<8x121xf32>
    %740 = arith.mulf %661, %739 : vector<8x121xf32>
    %741 = arith.addf %738, %740 : vector<8x121xf32>
    %742 = vector.broadcast %87 : f32 to vector<8x121xf32>
    %743 = arith.mulf %676, %742 : vector<8x121xf32>
    %744 = arith.addf %741, %743 : vector<8x121xf32>
    %745 = vector.broadcast %88 : f32 to vector<8x121xf32>
    %746 = arith.mulf %691, %745 : vector<8x121xf32>
    %747 = arith.addf %744, %746 : vector<8x121xf32>
    %748 = vector.broadcast %89 : f32 to vector<8x121xf32>
    %749 = arith.mulf %706, %748 : vector<8x121xf32>
    %750 = arith.addf %747, %749 : vector<8x121xf32>
    %751 = vector.broadcast %270 : f32 to vector<8x121xf32>
    %752 = arith.addf %750, %751 : vector<8x121xf32>
    %cst_296 = arith.constant 0.000000e+00 : f32
    %753 = vector.broadcast %cst_296 : f32 to vector<8x121xf32>
    %754 = arith.maximumf %752, %753 : vector<8x121xf32>
    %755 = vector.broadcast %90 : f32 to vector<8x121xf32>
    %756 = arith.mulf %496, %755 : vector<8x121xf32>
    %757 = vector.broadcast %91 : f32 to vector<8x121xf32>
    %758 = arith.mulf %511, %757 : vector<8x121xf32>
    %759 = arith.addf %756, %758 : vector<8x121xf32>
    %760 = vector.broadcast %92 : f32 to vector<8x121xf32>
    %761 = arith.mulf %526, %760 : vector<8x121xf32>
    %762 = arith.addf %759, %761 : vector<8x121xf32>
    %763 = vector.broadcast %93 : f32 to vector<8x121xf32>
    %764 = arith.mulf %541, %763 : vector<8x121xf32>
    %765 = arith.addf %762, %764 : vector<8x121xf32>
    %766 = vector.broadcast %94 : f32 to vector<8x121xf32>
    %767 = arith.mulf %556, %766 : vector<8x121xf32>
    %768 = arith.addf %765, %767 : vector<8x121xf32>
    %769 = vector.broadcast %95 : f32 to vector<8x121xf32>
    %770 = arith.mulf %571, %769 : vector<8x121xf32>
    %771 = arith.addf %768, %770 : vector<8x121xf32>
    %772 = vector.broadcast %96 : f32 to vector<8x121xf32>
    %773 = arith.mulf %586, %772 : vector<8x121xf32>
    %774 = arith.addf %771, %773 : vector<8x121xf32>
    %775 = vector.broadcast %97 : f32 to vector<8x121xf32>
    %776 = arith.mulf %601, %775 : vector<8x121xf32>
    %777 = arith.addf %774, %776 : vector<8x121xf32>
    %778 = vector.broadcast %98 : f32 to vector<8x121xf32>
    %779 = arith.mulf %616, %778 : vector<8x121xf32>
    %780 = arith.addf %777, %779 : vector<8x121xf32>
    %781 = vector.broadcast %99 : f32 to vector<8x121xf32>
    %782 = arith.mulf %631, %781 : vector<8x121xf32>
    %783 = arith.addf %780, %782 : vector<8x121xf32>
    %784 = vector.broadcast %100 : f32 to vector<8x121xf32>
    %785 = arith.mulf %646, %784 : vector<8x121xf32>
    %786 = arith.addf %783, %785 : vector<8x121xf32>
    %787 = vector.broadcast %101 : f32 to vector<8x121xf32>
    %788 = arith.mulf %661, %787 : vector<8x121xf32>
    %789 = arith.addf %786, %788 : vector<8x121xf32>
    %790 = vector.broadcast %102 : f32 to vector<8x121xf32>
    %791 = arith.mulf %676, %790 : vector<8x121xf32>
    %792 = arith.addf %789, %791 : vector<8x121xf32>
    %793 = vector.broadcast %103 : f32 to vector<8x121xf32>
    %794 = arith.mulf %691, %793 : vector<8x121xf32>
    %795 = arith.addf %792, %794 : vector<8x121xf32>
    %796 = vector.broadcast %104 : f32 to vector<8x121xf32>
    %797 = arith.mulf %706, %796 : vector<8x121xf32>
    %798 = arith.addf %795, %797 : vector<8x121xf32>
    %799 = vector.broadcast %271 : f32 to vector<8x121xf32>
    %800 = arith.addf %798, %799 : vector<8x121xf32>
    %cst_297 = arith.constant 0.000000e+00 : f32
    %801 = vector.broadcast %cst_297 : f32 to vector<8x121xf32>
    %802 = arith.maximumf %800, %801 : vector<8x121xf32>
    %803 = vector.broadcast %105 : f32 to vector<8x121xf32>
    %804 = arith.mulf %496, %803 : vector<8x121xf32>
    %805 = vector.broadcast %106 : f32 to vector<8x121xf32>
    %806 = arith.mulf %511, %805 : vector<8x121xf32>
    %807 = arith.addf %804, %806 : vector<8x121xf32>
    %808 = vector.broadcast %107 : f32 to vector<8x121xf32>
    %809 = arith.mulf %526, %808 : vector<8x121xf32>
    %810 = arith.addf %807, %809 : vector<8x121xf32>
    %811 = vector.broadcast %108 : f32 to vector<8x121xf32>
    %812 = arith.mulf %541, %811 : vector<8x121xf32>
    %813 = arith.addf %810, %812 : vector<8x121xf32>
    %814 = vector.broadcast %109 : f32 to vector<8x121xf32>
    %815 = arith.mulf %556, %814 : vector<8x121xf32>
    %816 = arith.addf %813, %815 : vector<8x121xf32>
    %817 = vector.broadcast %110 : f32 to vector<8x121xf32>
    %818 = arith.mulf %571, %817 : vector<8x121xf32>
    %819 = arith.addf %816, %818 : vector<8x121xf32>
    %820 = vector.broadcast %111 : f32 to vector<8x121xf32>
    %821 = arith.mulf %586, %820 : vector<8x121xf32>
    %822 = arith.addf %819, %821 : vector<8x121xf32>
    %823 = vector.broadcast %112 : f32 to vector<8x121xf32>
    %824 = arith.mulf %601, %823 : vector<8x121xf32>
    %825 = arith.addf %822, %824 : vector<8x121xf32>
    %826 = vector.broadcast %113 : f32 to vector<8x121xf32>
    %827 = arith.mulf %616, %826 : vector<8x121xf32>
    %828 = arith.addf %825, %827 : vector<8x121xf32>
    %829 = vector.broadcast %114 : f32 to vector<8x121xf32>
    %830 = arith.mulf %631, %829 : vector<8x121xf32>
    %831 = arith.addf %828, %830 : vector<8x121xf32>
    %832 = vector.broadcast %115 : f32 to vector<8x121xf32>
    %833 = arith.mulf %646, %832 : vector<8x121xf32>
    %834 = arith.addf %831, %833 : vector<8x121xf32>
    %835 = vector.broadcast %116 : f32 to vector<8x121xf32>
    %836 = arith.mulf %661, %835 : vector<8x121xf32>
    %837 = arith.addf %834, %836 : vector<8x121xf32>
    %838 = vector.broadcast %117 : f32 to vector<8x121xf32>
    %839 = arith.mulf %676, %838 : vector<8x121xf32>
    %840 = arith.addf %837, %839 : vector<8x121xf32>
    %841 = vector.broadcast %118 : f32 to vector<8x121xf32>
    %842 = arith.mulf %691, %841 : vector<8x121xf32>
    %843 = arith.addf %840, %842 : vector<8x121xf32>
    %844 = vector.broadcast %119 : f32 to vector<8x121xf32>
    %845 = arith.mulf %706, %844 : vector<8x121xf32>
    %846 = arith.addf %843, %845 : vector<8x121xf32>
    %847 = vector.broadcast %272 : f32 to vector<8x121xf32>
    %848 = arith.addf %846, %847 : vector<8x121xf32>
    %cst_298 = arith.constant 0.000000e+00 : f32
    %849 = vector.broadcast %cst_298 : f32 to vector<8x121xf32>
    %850 = arith.maximumf %848, %849 : vector<8x121xf32>
    %851 = vector.broadcast %120 : f32 to vector<8x121xf32>
    %852 = arith.mulf %496, %851 : vector<8x121xf32>
    %853 = vector.broadcast %121 : f32 to vector<8x121xf32>
    %854 = arith.mulf %511, %853 : vector<8x121xf32>
    %855 = arith.addf %852, %854 : vector<8x121xf32>
    %856 = vector.broadcast %122 : f32 to vector<8x121xf32>
    %857 = arith.mulf %526, %856 : vector<8x121xf32>
    %858 = arith.addf %855, %857 : vector<8x121xf32>
    %859 = vector.broadcast %123 : f32 to vector<8x121xf32>
    %860 = arith.mulf %541, %859 : vector<8x121xf32>
    %861 = arith.addf %858, %860 : vector<8x121xf32>
    %862 = vector.broadcast %124 : f32 to vector<8x121xf32>
    %863 = arith.mulf %556, %862 : vector<8x121xf32>
    %864 = arith.addf %861, %863 : vector<8x121xf32>
    %865 = vector.broadcast %125 : f32 to vector<8x121xf32>
    %866 = arith.mulf %571, %865 : vector<8x121xf32>
    %867 = arith.addf %864, %866 : vector<8x121xf32>
    %868 = vector.broadcast %126 : f32 to vector<8x121xf32>
    %869 = arith.mulf %586, %868 : vector<8x121xf32>
    %870 = arith.addf %867, %869 : vector<8x121xf32>
    %871 = vector.broadcast %127 : f32 to vector<8x121xf32>
    %872 = arith.mulf %601, %871 : vector<8x121xf32>
    %873 = arith.addf %870, %872 : vector<8x121xf32>
    %874 = vector.broadcast %128 : f32 to vector<8x121xf32>
    %875 = arith.mulf %616, %874 : vector<8x121xf32>
    %876 = arith.addf %873, %875 : vector<8x121xf32>
    %877 = vector.broadcast %129 : f32 to vector<8x121xf32>
    %878 = arith.mulf %631, %877 : vector<8x121xf32>
    %879 = arith.addf %876, %878 : vector<8x121xf32>
    %880 = vector.broadcast %130 : f32 to vector<8x121xf32>
    %881 = arith.mulf %646, %880 : vector<8x121xf32>
    %882 = arith.addf %879, %881 : vector<8x121xf32>
    %883 = vector.broadcast %131 : f32 to vector<8x121xf32>
    %884 = arith.mulf %661, %883 : vector<8x121xf32>
    %885 = arith.addf %882, %884 : vector<8x121xf32>
    %886 = vector.broadcast %132 : f32 to vector<8x121xf32>
    %887 = arith.mulf %676, %886 : vector<8x121xf32>
    %888 = arith.addf %885, %887 : vector<8x121xf32>
    %889 = vector.broadcast %133 : f32 to vector<8x121xf32>
    %890 = arith.mulf %691, %889 : vector<8x121xf32>
    %891 = arith.addf %888, %890 : vector<8x121xf32>
    %892 = vector.broadcast %134 : f32 to vector<8x121xf32>
    %893 = arith.mulf %706, %892 : vector<8x121xf32>
    %894 = arith.addf %891, %893 : vector<8x121xf32>
    %895 = vector.broadcast %273 : f32 to vector<8x121xf32>
    %896 = arith.addf %894, %895 : vector<8x121xf32>
    %cst_299 = arith.constant 0.000000e+00 : f32
    %897 = vector.broadcast %cst_299 : f32 to vector<8x121xf32>
    %898 = arith.maximumf %896, %897 : vector<8x121xf32>
    %899 = vector.broadcast %135 : f32 to vector<8x121xf32>
    %900 = arith.mulf %496, %899 : vector<8x121xf32>
    %901 = vector.broadcast %136 : f32 to vector<8x121xf32>
    %902 = arith.mulf %511, %901 : vector<8x121xf32>
    %903 = arith.addf %900, %902 : vector<8x121xf32>
    %904 = vector.broadcast %137 : f32 to vector<8x121xf32>
    %905 = arith.mulf %526, %904 : vector<8x121xf32>
    %906 = arith.addf %903, %905 : vector<8x121xf32>
    %907 = vector.broadcast %138 : f32 to vector<8x121xf32>
    %908 = arith.mulf %541, %907 : vector<8x121xf32>
    %909 = arith.addf %906, %908 : vector<8x121xf32>
    %910 = vector.broadcast %139 : f32 to vector<8x121xf32>
    %911 = arith.mulf %556, %910 : vector<8x121xf32>
    %912 = arith.addf %909, %911 : vector<8x121xf32>
    %913 = vector.broadcast %140 : f32 to vector<8x121xf32>
    %914 = arith.mulf %571, %913 : vector<8x121xf32>
    %915 = arith.addf %912, %914 : vector<8x121xf32>
    %916 = vector.broadcast %141 : f32 to vector<8x121xf32>
    %917 = arith.mulf %586, %916 : vector<8x121xf32>
    %918 = arith.addf %915, %917 : vector<8x121xf32>
    %919 = vector.broadcast %142 : f32 to vector<8x121xf32>
    %920 = arith.mulf %601, %919 : vector<8x121xf32>
    %921 = arith.addf %918, %920 : vector<8x121xf32>
    %922 = vector.broadcast %143 : f32 to vector<8x121xf32>
    %923 = arith.mulf %616, %922 : vector<8x121xf32>
    %924 = arith.addf %921, %923 : vector<8x121xf32>
    %925 = vector.broadcast %144 : f32 to vector<8x121xf32>
    %926 = arith.mulf %631, %925 : vector<8x121xf32>
    %927 = arith.addf %924, %926 : vector<8x121xf32>
    %928 = vector.broadcast %145 : f32 to vector<8x121xf32>
    %929 = arith.mulf %646, %928 : vector<8x121xf32>
    %930 = arith.addf %927, %929 : vector<8x121xf32>
    %931 = vector.broadcast %146 : f32 to vector<8x121xf32>
    %932 = arith.mulf %661, %931 : vector<8x121xf32>
    %933 = arith.addf %930, %932 : vector<8x121xf32>
    %934 = vector.broadcast %147 : f32 to vector<8x121xf32>
    %935 = arith.mulf %676, %934 : vector<8x121xf32>
    %936 = arith.addf %933, %935 : vector<8x121xf32>
    %937 = vector.broadcast %148 : f32 to vector<8x121xf32>
    %938 = arith.mulf %691, %937 : vector<8x121xf32>
    %939 = arith.addf %936, %938 : vector<8x121xf32>
    %940 = vector.broadcast %149 : f32 to vector<8x121xf32>
    %941 = arith.mulf %706, %940 : vector<8x121xf32>
    %942 = arith.addf %939, %941 : vector<8x121xf32>
    %943 = vector.broadcast %274 : f32 to vector<8x121xf32>
    %944 = arith.addf %942, %943 : vector<8x121xf32>
    %cst_300 = arith.constant 0.000000e+00 : f32
    %945 = vector.broadcast %cst_300 : f32 to vector<8x121xf32>
    %946 = arith.maximumf %944, %945 : vector<8x121xf32>
    %947 = vector.broadcast %150 : f32 to vector<8x121xf32>
    %948 = arith.mulf %496, %947 : vector<8x121xf32>
    %949 = vector.broadcast %151 : f32 to vector<8x121xf32>
    %950 = arith.mulf %511, %949 : vector<8x121xf32>
    %951 = arith.addf %948, %950 : vector<8x121xf32>
    %952 = vector.broadcast %152 : f32 to vector<8x121xf32>
    %953 = arith.mulf %526, %952 : vector<8x121xf32>
    %954 = arith.addf %951, %953 : vector<8x121xf32>
    %955 = vector.broadcast %153 : f32 to vector<8x121xf32>
    %956 = arith.mulf %541, %955 : vector<8x121xf32>
    %957 = arith.addf %954, %956 : vector<8x121xf32>
    %958 = vector.broadcast %154 : f32 to vector<8x121xf32>
    %959 = arith.mulf %556, %958 : vector<8x121xf32>
    %960 = arith.addf %957, %959 : vector<8x121xf32>
    %961 = vector.broadcast %155 : f32 to vector<8x121xf32>
    %962 = arith.mulf %571, %961 : vector<8x121xf32>
    %963 = arith.addf %960, %962 : vector<8x121xf32>
    %964 = vector.broadcast %156 : f32 to vector<8x121xf32>
    %965 = arith.mulf %586, %964 : vector<8x121xf32>
    %966 = arith.addf %963, %965 : vector<8x121xf32>
    %967 = vector.broadcast %157 : f32 to vector<8x121xf32>
    %968 = arith.mulf %601, %967 : vector<8x121xf32>
    %969 = arith.addf %966, %968 : vector<8x121xf32>
    %970 = vector.broadcast %158 : f32 to vector<8x121xf32>
    %971 = arith.mulf %616, %970 : vector<8x121xf32>
    %972 = arith.addf %969, %971 : vector<8x121xf32>
    %973 = vector.broadcast %159 : f32 to vector<8x121xf32>
    %974 = arith.mulf %631, %973 : vector<8x121xf32>
    %975 = arith.addf %972, %974 : vector<8x121xf32>
    %976 = vector.broadcast %160 : f32 to vector<8x121xf32>
    %977 = arith.mulf %646, %976 : vector<8x121xf32>
    %978 = arith.addf %975, %977 : vector<8x121xf32>
    %979 = vector.broadcast %161 : f32 to vector<8x121xf32>
    %980 = arith.mulf %661, %979 : vector<8x121xf32>
    %981 = arith.addf %978, %980 : vector<8x121xf32>
    %982 = vector.broadcast %162 : f32 to vector<8x121xf32>
    %983 = arith.mulf %676, %982 : vector<8x121xf32>
    %984 = arith.addf %981, %983 : vector<8x121xf32>
    %985 = vector.broadcast %163 : f32 to vector<8x121xf32>
    %986 = arith.mulf %691, %985 : vector<8x121xf32>
    %987 = arith.addf %984, %986 : vector<8x121xf32>
    %988 = vector.broadcast %164 : f32 to vector<8x121xf32>
    %989 = arith.mulf %706, %988 : vector<8x121xf32>
    %990 = arith.addf %987, %989 : vector<8x121xf32>
    %991 = vector.broadcast %275 : f32 to vector<8x121xf32>
    %992 = arith.addf %990, %991 : vector<8x121xf32>
    %cst_301 = arith.constant 0.000000e+00 : f32
    %993 = vector.broadcast %cst_301 : f32 to vector<8x121xf32>
    %994 = arith.maximumf %992, %993 : vector<8x121xf32>
    %995 = vector.broadcast %165 : f32 to vector<8x121xf32>
    %996 = arith.mulf %496, %995 : vector<8x121xf32>
    %997 = vector.broadcast %166 : f32 to vector<8x121xf32>
    %998 = arith.mulf %511, %997 : vector<8x121xf32>
    %999 = arith.addf %996, %998 : vector<8x121xf32>
    %1000 = vector.broadcast %167 : f32 to vector<8x121xf32>
    %1001 = arith.mulf %526, %1000 : vector<8x121xf32>
    %1002 = arith.addf %999, %1001 : vector<8x121xf32>
    %1003 = vector.broadcast %168 : f32 to vector<8x121xf32>
    %1004 = arith.mulf %541, %1003 : vector<8x121xf32>
    %1005 = arith.addf %1002, %1004 : vector<8x121xf32>
    %1006 = vector.broadcast %169 : f32 to vector<8x121xf32>
    %1007 = arith.mulf %556, %1006 : vector<8x121xf32>
    %1008 = arith.addf %1005, %1007 : vector<8x121xf32>
    %1009 = vector.broadcast %170 : f32 to vector<8x121xf32>
    %1010 = arith.mulf %571, %1009 : vector<8x121xf32>
    %1011 = arith.addf %1008, %1010 : vector<8x121xf32>
    %1012 = vector.broadcast %171 : f32 to vector<8x121xf32>
    %1013 = arith.mulf %586, %1012 : vector<8x121xf32>
    %1014 = arith.addf %1011, %1013 : vector<8x121xf32>
    %1015 = vector.broadcast %172 : f32 to vector<8x121xf32>
    %1016 = arith.mulf %601, %1015 : vector<8x121xf32>
    %1017 = arith.addf %1014, %1016 : vector<8x121xf32>
    %1018 = vector.broadcast %173 : f32 to vector<8x121xf32>
    %1019 = arith.mulf %616, %1018 : vector<8x121xf32>
    %1020 = arith.addf %1017, %1019 : vector<8x121xf32>
    %1021 = vector.broadcast %174 : f32 to vector<8x121xf32>
    %1022 = arith.mulf %631, %1021 : vector<8x121xf32>
    %1023 = arith.addf %1020, %1022 : vector<8x121xf32>
    %1024 = vector.broadcast %175 : f32 to vector<8x121xf32>
    %1025 = arith.mulf %646, %1024 : vector<8x121xf32>
    %1026 = arith.addf %1023, %1025 : vector<8x121xf32>
    %1027 = vector.broadcast %176 : f32 to vector<8x121xf32>
    %1028 = arith.mulf %661, %1027 : vector<8x121xf32>
    %1029 = arith.addf %1026, %1028 : vector<8x121xf32>
    %1030 = vector.broadcast %177 : f32 to vector<8x121xf32>
    %1031 = arith.mulf %676, %1030 : vector<8x121xf32>
    %1032 = arith.addf %1029, %1031 : vector<8x121xf32>
    %1033 = vector.broadcast %178 : f32 to vector<8x121xf32>
    %1034 = arith.mulf %691, %1033 : vector<8x121xf32>
    %1035 = arith.addf %1032, %1034 : vector<8x121xf32>
    %1036 = vector.broadcast %179 : f32 to vector<8x121xf32>
    %1037 = arith.mulf %706, %1036 : vector<8x121xf32>
    %1038 = arith.addf %1035, %1037 : vector<8x121xf32>
    %1039 = vector.broadcast %276 : f32 to vector<8x121xf32>
    %1040 = arith.addf %1038, %1039 : vector<8x121xf32>
    %cst_302 = arith.constant 0.000000e+00 : f32
    %1041 = vector.broadcast %cst_302 : f32 to vector<8x121xf32>
    %1042 = arith.maximumf %1040, %1041 : vector<8x121xf32>
    %1043 = vector.broadcast %180 : f32 to vector<8x121xf32>
    %1044 = arith.mulf %496, %1043 : vector<8x121xf32>
    %1045 = vector.broadcast %181 : f32 to vector<8x121xf32>
    %1046 = arith.mulf %511, %1045 : vector<8x121xf32>
    %1047 = arith.addf %1044, %1046 : vector<8x121xf32>
    %1048 = vector.broadcast %182 : f32 to vector<8x121xf32>
    %1049 = arith.mulf %526, %1048 : vector<8x121xf32>
    %1050 = arith.addf %1047, %1049 : vector<8x121xf32>
    %1051 = vector.broadcast %183 : f32 to vector<8x121xf32>
    %1052 = arith.mulf %541, %1051 : vector<8x121xf32>
    %1053 = arith.addf %1050, %1052 : vector<8x121xf32>
    %1054 = vector.broadcast %184 : f32 to vector<8x121xf32>
    %1055 = arith.mulf %556, %1054 : vector<8x121xf32>
    %1056 = arith.addf %1053, %1055 : vector<8x121xf32>
    %1057 = vector.broadcast %185 : f32 to vector<8x121xf32>
    %1058 = arith.mulf %571, %1057 : vector<8x121xf32>
    %1059 = arith.addf %1056, %1058 : vector<8x121xf32>
    %1060 = vector.broadcast %186 : f32 to vector<8x121xf32>
    %1061 = arith.mulf %586, %1060 : vector<8x121xf32>
    %1062 = arith.addf %1059, %1061 : vector<8x121xf32>
    %1063 = vector.broadcast %187 : f32 to vector<8x121xf32>
    %1064 = arith.mulf %601, %1063 : vector<8x121xf32>
    %1065 = arith.addf %1062, %1064 : vector<8x121xf32>
    %1066 = vector.broadcast %188 : f32 to vector<8x121xf32>
    %1067 = arith.mulf %616, %1066 : vector<8x121xf32>
    %1068 = arith.addf %1065, %1067 : vector<8x121xf32>
    %1069 = vector.broadcast %189 : f32 to vector<8x121xf32>
    %1070 = arith.mulf %631, %1069 : vector<8x121xf32>
    %1071 = arith.addf %1068, %1070 : vector<8x121xf32>
    %1072 = vector.broadcast %190 : f32 to vector<8x121xf32>
    %1073 = arith.mulf %646, %1072 : vector<8x121xf32>
    %1074 = arith.addf %1071, %1073 : vector<8x121xf32>
    %1075 = vector.broadcast %191 : f32 to vector<8x121xf32>
    %1076 = arith.mulf %661, %1075 : vector<8x121xf32>
    %1077 = arith.addf %1074, %1076 : vector<8x121xf32>
    %1078 = vector.broadcast %192 : f32 to vector<8x121xf32>
    %1079 = arith.mulf %676, %1078 : vector<8x121xf32>
    %1080 = arith.addf %1077, %1079 : vector<8x121xf32>
    %1081 = vector.broadcast %193 : f32 to vector<8x121xf32>
    %1082 = arith.mulf %691, %1081 : vector<8x121xf32>
    %1083 = arith.addf %1080, %1082 : vector<8x121xf32>
    %1084 = vector.broadcast %194 : f32 to vector<8x121xf32>
    %1085 = arith.mulf %706, %1084 : vector<8x121xf32>
    %1086 = arith.addf %1083, %1085 : vector<8x121xf32>
    %1087 = vector.broadcast %277 : f32 to vector<8x121xf32>
    %1088 = arith.addf %1086, %1087 : vector<8x121xf32>
    %cst_303 = arith.constant 0.000000e+00 : f32
    %1089 = vector.broadcast %cst_303 : f32 to vector<8x121xf32>
    %1090 = arith.maximumf %1088, %1089 : vector<8x121xf32>
    %1091 = vector.broadcast %195 : f32 to vector<8x121xf32>
    %1092 = arith.mulf %496, %1091 : vector<8x121xf32>
    %1093 = vector.broadcast %196 : f32 to vector<8x121xf32>
    %1094 = arith.mulf %511, %1093 : vector<8x121xf32>
    %1095 = arith.addf %1092, %1094 : vector<8x121xf32>
    %1096 = vector.broadcast %197 : f32 to vector<8x121xf32>
    %1097 = arith.mulf %526, %1096 : vector<8x121xf32>
    %1098 = arith.addf %1095, %1097 : vector<8x121xf32>
    %1099 = vector.broadcast %198 : f32 to vector<8x121xf32>
    %1100 = arith.mulf %541, %1099 : vector<8x121xf32>
    %1101 = arith.addf %1098, %1100 : vector<8x121xf32>
    %1102 = vector.broadcast %199 : f32 to vector<8x121xf32>
    %1103 = arith.mulf %556, %1102 : vector<8x121xf32>
    %1104 = arith.addf %1101, %1103 : vector<8x121xf32>
    %1105 = vector.broadcast %200 : f32 to vector<8x121xf32>
    %1106 = arith.mulf %571, %1105 : vector<8x121xf32>
    %1107 = arith.addf %1104, %1106 : vector<8x121xf32>
    %1108 = vector.broadcast %201 : f32 to vector<8x121xf32>
    %1109 = arith.mulf %586, %1108 : vector<8x121xf32>
    %1110 = arith.addf %1107, %1109 : vector<8x121xf32>
    %1111 = vector.broadcast %202 : f32 to vector<8x121xf32>
    %1112 = arith.mulf %601, %1111 : vector<8x121xf32>
    %1113 = arith.addf %1110, %1112 : vector<8x121xf32>
    %1114 = vector.broadcast %203 : f32 to vector<8x121xf32>
    %1115 = arith.mulf %616, %1114 : vector<8x121xf32>
    %1116 = arith.addf %1113, %1115 : vector<8x121xf32>
    %1117 = vector.broadcast %204 : f32 to vector<8x121xf32>
    %1118 = arith.mulf %631, %1117 : vector<8x121xf32>
    %1119 = arith.addf %1116, %1118 : vector<8x121xf32>
    %1120 = vector.broadcast %205 : f32 to vector<8x121xf32>
    %1121 = arith.mulf %646, %1120 : vector<8x121xf32>
    %1122 = arith.addf %1119, %1121 : vector<8x121xf32>
    %1123 = vector.broadcast %206 : f32 to vector<8x121xf32>
    %1124 = arith.mulf %661, %1123 : vector<8x121xf32>
    %1125 = arith.addf %1122, %1124 : vector<8x121xf32>
    %1126 = vector.broadcast %207 : f32 to vector<8x121xf32>
    %1127 = arith.mulf %676, %1126 : vector<8x121xf32>
    %1128 = arith.addf %1125, %1127 : vector<8x121xf32>
    %1129 = vector.broadcast %208 : f32 to vector<8x121xf32>
    %1130 = arith.mulf %691, %1129 : vector<8x121xf32>
    %1131 = arith.addf %1128, %1130 : vector<8x121xf32>
    %1132 = vector.broadcast %209 : f32 to vector<8x121xf32>
    %1133 = arith.mulf %706, %1132 : vector<8x121xf32>
    %1134 = arith.addf %1131, %1133 : vector<8x121xf32>
    %1135 = vector.broadcast %278 : f32 to vector<8x121xf32>
    %1136 = arith.addf %1134, %1135 : vector<8x121xf32>
    %cst_304 = arith.constant 0.000000e+00 : f32
    %1137 = vector.broadcast %cst_304 : f32 to vector<8x121xf32>
    %1138 = arith.maximumf %1136, %1137 : vector<8x121xf32>
    %1139 = vector.broadcast %210 : f32 to vector<8x121xf32>
    %1140 = arith.mulf %496, %1139 : vector<8x121xf32>
    %1141 = vector.broadcast %211 : f32 to vector<8x121xf32>
    %1142 = arith.mulf %511, %1141 : vector<8x121xf32>
    %1143 = arith.addf %1140, %1142 : vector<8x121xf32>
    %1144 = vector.broadcast %212 : f32 to vector<8x121xf32>
    %1145 = arith.mulf %526, %1144 : vector<8x121xf32>
    %1146 = arith.addf %1143, %1145 : vector<8x121xf32>
    %1147 = vector.broadcast %213 : f32 to vector<8x121xf32>
    %1148 = arith.mulf %541, %1147 : vector<8x121xf32>
    %1149 = arith.addf %1146, %1148 : vector<8x121xf32>
    %1150 = vector.broadcast %214 : f32 to vector<8x121xf32>
    %1151 = arith.mulf %556, %1150 : vector<8x121xf32>
    %1152 = arith.addf %1149, %1151 : vector<8x121xf32>
    %1153 = vector.broadcast %215 : f32 to vector<8x121xf32>
    %1154 = arith.mulf %571, %1153 : vector<8x121xf32>
    %1155 = arith.addf %1152, %1154 : vector<8x121xf32>
    %1156 = vector.broadcast %216 : f32 to vector<8x121xf32>
    %1157 = arith.mulf %586, %1156 : vector<8x121xf32>
    %1158 = arith.addf %1155, %1157 : vector<8x121xf32>
    %1159 = vector.broadcast %217 : f32 to vector<8x121xf32>
    %1160 = arith.mulf %601, %1159 : vector<8x121xf32>
    %1161 = arith.addf %1158, %1160 : vector<8x121xf32>
    %1162 = vector.broadcast %218 : f32 to vector<8x121xf32>
    %1163 = arith.mulf %616, %1162 : vector<8x121xf32>
    %1164 = arith.addf %1161, %1163 : vector<8x121xf32>
    %1165 = vector.broadcast %219 : f32 to vector<8x121xf32>
    %1166 = arith.mulf %631, %1165 : vector<8x121xf32>
    %1167 = arith.addf %1164, %1166 : vector<8x121xf32>
    %1168 = vector.broadcast %220 : f32 to vector<8x121xf32>
    %1169 = arith.mulf %646, %1168 : vector<8x121xf32>
    %1170 = arith.addf %1167, %1169 : vector<8x121xf32>
    %1171 = vector.broadcast %221 : f32 to vector<8x121xf32>
    %1172 = arith.mulf %661, %1171 : vector<8x121xf32>
    %1173 = arith.addf %1170, %1172 : vector<8x121xf32>
    %1174 = vector.broadcast %222 : f32 to vector<8x121xf32>
    %1175 = arith.mulf %676, %1174 : vector<8x121xf32>
    %1176 = arith.addf %1173, %1175 : vector<8x121xf32>
    %1177 = vector.broadcast %223 : f32 to vector<8x121xf32>
    %1178 = arith.mulf %691, %1177 : vector<8x121xf32>
    %1179 = arith.addf %1176, %1178 : vector<8x121xf32>
    %1180 = vector.broadcast %224 : f32 to vector<8x121xf32>
    %1181 = arith.mulf %706, %1180 : vector<8x121xf32>
    %1182 = arith.addf %1179, %1181 : vector<8x121xf32>
    %1183 = vector.broadcast %279 : f32 to vector<8x121xf32>
    %1184 = arith.addf %1182, %1183 : vector<8x121xf32>
    %cst_305 = arith.constant 0.000000e+00 : f32
    %1185 = vector.broadcast %cst_305 : f32 to vector<8x121xf32>
    %1186 = arith.maximumf %1184, %1185 : vector<8x121xf32>
    %1187 = vector.broadcast %225 : f32 to vector<8x121xf32>
    %1188 = arith.mulf %496, %1187 : vector<8x121xf32>
    %1189 = vector.broadcast %226 : f32 to vector<8x121xf32>
    %1190 = arith.mulf %511, %1189 : vector<8x121xf32>
    %1191 = arith.addf %1188, %1190 : vector<8x121xf32>
    %1192 = vector.broadcast %227 : f32 to vector<8x121xf32>
    %1193 = arith.mulf %526, %1192 : vector<8x121xf32>
    %1194 = arith.addf %1191, %1193 : vector<8x121xf32>
    %1195 = vector.broadcast %228 : f32 to vector<8x121xf32>
    %1196 = arith.mulf %541, %1195 : vector<8x121xf32>
    %1197 = arith.addf %1194, %1196 : vector<8x121xf32>
    %1198 = vector.broadcast %229 : f32 to vector<8x121xf32>
    %1199 = arith.mulf %556, %1198 : vector<8x121xf32>
    %1200 = arith.addf %1197, %1199 : vector<8x121xf32>
    %1201 = vector.broadcast %230 : f32 to vector<8x121xf32>
    %1202 = arith.mulf %571, %1201 : vector<8x121xf32>
    %1203 = arith.addf %1200, %1202 : vector<8x121xf32>
    %1204 = vector.broadcast %231 : f32 to vector<8x121xf32>
    %1205 = arith.mulf %586, %1204 : vector<8x121xf32>
    %1206 = arith.addf %1203, %1205 : vector<8x121xf32>
    %1207 = vector.broadcast %232 : f32 to vector<8x121xf32>
    %1208 = arith.mulf %601, %1207 : vector<8x121xf32>
    %1209 = arith.addf %1206, %1208 : vector<8x121xf32>
    %1210 = vector.broadcast %233 : f32 to vector<8x121xf32>
    %1211 = arith.mulf %616, %1210 : vector<8x121xf32>
    %1212 = arith.addf %1209, %1211 : vector<8x121xf32>
    %1213 = vector.broadcast %234 : f32 to vector<8x121xf32>
    %1214 = arith.mulf %631, %1213 : vector<8x121xf32>
    %1215 = arith.addf %1212, %1214 : vector<8x121xf32>
    %1216 = vector.broadcast %235 : f32 to vector<8x121xf32>
    %1217 = arith.mulf %646, %1216 : vector<8x121xf32>
    %1218 = arith.addf %1215, %1217 : vector<8x121xf32>
    %1219 = vector.broadcast %236 : f32 to vector<8x121xf32>
    %1220 = arith.mulf %661, %1219 : vector<8x121xf32>
    %1221 = arith.addf %1218, %1220 : vector<8x121xf32>
    %1222 = vector.broadcast %237 : f32 to vector<8x121xf32>
    %1223 = arith.mulf %676, %1222 : vector<8x121xf32>
    %1224 = arith.addf %1221, %1223 : vector<8x121xf32>
    %1225 = vector.broadcast %238 : f32 to vector<8x121xf32>
    %1226 = arith.mulf %691, %1225 : vector<8x121xf32>
    %1227 = arith.addf %1224, %1226 : vector<8x121xf32>
    %1228 = vector.broadcast %239 : f32 to vector<8x121xf32>
    %1229 = arith.mulf %706, %1228 : vector<8x121xf32>
    %1230 = arith.addf %1227, %1229 : vector<8x121xf32>
    %1231 = vector.broadcast %280 : f32 to vector<8x121xf32>
    %1232 = arith.addf %1230, %1231 : vector<8x121xf32>
    %cst_306 = arith.constant 0.000000e+00 : f32
    %1233 = vector.broadcast %cst_306 : f32 to vector<8x121xf32>
    %1234 = arith.maximumf %1232, %1233 : vector<8x121xf32>
    %1235 = vector.broadcast %240 : f32 to vector<8x121xf32>
    %1236 = arith.mulf %496, %1235 : vector<8x121xf32>
    %1237 = vector.broadcast %241 : f32 to vector<8x121xf32>
    %1238 = arith.mulf %511, %1237 : vector<8x121xf32>
    %1239 = arith.addf %1236, %1238 : vector<8x121xf32>
    %1240 = vector.broadcast %242 : f32 to vector<8x121xf32>
    %1241 = arith.mulf %526, %1240 : vector<8x121xf32>
    %1242 = arith.addf %1239, %1241 : vector<8x121xf32>
    %1243 = vector.broadcast %243 : f32 to vector<8x121xf32>
    %1244 = arith.mulf %541, %1243 : vector<8x121xf32>
    %1245 = arith.addf %1242, %1244 : vector<8x121xf32>
    %1246 = vector.broadcast %244 : f32 to vector<8x121xf32>
    %1247 = arith.mulf %556, %1246 : vector<8x121xf32>
    %1248 = arith.addf %1245, %1247 : vector<8x121xf32>
    %1249 = vector.broadcast %245 : f32 to vector<8x121xf32>
    %1250 = arith.mulf %571, %1249 : vector<8x121xf32>
    %1251 = arith.addf %1248, %1250 : vector<8x121xf32>
    %1252 = vector.broadcast %246 : f32 to vector<8x121xf32>
    %1253 = arith.mulf %586, %1252 : vector<8x121xf32>
    %1254 = arith.addf %1251, %1253 : vector<8x121xf32>
    %1255 = vector.broadcast %247 : f32 to vector<8x121xf32>
    %1256 = arith.mulf %601, %1255 : vector<8x121xf32>
    %1257 = arith.addf %1254, %1256 : vector<8x121xf32>
    %1258 = vector.broadcast %248 : f32 to vector<8x121xf32>
    %1259 = arith.mulf %616, %1258 : vector<8x121xf32>
    %1260 = arith.addf %1257, %1259 : vector<8x121xf32>
    %1261 = vector.broadcast %249 : f32 to vector<8x121xf32>
    %1262 = arith.mulf %631, %1261 : vector<8x121xf32>
    %1263 = arith.addf %1260, %1262 : vector<8x121xf32>
    %1264 = vector.broadcast %250 : f32 to vector<8x121xf32>
    %1265 = arith.mulf %646, %1264 : vector<8x121xf32>
    %1266 = arith.addf %1263, %1265 : vector<8x121xf32>
    %1267 = vector.broadcast %251 : f32 to vector<8x121xf32>
    %1268 = arith.mulf %661, %1267 : vector<8x121xf32>
    %1269 = arith.addf %1266, %1268 : vector<8x121xf32>
    %1270 = vector.broadcast %252 : f32 to vector<8x121xf32>
    %1271 = arith.mulf %676, %1270 : vector<8x121xf32>
    %1272 = arith.addf %1269, %1271 : vector<8x121xf32>
    %1273 = vector.broadcast %253 : f32 to vector<8x121xf32>
    %1274 = arith.mulf %691, %1273 : vector<8x121xf32>
    %1275 = arith.addf %1272, %1274 : vector<8x121xf32>
    %1276 = vector.broadcast %254 : f32 to vector<8x121xf32>
    %1277 = arith.mulf %706, %1276 : vector<8x121xf32>
    %1278 = arith.addf %1275, %1277 : vector<8x121xf32>
    %1279 = vector.broadcast %281 : f32 to vector<8x121xf32>
    %1280 = arith.addf %1278, %1279 : vector<8x121xf32>
    %cst_307 = arith.constant 0.000000e+00 : f32
    %1281 = vector.broadcast %cst_307 : f32 to vector<8x121xf32>
    %1282 = arith.maximumf %1280, %1281 : vector<8x121xf32>
    %1283 = vector.broadcast %255 : f32 to vector<8x121xf32>
    %1284 = arith.mulf %496, %1283 : vector<8x121xf32>
    %1285 = vector.broadcast %256 : f32 to vector<8x121xf32>
    %1286 = arith.mulf %511, %1285 : vector<8x121xf32>
    %1287 = arith.addf %1284, %1286 : vector<8x121xf32>
    %1288 = vector.broadcast %257 : f32 to vector<8x121xf32>
    %1289 = arith.mulf %526, %1288 : vector<8x121xf32>
    %1290 = arith.addf %1287, %1289 : vector<8x121xf32>
    %1291 = vector.broadcast %258 : f32 to vector<8x121xf32>
    %1292 = arith.mulf %541, %1291 : vector<8x121xf32>
    %1293 = arith.addf %1290, %1292 : vector<8x121xf32>
    %1294 = vector.broadcast %259 : f32 to vector<8x121xf32>
    %1295 = arith.mulf %556, %1294 : vector<8x121xf32>
    %1296 = arith.addf %1293, %1295 : vector<8x121xf32>
    %1297 = vector.broadcast %260 : f32 to vector<8x121xf32>
    %1298 = arith.mulf %571, %1297 : vector<8x121xf32>
    %1299 = arith.addf %1296, %1298 : vector<8x121xf32>
    %1300 = vector.broadcast %261 : f32 to vector<8x121xf32>
    %1301 = arith.mulf %586, %1300 : vector<8x121xf32>
    %1302 = arith.addf %1299, %1301 : vector<8x121xf32>
    %1303 = vector.broadcast %262 : f32 to vector<8x121xf32>
    %1304 = arith.mulf %601, %1303 : vector<8x121xf32>
    %1305 = arith.addf %1302, %1304 : vector<8x121xf32>
    %1306 = vector.broadcast %263 : f32 to vector<8x121xf32>
    %1307 = arith.mulf %616, %1306 : vector<8x121xf32>
    %1308 = arith.addf %1305, %1307 : vector<8x121xf32>
    %1309 = vector.broadcast %264 : f32 to vector<8x121xf32>
    %1310 = arith.mulf %631, %1309 : vector<8x121xf32>
    %1311 = arith.addf %1308, %1310 : vector<8x121xf32>
    %1312 = vector.broadcast %265 : f32 to vector<8x121xf32>
    %1313 = arith.mulf %646, %1312 : vector<8x121xf32>
    %1314 = arith.addf %1311, %1313 : vector<8x121xf32>
    %1315 = vector.broadcast %266 : f32 to vector<8x121xf32>
    %1316 = arith.mulf %661, %1315 : vector<8x121xf32>
    %1317 = arith.addf %1314, %1316 : vector<8x121xf32>
    %1318 = vector.broadcast %267 : f32 to vector<8x121xf32>
    %1319 = arith.mulf %676, %1318 : vector<8x121xf32>
    %1320 = arith.addf %1317, %1319 : vector<8x121xf32>
    %1321 = vector.broadcast %268 : f32 to vector<8x121xf32>
    %1322 = arith.mulf %691, %1321 : vector<8x121xf32>
    %1323 = arith.addf %1320, %1322 : vector<8x121xf32>
    %1324 = vector.broadcast %269 : f32 to vector<8x121xf32>
    %1325 = arith.mulf %706, %1324 : vector<8x121xf32>
    %1326 = arith.addf %1323, %1325 : vector<8x121xf32>
    %1327 = vector.broadcast %282 : f32 to vector<8x121xf32>
    %1328 = arith.addf %1326, %1327 : vector<8x121xf32>
    %cst_308 = arith.constant 0.000000e+00 : f32
    %1329 = vector.broadcast %cst_308 : f32 to vector<8x121xf32>
    %1330 = arith.maximumf %1328, %1329 : vector<8x121xf32>
    %1331 = vector.broadcast %283 : f32 to vector<8x121xf32>
    %1332 = arith.mulf %754, %1331 : vector<8x121xf32>
    %1333 = vector.broadcast %284 : f32 to vector<8x121xf32>
    %1334 = arith.mulf %802, %1333 : vector<8x121xf32>
    %1335 = arith.addf %1332, %1334 : vector<8x121xf32>
    %1336 = vector.broadcast %285 : f32 to vector<8x121xf32>
    %1337 = arith.mulf %850, %1336 : vector<8x121xf32>
    %1338 = arith.addf %1335, %1337 : vector<8x121xf32>
    %1339 = vector.broadcast %286 : f32 to vector<8x121xf32>
    %1340 = arith.mulf %898, %1339 : vector<8x121xf32>
    %1341 = arith.addf %1338, %1340 : vector<8x121xf32>
    %1342 = vector.broadcast %287 : f32 to vector<8x121xf32>
    %1343 = arith.mulf %946, %1342 : vector<8x121xf32>
    %1344 = arith.addf %1341, %1343 : vector<8x121xf32>
    %1345 = vector.broadcast %288 : f32 to vector<8x121xf32>
    %1346 = arith.mulf %994, %1345 : vector<8x121xf32>
    %1347 = arith.addf %1344, %1346 : vector<8x121xf32>
    %1348 = vector.broadcast %289 : f32 to vector<8x121xf32>
    %1349 = arith.mulf %1042, %1348 : vector<8x121xf32>
    %1350 = arith.addf %1347, %1349 : vector<8x121xf32>
    %1351 = vector.broadcast %290 : f32 to vector<8x121xf32>
    %1352 = arith.mulf %1090, %1351 : vector<8x121xf32>
    %1353 = arith.addf %1350, %1352 : vector<8x121xf32>
    %1354 = vector.broadcast %291 : f32 to vector<8x121xf32>
    %1355 = arith.mulf %1138, %1354 : vector<8x121xf32>
    %1356 = arith.addf %1353, %1355 : vector<8x121xf32>
    %1357 = vector.broadcast %292 : f32 to vector<8x121xf32>
    %1358 = arith.mulf %1186, %1357 : vector<8x121xf32>
    %1359 = arith.addf %1356, %1358 : vector<8x121xf32>
    %1360 = vector.broadcast %293 : f32 to vector<8x121xf32>
    %1361 = arith.mulf %1234, %1360 : vector<8x121xf32>
    %1362 = arith.addf %1359, %1361 : vector<8x121xf32>
    %1363 = vector.broadcast %294 : f32 to vector<8x121xf32>
    %1364 = arith.mulf %1282, %1363 : vector<8x121xf32>
    %1365 = arith.addf %1362, %1364 : vector<8x121xf32>
    %1366 = vector.broadcast %295 : f32 to vector<8x121xf32>
    %1367 = arith.mulf %1330, %1366 : vector<8x121xf32>
    %1368 = arith.addf %1365, %1367 : vector<8x121xf32>
    %1369 = vector.broadcast %400 : f32 to vector<8x121xf32>
    %1370 = arith.addf %1368, %1369 : vector<8x121xf32>
    %cst_309 = arith.constant 0.000000e+00 : f32
    %1371 = vector.broadcast %cst_309 : f32 to vector<8x121xf32>
    %1372 = arith.maximumf %1370, %1371 : vector<8x121xf32>
    %1373 = vector.broadcast %296 : f32 to vector<8x121xf32>
    %1374 = arith.mulf %754, %1373 : vector<8x121xf32>
    %1375 = vector.broadcast %297 : f32 to vector<8x121xf32>
    %1376 = arith.mulf %802, %1375 : vector<8x121xf32>
    %1377 = arith.addf %1374, %1376 : vector<8x121xf32>
    %1378 = vector.broadcast %298 : f32 to vector<8x121xf32>
    %1379 = arith.mulf %850, %1378 : vector<8x121xf32>
    %1380 = arith.addf %1377, %1379 : vector<8x121xf32>
    %1381 = vector.broadcast %299 : f32 to vector<8x121xf32>
    %1382 = arith.mulf %898, %1381 : vector<8x121xf32>
    %1383 = arith.addf %1380, %1382 : vector<8x121xf32>
    %1384 = vector.broadcast %300 : f32 to vector<8x121xf32>
    %1385 = arith.mulf %946, %1384 : vector<8x121xf32>
    %1386 = arith.addf %1383, %1385 : vector<8x121xf32>
    %1387 = vector.broadcast %301 : f32 to vector<8x121xf32>
    %1388 = arith.mulf %994, %1387 : vector<8x121xf32>
    %1389 = arith.addf %1386, %1388 : vector<8x121xf32>
    %1390 = vector.broadcast %302 : f32 to vector<8x121xf32>
    %1391 = arith.mulf %1042, %1390 : vector<8x121xf32>
    %1392 = arith.addf %1389, %1391 : vector<8x121xf32>
    %1393 = vector.broadcast %303 : f32 to vector<8x121xf32>
    %1394 = arith.mulf %1090, %1393 : vector<8x121xf32>
    %1395 = arith.addf %1392, %1394 : vector<8x121xf32>
    %1396 = vector.broadcast %304 : f32 to vector<8x121xf32>
    %1397 = arith.mulf %1138, %1396 : vector<8x121xf32>
    %1398 = arith.addf %1395, %1397 : vector<8x121xf32>
    %1399 = vector.broadcast %305 : f32 to vector<8x121xf32>
    %1400 = arith.mulf %1186, %1399 : vector<8x121xf32>
    %1401 = arith.addf %1398, %1400 : vector<8x121xf32>
    %1402 = vector.broadcast %306 : f32 to vector<8x121xf32>
    %1403 = arith.mulf %1234, %1402 : vector<8x121xf32>
    %1404 = arith.addf %1401, %1403 : vector<8x121xf32>
    %1405 = vector.broadcast %307 : f32 to vector<8x121xf32>
    %1406 = arith.mulf %1282, %1405 : vector<8x121xf32>
    %1407 = arith.addf %1404, %1406 : vector<8x121xf32>
    %1408 = vector.broadcast %308 : f32 to vector<8x121xf32>
    %1409 = arith.mulf %1330, %1408 : vector<8x121xf32>
    %1410 = arith.addf %1407, %1409 : vector<8x121xf32>
    %1411 = vector.broadcast %401 : f32 to vector<8x121xf32>
    %1412 = arith.addf %1410, %1411 : vector<8x121xf32>
    %cst_310 = arith.constant 0.000000e+00 : f32
    %1413 = vector.broadcast %cst_310 : f32 to vector<8x121xf32>
    %1414 = arith.maximumf %1412, %1413 : vector<8x121xf32>
    %1415 = vector.broadcast %309 : f32 to vector<8x121xf32>
    %1416 = arith.mulf %754, %1415 : vector<8x121xf32>
    %1417 = vector.broadcast %310 : f32 to vector<8x121xf32>
    %1418 = arith.mulf %802, %1417 : vector<8x121xf32>
    %1419 = arith.addf %1416, %1418 : vector<8x121xf32>
    %1420 = vector.broadcast %311 : f32 to vector<8x121xf32>
    %1421 = arith.mulf %850, %1420 : vector<8x121xf32>
    %1422 = arith.addf %1419, %1421 : vector<8x121xf32>
    %1423 = vector.broadcast %312 : f32 to vector<8x121xf32>
    %1424 = arith.mulf %898, %1423 : vector<8x121xf32>
    %1425 = arith.addf %1422, %1424 : vector<8x121xf32>
    %1426 = vector.broadcast %313 : f32 to vector<8x121xf32>
    %1427 = arith.mulf %946, %1426 : vector<8x121xf32>
    %1428 = arith.addf %1425, %1427 : vector<8x121xf32>
    %1429 = vector.broadcast %314 : f32 to vector<8x121xf32>
    %1430 = arith.mulf %994, %1429 : vector<8x121xf32>
    %1431 = arith.addf %1428, %1430 : vector<8x121xf32>
    %1432 = vector.broadcast %315 : f32 to vector<8x121xf32>
    %1433 = arith.mulf %1042, %1432 : vector<8x121xf32>
    %1434 = arith.addf %1431, %1433 : vector<8x121xf32>
    %1435 = vector.broadcast %316 : f32 to vector<8x121xf32>
    %1436 = arith.mulf %1090, %1435 : vector<8x121xf32>
    %1437 = arith.addf %1434, %1436 : vector<8x121xf32>
    %1438 = vector.broadcast %317 : f32 to vector<8x121xf32>
    %1439 = arith.mulf %1138, %1438 : vector<8x121xf32>
    %1440 = arith.addf %1437, %1439 : vector<8x121xf32>
    %1441 = vector.broadcast %318 : f32 to vector<8x121xf32>
    %1442 = arith.mulf %1186, %1441 : vector<8x121xf32>
    %1443 = arith.addf %1440, %1442 : vector<8x121xf32>
    %1444 = vector.broadcast %319 : f32 to vector<8x121xf32>
    %1445 = arith.mulf %1234, %1444 : vector<8x121xf32>
    %1446 = arith.addf %1443, %1445 : vector<8x121xf32>
    %1447 = vector.broadcast %320 : f32 to vector<8x121xf32>
    %1448 = arith.mulf %1282, %1447 : vector<8x121xf32>
    %1449 = arith.addf %1446, %1448 : vector<8x121xf32>
    %1450 = vector.broadcast %321 : f32 to vector<8x121xf32>
    %1451 = arith.mulf %1330, %1450 : vector<8x121xf32>
    %1452 = arith.addf %1449, %1451 : vector<8x121xf32>
    %1453 = vector.broadcast %402 : f32 to vector<8x121xf32>
    %1454 = arith.addf %1452, %1453 : vector<8x121xf32>
    %cst_311 = arith.constant 0.000000e+00 : f32
    %1455 = vector.broadcast %cst_311 : f32 to vector<8x121xf32>
    %1456 = arith.maximumf %1454, %1455 : vector<8x121xf32>
    %1457 = vector.broadcast %322 : f32 to vector<8x121xf32>
    %1458 = arith.mulf %754, %1457 : vector<8x121xf32>
    %1459 = vector.broadcast %323 : f32 to vector<8x121xf32>
    %1460 = arith.mulf %802, %1459 : vector<8x121xf32>
    %1461 = arith.addf %1458, %1460 : vector<8x121xf32>
    %1462 = vector.broadcast %324 : f32 to vector<8x121xf32>
    %1463 = arith.mulf %850, %1462 : vector<8x121xf32>
    %1464 = arith.addf %1461, %1463 : vector<8x121xf32>
    %1465 = vector.broadcast %325 : f32 to vector<8x121xf32>
    %1466 = arith.mulf %898, %1465 : vector<8x121xf32>
    %1467 = arith.addf %1464, %1466 : vector<8x121xf32>
    %1468 = vector.broadcast %326 : f32 to vector<8x121xf32>
    %1469 = arith.mulf %946, %1468 : vector<8x121xf32>
    %1470 = arith.addf %1467, %1469 : vector<8x121xf32>
    %1471 = vector.broadcast %327 : f32 to vector<8x121xf32>
    %1472 = arith.mulf %994, %1471 : vector<8x121xf32>
    %1473 = arith.addf %1470, %1472 : vector<8x121xf32>
    %1474 = vector.broadcast %328 : f32 to vector<8x121xf32>
    %1475 = arith.mulf %1042, %1474 : vector<8x121xf32>
    %1476 = arith.addf %1473, %1475 : vector<8x121xf32>
    %1477 = vector.broadcast %329 : f32 to vector<8x121xf32>
    %1478 = arith.mulf %1090, %1477 : vector<8x121xf32>
    %1479 = arith.addf %1476, %1478 : vector<8x121xf32>
    %1480 = vector.broadcast %330 : f32 to vector<8x121xf32>
    %1481 = arith.mulf %1138, %1480 : vector<8x121xf32>
    %1482 = arith.addf %1479, %1481 : vector<8x121xf32>
    %1483 = vector.broadcast %331 : f32 to vector<8x121xf32>
    %1484 = arith.mulf %1186, %1483 : vector<8x121xf32>
    %1485 = arith.addf %1482, %1484 : vector<8x121xf32>
    %1486 = vector.broadcast %332 : f32 to vector<8x121xf32>
    %1487 = arith.mulf %1234, %1486 : vector<8x121xf32>
    %1488 = arith.addf %1485, %1487 : vector<8x121xf32>
    %1489 = vector.broadcast %333 : f32 to vector<8x121xf32>
    %1490 = arith.mulf %1282, %1489 : vector<8x121xf32>
    %1491 = arith.addf %1488, %1490 : vector<8x121xf32>
    %1492 = vector.broadcast %334 : f32 to vector<8x121xf32>
    %1493 = arith.mulf %1330, %1492 : vector<8x121xf32>
    %1494 = arith.addf %1491, %1493 : vector<8x121xf32>
    %1495 = vector.broadcast %403 : f32 to vector<8x121xf32>
    %1496 = arith.addf %1494, %1495 : vector<8x121xf32>
    %cst_312 = arith.constant 0.000000e+00 : f32
    %1497 = vector.broadcast %cst_312 : f32 to vector<8x121xf32>
    %1498 = arith.maximumf %1496, %1497 : vector<8x121xf32>
    %1499 = vector.broadcast %335 : f32 to vector<8x121xf32>
    %1500 = arith.mulf %754, %1499 : vector<8x121xf32>
    %1501 = vector.broadcast %336 : f32 to vector<8x121xf32>
    %1502 = arith.mulf %802, %1501 : vector<8x121xf32>
    %1503 = arith.addf %1500, %1502 : vector<8x121xf32>
    %1504 = vector.broadcast %337 : f32 to vector<8x121xf32>
    %1505 = arith.mulf %850, %1504 : vector<8x121xf32>
    %1506 = arith.addf %1503, %1505 : vector<8x121xf32>
    %1507 = vector.broadcast %338 : f32 to vector<8x121xf32>
    %1508 = arith.mulf %898, %1507 : vector<8x121xf32>
    %1509 = arith.addf %1506, %1508 : vector<8x121xf32>
    %1510 = vector.broadcast %339 : f32 to vector<8x121xf32>
    %1511 = arith.mulf %946, %1510 : vector<8x121xf32>
    %1512 = arith.addf %1509, %1511 : vector<8x121xf32>
    %1513 = vector.broadcast %340 : f32 to vector<8x121xf32>
    %1514 = arith.mulf %994, %1513 : vector<8x121xf32>
    %1515 = arith.addf %1512, %1514 : vector<8x121xf32>
    %1516 = vector.broadcast %341 : f32 to vector<8x121xf32>
    %1517 = arith.mulf %1042, %1516 : vector<8x121xf32>
    %1518 = arith.addf %1515, %1517 : vector<8x121xf32>
    %1519 = vector.broadcast %342 : f32 to vector<8x121xf32>
    %1520 = arith.mulf %1090, %1519 : vector<8x121xf32>
    %1521 = arith.addf %1518, %1520 : vector<8x121xf32>
    %1522 = vector.broadcast %343 : f32 to vector<8x121xf32>
    %1523 = arith.mulf %1138, %1522 : vector<8x121xf32>
    %1524 = arith.addf %1521, %1523 : vector<8x121xf32>
    %1525 = vector.broadcast %344 : f32 to vector<8x121xf32>
    %1526 = arith.mulf %1186, %1525 : vector<8x121xf32>
    %1527 = arith.addf %1524, %1526 : vector<8x121xf32>
    %1528 = vector.broadcast %345 : f32 to vector<8x121xf32>
    %1529 = arith.mulf %1234, %1528 : vector<8x121xf32>
    %1530 = arith.addf %1527, %1529 : vector<8x121xf32>
    %1531 = vector.broadcast %346 : f32 to vector<8x121xf32>
    %1532 = arith.mulf %1282, %1531 : vector<8x121xf32>
    %1533 = arith.addf %1530, %1532 : vector<8x121xf32>
    %1534 = vector.broadcast %347 : f32 to vector<8x121xf32>
    %1535 = arith.mulf %1330, %1534 : vector<8x121xf32>
    %1536 = arith.addf %1533, %1535 : vector<8x121xf32>
    %1537 = vector.broadcast %404 : f32 to vector<8x121xf32>
    %1538 = arith.addf %1536, %1537 : vector<8x121xf32>
    %cst_313 = arith.constant 0.000000e+00 : f32
    %1539 = vector.broadcast %cst_313 : f32 to vector<8x121xf32>
    %1540 = arith.maximumf %1538, %1539 : vector<8x121xf32>
    %1541 = vector.broadcast %348 : f32 to vector<8x121xf32>
    %1542 = arith.mulf %754, %1541 : vector<8x121xf32>
    %1543 = vector.broadcast %349 : f32 to vector<8x121xf32>
    %1544 = arith.mulf %802, %1543 : vector<8x121xf32>
    %1545 = arith.addf %1542, %1544 : vector<8x121xf32>
    %1546 = vector.broadcast %350 : f32 to vector<8x121xf32>
    %1547 = arith.mulf %850, %1546 : vector<8x121xf32>
    %1548 = arith.addf %1545, %1547 : vector<8x121xf32>
    %1549 = vector.broadcast %351 : f32 to vector<8x121xf32>
    %1550 = arith.mulf %898, %1549 : vector<8x121xf32>
    %1551 = arith.addf %1548, %1550 : vector<8x121xf32>
    %1552 = vector.broadcast %352 : f32 to vector<8x121xf32>
    %1553 = arith.mulf %946, %1552 : vector<8x121xf32>
    %1554 = arith.addf %1551, %1553 : vector<8x121xf32>
    %1555 = vector.broadcast %353 : f32 to vector<8x121xf32>
    %1556 = arith.mulf %994, %1555 : vector<8x121xf32>
    %1557 = arith.addf %1554, %1556 : vector<8x121xf32>
    %1558 = vector.broadcast %354 : f32 to vector<8x121xf32>
    %1559 = arith.mulf %1042, %1558 : vector<8x121xf32>
    %1560 = arith.addf %1557, %1559 : vector<8x121xf32>
    %1561 = vector.broadcast %355 : f32 to vector<8x121xf32>
    %1562 = arith.mulf %1090, %1561 : vector<8x121xf32>
    %1563 = arith.addf %1560, %1562 : vector<8x121xf32>
    %1564 = vector.broadcast %356 : f32 to vector<8x121xf32>
    %1565 = arith.mulf %1138, %1564 : vector<8x121xf32>
    %1566 = arith.addf %1563, %1565 : vector<8x121xf32>
    %1567 = vector.broadcast %357 : f32 to vector<8x121xf32>
    %1568 = arith.mulf %1186, %1567 : vector<8x121xf32>
    %1569 = arith.addf %1566, %1568 : vector<8x121xf32>
    %1570 = vector.broadcast %358 : f32 to vector<8x121xf32>
    %1571 = arith.mulf %1234, %1570 : vector<8x121xf32>
    %1572 = arith.addf %1569, %1571 : vector<8x121xf32>
    %1573 = vector.broadcast %359 : f32 to vector<8x121xf32>
    %1574 = arith.mulf %1282, %1573 : vector<8x121xf32>
    %1575 = arith.addf %1572, %1574 : vector<8x121xf32>
    %1576 = vector.broadcast %360 : f32 to vector<8x121xf32>
    %1577 = arith.mulf %1330, %1576 : vector<8x121xf32>
    %1578 = arith.addf %1575, %1577 : vector<8x121xf32>
    %1579 = vector.broadcast %405 : f32 to vector<8x121xf32>
    %1580 = arith.addf %1578, %1579 : vector<8x121xf32>
    %cst_314 = arith.constant 0.000000e+00 : f32
    %1581 = vector.broadcast %cst_314 : f32 to vector<8x121xf32>
    %1582 = arith.maximumf %1580, %1581 : vector<8x121xf32>
    %1583 = vector.broadcast %361 : f32 to vector<8x121xf32>
    %1584 = arith.mulf %754, %1583 : vector<8x121xf32>
    %1585 = vector.broadcast %362 : f32 to vector<8x121xf32>
    %1586 = arith.mulf %802, %1585 : vector<8x121xf32>
    %1587 = arith.addf %1584, %1586 : vector<8x121xf32>
    %1588 = vector.broadcast %363 : f32 to vector<8x121xf32>
    %1589 = arith.mulf %850, %1588 : vector<8x121xf32>
    %1590 = arith.addf %1587, %1589 : vector<8x121xf32>
    %1591 = vector.broadcast %364 : f32 to vector<8x121xf32>
    %1592 = arith.mulf %898, %1591 : vector<8x121xf32>
    %1593 = arith.addf %1590, %1592 : vector<8x121xf32>
    %1594 = vector.broadcast %365 : f32 to vector<8x121xf32>
    %1595 = arith.mulf %946, %1594 : vector<8x121xf32>
    %1596 = arith.addf %1593, %1595 : vector<8x121xf32>
    %1597 = vector.broadcast %366 : f32 to vector<8x121xf32>
    %1598 = arith.mulf %994, %1597 : vector<8x121xf32>
    %1599 = arith.addf %1596, %1598 : vector<8x121xf32>
    %1600 = vector.broadcast %367 : f32 to vector<8x121xf32>
    %1601 = arith.mulf %1042, %1600 : vector<8x121xf32>
    %1602 = arith.addf %1599, %1601 : vector<8x121xf32>
    %1603 = vector.broadcast %368 : f32 to vector<8x121xf32>
    %1604 = arith.mulf %1090, %1603 : vector<8x121xf32>
    %1605 = arith.addf %1602, %1604 : vector<8x121xf32>
    %1606 = vector.broadcast %369 : f32 to vector<8x121xf32>
    %1607 = arith.mulf %1138, %1606 : vector<8x121xf32>
    %1608 = arith.addf %1605, %1607 : vector<8x121xf32>
    %1609 = vector.broadcast %370 : f32 to vector<8x121xf32>
    %1610 = arith.mulf %1186, %1609 : vector<8x121xf32>
    %1611 = arith.addf %1608, %1610 : vector<8x121xf32>
    %1612 = vector.broadcast %371 : f32 to vector<8x121xf32>
    %1613 = arith.mulf %1234, %1612 : vector<8x121xf32>
    %1614 = arith.addf %1611, %1613 : vector<8x121xf32>
    %1615 = vector.broadcast %372 : f32 to vector<8x121xf32>
    %1616 = arith.mulf %1282, %1615 : vector<8x121xf32>
    %1617 = arith.addf %1614, %1616 : vector<8x121xf32>
    %1618 = vector.broadcast %373 : f32 to vector<8x121xf32>
    %1619 = arith.mulf %1330, %1618 : vector<8x121xf32>
    %1620 = arith.addf %1617, %1619 : vector<8x121xf32>
    %1621 = vector.broadcast %406 : f32 to vector<8x121xf32>
    %1622 = arith.addf %1620, %1621 : vector<8x121xf32>
    %cst_315 = arith.constant 0.000000e+00 : f32
    %1623 = vector.broadcast %cst_315 : f32 to vector<8x121xf32>
    %1624 = arith.maximumf %1622, %1623 : vector<8x121xf32>
    %1625 = vector.broadcast %374 : f32 to vector<8x121xf32>
    %1626 = arith.mulf %754, %1625 : vector<8x121xf32>
    %1627 = vector.broadcast %375 : f32 to vector<8x121xf32>
    %1628 = arith.mulf %802, %1627 : vector<8x121xf32>
    %1629 = arith.addf %1626, %1628 : vector<8x121xf32>
    %1630 = vector.broadcast %376 : f32 to vector<8x121xf32>
    %1631 = arith.mulf %850, %1630 : vector<8x121xf32>
    %1632 = arith.addf %1629, %1631 : vector<8x121xf32>
    %1633 = vector.broadcast %377 : f32 to vector<8x121xf32>
    %1634 = arith.mulf %898, %1633 : vector<8x121xf32>
    %1635 = arith.addf %1632, %1634 : vector<8x121xf32>
    %1636 = vector.broadcast %378 : f32 to vector<8x121xf32>
    %1637 = arith.mulf %946, %1636 : vector<8x121xf32>
    %1638 = arith.addf %1635, %1637 : vector<8x121xf32>
    %1639 = vector.broadcast %379 : f32 to vector<8x121xf32>
    %1640 = arith.mulf %994, %1639 : vector<8x121xf32>
    %1641 = arith.addf %1638, %1640 : vector<8x121xf32>
    %1642 = vector.broadcast %380 : f32 to vector<8x121xf32>
    %1643 = arith.mulf %1042, %1642 : vector<8x121xf32>
    %1644 = arith.addf %1641, %1643 : vector<8x121xf32>
    %1645 = vector.broadcast %381 : f32 to vector<8x121xf32>
    %1646 = arith.mulf %1090, %1645 : vector<8x121xf32>
    %1647 = arith.addf %1644, %1646 : vector<8x121xf32>
    %1648 = vector.broadcast %382 : f32 to vector<8x121xf32>
    %1649 = arith.mulf %1138, %1648 : vector<8x121xf32>
    %1650 = arith.addf %1647, %1649 : vector<8x121xf32>
    %1651 = vector.broadcast %383 : f32 to vector<8x121xf32>
    %1652 = arith.mulf %1186, %1651 : vector<8x121xf32>
    %1653 = arith.addf %1650, %1652 : vector<8x121xf32>
    %1654 = vector.broadcast %384 : f32 to vector<8x121xf32>
    %1655 = arith.mulf %1234, %1654 : vector<8x121xf32>
    %1656 = arith.addf %1653, %1655 : vector<8x121xf32>
    %1657 = vector.broadcast %385 : f32 to vector<8x121xf32>
    %1658 = arith.mulf %1282, %1657 : vector<8x121xf32>
    %1659 = arith.addf %1656, %1658 : vector<8x121xf32>
    %1660 = vector.broadcast %386 : f32 to vector<8x121xf32>
    %1661 = arith.mulf %1330, %1660 : vector<8x121xf32>
    %1662 = arith.addf %1659, %1661 : vector<8x121xf32>
    %1663 = vector.broadcast %407 : f32 to vector<8x121xf32>
    %1664 = arith.addf %1662, %1663 : vector<8x121xf32>
    %cst_316 = arith.constant 0.000000e+00 : f32
    %1665 = vector.broadcast %cst_316 : f32 to vector<8x121xf32>
    %1666 = arith.maximumf %1664, %1665 : vector<8x121xf32>
    %1667 = vector.broadcast %387 : f32 to vector<8x121xf32>
    %1668 = arith.mulf %754, %1667 : vector<8x121xf32>
    %1669 = vector.broadcast %388 : f32 to vector<8x121xf32>
    %1670 = arith.mulf %802, %1669 : vector<8x121xf32>
    %1671 = arith.addf %1668, %1670 : vector<8x121xf32>
    %1672 = vector.broadcast %389 : f32 to vector<8x121xf32>
    %1673 = arith.mulf %850, %1672 : vector<8x121xf32>
    %1674 = arith.addf %1671, %1673 : vector<8x121xf32>
    %1675 = vector.broadcast %390 : f32 to vector<8x121xf32>
    %1676 = arith.mulf %898, %1675 : vector<8x121xf32>
    %1677 = arith.addf %1674, %1676 : vector<8x121xf32>
    %1678 = vector.broadcast %391 : f32 to vector<8x121xf32>
    %1679 = arith.mulf %946, %1678 : vector<8x121xf32>
    %1680 = arith.addf %1677, %1679 : vector<8x121xf32>
    %1681 = vector.broadcast %392 : f32 to vector<8x121xf32>
    %1682 = arith.mulf %994, %1681 : vector<8x121xf32>
    %1683 = arith.addf %1680, %1682 : vector<8x121xf32>
    %1684 = vector.broadcast %393 : f32 to vector<8x121xf32>
    %1685 = arith.mulf %1042, %1684 : vector<8x121xf32>
    %1686 = arith.addf %1683, %1685 : vector<8x121xf32>
    %1687 = vector.broadcast %394 : f32 to vector<8x121xf32>
    %1688 = arith.mulf %1090, %1687 : vector<8x121xf32>
    %1689 = arith.addf %1686, %1688 : vector<8x121xf32>
    %1690 = vector.broadcast %395 : f32 to vector<8x121xf32>
    %1691 = arith.mulf %1138, %1690 : vector<8x121xf32>
    %1692 = arith.addf %1689, %1691 : vector<8x121xf32>
    %1693 = vector.broadcast %396 : f32 to vector<8x121xf32>
    %1694 = arith.mulf %1186, %1693 : vector<8x121xf32>
    %1695 = arith.addf %1692, %1694 : vector<8x121xf32>
    %1696 = vector.broadcast %397 : f32 to vector<8x121xf32>
    %1697 = arith.mulf %1234, %1696 : vector<8x121xf32>
    %1698 = arith.addf %1695, %1697 : vector<8x121xf32>
    %1699 = vector.broadcast %398 : f32 to vector<8x121xf32>
    %1700 = arith.mulf %1282, %1699 : vector<8x121xf32>
    %1701 = arith.addf %1698, %1700 : vector<8x121xf32>
    %1702 = vector.broadcast %399 : f32 to vector<8x121xf32>
    %1703 = arith.mulf %1330, %1702 : vector<8x121xf32>
    %1704 = arith.addf %1701, %1703 : vector<8x121xf32>
    %1705 = vector.broadcast %408 : f32 to vector<8x121xf32>
    %1706 = arith.addf %1704, %1705 : vector<8x121xf32>
    %cst_317 = arith.constant 0.000000e+00 : f32
    %1707 = vector.broadcast %cst_317 : f32 to vector<8x121xf32>
    %1708 = arith.maximumf %1706, %1707 : vector<8x121xf32>
    %1709 = vector.broadcast %409 : f32 to vector<8x121xf32>
    %1710 = arith.mulf %1372, %1709 : vector<8x121xf32>
    %1711 = vector.broadcast %410 : f32 to vector<8x121xf32>
    %1712 = arith.mulf %1414, %1711 : vector<8x121xf32>
    %1713 = arith.addf %1710, %1712 : vector<8x121xf32>
    %1714 = vector.broadcast %411 : f32 to vector<8x121xf32>
    %1715 = arith.mulf %1456, %1714 : vector<8x121xf32>
    %1716 = arith.addf %1713, %1715 : vector<8x121xf32>
    %1717 = vector.broadcast %412 : f32 to vector<8x121xf32>
    %1718 = arith.mulf %1498, %1717 : vector<8x121xf32>
    %1719 = arith.addf %1716, %1718 : vector<8x121xf32>
    %1720 = vector.broadcast %413 : f32 to vector<8x121xf32>
    %1721 = arith.mulf %1540, %1720 : vector<8x121xf32>
    %1722 = arith.addf %1719, %1721 : vector<8x121xf32>
    %1723 = vector.broadcast %414 : f32 to vector<8x121xf32>
    %1724 = arith.mulf %1582, %1723 : vector<8x121xf32>
    %1725 = arith.addf %1722, %1724 : vector<8x121xf32>
    %1726 = vector.broadcast %415 : f32 to vector<8x121xf32>
    %1727 = arith.mulf %1624, %1726 : vector<8x121xf32>
    %1728 = arith.addf %1725, %1727 : vector<8x121xf32>
    %1729 = vector.broadcast %416 : f32 to vector<8x121xf32>
    %1730 = arith.mulf %1666, %1729 : vector<8x121xf32>
    %1731 = arith.addf %1728, %1730 : vector<8x121xf32>
    %1732 = vector.broadcast %417 : f32 to vector<8x121xf32>
    %1733 = arith.mulf %1708, %1732 : vector<8x121xf32>
    %1734 = arith.addf %1731, %1733 : vector<8x121xf32>
    %1735 = vector.broadcast %445 : f32 to vector<8x121xf32>
    %1736 = arith.addf %1734, %1735 : vector<8x121xf32>
    %cst_318 = arith.constant 0.000000e+00 : f32
    %1737 = vector.broadcast %cst_318 : f32 to vector<8x121xf32>
    %1738 = arith.maximumf %1736, %1737 : vector<8x121xf32>
    %1739 = vector.broadcast %418 : f32 to vector<8x121xf32>
    %1740 = arith.mulf %1372, %1739 : vector<8x121xf32>
    %1741 = vector.broadcast %419 : f32 to vector<8x121xf32>
    %1742 = arith.mulf %1414, %1741 : vector<8x121xf32>
    %1743 = arith.addf %1740, %1742 : vector<8x121xf32>
    %1744 = vector.broadcast %420 : f32 to vector<8x121xf32>
    %1745 = arith.mulf %1456, %1744 : vector<8x121xf32>
    %1746 = arith.addf %1743, %1745 : vector<8x121xf32>
    %1747 = vector.broadcast %421 : f32 to vector<8x121xf32>
    %1748 = arith.mulf %1498, %1747 : vector<8x121xf32>
    %1749 = arith.addf %1746, %1748 : vector<8x121xf32>
    %1750 = vector.broadcast %422 : f32 to vector<8x121xf32>
    %1751 = arith.mulf %1540, %1750 : vector<8x121xf32>
    %1752 = arith.addf %1749, %1751 : vector<8x121xf32>
    %1753 = vector.broadcast %423 : f32 to vector<8x121xf32>
    %1754 = arith.mulf %1582, %1753 : vector<8x121xf32>
    %1755 = arith.addf %1752, %1754 : vector<8x121xf32>
    %1756 = vector.broadcast %424 : f32 to vector<8x121xf32>
    %1757 = arith.mulf %1624, %1756 : vector<8x121xf32>
    %1758 = arith.addf %1755, %1757 : vector<8x121xf32>
    %1759 = vector.broadcast %425 : f32 to vector<8x121xf32>
    %1760 = arith.mulf %1666, %1759 : vector<8x121xf32>
    %1761 = arith.addf %1758, %1760 : vector<8x121xf32>
    %1762 = vector.broadcast %426 : f32 to vector<8x121xf32>
    %1763 = arith.mulf %1708, %1762 : vector<8x121xf32>
    %1764 = arith.addf %1761, %1763 : vector<8x121xf32>
    %1765 = vector.broadcast %446 : f32 to vector<8x121xf32>
    %1766 = arith.addf %1764, %1765 : vector<8x121xf32>
    %cst_319 = arith.constant 0.000000e+00 : f32
    %1767 = vector.broadcast %cst_319 : f32 to vector<8x121xf32>
    %1768 = arith.maximumf %1766, %1767 : vector<8x121xf32>
    %1769 = vector.broadcast %427 : f32 to vector<8x121xf32>
    %1770 = arith.mulf %1372, %1769 : vector<8x121xf32>
    %1771 = vector.broadcast %428 : f32 to vector<8x121xf32>
    %1772 = arith.mulf %1414, %1771 : vector<8x121xf32>
    %1773 = arith.addf %1770, %1772 : vector<8x121xf32>
    %1774 = vector.broadcast %429 : f32 to vector<8x121xf32>
    %1775 = arith.mulf %1456, %1774 : vector<8x121xf32>
    %1776 = arith.addf %1773, %1775 : vector<8x121xf32>
    %1777 = vector.broadcast %430 : f32 to vector<8x121xf32>
    %1778 = arith.mulf %1498, %1777 : vector<8x121xf32>
    %1779 = arith.addf %1776, %1778 : vector<8x121xf32>
    %1780 = vector.broadcast %431 : f32 to vector<8x121xf32>
    %1781 = arith.mulf %1540, %1780 : vector<8x121xf32>
    %1782 = arith.addf %1779, %1781 : vector<8x121xf32>
    %1783 = vector.broadcast %432 : f32 to vector<8x121xf32>
    %1784 = arith.mulf %1582, %1783 : vector<8x121xf32>
    %1785 = arith.addf %1782, %1784 : vector<8x121xf32>
    %1786 = vector.broadcast %433 : f32 to vector<8x121xf32>
    %1787 = arith.mulf %1624, %1786 : vector<8x121xf32>
    %1788 = arith.addf %1785, %1787 : vector<8x121xf32>
    %1789 = vector.broadcast %434 : f32 to vector<8x121xf32>
    %1790 = arith.mulf %1666, %1789 : vector<8x121xf32>
    %1791 = arith.addf %1788, %1790 : vector<8x121xf32>
    %1792 = vector.broadcast %435 : f32 to vector<8x121xf32>
    %1793 = arith.mulf %1708, %1792 : vector<8x121xf32>
    %1794 = arith.addf %1791, %1793 : vector<8x121xf32>
    %1795 = vector.broadcast %447 : f32 to vector<8x121xf32>
    %1796 = arith.addf %1794, %1795 : vector<8x121xf32>
    %cst_320 = arith.constant 0.000000e+00 : f32
    %1797 = vector.broadcast %cst_320 : f32 to vector<8x121xf32>
    %1798 = arith.maximumf %1796, %1797 : vector<8x121xf32>
    %1799 = vector.broadcast %436 : f32 to vector<8x121xf32>
    %1800 = arith.mulf %1372, %1799 : vector<8x121xf32>
    %1801 = vector.broadcast %437 : f32 to vector<8x121xf32>
    %1802 = arith.mulf %1414, %1801 : vector<8x121xf32>
    %1803 = arith.addf %1800, %1802 : vector<8x121xf32>
    %1804 = vector.broadcast %438 : f32 to vector<8x121xf32>
    %1805 = arith.mulf %1456, %1804 : vector<8x121xf32>
    %1806 = arith.addf %1803, %1805 : vector<8x121xf32>
    %1807 = vector.broadcast %439 : f32 to vector<8x121xf32>
    %1808 = arith.mulf %1498, %1807 : vector<8x121xf32>
    %1809 = arith.addf %1806, %1808 : vector<8x121xf32>
    %1810 = vector.broadcast %440 : f32 to vector<8x121xf32>
    %1811 = arith.mulf %1540, %1810 : vector<8x121xf32>
    %1812 = arith.addf %1809, %1811 : vector<8x121xf32>
    %1813 = vector.broadcast %441 : f32 to vector<8x121xf32>
    %1814 = arith.mulf %1582, %1813 : vector<8x121xf32>
    %1815 = arith.addf %1812, %1814 : vector<8x121xf32>
    %1816 = vector.broadcast %442 : f32 to vector<8x121xf32>
    %1817 = arith.mulf %1624, %1816 : vector<8x121xf32>
    %1818 = arith.addf %1815, %1817 : vector<8x121xf32>
    %1819 = vector.broadcast %443 : f32 to vector<8x121xf32>
    %1820 = arith.mulf %1666, %1819 : vector<8x121xf32>
    %1821 = arith.addf %1818, %1820 : vector<8x121xf32>
    %1822 = vector.broadcast %444 : f32 to vector<8x121xf32>
    %1823 = arith.mulf %1708, %1822 : vector<8x121xf32>
    %1824 = arith.addf %1821, %1823 : vector<8x121xf32>
    %1825 = vector.broadcast %448 : f32 to vector<8x121xf32>
    %1826 = arith.addf %1824, %1825 : vector<8x121xf32>
    %cst_321 = arith.constant 0.000000e+00 : f32
    %1827 = vector.broadcast %cst_321 : f32 to vector<8x121xf32>
    %1828 = arith.maximumf %1826, %1827 : vector<8x121xf32>
    %1829 = vector.broadcast %449 : f32 to vector<8x121xf32>
    %1830 = arith.mulf %1738, %1829 : vector<8x121xf32>
    %1831 = vector.broadcast %450 : f32 to vector<8x121xf32>
    %1832 = arith.mulf %1768, %1831 : vector<8x121xf32>
    %1833 = arith.addf %1830, %1832 : vector<8x121xf32>
    %1834 = vector.broadcast %451 : f32 to vector<8x121xf32>
    %1835 = arith.mulf %1798, %1834 : vector<8x121xf32>
    %1836 = arith.addf %1833, %1835 : vector<8x121xf32>
    %1837 = vector.broadcast %452 : f32 to vector<8x121xf32>
    %1838 = arith.mulf %1828, %1837 : vector<8x121xf32>
    %1839 = arith.addf %1836, %1838 : vector<8x121xf32>
    %1840 = vector.broadcast %465 : f32 to vector<8x121xf32>
    %1841 = arith.addf %1839, %1840 : vector<8x121xf32>
    %1842 = vector.broadcast %453 : f32 to vector<8x121xf32>
    %1843 = arith.mulf %1738, %1842 : vector<8x121xf32>
    %1844 = vector.broadcast %454 : f32 to vector<8x121xf32>
    %1845 = arith.mulf %1768, %1844 : vector<8x121xf32>
    %1846 = arith.addf %1843, %1845 : vector<8x121xf32>
    %1847 = vector.broadcast %455 : f32 to vector<8x121xf32>
    %1848 = arith.mulf %1798, %1847 : vector<8x121xf32>
    %1849 = arith.addf %1846, %1848 : vector<8x121xf32>
    %1850 = vector.broadcast %456 : f32 to vector<8x121xf32>
    %1851 = arith.mulf %1828, %1850 : vector<8x121xf32>
    %1852 = arith.addf %1849, %1851 : vector<8x121xf32>
    %1853 = vector.broadcast %466 : f32 to vector<8x121xf32>
    %1854 = arith.addf %1852, %1853 : vector<8x121xf32>
    %1855 = vector.broadcast %457 : f32 to vector<8x121xf32>
    %1856 = arith.mulf %1738, %1855 : vector<8x121xf32>
    %1857 = vector.broadcast %458 : f32 to vector<8x121xf32>
    %1858 = arith.mulf %1768, %1857 : vector<8x121xf32>
    %1859 = arith.addf %1856, %1858 : vector<8x121xf32>
    %1860 = vector.broadcast %459 : f32 to vector<8x121xf32>
    %1861 = arith.mulf %1798, %1860 : vector<8x121xf32>
    %1862 = arith.addf %1859, %1861 : vector<8x121xf32>
    %1863 = vector.broadcast %460 : f32 to vector<8x121xf32>
    %1864 = arith.mulf %1828, %1863 : vector<8x121xf32>
    %1865 = arith.addf %1862, %1864 : vector<8x121xf32>
    %1866 = vector.broadcast %467 : f32 to vector<8x121xf32>
    %1867 = arith.addf %1865, %1866 : vector<8x121xf32>
    %1868 = vector.broadcast %461 : f32 to vector<8x121xf32>
    %1869 = arith.mulf %1738, %1868 : vector<8x121xf32>
    %1870 = vector.broadcast %462 : f32 to vector<8x121xf32>
    %1871 = arith.mulf %1768, %1870 : vector<8x121xf32>
    %1872 = arith.addf %1869, %1871 : vector<8x121xf32>
    %1873 = vector.broadcast %463 : f32 to vector<8x121xf32>
    %1874 = arith.mulf %1798, %1873 : vector<8x121xf32>
    %1875 = arith.addf %1872, %1874 : vector<8x121xf32>
    %1876 = vector.broadcast %464 : f32 to vector<8x121xf32>
    %1877 = arith.mulf %1828, %1876 : vector<8x121xf32>
    %1878 = arith.addf %1875, %1877 : vector<8x121xf32>
    %1879 = vector.broadcast %468 : f32 to vector<8x121xf32>
    %1880 = arith.addf %1878, %1879 : vector<8x121xf32>
    %cst_322 = arith.constant dense<0xFF800000> : vector<8xf32>
    %1881 = vector.multi_reduction <maximumf>, %1841, %cst_322 [1] : vector<8x121xf32> to vector<8xf32>
    %1882 = vector.shape_cast %1881 : vector<8xf32> to vector<8x1xf32>
    %1883 = vector.broadcast %1882 : vector<8x1xf32> to vector<8x121xf32>
    %1884 = arith.subf %1841, %1883 : vector<8x121xf32>
    %1885 = math.exp %1884 : vector<8x121xf32>
    %cst_323 = arith.constant dense<0.000000e+00> : vector<8xf32>
    %1886 = vector.multi_reduction <add>, %1885, %cst_323 [1] : vector<8x121xf32> to vector<8xf32>
    %1887 = vector.shape_cast %1886 : vector<8xf32> to vector<8x1xf32>
    %1888 = vector.broadcast %1887 : vector<8x1xf32> to vector<8x121xf32>
    %1889 = arith.divf %1885, %1888 : vector<8x121xf32>
    %c0_324 = arith.constant 0 : index
    %1890 = arith.index_cast %469 : i32 to index
    %c0_325 = arith.constant 0 : index
    %1891 = vector.load %arg12[%c0_324, %1890, %c0_325] : memref<4x8x121xf32, #tpu.memory_space<vmem>>, vector<1x8x121xf32>
    %1892 = vector.shape_cast %1891 : vector<1x8x121xf32> to vector<8x121xf32>
    %1893 = vector.shape_cast %1889 : vector<8x121xf32> to vector<1x8x121xf32>
    tpu.vector_store %arg12[%c0_324, %1890, %c0_325], %1893 {strides = array<i32>} : memref<4x8x121xf32, #tpu.memory_space<vmem>>, vector<1x8x121xf32>,
    %cst_326 = arith.constant dense<0xFF800000> : vector<8xf32>
    %1894 = vector.multi_reduction <maximumf>, %1854, %cst_326 [1] : vector<8x121xf32> to vector<8xf32>
    %1895 = vector.shape_cast %1894 : vector<8xf32> to vector<8x1xf32>
    %1896 = vector.broadcast %1895 : vector<8x1xf32> to vector<8x121xf32>
    %1897 = arith.subf %1854, %1896 : vector<8x121xf32>
    %1898 = math.exp %1897 : vector<8x121xf32>
    %cst_327 = arith.constant dense<0.000000e+00> : vector<8xf32>
    %1899 = vector.multi_reduction <add>, %1898, %cst_327 [1] : vector<8x121xf32> to vector<8xf32>
    %1900 = vector.shape_cast %1899 : vector<8xf32> to vector<8x1xf32>
    %1901 = vector.broadcast %1900 : vector<8x1xf32> to vector<8x121xf32>
    %1902 = arith.divf %1898, %1901 : vector<8x121xf32>
    %c1_328 = arith.constant 1 : index
    %1903 = arith.index_cast %469 : i32 to index
    %c0_329 = arith.constant 0 : index
    %1904 = vector.load %arg12[%c1_328, %1903, %c0_329] : memref<4x8x121xf32, #tpu.memory_space<vmem>>, vector<1x8x121xf32>
    %1905 = vector.shape_cast %1904 : vector<1x8x121xf32> to vector<8x121xf32>
    %1906 = vector.shape_cast %1902 : vector<8x121xf32> to vector<1x8x121xf32>
    tpu.vector_store %arg12[%c1_328, %1903, %c0_329], %1906 {strides = array<i32>} : memref<4x8x121xf32, #tpu.memory_space<vmem>>, vector<1x8x121xf32>,
    %cst_330 = arith.constant dense<0xFF800000> : vector<8xf32>
    %1907 = vector.multi_reduction <maximumf>, %1867, %cst_330 [1] : vector<8x121xf32> to vector<8xf32>
    %1908 = vector.shape_cast %1907 : vector<8xf32> to vector<8x1xf32>
    %1909 = vector.broadcast %1908 : vector<8x1xf32> to vector<8x121xf32>
    %1910 = arith.subf %1867, %1909 : vector<8x121xf32>
    %1911 = math.exp %1910 : vector<8x121xf32>
    %cst_331 = arith.constant dense<0.000000e+00> : vector<8xf32>
    %1912 = vector.multi_reduction <add>, %1911, %cst_331 [1] : vector<8x121xf32> to vector<8xf32>
    %1913 = vector.shape_cast %1912 : vector<8xf32> to vector<8x1xf32>
    %1914 = vector.broadcast %1913 : vector<8x1xf32> to vector<8x121xf32>
    %1915 = arith.divf %1911, %1914 : vector<8x121xf32>
    %c2_332 = arith.constant 2 : index
    %1916 = arith.index_cast %469 : i32 to index
    %c0_333 = arith.constant 0 : index
    %1917 = vector.load %arg12[%c2_332, %1916, %c0_333] : memref<4x8x121xf32, #tpu.memory_space<vmem>>, vector<1x8x121xf32>
    %1918 = vector.shape_cast %1917 : vector<1x8x121xf32> to vector<8x121xf32>
    %1919 = vector.shape_cast %1915 : vector<8x121xf32> to vector<1x8x121xf32>
    tpu.vector_store %arg12[%c2_332, %1916, %c0_333], %1919 {strides = array<i32>} : memref<4x8x121xf32, #tpu.memory_space<vmem>>, vector<1x8x121xf32>,
    %cst_334 = arith.constant dense<0xFF800000> : vector<8xf32>
    %1920 = vector.multi_reduction <maximumf>, %1880, %cst_334 [1] : vector<8x121xf32> to vector<8xf32>
    %1921 = vector.shape_cast %1920 : vector<8xf32> to vector<8x1xf32>
    %1922 = vector.broadcast %1921 : vector<8x1xf32> to vector<8x121xf32>
    %1923 = arith.subf %1880, %1922 : vector<8x121xf32>
    %1924 = math.exp %1923 : vector<8x121xf32>
    %cst_335 = arith.constant dense<0.000000e+00> : vector<8xf32>
    %1925 = vector.multi_reduction <add>, %1924, %cst_335 [1] : vector<8x121xf32> to vector<8xf32>
    %1926 = vector.shape_cast %1925 : vector<8xf32> to vector<8x1xf32>
    %1927 = vector.broadcast %1926 : vector<8x1xf32> to vector<8x121xf32>
    %1928 = arith.divf %1924, %1927 : vector<8x121xf32>
    %c3_336 = arith.constant 3 : index
    %1929 = arith.index_cast %469 : i32 to index
    %c0_337 = arith.constant 0 : index
    %1930 = vector.load %arg12[%c3_336, %1929, %c0_337] : memref<4x8x121xf32, #tpu.memory_space<vmem>>, vector<1x8x121xf32>
    %1931 = vector.shape_cast %1930 : vector<1x8x121xf32> to vector<8x121xf32>
    %1932 = vector.shape_cast %1928 : vector<8x121xf32> to vector<1x8x121xf32>
    tpu.vector_store %arg12[%c3_336, %1929, %c0_337], %1932 {strides = array<i32>} : memref<4x8x121xf32, #tpu.memory_space<vmem>>, vector<1x8x121xf32>,
    return
  }
  func.func @transform_0(%arg0: i32) -> (i32, i32, i32) {
    %c0_i32 = arith.constant 0 : i32
    %c0_i32_0 = arith.constant 0 : i32
    %c0_i32_1 = arith.constant 0 : i32
    return %c0_i32, %arg0, %c0_i32_0 : i32, i32, i32
  }
  func.func @transform_1(%arg0: i32) -> i32 {
    %c0_i32 = arith.constant 0 : i32
    %c0_i32_0 = arith.constant 0 : i32
    return %c0_i32 : i32
  }
  func.func @transform_2(%arg0: i32) -> i32 {
    %c0_i32 = arith.constant 0 : i32
    %c0_i32_0 = arith.constant 0 : i32
    return %c0_i32 : i32
  }
  func.func @transform_3(%arg0: i32) -> i32 {
    %c0_i32 = arith.constant 0 : i32
    %c0_i32_0 = arith.constant 0 : i32
    return %c0_i32 : i32
  }
  func.func @transform_4(%arg0: i32) -> i32 {
    %c0_i32 = arith.constant 0 : i32
    %c0_i32_0 = arith.constant 0 : i32
    return %c0_i32 : i32
  }
  func.func @transform_5(%arg0: i32) -> i32 {
    %c0_i32 = arith.constant 0 : i32
    %c0_i32_0 = arith.constant 0 : i32
    return %c0_i32 : i32
  }
  func.func @transform_6(%arg0: i32) -> i32 {
    %c0_i32 = arith.constant 0 : i32
    %c0_i32_0 = arith.constant 0 : i32
    return %c0_i32 : i32
  }
  func.func @transform_7(%arg0: i32) -> i32 {
    %c0_i32 = arith.constant 0 : i32
    %c0_i32_0 = arith.constant 0 : i32
    return %c0_i32 : i32
  }
  func.func @transform_8(%arg0: i32) -> i32 {
    %c0_i32 = arith.constant 0 : i32
    %c0_i32_0 = arith.constant 0 : i32
    return %c0_i32 : i32
  }
  func.func @transform_9(%arg0: i32) -> i32 {
    %c0_i32 = arith.constant 0 : i32
    %c0_i32_0 = arith.constant 0 : i32
    return %c0_i32 : i32
  }
  func.func @transform_10(%arg0: i32) -> i32 {
    %c0_i32 = arith.constant 0 : i32
    %c0_i32_0 = arith.constant 0 : i32
    return %c0_i32 : i32
  }
  func.func @transform_11(%arg0: i32) -> (i32, i32, i32) {
    %c0_i32 = arith.constant 0 : i32
    %c0_i32_0 = arith.constant 0 : i32
    %c0_i32_1 = arith.constant 0 : i32
    return %c0_i32, %arg0, %c0_i32_0 : i32, i32, i32
  }
}

</mosaic_0001>

<bundles_post_ra>
// kernel: tpu_custom_call.1
= control target key start
LH: loop header
LB: loop body
LE: loop exit
PB: predicated region body
PF: predicated region fallthrough
CT: control target
= control target key end

     0   :  { %s5009_s0 = inlined_call_operand.hbm [shape: f32[4,8,121], index: 0, kind: input, shape index: {}]   ;;  %s5010_s1 = inlined_call_operand.vmem [shape: f32[60], index: 1, kind: input, shape index: {}]   ;;  %s5011_s2 = inlined_call_operand.hbm [shape: f32[15], index: 2, kind: input, shape index: {}]   ;;  %s5012_s3 = inlined_call_operand.vmem [shape: f32[195], index: 3, kind: input, shape index: {}]   ;;  %s5013_s4 = inlined_call_operand.vmem [shape: f32[13], index: 4, kind: input, shape index: {}]   ;;  %s5014_s5 = inlined_call_operand.vmem [shape: f32[117], index: 5, kind: input, shape index: {}]   ;;  %s5015_s6 = inlined_call_operand.vmem [shape: f32[9], index: 6, kind: input, shape index: {}]   ;;  %s5016_s7 = inlined_call_operand.vmem [shape: f32[36], index: 7, kind: input, shape index: {}]   ;;  %s5017_s8 = inlined_call_operand.vmem [shape: f32[4], index: 8, kind: input, shape index: {}]   ;;  %s5018_s9 = inlined_call_operand.vmem [shape: f32[16], index: 9, kind: input, shape index: {}]   ;;  %s5019_s10 = inlined_call_operand.vmem [shape: f32[4], index: 10, kind: input, shape index: {}]   ;;  %s5020_s11 = inlined_call_operand.hbm [shape: f32[4,8,121], index: 11, kind: output, shape index: {}]  }
   0x1   :  { %5026 = sst [smem:[#allocation138_spill]] %s5020_s11 }
   0x2   :  { %16 = vsyncpa [#allocation3], 0 }
   0x3   :  { %17 = vsyncpa [#allocation6], 0 }
   0x4   :  { %18 = vsyncpa [#allocation5], 0 }
   0x5   :  { %19 = vsyncpa [#allocation10], 0 }
   0x6   :  { %20 = vsyncpa [#allocation13], 0 }
   0x7   :  { %21 = vsyncpa [#allocation16], 0 }
   0x8   :  { %22 = vsyncpa [#allocation19], 0  ;;  %s60_s19 = sshll.u32 %s5012_s3, 4  ;;  %s61_s19 = int_to_ptr.vmem [resolvable:$true] %s60_s19 }
   0x9   :  { %23 = vsyncpa [#allocation4], 0  ;;  %s80_s22 = sshll.u32 %s5014_s5, 4  ;;  %s2575_s23 = scalar_lea.vmem %s61_s19, 32  ;;  %s81_s22 = int_to_ptr.vmem [resolvable:$true] %s80_s22 }
   0xa   :  { %p2576_p0 = scmp.ne.s32.totalorder %s61_s19, %s2575_s23  ;;  %p2580_p1 = scmp.lt.s32.totalorder %s61_s19, %s61_s19 }
   0xb   :  { %p2581_p2 = scmp.lt.s32.totalorder %s2575_s23, %s2575_s23 }
   0xd   :  { %p2582_p3 = por %p2581_p2, %p2580_p1 }
   0xf   :  { %p2583_p4 = pnand %p2582_p3, %p2576_p0 }
  0x11   :  { %2586 = shalt.err (!%p2583_p4)
}
  0x12   :  { %s2747_s24 = smov [#allocation9]   ;;  %s2587_s25 = scalar_lea.vmem %s81_s22, 16 }
  0x13   :  { %63 = dma.vmem_to_smem %s61_s19, 32, %s2747_s24, [#allocation10]  }
  0x14   :  { %p2588_p5 = scmp.ne.s32.totalorder %s81_s22, %s2587_s25  ;;  %p2592_p6 = scmp.lt.s32.totalorder %s81_s22, %s81_s22 }
  0x15   :  { %p2593_p7 = scmp.lt.s32.totalorder %s2587_s25, %s2587_s25 }
  0x17   :  { %p2594_p8 = por %p2593_p7, %p2592_p6 }
  0x19   :  { %p2595_p9 = pnand %p2594_p8, %p2588_p5 }
  0x1b   :  { %2598 = shalt.err (!%p2595_p9)
}
  0x1c   :  { %s2748_s3 = smov [#allocation12]   ;;  %s100_s27 = sshll.u32 %s5016_s7, 4  ;;  %s101_s27 = int_to_ptr.vmem [resolvable:$true] %s100_s27 }
  0x1d   :  { %83 = dma.vmem_to_smem %s81_s22, 16, %s2748_s3, [#allocation13]  }
  0x1e   :  { %s120_s30 = sshll.u32 %s5018_s9, 4  ;;  %s2599_s12 = scalar_lea.vmem %s101_s27, 16  ;;  %s121_s30 = int_to_ptr.vmem [resolvable:$true] %s120_s30 }
  0x1f   :  { %p2600_p10 = scmp.ne.s32.totalorder %s101_s27, %s2599_s12  ;;  %p2604_p11 = scmp.lt.s32.totalorder %s101_s27, %s101_s27 }
  0x20   :  { %p2605_p12 = scmp.lt.s32.totalorder %s2599_s12, %s2599_s12 }
  0x22   :  { %p2606_p13 = por %p2605_p12, %p2604_p11 }
  0x24   :  { %p2607_p0 = pnand %p2606_p13, %p2600_p10 }
  0x26   :  { %2610 = shalt.err (!%p2607_p0)
}
  0x27   :  { %s2749_s13 = smov [#allocation15]   ;;  %s2611_s14 = scalar_lea.vmem %s121_s30, 16 }
  0x28   :  { %103 = dma.vmem_to_smem %s101_s27, 16, %s2749_s13, [#allocation16]  }
  0x29   :  { %p2612_p1 = scmp.ne.s32.totalorder %s121_s30, %s2611_s14  ;;  %p2616_p2 = scmp.lt.s32.totalorder %s121_s30, %s121_s30 }
  0x2a   :  { %p2617_p3 = scmp.lt.s32.totalorder %s2611_s14, %s2611_s14 }
  0x2c   :  { %p2618_p4 = por %p2617_p3, %p2616_p2 }
  0x2e   :  { %p2619_p5 = pnand %p2618_p4, %p2612_p1 }
  0x30   :  { %2622 = shalt.err (!%p2619_p5)
}
  0x31   :  { %s2750_s7 = smov [#allocation18]   ;;  %s2751_s9 = smov [#allocation2]  }
  0x32   :  { %123 = dma.vmem_to_smem %s121_s30, 16, %s2750_s7, [#allocation19]  }
  0x33   :  { %s29_s15 = sshll.u32 %s2751_s9, 4  ;;  %s42_s18 = sshll.u32 %s5010_s1, 4  ;;  %s30_s15 = int_to_ptr.vmem [resolvable:$true] %s29_s15  ;;  %s43_s18 = int_to_ptr.vmem [resolvable:$true] %s42_s18 }
  0x34   :  { %s2631_s19 = scalar_lea.vmem %s30_s15, 512  ;;  %p2636_p7 = scmp.lt.s32.totalorder %s30_s15, %s30_s15 }
  0x35   :  { %p2632_p6 = scmp.ne.s32.totalorder %s30_s15, %s2631_s19  ;;  %p2637_p8 = scmp.lt.s32.totalorder %s2631_s19, %s2631_s19 }
  0x37   :  { %p2638_p9 = por %p2637_p8, %p2636_p7 }
  0x39   :  { %p2639_p10 = pnand %p2638_p9, %p2632_p6 }
  0x3b   :  { %2642 = shalt.err (!%p2639_p10)
}
  0x3c   :  { %s5021_s20 = smov 128   ;;  %s5022_s21 = smov 8  }
  0x3d   :  { %35 = dma.hbm_to_vmem [thread:$0]  %s5009_s0, 512, %s30_s15, [#allocation3], %s5021_s20, %s5021_s20, %s5022_s21  }
  0x3e   :  { %s2643_s24 = scalar_lea.vmem %s43_s18, 16  ;;  %p2648_p12 = scmp.lt.s32.totalorder %s43_s18, %s43_s18 }
  0x3f   :  { %p2644_p11 = scmp.ne.s32.totalorder %s43_s18, %s2643_s24  ;;  %p2649_p13 = scmp.lt.s32.totalorder %s2643_s24, %s2643_s24 }
  0x41   :  { %p2650_p0 = por %p2649_p13, %p2648_p12 }
  0x43   :  { %p2651_p1 = pnand %p2650_p0, %p2644_p11 }
  0x45   :  { %2654 = shalt.err (!%p2651_p1)
}
  0x46   :  { %s2754_s1 = smov [#allocation7]   ;;  %s70_s5 = sshll.u32 %s5013_s4, 4  ;;  %s71_s5 = int_to_ptr.vmem [resolvable:$true] %s70_s5 }
  0x47   :  { %45 = dma.vmem_to_smem %s43_s18, 16, %s2754_s1, [#allocation6]  }
  0x48   :  { %s2755_s26 = smov [#allocation8]   ;;  %s2663_s0 = scalar_lea.vmem %s71_s5, 16 }
  0x49   :  { %53 = dma.hbm_to_smem %s5011_s2, 16, %s2755_s26, [#allocation5]  }
  0x4a   :  { %p2664_p2 = scmp.ne.s32.totalorder %s71_s5, %s2663_s0  ;;  %p2668_p3 = scmp.lt.s32.totalorder %s71_s5, %s71_s5 }
  0x4b   :  { %p2669_p4 = scmp.lt.s32.totalorder %s2663_s0, %s2663_s0 }
  0x4d   :  { %p2670_p5 = por %p2669_p4, %p2668_p3 }
  0x4f   :  { %p2671_p6 = pnand %p2670_p5, %p2664_p2 }
  0x51   :  { %2674 = shalt.err (!%p2671_p6)
}
  0x52   :  { %s2756_s29 = smov [#allocation11]   ;;  %s90_s13 = sshll.u32 %s5015_s6, 4  ;;  %s91_s13 = int_to_ptr.vmem [resolvable:$true] %s90_s13 }
  0x53   :  { %73 = dma.vmem_to_smem %s71_s5, 16, %s2756_s29, [#allocation10]  }
  0x54   :  { %s110_s7 = sshll.u32 %s5017_s8, 4  ;;  %s2675_s2 = scalar_lea.vmem %s91_s13, 16  ;;  %s111_s7 = int_to_ptr.vmem [resolvable:$true] %s110_s7 }
  0x55   :  { %p2676_p7 = scmp.ne.s32.totalorder %s91_s13, %s2675_s2  ;;  %p2680_p8 = scmp.lt.s32.totalorder %s91_s13, %s91_s13 }
  0x56   :  { %p2681_p9 = scmp.lt.s32.totalorder %s2675_s2, %s2675_s2 }
  0x58   :  { %p2682_p10 = por %p2681_p9, %p2680_p8 }
  0x5a   :  { %p2683_p11 = pnand %p2682_p10, %p2676_p7 }
  0x5c   :  { %2686 = shalt.err (!%p2683_p11)
}
  0x5d   :  { %s2757_s9 = smov [#allocation14]   ;;  %s2687_s15 = scalar_lea.vmem %s111_s7, 16 }
  0x5e   :  { %93 = dma.vmem_to_smem %s91_s13, 16, %s2757_s9, [#allocation13]  }
  0x5f   :  { %p2688_p12 = scmp.ne.s32.totalorder %s111_s7, %s2687_s15  ;;  %p2692_p13 = scmp.lt.s32.totalorder %s111_s7, %s111_s7 }
  0x60   :  { %p2693_p0 = scmp.lt.s32.totalorder %s2687_s15, %s2687_s15 }
  0x62   :  { %p2694_p1 = por %p2693_p0, %p2692_p13 }
  0x64   :  { %p2695_p2 = pnand %p2694_p1, %p2688_p12 }
  0x66   :  { %2698 = shalt.err (!%p2695_p2)
}
  0x67   :  { %s2758_s6 = smov [#allocation17]   ;;  %s130_s17 = sshll.u32 %s5019_s10, 4  ;;  %s131_s17 = int_to_ptr.vmem [resolvable:$true] %s130_s17 }
  0x68   :  { %113 = dma.vmem_to_smem %s111_s7, 16, %s2758_s6, [#allocation16]  }
  0x69   :  { %s2699_s18 = scalar_lea.vmem %s131_s17, 16  ;;  %p2704_p4 = scmp.lt.s32.totalorder %s131_s17, %s131_s17 }
  0x6a   :  { %p2700_p3 = scmp.ne.s32.totalorder %s131_s17, %s2699_s18  ;;  %p2705_p5 = scmp.lt.s32.totalorder %s2699_s18, %s2699_s18 }
  0x6c   :  { %p2706_p6 = por %p2705_p5, %p2704_p4 }
  0x6e   :  { %p2707_p7 = pnand %p2706_p6, %p2700_p3 }
  0x70   :  { %2710 = shalt.err (!%p2707_p7)
}
  0x71   :  { %s2759_s19 = smov [#allocation20]  }
  0x72   :  { %133 = dma.vmem_to_smem %s131_s17, 16, %s2759_s19, [#allocation19]  }
  0x73   :  { %2731 = dma.done.wait [#allocation3], 512  }
  0x74   :  { %2732 = vsyncadd [#allocation3], 4294966784 }
  0x75   :  { %2733 = dma.done.wait [#allocation6], 16  }
  0x76   :  { %2734 = vsyncadd [#allocation6], 4294967280 }
  0x77   :  { %2735 = dma.done.wait [#allocation5], 16  }
  0x78   :  { %2736 = vsyncadd [#allocation5], 4294967280 }
  0x79   :  { %2737 = dma.done.wait [#allocation10], 48  }
  0x7a   :  { %2738 = vsyncadd [#allocation10], 4294967248 }
  0x7b   :  { %2739 = dma.done.wait [#allocation13], 32  }
  0x7c   :  { %2740 = vsyncadd [#allocation13], 4294967264 }
  0x7d   :  { %2741 = dma.done.wait [#allocation16], 32  }
  0x7e   :  { %2742 = vsyncadd [#allocation16], 4294967264 }
  0x7f   :  { %2743 = dma.done.wait [#allocation19], 32  }
  0x80   :  { %2744 = vsyncadd [#allocation19], 4294967264 }
  0x81   :  { %167 = sfence }
  0x82   :  { %s2857_s10 = sld [smem:[#allocation7]]  ;;  %v3129_v0 = vld [vmem:[#allocation2] sm:$0xff]  ;;  %v3131_v1 = vld [vmem:[#allocation2 + $0x8] sm:$0xff]  ;;  %v3145_v10 = vld [vmem:[#allocation2 + $0x10] sm:$0xff]  ;;  %vm2005_vm0 = vcmask 990208  }
  0x83   :  { %s2859_s22 = sld [smem:[#allocation7 + $0x1]]  ;;  %v3157_v19 = vld [vmem:[#allocation2 + $0x18] sm:$0xff] }
  0x84   :  { %s2861_s23 = sld [smem:[#allocation7 + $0x2]] }
  0x85   :  { %s2863_s24 = sld [smem:[#allocation7 + $0x3]] }
  0x86   :  { %s2865_s1 = sld [smem:[#allocation7 + $0x4]] }
  0x87   :  { %s2867_s25 = sld [smem:[#allocation7 + $0x5]] }
  0x88   :  { %s2869_s3 = sld [smem:[#allocation7 + $0x6]]  ;;  %v647_v2 = vstv %s2857_s10 }
  0x89   :  { %s2871_s5 = sld [smem:[#allocation7 + $0x7]]  ;;  %v649_v3 = vstv %s2859_s22  ;;  %v648_v6 = vmul.f32 %v647_v2, %v3129_v0 }
  0x8a   :  { %s2873_s26 = sld [smem:[#allocation7 + $0x8]]  ;;  %v650_v7 = vmul.f32 %v649_v3, %v3131_v1  ;;  %v652_v11 = vstv %s2861_s23 }
  0x8b   :  { %s2875_s27 = sld [smem:[#allocation7 + $0x9]]  ;;  %v653_v16 = vmul.f32 %v652_v11, %v3145_v10  ;;  %v655_v20 = vstv %s2863_s24 }
  0x8c   :  { %s2877_s28 = sld [smem:[#allocation7 + $0xa]]  ;;  %v661_v4 = vstv %s2865_s1  ;;  %v651_v15 = vadd.f32 %v650_v7, %v648_v6  ;;  %v656_v25 = vmul.f32 %v655_v20, %v3157_v19 }
  0x8d   :  { %s2879_s0 = sld [smem:[#allocation7 + $0xb]]  ;;  %v663_v5 = vstv %s2867_s25  ;;  %v662_v8 = vmul.f32 %v661_v4, %v3129_v0 }
  0x8e   :  { %s2881_s29 = sld [smem:[#allocation7 + $0xc]]  ;;  %v664_v9 = vmul.f32 %v663_v5, %v3131_v1  ;;  %v666_v12 = vstv %s2869_s3  ;;  %v654_v24 = vadd.f32 %v653_v16, %v651_v15 }
  0x8f   :  { %s2883_s30 = sld [smem:[#allocation7 + $0xd]]  ;;  %v667_v18 = vmul.f32 %v666_v12, %v3145_v10  ;;  %v669_v21 = vstv %s2871_s5 }
  0x90   :  { %s2885_s12 = sld [smem:[#allocation7 + $0xe]]  ;;  %v675_v13 = vstv %s2873_s26  ;;  %v665_v17 = vadd.f32 %v664_v9, %v662_v8  ;;  %v670_v27 = vmul.f32 %v669_v21, %v3157_v19  ;;  %v657_v32 = vadd.f32 %v656_v25, %v654_v24 }
  0x91   :  { %s2887_s13 = sld [smem:[#allocation7 + $0xf]]  ;;  %v677_v14 = vstv %s2875_s27  ;;  %v676_v22 = vmul.f32 %v675_v13, %v3129_v0 }
  0x92   :  { %s2889_s4 = sld [smem:[#allocation7 + $0x10]]  ;;  %v678_v23 = vmul.f32 %v677_v14, %v3131_v1  ;;  %v668_v26 = vadd.f32 %v667_v18, %v665_v17  ;;  %v680_v29 = vstv %s2877_s28 }
  0x93   :  { %s2891_s14 = sld [smem:[#allocation7 + $0x11]]  ;;  %v683_v30 = vstv %s2879_s0  ;;  %v681_v34 = vmul.f32 %v680_v29, %v3145_v10 }
  0x94   :  { %s2893_s7 = sld [smem:[#allocation7 + $0x12]]  ;;  %v679_v28 = vadd.f32 %v678_v23, %v676_v22  ;;  %v689_v31 = vstv %s2881_s29  ;;  %v671_v33 = vadd.f32 %v670_v27, %v668_v26  ;;  %v684_v35 = vmul.f32 %v683_v30, %v3157_v19 }
  0x95   :  { %s2895_s2 = sld [smem:[#allocation7 + $0x13]]  ;;  %v690_v38 = vmul.f32 %v689_v31, %v3129_v0  ;;  %v691_v39 = vstv %s2883_s30 }
  0x96   :  { %s2897_s9 = sld [smem:[#allocation7 + $0x14]]  ;;  %v682_v42 = vadd.f32 %v681_v34, %v679_v28  ;;  %v692_v43 = vmul.f32 %v691_v39, %v3131_v1  ;;  %v694_v45 = vstv %s2885_s12 }
  0x97   :  { %s2899_s15 = sld [smem:[#allocation7 + $0x15]]  ;;  %v697_v46 = vstv %s2887_s13  ;;  %v695_v51 = vmul.f32 %v694_v45, %v3145_v10 }
  0x98   :  { %s2901_s6 = sld [smem:[#allocation7 + $0x16]]  ;;  %v703_v47 = vstv %s2889_s4  ;;  %v685_v48 = vadd.f32 %v684_v35, %v682_v42  ;;  %v693_v49 = vadd.f32 %v692_v43, %v690_v38  ;;  %v698_v52 = vmul.f32 %v697_v46, %v3157_v19 }
  0x99   :  { %5027 = sst [smem:[#allocation30_spill]] %s2891_s14  ;;  %v704_v53 = vmul.f32 %v703_v47, %v3129_v0 }
  0x9a   :  { %5028 = sst [smem:[#allocation31_spill]] %s2893_s7  ;;  %v696_v59 = vadd.f32 %v695_v51, %v693_v49 }
  0x9b   :  { %5029 = sst [smem:[#allocation32_spill]] %s2895_s2 }
  0x9c   :  { %5030 = sst [smem:[#allocation33_spill]] %s2897_s9  ;;  %v699_v4 = vadd.f32 %v698_v52, %v696_v59 }
  0x9d   :  { %5031 = sst [smem:[#allocation34_spill]] %s2899_s15 }
  0x9e   :  { %5032 = sst [smem:[#allocation35_spill]] %s2901_s6 }
  0x9f   :  { %s2903_s8 = sld [smem:[#allocation7 + $0x17]] }
  0xa0   :  { %s2905_s16 = sld [smem:[#allocation7 + $0x18]] }
  0xa1   :  { %s2907_s17 = sld [smem:[#allocation7 + $0x19]] }
  0xa2   :  { %s2909_s18 = sld [smem:[#allocation7 + $0x1a]] }
  0xa3   :  { %s2911_s19 = sld [smem:[#allocation7 + $0x1b]] }
  0xa4   :  { %s2913_s20 = sld [smem:[#allocation7 + $0x1c]] }
  0xa5   :  { %5033 = sst [smem:[#allocation36_spill]] %s2903_s8 }
  0xa6   :  { %5034 = sst [smem:[#allocation37_spill]] %s2905_s16 }
  0xa7   :  { %5035 = sst [smem:[#allocation38_spill]] %s2907_s17 }
  0xa8   :  { %5036 = sst [smem:[#allocation39_spill]] %s2909_s18 }
  0xa9   :  { %5037 = sst [smem:[#allocation40_spill]] %s2911_s19 }
  0xaa   :  { %5038 = sst [smem:[#allocation41_spill]] %s2913_s20 }
  0xab   :  { %s2915_s21 = sld [smem:[#allocation7 + $0x1d]] }
  0xac   :  { %s2917_s11 = sld [smem:[#allocation7 + $0x1e]] }
  0xad   :  { %s2919_s9 = sld [smem:[#allocation7 + $0x1f]] }
  0xae   :  { %s2921_s15 = sld [smem:[#allocation7 + $0x20]] }
  0xaf   :  { %s2923_s6 = sld [smem:[#allocation7 + $0x21]] }
  0xb0   :  { %s2925_s8 = sld [smem:[#allocation7 + $0x22]] }
  0xb1   :  { %5039 = sst [smem:[#allocation42_spill]] %s2915_s21 }
  0xb2   :  { %5040 = sst [smem:[#allocation43_spill]] %s2917_s11 }
  0xb3   :  { %5041 = sst [smem:[#allocation44_spill]] %s2919_s9 }
  0xb4   :  { %5042 = sst [smem:[#allocation45_spill]] %s2921_s15 }
  0xb5   :  { %5043 = sst [smem:[#allocation46_spill]] %s2923_s6 }
  0xb6   :  { %5044 = sst [smem:[#allocation47_spill]] %s2925_s8 }
  0xb7   :  { %s2927_s16 = sld [smem:[#allocation7 + $0x23]] }
  0xb8   :  { %s2929_s17 = sld [smem:[#allocation7 + $0x24]] }
  0xb9   :  { %s2931_s18 = sld [smem:[#allocation7 + $0x25]] }
  0xba   :  { %s2933_s19 = sld [smem:[#allocation7 + $0x26]] }
  0xbb   :  { %s2935_s20 = sld [smem:[#allocation7 + $0x27]] }
  0xbc   :  { %s2937_s21 = sld [smem:[#allocation7 + $0x28]] }
  0xbd   :  { %5045 = sst [smem:[#allocation48_spill]] %s2927_s16 }
  0xbe   :  { %5046 = sst [smem:[#allocation49_spill]] %s2929_s17 }
  0xbf   :  { %5047 = sst [smem:[#allocation50_spill]] %s2931_s18 }
  0xc0   :  { %5048 = sst [smem:[#allocation51_spill]] %s2933_s19 }
  0xc1   :  { %5049 = sst [smem:[#allocation52_spill]] %s2935_s20 }
  0xc2   :  { %5050 = sst [smem:[#allocation53_spill]] %s2937_s21 }
  0xc3   :  { %s2939_s11 = sld [smem:[#allocation7 + $0x29]] }
  0xc4   :  { %s2941_s9 = sld [smem:[#allocation7 + $0x2a]] }
  0xc5   :  { %s2943_s15 = sld [smem:[#allocation7 + $0x2b]] }
  0xc6   :  { %s2945_s6 = sld [smem:[#allocation7 + $0x2c]] }
  0xc7   :  { %s2947_s8 = sld [smem:[#allocation7 + $0x2d]] }
  0xc8   :  { %s2949_s16 = sld [smem:[#allocation7 + $0x2e]] }
  0xc9   :  { %5051 = sst [smem:[#allocation54_spill]] %s2939_s11 }
  0xca   :  { %5052 = sst [smem:[#allocation55_spill]] %s2941_s9 }
  0xcb   :  { %5053 = sst [smem:[#allocation56_spill]] %s2943_s15 }
  0xcc   :  { %5054 = sst [smem:[#allocation57_spill]] %s2945_s6 }
  0xcd   :  { %5055 = sst [smem:[#allocation58_spill]] %s2947_s8 }
  0xce   :  { %5056 = sst [smem:[#allocation59_spill]] %s2949_s16 }
  0xcf   :  { %s2951_s17 = sld [smem:[#allocation7 + $0x2f]] }
  0xd0   :  { %s2953_s18 = sld [smem:[#allocation7 + $0x30]] }
  0xd1   :  { %s2955_s19 = sld [smem:[#allocation7 + $0x31]] }
  0xd2   :  { %s2957_s20 = sld [smem:[#allocation7 + $0x32]] }
  0xd3   :  { %s2959_s21 = sld [smem:[#allocation7 + $0x33]] }
  0xd4   :  { %s2961_s11 = sld [smem:[#allocation7 + $0x34]] }
  0xd5   :  { %5057 = sst [smem:[#allocation60_spill]] %s2951_s17 }
  0xd6   :  { %5058 = sst [smem:[#allocation61_spill]] %s2953_s18 }
  0xd7   :  { %5059 = sst [smem:[#allocation62_spill]] %s2955_s19 }
  0xd8   :  { %5060 = sst [smem:[#allocation63_spill]] %s2957_s20 }
  0xd9   :  { %5061 = sst [smem:[#allocation64_spill]] %s2959_s21 }
  0xda   :  { %5062 = sst [smem:[#allocation65_spill]] %s2961_s11 }
  0xdb   :  { %s2963_s9 = sld [smem:[#allocation7 + $0x35]] }
  0xdc   :  { %s2965_s15 = sld [smem:[#allocation7 + $0x36]] }
  0xdd   :  { %s2967_s6 = sld [smem:[#allocation7 + $0x37]] }
  0xde   :  { %s2969_s8 = sld [smem:[#allocation7 + $0x38]] }
  0xdf   :  { %s2971_s16 = sld [smem:[#allocation7 + $0x39]] }
  0xe0   :  { %s2973_s17 = sld [smem:[#allocation7 + $0x3a]] }
  0xe1   :  { %5063 = sst [smem:[#allocation66_spill]] %s2963_s9 }
  0xe2   :  { %5064 = sst [smem:[#allocation67_spill]] %s2965_s15 }
  0xe3   :  { %5065 = sst [smem:[#allocation68_spill]] %s2967_s6 }
  0xe4   :  { %5066 = sst [smem:[#allocation69_spill]] %s2969_s8 }
  0xe5   :  { %5067 = sst [smem:[#allocation70_spill]] %s2971_s16 }
  0xe6   :  { %5068 = sst [smem:[#allocation71_spill]] %s2973_s17 }
  0xe7   :  { %s2975_s18 = sld [smem:[#allocation7 + $0x3b]] }
  0xe8   :  { %s2977_s19 = sld [smem:[#allocation8]] }
  0xe9   :  { %s2979_s20 = sld [smem:[#allocation8 + $0x1]] }
  0xea   :  { %s2981_s21 = sld [smem:[#allocation8 + $0x2]] }
  0xeb   :  { %s2983_s11 = sld [smem:[#allocation8 + $0x3]] }
  0xec   :  { %s2985_s9 = sld [smem:[#allocation8 + $0x4]] }
  0xed   :  { %5069 = sst [smem:[#allocation72_spill]] %s2975_s18 }
  0xee   :  { %s2987_s15 = sld [smem:[#allocation8 + $0x5]]  ;;  %v658_v36 = vstv %s2977_s19 }
  0xef   :  { %s2989_s6 = sld [smem:[#allocation8 + $0x6]]  ;;  %v672_v37 = vstv %s2979_s20  ;;  %v659_v40 = vadd.f32 %v658_v36, %v657_v32 }
  0xf0   :  { %s2991_s8 = sld [smem:[#allocation8 + $0x7]]  ;;  %v673_v41 = vadd.f32 %v672_v37, %v671_v33  ;;  %v686_v44 = vstv %s2981_s21 }
  0xf1   :  { %5070 = sst [smem:[#allocation73_spill]] %s2983_s11  ;;  %v3195_v50 = vmax.f32 %v659_v40, 0.0  ;;  %v687_v54 = vadd.f32 %v686_v44, %v685_v48 }
  0xf2   :  { %5071 = sst [smem:[#allocation74_spill]] %s2985_s9  ;;  %v3207_v58 = vmax.f32 %v673_v41, 0.0 }
  0xf3   :  { %s2993_s16 = sld [smem:[#allocation8 + $0x8]]  ;;  %v3223_v8 = vmax.f32 %v687_v54, 0.0 }
  0xf4   :  { %5072 = sst [smem:[#allocation75_spill]] %s2987_s15 }
  0xf5   :  { %5073 = sst [smem:[#allocation76_spill]] %s2989_s6 }
  0xf6   :  { %5074 = sst [smem:[#allocation77_spill]] %s2991_s8 }
  0xf7   :  { %s2995_s17 = sld [smem:[#allocation8 + $0x9]] }
  0xf8   :  { %s2997_s18 = sld [smem:[#allocation8 + $0xa]] }
  0xf9   :  { %5075 = sst [smem:[#allocation78_spill]] %s2993_s16 }
  0xfa   :  { %s2999_s2 = sld [smem:[#allocation8 + $0xb]] }
  0xfb   :  { %s3001_s7 = sld [smem:[#allocation8 + $0xc]] }
  0xfc   :  { %s3003_s14 = sld [smem:[#allocation8 + $0xd]] }
  0xfd   :  { %5076 = sst [smem:[#allocation79_spill]] %s2995_s17 }
  0xfe   :  { %5077 = sst [smem:[#allocation80_spill]] %s2997_s18 }
  0xff   :  { %s3005_s11 = sld [smem:[#allocation8 + $0xe]] }
 0x100   :  { %5078 = sst [smem:[#allocation81_spill]] %s2999_s2 }
 0x101   :  { %5079 = sst [smem:[#allocation82_spill]] %s3001_s7 }
 0x102   :  { %5080 = sst [smem:[#allocation83_spill]] %s3003_s14 }
 0x103   :  { %s3007_s9 = sld [smem:[#allocation9]] }
 0x104   :  { %s3009_s15 = sld [smem:[#allocation9 + $0x1]] }
 0x105   :  { %5081 = sst [smem:[#allocation84_spill]] %s3005_s11 }
 0x106   :  { %s3011_s6 = sld [smem:[#allocation9 + $0x2]] }
 0x107   :  { %s3013_s8 = sld [smem:[#allocation9 + $0x3]] }
 0x108   :  { %s3015_s16 = sld [smem:[#allocation9 + $0x4]] }
 0x109   :  { %5082 = sst [smem:[#allocation85_spill]] %s3007_s9 }
 0x10a   :  { %5083 = sst [smem:[#allocation86_spill]] %s3009_s15 }
 0x10b   :  { %s3017_s17 = sld [smem:[#allocation9 + $0x5]] }
 0x10c   :  { %5084 = sst [smem:[#allocation87_spill]] %s3011_s6 }
 0x10d   :  { %5085 = sst [smem:[#allocation88_spill]] %s3013_s8 }
 0x10e   :  { %5086 = sst [smem:[#allocation89_spill]] %s3015_s16 }
 0x10f   :  { %s3019_s18 = sld [smem:[#allocation9 + $0x6]] }
 0x110   :  { %s3021_s2 = sld [smem:[#allocation9 + $0x7]] }
 0x111   :  { %5087 = sst [smem:[#allocation90_spill]] %s3017_s17 }
 0x112   :  { %s3023_s7 = sld [smem:[#allocation9 + $0x8]] }
 0x113   :  { %s3025_s14 = sld [smem:[#allocation9 + $0x9]] }
 0x114   :  { %s3027_s11 = sld [smem:[#allocation9 + $0xa]] }
 0x115   :  { %5088 = sst [smem:[#allocation91_spill]] %s3019_s18 }
 0x116   :  { %5089 = sst [smem:[#allocation92_spill]] %s3021_s2 }
 0x117   :  { %s3029_s9 = sld [smem:[#allocation9 + $0xb]] }
 0x118   :  { %5090 = sst [smem:[#allocation93_spill]] %s3023_s7 }
 0x119   :  { %5091 = sst [smem:[#allocation94_spill]] %s3025_s14 }
 0x11a   :  { %5092 = sst [smem:[#allocation95_spill]] %s3027_s11 }
 0x11b   :  { %s3031_s15 = sld [smem:[#allocation9 + $0xc]] }
 0x11c   :  { %s3033_s6 = sld [smem:[#allocation9 + $0xd]] }
 0x11d   :  { %5093 = sst [smem:[#allocation96_spill]] %s3029_s9 }
 0x11e   :  { %s3035_s8 = sld [smem:[#allocation9 + $0xe]] }
 0x11f   :  { %s3037_s16 = sld [smem:[#allocation9 + $0xf]] }
 0x120   :  { %s3039_s17 = sld [smem:[#allocation9 + $0x10]] }
 0x121   :  { %5094 = sst [smem:[#allocation97_spill]] %s3031_s15 }
 0x122   :  { %5095 = sst [smem:[#allocation98_spill]] %s3033_s6 }
 0x123   :  { %s3041_s18 = sld [smem:[#allocation9 + $0x11]] }
 0x124   :  { %5096 = sst [smem:[#allocation99_spill]] %s3035_s8 }
 0x125   :  { %5097 = sst [smem:[#allocation100_spill]] %s3037_s16 }
 0x126   :  { %5098 = sst [smem:[#allocation101_spill]] %s3039_s17 }
 0x127   :  { %s3043_s2 = sld [smem:[#allocation9 + $0x12]] }
 0x128   :  { %s3045_s7 = sld [smem:[#allocation9 + $0x13]] }
 0x129   :  { %5099 = sst [smem:[#allocation102_spill]] %s3041_s18 }
 0x12a   :  { %s3047_s14 = sld [smem:[#allocation9 + $0x14]] }
 0x12b   :  { %s3049_s11 = sld [smem:[#allocation9 + $0x15]] }
 0x12c   :  { %s3051_s9 = sld [smem:[#allocation9 + $0x16]] }
 0x12d   :  { %5100 = sst [smem:[#allocation103_spill]] %s3043_s2 }
 0x12e   :  { %5101 = sst [smem:[#allocation104_spill]] %s3045_s7 }
 0x12f   :  { %s3053_s15 = sld [smem:[#allocation9 + $0x17]] }
 0x130   :  { %5102 = sst [smem:[#allocation105_spill]] %s3047_s14 }
 0x131   :  { %5103 = sst [smem:[#allocation106_spill]] %s3049_s11 }
 0x132   :  { %5104 = sst [smem:[#allocation107_spill]] %s3051_s9 }
 0x133   :  { %s3055_s6 = sld [smem:[#allocation9 + $0x18]] }
 0x134   :  { %s3057_s8 = sld [smem:[#allocation9 + $0x19]] }
 0x135   :  { %5105 = sst [smem:[#allocation108_spill]] %s3053_s15 }
 0x136   :  { %s3059_s16 = sld [smem:[#allocation9 + $0x1a]] }
 0x137   :  { %s3061_s17 = sld [smem:[#allocation9 + $0x1b]] }
 0x138   :  { %s3063_s18 = sld [smem:[#allocation9 + $0x1c]] }
 0x139   :  { %5106 = sst [smem:[#allocation109_spill]] %s3055_s6 }
 0x13a   :  { %5107 = sst [smem:[#allocation110_spill]] %s3057_s8 }
 0x13b   :  { %s3065_s2 = sld [smem:[#allocation9 + $0x1d]] }
 0x13c   :  { %5108 = sst [smem:[#allocation111_spill]] %s3059_s16 }
 0x13d   :  { %5109 = sst [smem:[#allocation112_spill]] %s3061_s17 }
 0x13e   :  { %5110 = sst [smem:[#allocation113_spill]] %s3063_s18 }
 0x13f   :  { %s3067_s7 = sld [smem:[#allocation9 + $0x1e]] }
 0x140   :  { %s3069_s14 = sld [smem:[#allocation9 + $0x1f]] }
 0x141   :  { %5111 = sst [smem:[#allocation114_spill]] %s3065_s2 }
 0x142   :  { %s3071_s11 = sld [smem:[#allocation9 + $0x20]] }
 0x143   :  { %s3073_s9 = sld [smem:[#allocation9 + $0x21]] }
 0x144   :  { %s3075_s15 = sld [smem:[#allocation9 + $0x22]] }
 0x145   :  { %5112 = sst [smem:[#allocation115_spill]] %s3067_s7 }
 0x146   :  { %5113 = sst [smem:[#allocation116_spill]] %s3069_s14 }
 0x147   :  { %s3077_s6 = sld [smem:[#allocation9 + $0x23]] }
 0x148   :  { %5114 = sst [smem:[#allocation117_spill]] %s3071_s11 }
 0x149   :  { %5115 = sst [smem:[#allocation118_spill]] %s3073_s9 }
 0x14a   :  { %5116 = sst [smem:[#allocation119_spill]] %s3075_s15 }
 0x14b   :  { %s3079_s8 = sld [smem:[#allocation9 + $0x24]] }
 0x14c   :  { %s3081_s16 = sld [smem:[#allocation9 + $0x25]] }
 0x14d   :  { %5117 = sst [smem:[#allocation120_spill]] %s3077_s6 }
 0x14e   :  { %s3083_s17 = sld [smem:[#allocation9 + $0x26]] }
 0x14f   :  { %s3085_s18 = sld [smem:[#allocation9 + $0x27]] }
 0x150   :  { %s3087_s2 = sld [smem:[#allocation9 + $0x28]] }
 0x151   :  { %5118 = sst [smem:[#allocation121_spill]] %s3079_s8 }
 0x152   :  { %s3089_s7 = sld [smem:[#allocation9 + $0x29]] }
 0x153   :  { %s3091_s14 = sld [smem:[#allocation9 + $0x2a]] }
 0x154   :  { %5119 = sst [smem:[#allocation122_spill]] %s3083_s17 }
 0x155   :  { %5120 = sst [smem:[#allocation123_spill]] %s3085_s18 }
 0x156   :  { %5121 = sst [smem:[#allocation124_spill]] %s3087_s2 }
 0x157   :  { %s3093_s11 = sld [smem:[#allocation9 + $0x2b]] }
 0x158   :  { %5122 = sst [smem:[#allocation125_spill]] %s3089_s7 }
 0x159   :  { %5123 = sst [smem:[#allocation126_spill]] %s3091_s14 }
 0x15a   :  { %s3095_s9 = sld [smem:[#allocation9 + $0x2c]] }
 0x15b   :  { %s3097_s15 = sld [smem:[#allocation9 + $0x2d]] }
 0x15c   :  { %s3099_s6 = sld [smem:[#allocation9 + $0x2e]] }
 0x15d   :  { %5124 = sst [smem:[#allocation127_spill]] %s3093_s11 }
 0x15e   :  { %s3101_s8 = sld [smem:[#allocation9 + $0x2f]] }
 0x15f   :  { %s3103_s17 = sld [smem:[#allocation9 + $0x30]] }
 0x160   :  { %5125 = sst [smem:[#allocation128_spill]] %s3095_s9 }
 0x161   :  { %5126 = sst [smem:[#allocation129_spill]] %s3097_s15 }
 0x162   :  { %5127 = sst [smem:[#allocation130_spill]] %s3099_s6 }
 0x163   :  { %s3105_s18 = sld [smem:[#allocation9 + $0x31]] }
 0x164   :  { %5128 = sst [smem:[#allocation131_spill]] %s3101_s8 }
 0x165   :  { %5129 = sst [smem:[#allocation132_spill]] %s3103_s17 }
 0x166   :  { %s3107_s7 = sld [smem:[#allocation9 + $0x32]] }
 0x167   :  { %s3109_s14 = sld [smem:[#allocation9 + $0x33]] }
 0x168   :  { %s3111_s11 = sld [smem:[#allocation9 + $0x34]] }
 0x169   :  { %5130 = sst [smem:[#allocation133_spill]] %s3105_s18 }
 0x16a   :  { %s3113_s9 = sld [smem:[#allocation9 + $0x35]] }
 0x16b   :  { %s3115_s15 = sld [smem:[#allocation9 + $0x36]] }
 0x16c   :  { %5131 = sst [smem:[#allocation134_spill]] %s3107_s7 }
 0x16d   :  { %s3117_s6 = sld [smem:[#allocation9 + $0x37]] }
 0x16e   :  { %s3119_s8 = sld [smem:[#allocation9 + $0x38]] }
 0x16f   :  { %s3121_s17 = sld [smem:[#allocation9 + $0x39]] }
 0x170   :  { %s3123_s2 = sld [smem:[#allocation9 + $0x3a]] }
 0x171   :  { %s3125_s18 = sld [smem:[#allocation9 + $0x3b]] }
 0x172   :  { %s3127_s7 = sld [smem:[#allocation9 + $0x3c]] }
 0x173   :  { %s3151_s10 = sld [smem:[#allocation9 + $0x3f]] }
 0x174   :  { %5132 = sst [smem:[#allocation135_spill]] %s3119_s8 }
 0x175   :  { %s3137_s8 = sld [smem:[#allocation9 + $0x3d]] }
 0x176   :  { %s3155_s22 = sld [smem:[#allocation9 + $0x40]] }
 0x177   :  { %s3163_s23 = sld [smem:[#allocation9 + $0x41]] }
 0x178   :  { %5133 = sst [smem:[#allocation136_spill]] %s3127_s7 }
 0x179   :  { %s3143_s7 = sld [smem:[#allocation9 + $0x3e]] }
 0x17a   :  { %s3167_s1 = sld [smem:[#allocation9 + $0x42]] }
 0x17b   :  { %s3172_s24 = sld [smem:[#allocation9 + $0x43]] }
 0x17c   :  { %s3176_s25 = sld [smem:[#allocation9 + $0x44]] }
 0x17d   :  { %s3182_s3 = sld [smem:[#allocation9 + $0x45]] }
 0x17e   :  { %s5135_s5 = sld [smem:[#allocation30_spill]] }
 0x17f   :  { %s3185_s26 = sld [smem:[#allocation9 + $0x46]] }
 0x180   :  { %s5137_s27 = sld [smem:[#allocation31_spill]] }
 0x181   :  { %s5138_s28 = sld [smem:[#allocation32_spill]] }
 0x182   :  { %s3191_s20 = sld [smem:[#allocation9 + $0x47]] }
 0x183   :  { %5134 = sst [smem:[#allocation137_spill]] %s3182_s3 }
 0x184   :  { %s3193_s0 = sld [smem:[#allocation9 + $0x48]]  ;;  %v705_v55 = vstv %s5135_s5 }
 0x185   :  { %5136 = sst [smem:[#allocation30_spill]] %s3185_s26  ;;  %v706_v60 = vmul.f32 %v705_v55, %v3131_v1 }
 0x186   :  { %s5141_s29 = sld [smem:[#allocation73_spill]]  ;;  %v708_v56 = vstv %s5137_s27 }
 0x187   :  { %s5142_s30 = sld [smem:[#allocation33_spill]]  ;;  %v711_v57 = vstv %s5138_s28  ;;  %v709_v61 = vmul.f32 %v708_v56, %v3145_v10  ;;  %v707_v5 = vadd.f32 %v706_v60, %v704_v53 }
 0x188   :  { %5139 = sst [smem:[#allocation31_spill]] %s3191_s20  ;;  %v712_v63 = vmul.f32 %v711_v57, %v3157_v19 }
 0x189   :  { %s5143_s21 = sld [smem:[#allocation34_spill]]  ;;  %v710_v13 = vadd.f32 %v709_v61, %v707_v5 }
 0x18a   :  { %5140 = sst [smem:[#allocation32_spill]] %s3193_s0 }
 0x18b   :  { %s3200_s12 = sld [smem:[#allocation9 + $0x49]]  ;;  %v713_v23 = vadd.f32 %v712_v63, %v710_v13 }
 0x18c   :  { %s3205_s13 = sld [smem:[#allocation9 + $0x4a]]  ;;  %v700_v62 = vstv %s5141_s29 }
 0x18d   :  { %s5146_s4 = sld [smem:[#allocation35_spill]]  ;;  %v717_v2 = vstv %s5142_s30  ;;  %v701_v22 = vadd.f32 %v700_v62, %v699_v4 }
 0x18e   :  { %s5147_s19 = sld [smem:[#allocation36_spill]]  ;;  %v718_v6 = vmul.f32 %v717_v2, %v3129_v0 }
 0x18f   :  { %s5148_s0 = sld [smem:[#allocation37_spill]]  ;;  %v719_v3 = vstv %s5143_s21  ;;  %v3258_v38 = vmax.f32 %v701_v22, 0.0 }
 0x190   :  { %s3211_s20 = sld [smem:[#allocation9 + $0x4b]]  ;;  %v720_v7 = vmul.f32 %v719_v3, %v3131_v1 }
 0x191   :  { %5144 = sst [smem:[#allocation73_spill]] %s3200_s12 }
 0x192   :  { %5145 = sst [smem:[#allocation33_spill]] %s3205_s13  ;;  %v721_v15 = vadd.f32 %v720_v7, %v718_v6 }
 0x193   :  { %s5150_s12 = sld [smem:[#allocation74_spill]]  ;;  %v722_v9 = vstv %s5146_s4 }
 0x194   :  { %s3217_s5 = sld [smem:[#allocation9 + $0x4c]]  ;;  %v725_v11 = vstv %s5147_s19  ;;  %v723_v16 = vmul.f32 %v722_v9, %v3145_v10 }
 0x195   :  { %s5152_s27 = sld [smem:[#allocation38_spill]]  ;;  %v731_v12 = vstv %s5148_s0  ;;  %v726_v17 = vmul.f32 %v725_v11, %v3157_v19 }
 0x196   :  { %5149 = sst [smem:[#allocation34_spill]] %s3211_s20  ;;  %v732_v18 = vmul.f32 %v731_v12, %v3129_v0  ;;  %v724_v24 = vadd.f32 %v723_v16, %v721_v15 }
 0x197   :  { %s5153_s28 = sld [smem:[#allocation39_spill]] }
 0x198   :  { %s3221_s13 = sld [smem:[#allocation9 + $0x4d]]  ;;  %v727_v31 = vadd.f32 %v726_v17, %v724_v24 }
 0x199   :  { %s3228_s29 = sld [smem:[#allocation9 + $0x4e]]  ;;  %v714_v14 = vstv %s5150_s12 }
 0x19a   :  { %5151 = sst [smem:[#allocation35_spill]] %s3217_s5  ;;  %v715_v30 = vadd.f32 %v714_v14, %v713_v23 }
 0x19b   :  { %s5156_s30 = sld [smem:[#allocation75_spill]]  ;;  %v733_v20 = vstv %s5152_s27 }
 0x19c   :  { %s5157_s21 = sld [smem:[#allocation40_spill]]  ;;  %v734_v25 = vmul.f32 %v733_v20, %v3131_v1  ;;  %v3264_v42 = vmax.f32 %v715_v30, 0.0 }
 0x19d   :  { %s5158_s5 = sld [smem:[#allocation41_spill]]  ;;  %v736_v21 = vstv %s5153_s28 }
 0x19e   :  { %5154 = sst [smem:[#allocation36_spill]] %s3221_s13  ;;  %v737_v27 = vmul.f32 %v736_v21, %v3145_v10  ;;  %v735_v32 = vadd.f32 %v734_v25, %v732_v18 }
 0x19f   :  { %5155 = sst [smem:[#allocation37_spill]] %s3228_s29 }
 0x1a0   :  { %s3232_s20 = sld [smem:[#allocation9 + $0x4f]]  ;;  %v738_v39 = vadd.f32 %v737_v27, %v735_v32 }
 0x1a1   :  { %s3238_s4 = sld [smem:[#allocation9 + $0x50]]  ;;  %v728_v26 = vstv %s5156_s30 }
 0x1a2   :  { %s5161_s0 = sld [smem:[#allocation42_spill]]  ;;  %v739_v28 = vstv %s5157_s21  ;;  %v729_v43 = vadd.f32 %v728_v26, %v727_v31 }
 0x1a3   :  { %s5162_s19 = sld [smem:[#allocation43_spill]]  ;;  %v745_v29 = vstv %s5158_s5  ;;  %v740_v33 = vmul.f32 %v739_v28, %v3157_v19 }
 0x1a4   :  { %s5163_s12 = sld [smem:[#allocation44_spill]]  ;;  %v746_v34 = vmul.f32 %v745_v29, %v3129_v0  ;;  %v3284_v60 = vmax.f32 %v729_v43, 0.0 }
 0x1a5   :  { %s3241_s29 = sld [smem:[#allocation9 + $0x51]]  ;;  %v741_v46 = vadd.f32 %v740_v33, %v738_v39 }
 0x1a6   :  { %5159 = sst [smem:[#allocation74_spill]] %s3232_s20 }
 0x1a7   :  { %5160 = sst [smem:[#allocation38_spill]] %s3238_s4 }
 0x1a8   :  { %s5165_s20 = sld [smem:[#allocation76_spill]]  ;;  %v747_v35 = vstv %s5161_s0 }
 0x1a9   :  { %s3247_s27 = sld [smem:[#allocation9 + $0x52]]  ;;  %v750_v36 = vstv %s5162_s19  ;;  %v748_v41 = vmul.f32 %v747_v35, %v3131_v1 }
 0x1aa   :  { %s5167_s28 = sld [smem:[#allocation45_spill]]  ;;  %v753_v37 = vstv %s5163_s12  ;;  %v751_v44 = vmul.f32 %v750_v36, %v3145_v10 }
 0x1ab   :  { %5164 = sst [smem:[#allocation39_spill]] %s3241_s29  ;;  %v749_v47 = vadd.f32 %v748_v41, %v746_v34  ;;  %v754_v48 = vmul.f32 %v753_v37, %v3157_v19 }
 0x1ac   :  { %s3250_s4 = sld [smem:[#allocation9 + $0x53]] }
 0x1ad   :  { %s3256_s30 = sld [smem:[#allocation9 + $0x54]]  ;;  %v752_v56 = vadd.f32 %v751_v44, %v749_v47 }
 0x1ae   :  { %s5170_s29 = sld [smem:[#allocation77_spill]]  ;;  %v742_v40 = vstv %s5165_s20 }
 0x1af   :  { %5166 = sst [smem:[#allocation75_spill]] %s3247_s27  ;;  %v743_v55 = vadd.f32 %v742_v40, %v741_v46  ;;  %v755_v2 = vadd.f32 %v754_v48, %v752_v56 }
 0x1b0   :  { %s5171_s5 = sld [smem:[#allocation46_spill]]  ;;  %v759_v45 = vstv %s5167_s28 }
 0x1b1   :  { %s5172_s21 = sld [smem:[#allocation47_spill]]  ;;  %v760_v49 = vmul.f32 %v759_v45, %v3129_v0  ;;  %v3301_v12 = vmax.f32 %v743_v55, 0.0 }
 0x1b2   :  { %5168 = sst [smem:[#allocation40_spill]] %s3250_s4 }
 0x1b3   :  { %5169 = sst [smem:[#allocation41_spill]] %s3256_s30 }
 0x1b4   :  { %s5173_s27 = sld [smem:[#allocation48_spill]]  ;;  %v756_v51 = vstv %s5170_s29 }
 0x1b5   :  { %s3262_s13 = sld [smem:[#allocation9 + $0x55]]  ;;  %v757_v21 = vadd.f32 %v756_v51, %v755_v2 }
 0x1b6   :  { %s3268_s0 = sld [smem:[#allocation9 + $0x56]]  ;;  %v761_v52 = vstv %s5171_s5 }
 0x1b7   :  { %s5176_s19 = sld [smem:[#allocation49_spill]]  ;;  %v764_v53 = vstv %s5172_s21  ;;  %v762_v57 = vmul.f32 %v761_v52, %v3131_v1  ;;  %v3330_v37 = vmax.f32 %v757_v21, 0.0 }
 0x1b8   :  { %s5177_s12 = sld [smem:[#allocation50_spill]]  ;;  %v765_v59 = vmul.f32 %v764_v53, %v3145_v10 }
 0x1b9   :  { %s5178_s20 = sld [smem:[#allocation51_spill]]  ;;  %v763_v3 = vadd.f32 %v762_v57, %v760_v49 }
 0x1ba   :  { %s3272_s30 = sld [smem:[#allocation9 + $0x57]]  ;;  %v767_v54 = vstv %s5173_s27 }
 0x1bb   :  { %5174 = sst [smem:[#allocation42_spill]] %s3262_s13  ;;  %v768_v4 = vmul.f32 %v767_v54, %v3157_v19  ;;  %v766_v13 = vadd.f32 %v765_v59, %v763_v3 }
 0x1bc   :  { %5175 = sst [smem:[#allocation43_spill]] %s3268_s0 }
 0x1bd   :  { %s3278_s13 = sld [smem:[#allocation9 + $0x58]]  ;;  %v773_v61 = vstv %s5176_s19  ;;  %v769_v22 = vadd.f32 %v768_v4, %v766_v13 }
 0x1be   :  { %s5181_s28 = sld [smem:[#allocation78_spill]]  ;;  %v775_v62 = vstv %s5177_s12  ;;  %v774_v5 = vmul.f32 %v773_v61, %v3129_v0 }
 0x1bf   :  { %s5182_s0 = sld [smem:[#allocation52_spill]]  ;;  %v778_v63 = vstv %s5178_s20  ;;  %v776_v7 = vmul.f32 %v775_v62, %v3131_v1 }
 0x1c0   :  { %5179 = sst [smem:[#allocation44_spill]] %s3272_s30  ;;  %v779_v9 = vmul.f32 %v778_v63, %v3145_v10 }
 0x1c1   :  { %s3282_s4 = sld [smem:[#allocation9 + $0x59]]  ;;  %v777_v16 = vadd.f32 %v776_v7, %v774_v5 }
 0x1c2   :  { %s5184_s29 = sld [smem:[#allocation53_spill]] }
 0x1c3   :  { %5180 = sst [smem:[#allocation76_spill]] %s3278_s13  ;;  %v780_v25 = vadd.f32 %v779_v9, %v777_v16 }
 0x1c4   :  { %s3289_s5 = sld [smem:[#allocation9 + $0x5a]]  ;;  %v770_v6 = vstv %s5181_s28 }
 0x1c5   :  { %s5186_s27 = sld [smem:[#allocation54_spill]]  ;;  %v781_v11 = vstv %s5182_s0  ;;  %v771_v29 = vadd.f32 %v770_v6, %v769_v22 }
 0x1c6   :  { %s5187_s21 = sld [smem:[#allocation55_spill]]  ;;  %v782_v14 = vmul.f32 %v781_v11, %v3157_v19 }
 0x1c7   :  { %5183 = sst [smem:[#allocation45_spill]] %s3282_s4  ;;  %v3345_v52 = vmax.f32 %v771_v29, 0.0 }
 0x1c8   :  { %s3293_s13 = sld [smem:[#allocation9 + $0x5b]]  ;;  %v787_v15 = vstv %s5184_s29  ;;  %v783_v33 = vadd.f32 %v782_v14, %v780_v25 }
 0x1c9   :  { %s3299_s19 = sld [smem:[#allocation9 + $0x5c]]  ;;  %v788_v17 = vmul.f32 %v787_v15, %v3129_v0 }
 0x1ca   :  { %5185 = sst [smem:[#allocation77_spill]] %s3289_s5 }
 0x1cb   :  { %s5190_s12 = sld [smem:[#allocation79_spill]]  ;;  %v789_v18 = vstv %s5186_s27 }
 0x1cc   :  { %s5191_s20 = sld [smem:[#allocation56_spill]]  ;;  %v792_v20 = vstv %s5187_s21  ;;  %v790_v23 = vmul.f32 %v789_v18, %v3131_v1 }
 0x1cd   :  { %s5192_s5 = sld [smem:[#allocation57_spill]]  ;;  %v793_v24 = vmul.f32 %v792_v20, %v3145_v10 }
 0x1ce   :  { %5188 = sst [smem:[#allocation46_spill]] %s3293_s13  ;;  %v791_v30 = vadd.f32 %v790_v23, %v788_v17 }
 0x1cf   :  { %5189 = sst [smem:[#allocation47_spill]] %s3299_s19 }
 0x1d0   :  { %s3305_s4 = sld [smem:[#allocation9 + $0x5d]]  ;;  %v794_v39 = vadd.f32 %v793_v24, %v791_v30 }
 0x1d1   :  { %s3310_s28 = sld [smem:[#allocation9 + $0x5e]]  ;;  %v784_v26 = vstv %s5190_s12 }
 0x1d2   :  { %s5195_s0 = sld [smem:[#allocation58_spill]]  ;;  %v795_v27 = vstv %s5191_s20  ;;  %v785_v43 = vadd.f32 %v784_v26, %v783_v33 }
 0x1d3   :  { %s5196_s19 = sld [smem:[#allocation59_spill]]  ;;  %v801_v28 = vstv %s5192_s5  ;;  %v796_v31 = vmul.f32 %v795_v27, %v3157_v19 }
 0x1d4   :  { %s5197_s13 = sld [smem:[#allocation60_spill]]  ;;  %v802_v32 = vmul.f32 %v801_v28, %v3129_v0  ;;  %v3352_v56 = vmax.f32 %v785_v43, 0.0 }
 0x1d5   :  { %s3314_s30 = sld [smem:[#allocation9 + $0x5f]]  ;;  %v797_v47 = vadd.f32 %v796_v31, %v794_v39 }
 0x1d6   :  { %5193 = sst [smem:[#allocation48_spill]] %s3305_s4 }
 0x1d7   :  { %5194 = sst [smem:[#allocation49_spill]] %s3310_s28 }
 0x1d8   :  { %s3319_s29 = sld [smem:[#allocation9 + $0x60]]  ;;  %v803_v34 = vstv %s5195_s0 }
 0x1d9   :  { %s5200_s27 = sld [smem:[#allocation80_spill]]  ;;  %v806_v35 = vstv %s5196_s19  ;;  %v804_v40 = vmul.f32 %v803_v34, %v3131_v1 }
 0x1da   :  { %s5201_s21 = sld [smem:[#allocation61_spill]]  ;;  %v809_v36 = vstv %s5197_s13  ;;  %v807_v41 = vmul.f32 %v806_v35, %v3145_v10 }
 0x1db   :  { %5198 = sst [smem:[#allocation50_spill]] %s3314_s30  ;;  %v810_v45 = vmul.f32 %v809_v36, %v3157_v19  ;;  %v805_v48 = vadd.f32 %v804_v40, %v802_v32 }
 0x1dc   :  { %s3323_s28 = sld [smem:[#allocation9 + $0x61]] }
 0x1dd   :  { %s5203_s30 = sld [smem:[#allocation62_spill]]  ;;  %v808_v57 = vadd.f32 %v807_v41, %v805_v48 }
 0x1de   :  { %5199 = sst [smem:[#allocation51_spill]] %s3319_s29 }
 0x1df   :  { %s3328_s12 = sld [smem:[#allocation9 + $0x62]]  ;;  %v798_v44 = vstv %s5200_s27  ;;  %v811_v5 = vadd.f32 %v810_v45, %v808_v57 }
 0x1e0   :  { %s5205_s5 = sld [smem:[#allocation63_spill]]  ;;  %v815_v46 = vstv %s5201_s21  ;;  %v799_v4 = vadd.f32 %v798_v44, %v797_v47 }
 0x1e1   :  { %s5206_s20 = sld [smem:[#allocation64_spill]]  ;;  %v816_v49 = vmul.f32 %v815_v46, %v3129_v0 }
 0x1e2   :  { %5202 = sst [smem:[#allocation78_spill]] %s3323_s28  ;;  %v3381_v24 = vmax.f32 %v799_v4, 0.0 }
 0x1e3   :  { %s3334_s29 = sld [smem:[#allocation9 + $0x63]]  ;;  %v817_v51 = vstv %s5203_s30 }
 0x1e4   :  { %s5208_s0 = sld [smem:[#allocation81_spill]]  ;;  %v818_v53 = vmul.f32 %v817_v51, %v3131_v1 }
 0x1e5   :  { %5204 = sst [smem:[#allocation52_spill]] %s3328_s12 }
 0x1e6   :  { %s3339_s13 = sld [smem:[#allocation9 + $0x64]]  ;;  %v820_v54 = vstv %s5205_s5  ;;  %v819_v62 = vadd.f32 %v818_v53, %v816_v49 }
 0x1e7   :  { %s5210_s19 = sld [smem:[#allocation65_spill]]  ;;  %v823_v55 = vstv %s5206_s20  ;;  %v821_v61 = vmul.f32 %v820_v54, %v3145_v10 }
 0x1e8   :  { %s5211_s12 = sld [smem:[#allocation66_spill]]  ;;  %v824_v63 = vmul.f32 %v823_v55, %v3157_v19 }
 0x1e9   :  { %5207 = sst [smem:[#allocation53_spill]] %s3334_s29  ;;  %v822_v9 = vadd.f32 %v821_v61, %v819_v62 }
 0x1ea   :  { %s3343_s28 = sld [smem:[#allocation9 + $0x65]]  ;;  %v812_v59 = vstv %s5208_s0 }
 0x1eb   :  { %s3350_s27 = sld [smem:[#allocation9 + $0x66]]  ;;  %v813_v15 = vadd.f32 %v812_v59, %v811_v5  ;;  %v825_v20 = vadd.f32 %v824_v63, %v822_v9 }
 0x1ec   :  { %5209 = sst [smem:[#allocation54_spill]] %s3339_s13 }
 0x1ed   :  { %s5214_s21 = sld [smem:[#allocation82_spill]]  ;;  %v829_v2 = vstv %s5210_s19  ;;  %v3387_v28 = vmax.f32 %v813_v15, 0.0 }
 0x1ee   :  { %s5215_s13 = sld [smem:[#allocation67_spill]]  ;;  %v831_v3 = vstv %s5211_s12  ;;  %v830_v6 = vmul.f32 %v829_v2, %v3129_v0 }
 0x1ef   :  { %s5216_s29 = sld [smem:[#allocation68_spill]]  ;;  %v832_v7 = vmul.f32 %v831_v3, %v3131_v1 }
 0x1f0   :  { %5212 = sst [smem:[#allocation55_spill]] %s3343_s28 }
 0x1f1   :  { %5213 = sst [smem:[#allocation79_spill]] %s3350_s27  ;;  %v833_v16 = vadd.f32 %v832_v7, %v830_v6 }
 0x1f2   :  { %s3356_s30 = sld [smem:[#allocation9 + $0x67]] }
 0x1f3   :  { %s3361_s5 = sld [smem:[#allocation9 + $0x68]]  ;;  %v826_v11 = vstv %s5214_s21 }
 0x1f4   :  { %s5219_s20 = sld [smem:[#allocation69_spill]]  ;;  %v834_v13 = vstv %s5215_s13 }
 0x1f5   :  { %s5220_s27 = sld [smem:[#allocation70_spill]]  ;;  %v837_v14 = vstv %s5216_s29  ;;  %v835_v17 = vmul.f32 %v834_v13, %v3145_v10 }
 0x1f6   :  { %s5221_s0 = sld [smem:[#allocation71_spill]]  ;;  %v838_v18 = vmul.f32 %v837_v14, %v3157_v19 }
 0x1f7   :  { %s3365_s28 = sld [smem:[#allocation9 + $0x69]]  ;;  %v836_v25 = vadd.f32 %v835_v17, %v833_v16 }
 0x1f8   :  { %5217 = sst [smem:[#allocation56_spill]] %s3356_s30 }
 0x1f9   :  { %5218 = sst [smem:[#allocation57_spill]] %s3361_s5  ;;  %v839_v32 = vadd.f32 %v838_v18, %v836_v25 }
 0x1fa   :  { %s3370_s30 = sld [smem:[#allocation9 + $0x6a]]  ;;  %v843_v21 = vstv %s5219_s20 }
 0x1fb   :  { %s5224_s12 = sld [smem:[#allocation83_spill]]  ;;  %v845_v22 = vstv %s5220_s27  ;;  %v844_v26 = vmul.f32 %v843_v21, %v3129_v0 }
 0x1fc   :  { %s5225_s19 = sld [smem:[#allocation72_spill]]  ;;  %v848_v23 = vstv %s5221_s0  ;;  %v846_v27 = vmul.f32 %v845_v22, %v3131_v1  ;;  %v827_v1 = vadd.f32 %v826_v11, %v825_v20 }
 0x1fd   :  { %5222 = sst [smem:[#allocation58_spill]] %s3365_s28  ;;  %v849_v30 = vmul.f32 %v848_v23, %v3145_v10 }
 0x1fe   :  { %s3374_s5 = sld [smem:[#allocation9 + $0x6b]]  ;;  %v847_v33 = vadd.f32 %v846_v27, %v844_v26  ;;  %v3417_v53 = vmax.f32 %v827_v1, 0.0 }
 0x1ff   :  { %s5227_s28 = sld [smem:[#allocation85_spill]] }
 0x200   :  { %5223 = sst [smem:[#allocation59_spill]] %s3370_s30  ;;  %v850_v40 = vadd.f32 %v849_v30, %v847_v33 }
 0x201   :  { %s3379_s21 = sld [smem:[#allocation9 + $0x6c]]  ;;  %v840_v29 = vstv %s5224_s12 }
 0x202   :  { %s5229_s29 = sld [smem:[#allocation86_spill]]  ;;  %v851_v31 = vstv %s5225_s19  ;;  %v841_v39 = vadd.f32 %v840_v29, %v839_v32 }
 0x203   :  { %s5230_s13 = sld [smem:[#allocation87_spill]]  ;;  %v852_v0 = vmul.f32 %v851_v31, %v3157_v19 }
 0x204   :  { %5226 = sst [smem:[#allocation60_spill]] %s3374_s5  ;;  %v3419_v54 = vmax.f32 %v841_v39, 0.0 }
 0x205   :  { %s3385_s30 = sld [smem:[#allocation9 + $0x6d]]  ;;  %v857_v34 = vstv %s5227_s28  ;;  %v853_v47 = vadd.f32 %v852_v0, %v850_v40 }
 0x206   :  { %s3392_s27 = sld [smem:[#allocation9 + $0x6e]]  ;;  %v858_v35 = vmul.f32 %v857_v34, %v3195_v50 }
 0x207   :  { %5228 = sst [smem:[#allocation80_spill]] %s3379_s21 }
 0x208   :  { %s5233_s20 = sld [smem:[#allocation84_spill]]  ;;  %v859_v36 = vstv %s5229_s29 }
 0x209   :  { %s5234_s0 = sld [smem:[#allocation88_spill]]  ;;  %v862_v10 = vstv %s5230_s13  ;;  %v860_v41 = vmul.f32 %v859_v36, %v3207_v58 }
 0x20a   :  { %s5235_s21 = sld [smem:[#allocation89_spill]]  ;;  %v863_v43 = vmul.f32 %v862_v10, %v3223_v8 }
 0x20b   :  { %5231 = sst [smem:[#allocation61_spill]] %s3385_s30  ;;  %v861_v48 = vadd.f32 %v860_v41, %v858_v35 }
 0x20c   :  { %5232 = sst [smem:[#allocation62_spill]] %s3392_s27 }
 0x20d   :  { %s5236_s5 = sld [smem:[#allocation90_spill]]  ;;  %v864_v61 = vadd.f32 %v863_v43, %v861_v48 }
 0x20e   :  { %s3396_s4 = sld [smem:[#allocation9 + $0x6f]]  ;;  %v854_v19 = vstv %s5233_s20 }
 0x20f   :  { %s5238_s12 = sld [smem:[#allocation91_spill]]  ;;  %v865_v44 = vstv %s5234_s0  ;;  %v855_v59 = vadd.f32 %v854_v19, %v853_v47 }
 0x210   :  { %s3401_s19 = sld [smem:[#allocation9 + $0x70]]  ;;  %v868_v45 = vstv %s5235_s21  ;;  %v866_v49 = vmul.f32 %v865_v44, %v3258_v38 }
 0x211   :  { %s5240_s27 = sld [smem:[#allocation92_spill]]  ;;  %v869_v55 = vmul.f32 %v868_v45, %v3264_v42  ;;  %v3435_v6 = vmax.f32 %v855_v59, 0.0 }
 0x212   :  { %s3405_s30 = sld [smem:[#allocation9 + $0x71]]  ;;  %v867_v7 = vadd.f32 %v866_v49, %v864_v61 }
 0x213   :  { %s5242_s28 = sld [smem:[#allocation93_spill]]  ;;  %v871_v46 = vstv %s5236_s5 }
 0x214   :  { %5237 = sst [smem:[#allocation63_spill]] %s3396_s4  ;;  %v872_v62 = vmul.f32 %v871_v46, %v3284_v60  ;;  %v870_v17 = vadd.f32 %v869_v55, %v867_v7 }
 0x215   :  { %s3411_s4 = sld [smem:[#allocation9 + $0x72]]  ;;  %v874_v51 = vstv %s5238_s12 }
 0x216   :  { %5239 = sst [smem:[#allocation64_spill]] %s3401_s19  ;;  %v875_v2 = vmul.f32 %v874_v51, %v3301_v12  ;;  %v873_v27 = vadd.f32 %v872_v62, %v870_v17 }
 0x217   :  { %s5244_s29 = sld [smem:[#allocation94_spill]]  ;;  %v877_v57 = vstv %s5240_s27 }
 0x218   :  { %5241 = sst [smem:[#allocation81_spill]] %s3405_s30  ;;  %v878_v9 = vmul.f32 %v877_v57, %v3330_v37  ;;  %v876_v1 = vadd.f32 %v875_v2, %v873_v27 }
 0x219   :  { %s5245_s13 = sld [smem:[#allocation95_spill]]  ;;  %v880_v63 = vstv %s5242_s28 }
 0x21a   :  { %s5246_s19 = sld [smem:[#allocation96_spill]]  ;;  %v881_v11 = vmul.f32 %v880_v63, %v3345_v52  ;;  %v879_v19 = vadd.f32 %v878_v9, %v876_v1 }
 0x21b   :  { %5243 = sst [smem:[#allocation65_spill]] %s3411_s4 }
 0x21c   :  { %s3415_s26 = sld [smem:[#allocation9 + $0x73]]  ;;  %v882_v55 = vadd.f32 %v881_v11, %v879_v19 }
 0x21d   :  { %s3423_s5 = sld [smem:[#allocation9 + $0x74]]  ;;  %v883_v3 = vstv %s5244_s29 }
 0x21e   :  { %s5249_s21 = sld [smem:[#allocation97_spill]]  ;;  %v884_v13 = vmul.f32 %v883_v3, %v3352_v56 }
 0x21f   :  { %s5250_s20 = sld [smem:[#allocation98_spill]]  ;;  %v886_v4 = vstv %s5245_s13 }
 0x220   :  { %s3427_s0 = sld [smem:[#allocation11]]  ;;  %v889_v5 = vstv %s5246_s19  ;;  %v3443_v14 = vmul.f32 %v886_v4, %v3381_v24  ;;  %v885_v4 = vadd.f32 %v884_v13, %v882_v55 }
 0x221   :  { %s5251_s12 = sld [smem:[#allocation99_spill]]  ;;  %v3450_v18 = vmul.f32 %v889_v5, %v3387_v28 }
 0x222   :  { %5247 = sst [smem:[#allocation66_spill]] %s3415_s26  ;;  %v888_v13 = vadd.f32 %v3443_v14, %v885_v4 }
 0x223   :  { %5248 = sst [smem:[#allocation82_spill]] %s3423_s5 }
 0x224   :  { %s3433_s26 = sld [smem:[#allocation9 + $0x75]]  ;;  %v892_v15 = vstv %s5249_s21 }
 0x225   :  { %s5253_s27 = sld [smem:[#allocation100_spill]]  ;;  %v895_v16 = vstv %s5250_s20  ;;  %v3453_v20 = vmul.f32 %v892_v15, %v3417_v53 }
 0x226   :  { %s5254_s5 = sld [smem:[#allocation101_spill]]  ;;  %v3459_v22 = vmul.f32 %v895_v16, %v3419_v54  ;;  %v901_v39 = vstv %s3427_s0 }
 0x227   :  { %s5255_s4 = sld [smem:[#allocation102_spill]]  ;;  %v898_v21 = vstv %s5251_s12 }
 0x228   :  { %s3439_s28 = sld [smem:[#allocation9 + $0x76]]  ;;  %v3478_v35 = vmul.f32 %v898_v21, %v3435_v6 }
 0x229   :  { %s3447_s19 = sld [smem:[#allocation9 + $0x77]] }
 0x22a   :  { %5252 = sst [smem:[#allocation67_spill]] %s3433_s26 }
 0x22b   :  { %s5258_s29 = sld [smem:[#allocation103_spill]]  ;;  %v904_v23 = vstv %s5253_s27 }
 0x22c   :  { %s5259_s13 = sld [smem:[#allocation104_spill]]  ;;  %v906_v25 = vstv %s5254_s5  ;;  %v905_v29 = vmul.f32 %v904_v23, %v3195_v50 }
 0x22d   :  { %s5260_s26 = sld [smem:[#allocation105_spill]]  ;;  %v909_v26 = vstv %s5255_s4  ;;  %v907_v30 = vmul.f32 %v906_v25, %v3207_v58 }
 0x22e   :  { %5256 = sst [smem:[#allocation68_spill]] %s3439_s28  ;;  %v910_v31 = vmul.f32 %v909_v26, %v3223_v8 }
 0x22f   :  { %5257 = sst [smem:[#allocation69_spill]] %s3447_s19  ;;  %v908_v36 = vadd.f32 %v907_v30, %v905_v29 }
 0x230   :  { %s5261_s28 = sld [smem:[#allocation106_spill]] }
 0x231   :  { %s3456_s30 = sld [smem:[#allocation9 + $0x78]]  ;;  %v912_v32 = vstv %s5258_s29  ;;  %v911_v44 = vadd.f32 %v910_v31, %v908_v36  ;;  %v891_v31 = vadd.f32 %v3450_v18, %v888_v13 }
 0x232   :  { %s3464_s21 = sld [smem:[#allocation9 + $0x79]]  ;;  %v915_v33 = vstv %s5259_s13  ;;  %v913_v10 = vmul.f32 %v912_v32, %v3258_v38 }
 0x233   :  { %s5264_s20 = sld [smem:[#allocation107_spill]]  ;;  %v918_v0 = vstv %s5260_s26  ;;  %v916_v40 = vmul.f32 %v915_v33, %v3264_v42  ;;  %v894_v18 = vadd.f32 %v3453_v20, %v891_v31 }
 0x234   :  { %s5265_s19 = sld [smem:[#allocation108_spill]]  ;;  %v919_v45 = vmul.f32 %v918_v0, %v3284_v60  ;;  %v914_v57 = vadd.f32 %v913_v10, %v911_v44 }
 0x235   :  { %s3469_s12 = sld [smem:[#allocation9 + $0x7a]] }
 0x236   :  { %v921_v34 = vstv %s5261_s28  ;;  %s3475_s5 = sld [smem:[#allocation9 + $0x7b]]  ;;  %v917_v5 = vadd.f32 %v916_v40, %v914_v57 }
 0x237   :  { %5262 = sst [smem:[#allocation70_spill]] %s3456_s30  ;;  %v922_v46 = vmul.f32 %v921_v34, %v3301_v12 }
 0x238   :  { %5263 = sst [smem:[#allocation71_spill]] %s3464_s21  ;;  %v920_v21 = vadd.f32 %v919_v45, %v917_v5 }
 0x239   :  { %s5267_s4 = sld [smem:[#allocation109_spill]]  ;;  %v924_v41 = vstv %s5264_s20 }
 0x23a   :  { %s5268_s27 = sld [smem:[#allocation110_spill]]  ;;  %v927_v43 = vstv %s5265_s19  ;;  %v925_v59 = vmul.f32 %v924_v41, %v3330_v37  ;;  %v923_v14 = vadd.f32 %v922_v46, %v920_v21  ;;  %v971_v41 = vstv %s3081_s16 }
 0x23b   :  { %s5269_s21 = sld [smem:[#allocation111_spill]]  ;;  %v928_v61 = vmul.f32 %v927_v43, %v3345_v52  ;;  %v897_v46 = vadd.f32 %v3459_v22, %v894_v18 }
 0x23c   :  { %5266 = sst [smem:[#allocation83_spill]] %s3475_s5  ;;  %v926_v10 = vadd.f32 %v925_v59, %v923_v14 }
 0x23d   :  { %s5270_s30 = sld [smem:[#allocation112_spill]]  ;;  %v900_v59 = vadd.f32 %v3478_v35, %v897_v46  ;;  %v1021_v46 = vstv %s3113_s9 }
 0x23e   :  { %s3481_s3 = sld [smem:[#allocation9 + $0x7c]] }
 0x23f   :  { %s3487_s26 = sld [smem:[#allocation9 + $0x7d]]  ;;  %v930_v47 = vstv %s5267_s4  ;;  %v902_v13 = vadd.f32 %v901_v39, %v900_v59  ;;  %v1033_v59 = vstv %s3121_s17 }
 0x240   :  { %s5273_s28 = sld [smem:[#allocation113_spill]]  ;;  %v933_v48 = vstv %s5268_s27  ;;  %v931_v62 = vmul.f32 %v930_v47, %v3352_v56  ;;  %v929_v47 = vadd.f32 %v928_v61, %v926_v10  ;;  %v1015_v10 = vstv %s3109_s14 }
 0x241   :  { %s3491_s29 = sld [smem:[#allocation11 + $0x1]]  ;;  %v936_v49 = vstv %s5269_s21  ;;  %v3505_v63 = vmul.f32 %v933_v48, %v3381_v24 }
 0x242   :  { %s5274_s13 = sld [smem:[#allocation114_spill]]  ;;  %v3508_v2 = vmul.f32 %v936_v49, %v3387_v28  ;;  %v972_v49 = vmul.f32 %v971_v41, %v3330_v37  ;;  %v932_v22 = vadd.f32 %v931_v62, %v929_v47  ;;  %v3621_v41 = vmax.f32 %v902_v13, 0.0 }
 0x243   :  { %v939_v51 = vstv %s5270_s30  ;;  %s5275_s19 = sld [smem:[#allocation115_spill]]  ;;  %v1024_v47 = vstv %s3115_s15  ;;  %v3659_v13 = vmul.f32 %v1033_v59, %v3417_v53 }
 0x244   :  { %5271 = sst [smem:[#allocation72_spill]] %s3481_s3  ;;  %v3514_v7 = vmul.f32 %v939_v51, %v3417_v53  ;;  %v935_v35 = vadd.f32 %v3505_v63, %v932_v22 }
 0x245   :  { %5272 = sst [smem:[#allocation85_spill]] %s3487_s26 }
 0x246   :  { %s3497_s3 = sld [smem:[#allocation9 + $0x7e]]  ;;  %v942_v3 = vstv %s5273_s28 }
 0x247   :  { %s5276_s20 = sld [smem:[#allocation116_spill]]  ;;  %v3520_v11 = vmul.f32 %v942_v3, %v3419_v54  ;;  %v948_v34 = vstv %s3491_s29 }
 0x248   :  { %s5277_s26 = sld [smem:[#allocation117_spill]]  ;;  %v945_v9 = vstv %s5274_s13 }
 0x249   :  { %s3501_s5 = sld [smem:[#allocation9 + $0x7f]]  ;;  %v951_v15 = vstv %s5275_s19  ;;  %v3543_v0 = vmul.f32 %v945_v9, %v3435_v6 }
 0x24a   :  { %s3511_s30 = sld [smem:[#allocation9 + $0x80]]  ;;  %v952_v23 = vmul.f32 %v951_v15, %v3195_v50 }
 0x24b   :  { %s5280_s21 = sld [smem:[#allocation118_spill]] }
 0x24c   :  { %s5281_s4 = sld [smem:[#allocation119_spill]] }
 0x24d   :  { %s5282_s27 = sld [smem:[#allocation120_spill]]  ;;  %v953_v16 = vstv %s5276_s20 }
 0x24e   :  { %v956_v17 = vstv %s5277_s26  ;;  %s3525_s28 = sld [smem:[#allocation9 + $0x82]]  ;;  %v954_v25 = vmul.f32 %v953_v16, %v3207_v58 }
 0x24f   :  { %5278 = sst [smem:[#allocation86_spill]] %s3501_s5  ;;  %v957_v26 = vmul.f32 %v956_v17, %v3223_v8 }
 0x250   :  { %5279 = sst [smem:[#allocation87_spill]] %s3511_s30  ;;  %v955_v32 = vadd.f32 %v954_v25, %v952_v23 }
 0x251   :  { %s3517_s5 = sld [smem:[#allocation9 + $0x81]]  ;;  %v959_v27 = vstv %s5280_s21 }
 0x252   :  { %s5285_s30 = sld [smem:[#allocation121_spill]]  ;;  %v962_v29 = vstv %s5281_s4  ;;  %v960_v33 = vmul.f32 %v959_v27, %v3258_v38  ;;  %v958_v40 = vadd.f32 %v957_v26, %v955_v32  ;;  %v938_v26 = vadd.f32 %v3508_v2, %v935_v35 }
 0x253   :  { %s3530_s13 = sld [smem:[#allocation9 + $0x83]]  ;;  %v965_v30 = vstv %s5282_s27  ;;  %v963_v1 = vmul.f32 %v962_v29, %v3264_v42 }
 0x254   :  { %5284 = sst [smem:[#allocation88_spill]] %s3525_s28  ;;  %v966_v43 = vmul.f32 %v965_v30, %v3284_v60  ;;  %v961_v48 = vadd.f32 %v960_v33, %v958_v40  ;;  %v941_v2 = vadd.f32 %v3514_v7, %v938_v26  ;;  %v1018_v40 = vstv %s3111_s11 }
 0x255   :  { %s3536_s26 = sld [smem:[#allocation11 + $0x2]] }
 0x256   :  { %s5287_s19 = sld [smem:[#allocation122_spill]]  ;;  %v964_v61 = vadd.f32 %v963_v1, %v961_v48  ;;  %v944_v7 = vadd.f32 %v3520_v11, %v941_v2  ;;  %v1016_v11 = vmul.f32 %v1015_v10, %v3301_v12  ;;  %v1053_v2 = vstv %s3151_s10 }
 0x257   :  { %5283 = sst [smem:[#allocation84_spill]] %s3517_s5 }
 0x258   :  { %s5288_s20 = sld [smem:[#allocation123_spill]]  ;;  %v968_v36 = vstv %s5285_s30  ;;  %v967_v62 = vadd.f32 %v966_v43, %v964_v61  ;;  %v947_v48 = vadd.f32 %v3543_v0, %v944_v7  ;;  %v1022_v0 = vmul.f32 %v1021_v46, %v3345_v52 }
 0x259   :  { %5286 = sst [smem:[#allocation89_spill]] %s3530_s13  ;;  %v969_v19 = vmul.f32 %v968_v36, %v3301_v12  ;;  %v1062_v7 = vstv %s3167_s1 }
 0x25a   :  { %s3540_s28 = sld [smem:[#allocation9 + $0x84]]  ;;  %v949_v22 = vadd.f32 %v948_v34, %v947_v48  ;;  %v1068_v48 = vstv %s3176_s25 }
 0x25b   :  { %s5290_s21 = sld [smem:[#allocation124_spill]]  ;;  %v995_v17 = vstv %s3536_s26  ;;  %v970_v27 = vadd.f32 %v969_v19, %v967_v62 }
 0x25c   :  { %s3548_s4 = sld [smem:[#allocation9 + $0x85]]  ;;  %v974_v44 = vstv %s5287_s19  ;;  %v3655_v34 = vmax.f32 %v949_v22, 0.0 }
 0x25d   :  { %s5292_s27 = sld [smem:[#allocation125_spill]]  ;;  %v975_v51 = vmul.f32 %v974_v44, %v3345_v52  ;;  %v973_v32 = vadd.f32 %v972_v49, %v970_v27  ;;  %v1019_v49 = vmul.f32 %v1018_v40, %v3330_v37  ;;  %v1047_v27 = vstv %s3137_s8 }
 0x25e   :  { %s5293_s13 = sld [smem:[#allocation126_spill]]  ;;  %v977_v45 = vstv %s5288_s20  ;;  %v1059_v40 = vstv %s3163_s23 }
 0x25f   :  { %s3552_s5 = sld [smem:[#allocation9 + $0x86]]  ;;  %v978_v3 = vmul.f32 %v977_v45, %v3352_v56  ;;  %v976_v43 = vadd.f32 %v975_v51, %v973_v32  ;;  %v1056_v32 = vstv %s3155_s22 }
 0x260   :  { %5289 = sst [smem:[#allocation90_spill]] %s3540_s28 }
 0x261   :  { %s3558_s28 = sld [smem:[#allocation9 + $0x87]]  ;;  %v980_v20 = vstv %s5290_s21 }
 0x262   :  { %5291 = sst [smem:[#allocation91_spill]] %s3548_s4  ;;  %v981_v4 = vmul.f32 %v980_v20, %v3381_v24  ;;  %v979_v20 = vadd.f32 %v978_v3, %v976_v43  ;;  %v1025_v3 = vmul.f32 %v1024_v47, %v3352_v56  ;;  %v1065_v43 = vstv %s3172_s24 }
 0x263   :  { %s5296_s30 = sld [smem:[#allocation127_spill]]  ;;  %v983_v55 = vstv %s5292_s27  ;;  %v1060_v47 = vmul.f32 %v1059_v40, %v3284_v60 }
 0x264   :  { %s3562_s4 = sld [smem:[#allocation9 + $0x88]]  ;;  %v986_v57 = vstv %s5293_s13  ;;  %v3576_v5 = vmul.f32 %v983_v55, %v3387_v28  ;;  %v1027_v55 = vstv %s3117_s6  ;;  %v982_v61 = vadd.f32 %v981_v4, %v979_v20 }
 0x265   :  { %5294 = sst [smem:[#allocation92_spill]] %s3552_s5  ;;  %v3579_v9 = vmul.f32 %v986_v57, %v3417_v53  ;;  %v1028_v35 = vmul.f32 %v1027_v55, %v3381_v24 }
 0x266   :  { %s5298_s16 = sld [smem:[#allocation128_spill]]  ;;  %v985_v4 = vadd.f32 %v3576_v5, %v982_v61 }
 0x267   :  { %5295 = sst [smem:[#allocation93_spill]] %s3558_s28 }
 0x268   :  { %s3568_s19 = sld [smem:[#allocation9 + $0x89]] }
 0x269   :  { %s5300_s20 = sld [smem:[#allocation129_spill]]  ;;  %v989_v15 = vstv %s5296_s30 }
 0x26a   :  { %5297 = sst [smem:[#allocation94_spill]] %s3562_s4  ;;  %v3598_v63 = vmul.f32 %v989_v15, %v3419_v54 }
 0x26b   :  { %s5301_s28 = sld [smem:[#allocation130_spill]] }
 0x26c   :  { %s5302_s21 = sld [smem:[#allocation131_spill]]  ;;  %v992_v16 = vstv %s5298_s16 }
 0x26d   :  { %s3572_s4 = sld [smem:[#allocation9 + $0x8a]]  ;;  %v3611_v33 = vmul.f32 %v992_v16, %v3435_v6  ;;  %v1036_v16 = vstv %s3123_s2 }
 0x26e   :  { %5299 = sst [smem:[#allocation95_spill]] %s3568_s19 }
 0x26f   :  { %s3582_s13 = sld [smem:[#allocation9 + $0x8b]]  ;;  %v998_v21 = vstv %s5300_s20 }
 0x270   :  { %s5304_s27 = sld [smem:[#allocation132_spill]]  ;;  %v999_v29 = vmul.f32 %v998_v21, %v3195_v50  ;;  %v1039_v21 = vstv %s3125_s18 }
 0x271   :  { %s5305_s19 = sld [smem:[#allocation133_spill]]  ;;  %v1000_v23 = vstv %s5301_s28 }
 0x272   :  { %s3587_s5 = sld [smem:[#allocation9 + $0x8c]]  ;;  %v1003_v25 = vstv %s5302_s21  ;;  %v1001_v39 = vmul.f32 %v1000_v23, %v3207_v58 }
 0x273   :  { %5303 = sst [smem:[#allocation96_spill]] %s3572_s4  ;;  %v1004_v30 = vmul.f32 %v1003_v25, %v3223_v8  ;;  %v3665_v25 = vmul.f32 %v1036_v16, %v3419_v54 }
 0x274   :  { %s3594_s4 = sld [smem:[#allocation9 + $0x8d]]  ;;  %v1002_v36 = vadd.f32 %v1001_v39, %v999_v29  ;;  %v988_v29 = vadd.f32 %v3579_v9, %v985_v4  ;;  %v1048_v39 = vmul.f32 %v1047_v27, %v3207_v58 }
 0x275   :  { %s5306_s30 = sld [smem:[#allocation134_spill]] }
 0x276   :  { %s3601_s16 = sld [smem:[#allocation9 + $0x8e]]  ;;  %v1006_v31 = vstv %s5304_s27  ;;  %v1005_v44 = vadd.f32 %v1004_v30, %v1002_v36  ;;  %v1050_v30 = vstv %s3143_s7  ;;  %v991_v9 = vadd.f32 %v3598_v63, %v988_v29 }
 0x277   :  { %v1009_v14 = vstv %s5305_s19  ;;  %s3607_s0 = sld [smem:[#allocation9 + $0x8f]]  ;;  %v1007_v1 = vmul.f32 %v1006_v31, %v3258_v38 }
 0x278   :  { %s3614_s28 = sld [smem:[#allocation9 + $0x90]]  ;;  %v1010_v19 = vmul.f32 %v1009_v14, %v3264_v42  ;;  %v1051_v14 = vmul.f32 %v1050_v30, %v3223_v8 }
 0x279   :  { %s3619_s20 = sld [smem:[#allocation9 + $0x91]]  ;;  %v1008_v51 = vadd.f32 %v1007_v1, %v1005_v44  ;;  %v3684_v1 = vmul.f32 %v1039_v21, %v3435_v6 }
 0x27a   :  { %s5307_s19 = sld [smem:[#allocation135_spill]] }
 0x27b   :  { %v1012_v18 = vstv %s5306_s30  ;;  %s3625_s21 = sld [smem:[#allocation9 + $0x92]]  ;;  %v1011_v15 = vadd.f32 %v1010_v19, %v1008_v51  ;;  %v994_v19 = vadd.f32 %v3611_v33, %v991_v9  ;;  %v1063_v33 = vmul.f32 %v1062_v7, %v3301_v12 }
 0x27c   :  { %v1013_v45 = vmul.f32 %v1012_v18, %v3284_v60  ;;  %s3630_s11 = sld [smem:[#allocation9 + $0x93]]  ;;  %v1054_v18 = vmul.f32 %v1053_v2, %v3258_v38  ;;  %v1066_v51 = vmul.f32 %v1065_v43, %v3330_v37 }
 0x27d   :  { %s3635_s14 = sld [smem:[#allocation9 + $0x94]] }
 0x27e   :  { %s3640_s27 = sld [smem:[#allocation11 + $0x3]]  ;;  %v1014_v23 = vadd.f32 %v1013_v45, %v1011_v15  ;;  %v1057_v45 = vmul.f32 %v1056_v32, %v3264_v42 }
 0x27f   :  { %s5308_s9 = sld [smem:[#allocation136_spill]] }
 0x280   :  { %v1030_v57 = vstv %s5307_s19  ;;  %s3646_s15 = sld [smem:[#allocation9 + $0x95]]  ;;  %v1017_v31 = vadd.f32 %v1016_v11, %v1014_v23  ;;  %v996_v11 = vadd.f32 %v995_v17, %v994_v19  ;;  %v1069_v17 = vmul.f32 %v1068_v48, %v3345_v52 }
 0x281   :  { %v3650_v62 = vmul.f32 %v1030_v57, %v3387_v28  ;;  %s3653_s6 = sld [smem:[#allocation9 + $0x96]] }
 0x282   :  { %s3662_s17 = sld [smem:[#allocation9 + $0x97]]  ;;  %v1020_v10 = vadd.f32 %v1019_v49, %v1017_v31  ;;  %v3715_v61 = vmax.f32 %v996_v11, 0.0 }
 0x283   :  { %s3669_s2 = sld [smem:[#allocation9 + $0x98]] }
 0x284   :  { %s3675_s18 = sld [smem:[#allocation9 + $0x99]]  ;;  %v1042_v63 = vstv %s3640_s27  ;;  %v1023_v46 = vadd.f32 %v1022_v0, %v1020_v10 }
 0x285   :  { %v1045_v26 = vstv %s5308_s9  ;;  %s3680_s8 = sld [smem:[#allocation9 + $0x9a]] }
 0x286   :  { %v1046_v5 = vmul.f32 %v1045_v26, %v3195_v50  ;;  %s5309_s29 = sld [smem:[#allocation137_spill]]  ;;  %v1026_v55 = vadd.f32 %v1025_v3, %v1023_v46 }
 0x287   :  { %s3687_s7 = sld [smem:[#allocation9 + $0x9b]] }
 0x288   :  { %v1049_v36 = vadd.f32 %v1048_v39, %v1046_v5  ;;  %s3692_s10 = sld [smem:[#allocation9 + $0x9c]]  ;;  %v1029_v16 = vadd.f32 %v1028_v35, %v1026_v55 }
 0x289   :  { %s5312_s22 = sld [smem:[#allocation30_spill]] }
 0x28a   :  { %s5313_s30 = sld [smem:[#allocation31_spill]]  ;;  %v1052_v44 = vadd.f32 %v1051_v14, %v1049_v36  ;;  %v1032_v35 = vadd.f32 %v3650_v62, %v1029_v16 }
 0x28b   :  { %s5314_s19 = sld [smem:[#allocation32_spill]] }
 0x28c   :  { %s3697_s9 = sld [smem:[#allocation9 + $0x9d]]  ;;  %v1071_v20 = vstv %s5309_s29  ;;  %v1055_v49 = vadd.f32 %v1054_v18, %v1052_v44  ;;  %v1035_v9 = vadd.f32 %v3659_v13, %v1032_v35 }
 0x28d   :  { %5310 = sst [smem:[#allocation97_spill]] %s3687_s7  ;;  %v1072_v15 = vmul.f32 %v1071_v20, %v3352_v56 }
 0x28e   :  { %5311 = sst [smem:[#allocation98_spill]] %s3692_s10  ;;  %v1058_v0 = vadd.f32 %v1057_v45, %v1055_v49  ;;  %v1038_v19 = vadd.f32 %v3665_v25, %v1035_v9 }
 0x28f   :  { %s3702_s23 = sld [smem:[#allocation9 + $0x9e]]  ;;  %v1074_v57 = vstv %s5312_s22 }
 0x290   :  { %s5317_s1 = sld [smem:[#allocation73_spill]]  ;;  %v1077_v59 = vstv %s5313_s30  ;;  %v1075_v3 = vmul.f32 %v1074_v57, %v3381_v24  ;;  %v1061_v23 = vadd.f32 %v1060_v47, %v1058_v0  ;;  %v1041_v11 = vadd.f32 %v3684_v1, %v1038_v19 }
 0x291   :  { %s3708_s24 = sld [smem:[#allocation11 + $0x4]]  ;;  %v1080_v22 = vstv %s5314_s19  ;;  %v3723_v4 = vmul.f32 %v1077_v59, %v3387_v28 }
 0x292   :  { %5315 = sst [smem:[#allocation99_spill]] %s3697_s9  ;;  %v3729_v26 = vmul.f32 %v1080_v22, %v3417_v53  ;;  %v1064_v31 = vadd.f32 %v1063_v33, %v1061_v23  ;;  %v1043_v22 = vadd.f32 %v1042_v63, %v1041_v11 }
 0x293   :  { %s5318_s9 = sld [smem:[#allocation33_spill]] }
 0x294   :  { %s3713_s10 = sld [smem:[#allocation9 + $0x9f]]  ;;  %v1067_v10 = vadd.f32 %v1066_v51, %v1064_v31  ;;  %v3791_v63 = vmax.f32 %v1043_v22, 0.0 }
 0x295   :  { %5316 = sst [smem:[#allocation100_spill]] %s3702_s23 }
 0x296   :  { %s5320_s25 = sld [smem:[#allocation34_spill]]  ;;  %v1083_v21 = vstv %s5317_s1  ;;  %v1070_v46 = vadd.f32 %v1069_v17, %v1067_v10 }
 0x297   :  { %s5321_s26 = sld [smem:[#allocation35_spill]]  ;;  %v3732_v27 = vmul.f32 %v1083_v21, %v3419_v54  ;;  %v1089_v13 = vstv %s3708_s24 }
 0x298   :  { %s5322_s29 = sld [smem:[#allocation36_spill]]  ;;  %v1073_v51 = vadd.f32 %v1072_v15, %v1070_v46 }
 0x299   :  { %s3719_s23 = sld [smem:[#allocation9 + $0xa0]]  ;;  %v1086_v29 = vstv %s5318_s9 }
 0x29a   :  { %5319 = sst [smem:[#allocation101_spill]] %s3713_s10  ;;  %v3755_v40 = vmul.f32 %v1086_v29, %v3435_v6  ;;  %v1076_v15 = vadd.f32 %v1075_v3, %v1073_v51 }
 0x29b   :  { %s3726_s22 = sld [smem:[#allocation9 + $0xa1]] }
 0x29c   :  { %s5325_s30 = sld [smem:[#allocation37_spill]]  ;;  %v1092_v5 = vstv %s5320_s25  ;;  %v1079_v3 = vadd.f32 %v3723_v4, %v1076_v15 }
 0x29d   :  { %s5326_s19 = sld [smem:[#allocation74_spill]]  ;;  %v1094_v39 = vstv %s5321_s26  ;;  %v1093_v14 = vmul.f32 %v1092_v5, %v3195_v50 }
 0x29e   :  { %s5327_s10 = sld [smem:[#allocation38_spill]]  ;;  %v1097_v30 = vstv %s5322_s29  ;;  %v1095_v2 = vmul.f32 %v1094_v39, %v3207_v58 }
 0x29f   :  { %5323 = sst [smem:[#allocation102_spill]] %s3719_s23  ;;  %v1098_v32 = vmul.f32 %v1097_v30, %v3223_v8 }
 0x2a0   :  { %s3735_s23 = sld [smem:[#allocation9 + $0xa2]]  ;;  %v1096_v7 = vadd.f32 %v1095_v2, %v1093_v14 }
 0x2a1   :  { %5324 = sst [smem:[#allocation103_spill]] %s3726_s22 }
 0x2a2   :  { %s3741_s1 = sld [smem:[#allocation9 + $0xa3]]  ;;  %v1100_v62 = vstv %s5325_s30  ;;  %v1099_v47 = vadd.f32 %v1098_v32, %v1096_v7 }
 0x2a3   :  { %s5330_s22 = sld [smem:[#allocation39_spill]]  ;;  %v1103_v36 = vstv %s5326_s19  ;;  %v1101_v43 = vmul.f32 %v1100_v62, %v3258_v38  ;;  %v1082_v62 = vadd.f32 %v3729_v26, %v1079_v3 }
 0x2a4   :  { %s5331_s7 = sld [smem:[#allocation75_spill]]  ;;  %v1106_v18 = vstv %s5327_s10  ;;  %v1104_v48 = vmul.f32 %v1103_v36, %v3264_v42 }
 0x2a5   :  { %s3746_s9 = sld [smem:[#allocation9 + $0xa4]]  ;;  %v1107_v20 = vmul.f32 %v1106_v18, %v3284_v60  ;;  %v1102_v55 = vadd.f32 %v1101_v43, %v1099_v47  ;;  %v1085_v26 = vadd.f32 %v3732_v27, %v1082_v62 }
 0x2a6   :  { %5328 = sst [smem:[#allocation104_spill]] %s3735_s23 }
 0x2a7   :  { %s3752_s25 = sld [smem:[#allocation11 + $0x5]]  ;;  %v1105_v16 = vadd.f32 %v1104_v48, %v1102_v55 }
 0x2a8   :  { %5329 = sst [smem:[#allocation105_spill]] %s3741_s1 }
 0x2a9   :  { %s5333_s26 = sld [smem:[#allocation40_spill]]  ;;  %v1109_v44 = vstv %s5330_s22  ;;  %v1108_v39 = vadd.f32 %v1107_v20, %v1105_v16 }
 0x2aa   :  { %s5334_s29 = sld [smem:[#allocation41_spill]]  ;;  %v1112_v45 = vstv %s5331_s7  ;;  %v1110_v57 = vmul.f32 %v1109_v44, %v3301_v12 }
 0x2ab   :  { %5332 = sst [smem:[#allocation106_spill]] %s3746_s9  ;;  %v1113_v59 = vmul.f32 %v1112_v45, %v3330_v37 }
 0x2ac   :  { %s5335_s1 = sld [smem:[#allocation42_spill]]  ;;  %v1111_v36 = vadd.f32 %v1110_v57, %v1108_v39 }
 0x2ad   :  { %s3758_s23 = sld [smem:[#allocation9 + $0xa5]]  ;;  %v1136_v31 = vstv %s3752_s25 }
 0x2ae   :  { %s3764_s10 = sld [smem:[#allocation9 + $0xa6]]  ;;  %v1114_v44 = vadd.f32 %v1113_v59, %v1111_v36 }
 0x2af   :  { %s5338_s30 = sld [smem:[#allocation43_spill]]  ;;  %v1115_v49 = vstv %s5333_s26 }
 0x2b0   :  { %s5339_s19 = sld [smem:[#allocation44_spill]]  ;;  %v1118_v25 = vstv %s5334_s29  ;;  %v1116_v0 = vmul.f32 %v1115_v49, %v3345_v52  ;;  %v1088_v49 = vadd.f32 %v3755_v40, %v1085_v26 }
 0x2b1   :  { %s3768_s9 = sld [smem:[#allocation9 + $0xa7]]  ;;  %v1119_v21 = vmul.f32 %v1118_v25, %v3352_v56 }
 0x2b2   :  { %v1121_v33 = vstv %s5335_s1  ;;  %s3774_s22 = sld [smem:[#allocation9 + $0xa8]]  ;;  %v1117_v27 = vadd.f32 %v1116_v0, %v1114_v44  ;;  %v1090_v22 = vadd.f32 %v1089_v13, %v1088_v49 }
 0x2b3   :  { %5336 = sst [smem:[#allocation107_spill]] %s3758_s23  ;;  %v1122_v23 = vmul.f32 %v1121_v33, %v3381_v24 }
 0x2b4   :  { %5337 = sst [smem:[#allocation108_spill]] %s3764_s10 }
 0x2b5   :  { %s5342_s7 = sld [smem:[#allocation76_spill]]  ;;  %v1124_v1 = vstv %s5338_s30 }
 0x2b6   :  { %s3778_s10 = sld [smem:[#allocation9 + $0xa9]]  ;;  %v1127_v17 = vstv %s5339_s19  ;;  %v3794_v29 = vmul.f32 %v1124_v1, %v3387_v28  ;;  %v1120_v1 = vadd.f32 %v1119_v21, %v1117_v27 }
 0x2b7   :  { %5340 = sst [smem:[#allocation109_spill]] %s3768_s9  ;;  %v3797_v35 = vmul.f32 %v1127_v17, %v3417_v53 }
 0x2b8   :  { %5341 = sst [smem:[#allocation110_spill]] %s3774_s22  ;;  %v1123_v3 = vadd.f32 %v1122_v23, %v1120_v1 }
 0x2b9   :  { %s5344_s9 = sld [smem:[#allocation45_spill]] }
 0x2ba   :  { %s3785_s1 = sld [smem:[#allocation9 + $0xaa]] }
 0x2bb   :  { %s5346_s26 = sld [smem:[#allocation77_spill]]  ;;  %v1130_v5 = vstv %s5342_s7 }
 0x2bc   :  { %5343 = sst [smem:[#allocation111_spill]] %s3778_s10  ;;  %v3819_v10 = vmul.f32 %v1130_v5, %v3419_v54 }
 0x2bd   :  { %s5347_s29 = sld [smem:[#allocation46_spill]] }
 0x2be   :  { %s5348_s22 = sld [smem:[#allocation47_spill]] }
 0x2bf   :  { %s5349_s23 = sld [smem:[#allocation48_spill]]  ;;  %v1133_v30 = vstv %s5344_s9 }
 0x2c0   :  { %5345 = sst [smem:[#allocation112_spill]] %s3785_s1  ;;  %v3831_v47 = vmul.f32 %v1133_v30, %v3435_v6  ;;  %v3863_v30 = vmax.f32 %v1090_v22, 0.0 }
 0x2c1   :  { %s3789_s27 = sld [smem:[#allocation9 + $0xab]]  ;;  %v1139_v14 = vstv %s5346_s26 }
 0x2c2   :  { %s3800_s30 = sld [smem:[#allocation9 + $0xac]]  ;;  %v1140_v18 = vmul.f32 %v1139_v14, %v3195_v50 }
 0x2c3   :  { %s5352_s19 = sld [smem:[#allocation49_spill]]  ;;  %v1141_v2 = vstv %s5347_s29 }
 0x2c4   :  { %s3805_s1 = sld [smem:[#allocation9 + $0xad]]  ;;  %v1144_v32 = vstv %s5348_s22  ;;  %v1142_v4 = vmul.f32 %v1141_v2, %v3207_v58 }
 0x2c5   :  { %v1147_v9 = vstv %s5349_s23  ;;  %s3811_s10 = sld [smem:[#allocation9 + $0xae]]  ;;  %v1145_v7 = vmul.f32 %v1144_v32, %v3223_v8  ;;  %v1126_v32 = vadd.f32 %v3794_v29, %v1123_v3 }
 0x2c6   :  { %s5356_s7 = sld [smem:[#allocation51_spill]]  ;;  %v1148_v43 = vmul.f32 %v1147_v9, %v3258_v38  ;;  %v1143_v45 = vadd.f32 %v1142_v4, %v1140_v18 }
 0x2c7   :  { %5350 = sst [smem:[#allocation113_spill]] %s3789_s27 }
 0x2c8   :  { %5351 = sst [smem:[#allocation114_spill]] %s3800_s30  ;;  %v1146_v25 = vadd.f32 %v1145_v7, %v1143_v45 }
 0x2c9   :  { %s5354_s27 = sld [smem:[#allocation50_spill]]  ;;  %v1150_v19 = vstv %s5352_s19 }
 0x2ca   :  { %5353 = sst [smem:[#allocation115_spill]] %s3805_s1  ;;  %v1151_v48 = vmul.f32 %v1150_v19, %v3264_v42  ;;  %v1149_v40 = vadd.f32 %v1148_v43, %v1146_v25  ;;  %v1129_v19 = vadd.f32 %v3797_v35, %v1126_v32 }
 0x2cb   :  { %5355 = sst [smem:[#allocation116_spill]] %s3811_s10 }
 0x2cc   :  { %s5357_s30 = sld [smem:[#allocation78_spill]]  ;;  %v1156_v20 = vstv %s5356_s7  ;;  %v1152_v39 = vadd.f32 %v1151_v48, %v1149_v40 }
 0x2cd   :  { %s3816_s9 = sld [smem:[#allocation9 + $0xaf]]  ;;  %v1157_v55 = vmul.f32 %v1156_v20, %v3301_v12 }
 0x2ce   :  { %s5359_s23 = sld [smem:[#allocation52_spill]] }
 0x2cf   :  { %s3824_s22 = sld [smem:[#allocation9 + $0xb0]]  ;;  %v1153_v46 = vstv %s5354_s27 }
 0x2d0   :  { %s5361_s26 = sld [smem:[#allocation53_spill]]  ;;  %v1154_v51 = vmul.f32 %v1153_v46, %v3284_v60 }
 0x2d1   :  { %s5362_s29 = sld [smem:[#allocation54_spill]] }
 0x2d2   :  { %s3828_s10 = sld [smem:[#allocation9 + $0xb1]]  ;;  %v1159_v11 = vstv %s5357_s30  ;;  %v1155_v9 = vadd.f32 %v1154_v51, %v1152_v39 }
 0x2d3   :  { %5358 = sst [smem:[#allocation117_spill]] %s3816_s9  ;;  %v1160_v0 = vmul.f32 %v1159_v11, %v3330_v37  ;;  %v1132_v11 = vadd.f32 %v3819_v10, %v1129_v19 }
 0x2d4   :  { %s3836_s19 = sld [smem:[#allocation9 + $0xb2]]  ;;  %v1162_v33 = vstv %s5359_s23  ;;  %v1158_v26 = vadd.f32 %v1157_v55, %v1155_v9 }
 0x2d5   :  { %5360 = sst [smem:[#allocation118_spill]] %s3824_s22  ;;  %v1163_v17 = vmul.f32 %v1162_v33, %v3345_v52  ;;  %v1135_v10 = vadd.f32 %v3831_v47, %v1132_v11 }
 0x2d6   :  { %s5365_s22 = sld [smem:[#allocation55_spill]]  ;;  %v1165_v57 = vstv %s5361_s26  ;;  %v1161_v35 = vadd.f32 %v1160_v0, %v1158_v26 }
 0x2d7   :  { %s5366_s9 = sld [smem:[#allocation79_spill]]  ;;  %v1168_v59 = vstv %s5362_s29  ;;  %v1166_v13 = vmul.f32 %v1165_v57, %v3352_v56 }
 0x2d8   :  { %5363 = sst [smem:[#allocation119_spill]] %s3828_s10  ;;  %v1169_v21 = vmul.f32 %v1168_v59, %v3381_v24  ;;  %v1164_v57 = vadd.f32 %v1163_v17, %v1161_v35 }
 0x2d9   :  { %s5367_s1 = sld [smem:[#allocation56_spill]] }
 0x2da   :  { %5364 = sst [smem:[#allocation120_spill]] %s3836_s19 }
 0x2db   :  { %s3840_s27 = sld [smem:[#allocation11 + $0x6]] }
 0x2dc   :  { %s3846_s7 = sld [smem:[#allocation9 + $0xb3]]  ;;  %v1171_v15 = vstv %s5365_s22 }
 0x2dd   :  { %s3851_s30 = sld [smem:[#allocation9 + $0xb4]]  ;;  %v1174_v16 = vstv %s5366_s9  ;;  %v3866_v14 = vmul.f32 %v1171_v15, %v3387_v28 }
 0x2de   :  { %s5370_s23 = sld [smem:[#allocation57_spill]]  ;;  %v3869_v2 = vmul.f32 %v1174_v16, %v3417_v53  ;;  %v1137_v16 = vadd.f32 %v1136_v31, %v1135_v10 }
 0x2df   :  { %s5371_s19 = sld [smem:[#allocation58_spill]]  ;;  %v1177_v5 = vstv %s5367_s1 }
 0x2e0   :  { %s3857_s10 = sld [smem:[#allocation9 + $0xb5]]  ;;  %v3872_v23 = vmul.f32 %v1177_v5, %v3419_v54  ;;  %v1167_v5 = vadd.f32 %v1166_v13, %v1164_v57 }
 0x2e1   :  { %s5373_s26 = sld [smem:[#allocation59_spill]]  ;;  %v1183_v45 = vstv %s3840_s27 }
 0x2e2   :  { %5368 = sst [smem:[#allocation121_spill]] %s3846_s7 }
 0x2e3   :  { %5369 = sst [smem:[#allocation122_spill]] %s3851_s30 }
 0x2e4   :  { %s5374_s24 = sld [smem:[#allocation60_spill]]  ;;  %v1180_v62 = vstv %s5370_s23 }
 0x2e5   :  { %s5375_s29 = sld [smem:[#allocation80_spill]]  ;;  %v1186_v36 = vstv %s5371_s19  ;;  %v3903_v25 = vmul.f32 %v1180_v62, %v3435_v6  ;;  %v1170_v62 = vadd.f32 %v1169_v21, %v1167_v5 }
 0x2e6   :  { %5372 = sst [smem:[#allocation123_spill]] %s3857_s10  ;;  %v1187_v18 = vmul.f32 %v1186_v36, %v3195_v50 }
 0x2e7   :  { %s3861_s7 = sld [smem:[#allocation9 + $0xb6]]  ;;  %v1188_v4 = vstv %s5373_s26 }
 0x2e8   :  { %s3874_s1 = sld [smem:[#allocation9 + $0xb7]]  ;;  %v1189_v29 = vmul.f32 %v1188_v4, %v3207_v58 }
 0x2e9   :  { %s5378_s9 = sld [smem:[#allocation61_spill]] }
 0x2ea   :  { %s5379_s22 = sld [smem:[#allocation62_spill]]  ;;  %v1191_v7 = vstv %s5374_s24  ;;  %v1190_v49 = vadd.f32 %v1189_v29, %v1187_v18  ;;  %v3937_v18 = vmax.f32 %v1137_v16, 0.0 }
 0x2eb   :  { %s5381_s10 = sld [smem:[#allocation63_spill]]  ;;  %v1194_v43 = vstv %s5375_s29  ;;  %v1192_v44 = vmul.f32 %v1191_v7, %v3223_v8 }
 0x2ec   :  { %s3885_s30 = sld [smem:[#allocation9 + $0xb9]]  ;;  %v1195_v46 = vmul.f32 %v1194_v43, %v3258_v38  ;;  %v1173_v43 = vadd.f32 %v3866_v14, %v1170_v62 }
 0x2ed   :  { %5376 = sst [smem:[#allocation124_spill]] %s3861_s7  ;;  %v1193_v59 = vadd.f32 %v1192_v44, %v1190_v49 }
 0x2ee   :  { %5377 = sst [smem:[#allocation125_spill]] %s3874_s1  ;;  %v1176_v11 = vadd.f32 %v3869_v2, %v1173_v43 }
 0x2ef   :  { %s3879_s7 = sld [smem:[#allocation9 + $0xb8]]  ;;  %v1197_v48 = vstv %s5378_s9  ;;  %v1196_v3 = vadd.f32 %v1195_v46, %v1193_v59  ;;  %v1238_v46 = vstv %s3469_s12  ;;  %v1250_v59 = vstv %s3497_s3 }
 0x2f0   :  { %s5383_s1 = sld [smem:[#allocation64_spill]]  ;;  %v1200_v20 = vstv %s5379_s22  ;;  %v1198_v33 = vmul.f32 %v1197_v48, %v3264_v42  ;;  %v1239_v49 = vmul.f32 %v1238_v46, %v3223_v8  ;;  %v1179_v2 = vadd.f32 %v3872_v23, %v1176_v11 }
 0x2f1   :  { %s3890_s23 = sld [smem:[#allocation9 + $0xba]]  ;;  %v1203_v27 = vstv %s5381_s10  ;;  %v1201_v51 = vmul.f32 %v1200_v20, %v3284_v60 }
 0x2f2   :  { %5382 = sst [smem:[#allocation127_spill]] %s3885_s30  ;;  %v1204_v1 = vmul.f32 %v1203_v27, %v3301_v12  ;;  %v1199_v31 = vadd.f32 %v1198_v33, %v1196_v3  ;;  %v1251_v3 = vmul.f32 %v1250_v59, %v3301_v12 }
 0x2f3   :  { %s5385_s19 = sld [smem:[#allocation81_spill]] }
 0x2f4   :  { %s3896_s26 = sld [smem:[#allocation9 + $0xbb]]  ;;  %v1202_v19 = vadd.f32 %v1201_v51, %v1199_v31 }
 0x2f5   :  { %5380 = sst [smem:[#allocation126_spill]] %s3879_s7 }
 0x2f6   :  { %s5387_s24 = sld [smem:[#allocation65_spill]]  ;;  %v1206_v55 = vstv %s5383_s1  ;;  %v1205_v35 = vadd.f32 %v1204_v1, %v1202_v19 }
 0x2f7   :  { %5384 = sst [smem:[#allocation128_spill]] %s3890_s23  ;;  %v1207_v47 = vmul.f32 %v1206_v55, %v3330_v37 }
 0x2f8   :  { %s5388_s29 = sld [smem:[#allocation66_spill]] }
 0x2f9   :  { %s5389_s30 = sld [smem:[#allocation82_spill]]  ;;  %v1209_v22 = vstv %s5385_s19  ;;  %v1208_v10 = vadd.f32 %v1207_v47, %v1205_v35 }
 0x2fa   :  { %5386 = sst [smem:[#allocation129_spill]] %s3896_s26  ;;  %v1210_v17 = vmul.f32 %v1209_v22, %v3345_v52 }
 0x2fb   :  { %s3900_s7 = sld [smem:[#allocation9 + $0xbc]] }
 0x2fc   :  { %s3908_s9 = sld [smem:[#allocation9 + $0xbd]]  ;;  %v1212_v40 = vstv %s5387_s24  ;;  %v1211_v16 = vadd.f32 %v1210_v17, %v1208_v10  ;;  %v1291_v10 = vstv %s3582_s13 }
 0x2fd   :  { %s5392_s22 = sld [smem:[#allocation67_spill]]  ;;  %v1213_v39 = vmul.f32 %v1212_v40, %v3352_v56 }
 0x2fe   :  { %s5393_s26 = sld [smem:[#allocation68_spill]]  ;;  %v1215_v0 = vstv %s5388_s29 }
 0x2ff   :  { %s3912_s10 = sld [smem:[#allocation11 + $0x7]]  ;;  %v1218_v15 = vstv %s5389_s30  ;;  %v1216_v13 = vmul.f32 %v1215_v0, %v3381_v24  ;;  %v1214_v31 = vadd.f32 %v1213_v39, %v1211_v16 }
 0x300   :  { %s5395_s1 = sld [smem:[#allocation70_spill]]  ;;  %v3933_v36 = vmul.f32 %v1218_v15, %v3387_v28  ;;  %v1182_v15 = vadd.f32 %v3903_v25, %v1179_v2 }
 0x301   :  { %5390 = sst [smem:[#allocation130_spill]] %s3900_s7 }
 0x302   :  { %5391 = sst [smem:[#allocation131_spill]] %s3908_s9  ;;  %v1184_v62 = vadd.f32 %v1183_v45, %v1182_v15  ;;  %v1297_v15 = vstv %s3594_s4 }
 0x303   :  { %s3918_s7 = sld [smem:[#allocation9 + $0xbe]]  ;;  %v1221_v32 = vstv %s5392_s22 }
 0x304   :  { %s3923_s9 = sld [smem:[#allocation9 + $0xbf]]  ;;  %v1224_v9 = vstv %s5393_s26  ;;  %v3940_v4 = vmul.f32 %v1221_v32, %v3417_v53  ;;  %v4011_v46 = vmax.f32 %v1184_v62, 0.0  ;;  %v1306_v62 = vstv %s3614_s28 }
 0x305   :  { %s5397_s19 = sld [smem:[#allocation69_spill]]  ;;  %v3943_v7 = vmul.f32 %v1224_v9, %v3419_v54  ;;  %v1230_v33 = vstv %s3912_s10 }
 0x306   :  { %s3929_s24 = sld [smem:[#allocation9 + $0xc0]]  ;;  %v1233_v21 = vstv %s5395_s1 }
 0x307   :  { %s5399_s30 = sld [smem:[#allocation71_spill]]  ;;  %v1234_v29 = vmul.f32 %v1233_v21, %v3195_v50 }
 0x308   :  { %s5400_s25 = sld [smem:[#allocation83_spill]] }
 0x309   :  { %5394 = sst [smem:[#allocation132_spill]] %s3918_s7 }
 0x30a   :  { %5396 = sst [smem:[#allocation133_spill]] %s3923_s9 }
 0x30b   :  { %s5401_s29 = sld [smem:[#allocation72_spill]]  ;;  %v1227_v26 = vstv %s5397_s19 }
 0x30c   :  { %5398 = sst [smem:[#allocation134_spill]] %s3929_s24  ;;  %v3965_v27 = vmul.f32 %v1227_v26, %v3435_v6 }
 0x30d   :  { %s3935_s9 = sld [smem:[#allocation9 + $0xc1]]  ;;  %v1235_v44 = vstv %s5399_s30 }
 0x30e   :  { %s3946_s26 = sld [smem:[#allocation9 + $0xc2]]  ;;  %v1241_v48 = vstv %s5400_s25  ;;  %v1236_v14 = vmul.f32 %v1235_v44, %v3207_v58 }
 0x30f   :  { %s5404_s22 = sld [smem:[#allocation85_spill]]  ;;  %v1242_v51 = vmul.f32 %v1241_v48, %v3258_v38 }
 0x310   :  { %s3957_s24 = sld [smem:[#allocation11 + $0x9]]  ;;  %v1237_v57 = vadd.f32 %v1236_v14, %v1234_v29  ;;  %v1217_v29 = vadd.f32 %v1216_v13, %v1214_v31 }
 0x311   :  { %v1244_v20 = vstv %s5401_s29  ;;  %s5405_s1 = sld [smem:[#allocation86_spill]] }
 0x312   :  { %s5406_s19 = sld [smem:[#allocation87_spill]]  ;;  %v1245_v22 = vmul.f32 %v1244_v20, %v3264_v42  ;;  %v1240_v23 = vadd.f32 %v1239_v49, %v1237_v57  ;;  %v1220_v13 = vadd.f32 %v3933_v36, %v1217_v29  ;;  %v1309_v29 = vstv %s3619_s20 }
 0x313   :  { %5402 = sst [smem:[#allocation135_spill]] %s3935_s9 }
 0x314   :  { %5403 = sst [smem:[#allocation136_spill]] %s3946_s26  ;;  %v1243_v25 = vadd.f32 %v1242_v51, %v1240_v23  ;;  %v1223_v57 = vadd.f32 %v3940_v4, %v1220_v13 }
 0x315   :  { %s3951_s9 = sld [smem:[#allocation11 + $0x8]]  ;;  %v1247_v55 = vstv %s5404_s22 }
 0x316   :  { %s3962_s26 = sld [smem:[#allocation11 + $0xa]]  ;;  %v1248_v1 = vmul.f32 %v1247_v55, %v3284_v60  ;;  %v1246_v45 = vadd.f32 %v1245_v22, %v1243_v25  ;;  %v1226_v4 = vadd.f32 %v3943_v7, %v1223_v57 }
 0x317   :  { %s5408_s12 = sld [smem:[#allocation84_spill]]  ;;  %v1253_v40 = vstv %s5405_s1 }
 0x318   :  { %s3970_s30 = sld [smem:[#allocation11 + $0xb]]  ;;  %v1256_v0 = vstv %s5406_s19  ;;  %v1254_v47 = vmul.f32 %v1253_v40, %v3330_v37  ;;  %v1249_v35 = vadd.f32 %v1248_v1, %v1246_v45  ;;  %v1229_v31 = vadd.f32 %v3965_v27, %v1226_v4 }
 0x319   :  { %s5410_s25 = sld [smem:[#allocation88_spill]]  ;;  %v1257_v17 = vmul.f32 %v1256_v0, %v3345_v52  ;;  %v1294_v0 = vstv %s3587_s5  ;;  %v1312_v45 = vstv %s3625_s21 }
 0x31a   :  { %s5411_s29 = sld [smem:[#allocation89_spill]]  ;;  %v1252_v36 = vadd.f32 %v1251_v3, %v1249_v35  ;;  %v1295_v7 = vmul.f32 %v1294_v0, %v3284_v60  ;;  %v1310_v35 = vmul.f32 %v1309_v29, %v3381_v24 }
 0x31b   :  { %s3974_s7 = sld [smem:[#allocation11 + $0xc]]  ;;  %v1277_v23 = vstv %s3951_s9 }
 0x31c   :  { %5407 = sst [smem:[#allocation137_spill]] %s3962_s26  ;;  %v1255_v16 = vadd.f32 %v1254_v47, %v1252_v36  ;;  %v1298_v47 = vmul.f32 %v1297_v15, %v3301_v12  ;;  %v1327_v36 = vstv %s3653_s6 }
 0x31d   :  { %s3980_s23 = sld [smem:[#allocation12]]  ;;  %v1259_v5 = vstv %s5408_s12 }
 0x31e   :  { %5409 = sst [smem:[#allocation30_spill]] %s3970_s30  ;;  %v1260_v21 = vmul.f32 %v1259_v5, %v3352_v56  ;;  %v1292_v5 = vmul.f32 %v1291_v10, %v3264_v42  ;;  %v1258_v25 = vadd.f32 %v1257_v17, %v1255_v16  ;;  %v1335_v16 = vstv %s3675_s18 }
 0x31f   :  { %s5413_s22 = sld [smem:[#allocation90_spill]]  ;;  %v1262_v32 = vstv %s5410_s25 }
 0x320   :  { %s5414_s30 = sld [smem:[#allocation91_spill]]  ;;  %v1265_v9 = vstv %s5411_s29  ;;  %v3999_v43 = vmul.f32 %v1262_v32, %v3381_v24  ;;  %v1300_v32 = vstv %s3601_s16  ;;  %v1261_v27 = vadd.f32 %v1260_v21, %v1258_v25 }
 0x321   :  { %5412 = sst [smem:[#allocation31_spill]] %s3974_s7  ;;  %v4006_v39 = vmul.f32 %v1265_v9, %v3387_v28  ;;  %v1303_v9 = vstv %s3607_s0  ;;  %v4080_v21 = vmul.f32 %v1312_v45, %v3387_v28  ;;  %v1336_v25 = vmul.f32 %v1335_v16, %v3258_v38 }
 0x322   :  { %s3984_s26 = sld [smem:[#allocation12 + $0x1]]  ;;  %v1304_v17 = vmul.f32 %v1303_v9, %v3345_v52 }
 0x323   :  { %s5415_s3 = sld [smem:[#allocation92_spill]] }
 0x324   :  { %s3990_s1 = sld [smem:[#allocation12 + $0x2]] }
 0x325   :  { %s5416_s19 = sld [smem:[#allocation93_spill]]  ;;  %v1268_v19 = vstv %s5413_s22 }
 0x326   :  { %s3995_s7 = sld [smem:[#allocation12 + $0x3]]  ;;  %v1271_v26 = vstv %s5414_s30  ;;  %v4014_v48 = vmul.f32 %v1268_v19, %v3417_v53 }
 0x327   :  { %s5418_s12 = sld [smem:[#allocation94_spill]]  ;;  %v4017_v20 = vmul.f32 %v1271_v26, %v3419_v54  ;;  %v1301_v26 = vmul.f32 %v1300_v32, %v3330_v37 }
 0x328   :  { %s4003_s25 = sld [smem:[#allocation12 + $0x4]] }
 0x329   :  { %s5419_s27 = sld [smem:[#allocation95_spill]]  ;;  %v1274_v44 = vstv %s5415_s3 }
 0x32a   :  { %s5420_s29 = sld [smem:[#allocation96_spill]]  ;;  %v4035_v59 = vmul.f32 %v1274_v44, %v3435_v6  ;;  %v1231_v44 = vadd.f32 %v1230_v33, %v1229_v31  ;;  %v1264_v33 = vadd.f32 %v3999_v43, %v1261_v27 }
 0x32b   :  { %v1280_v11 = vstv %s5416_s19  ;;  %s4020_s30 = sld [smem:[#allocation12 + $0x6]] }
 0x32c   :  { %5417 = sst [smem:[#allocation32_spill]] %s3995_s7  ;;  %v1281_v14 = vmul.f32 %v1280_v11, %v3195_v50  ;;  %v1307_v11 = vmul.f32 %v1306_v62, %v3352_v56  ;;  %v1267_v43 = vadd.f32 %v4006_v39, %v1264_v33  ;;  %v1324_v62 = vstv %s3957_s24 }
 0x32d   :  { %s4009_s7 = sld [smem:[#allocation12 + $0x5]]  ;;  %v1282_v49 = vstv %s5418_s12 }
 0x32e   :  { %s4025_s22 = sld [smem:[#allocation12 + $0x7]]  ;;  %v1283_v51 = vmul.f32 %v1282_v49, %v3207_v58  ;;  %v1318_v49 = vstv %s3635_s14  ;;  %v1270_v39 = vadd.f32 %v4014_v48, %v1267_v43 }
 0x32f   :  { %v1285_v55 = vstv %s5419_s27  ;;  %s4031_s3 = sld [smem:[#allocation12 + $0x8]]  ;;  %v4089_v57 = vmul.f32 %v1318_v49, %v3419_v54 }
 0x330   :  { %v1288_v2 = vstv %s5420_s29  ;;  %v1286_v22 = vmul.f32 %v1285_v55, %v3223_v8  ;;  %s4038_s19 = sld [smem:[#allocation12 + $0x9]]  ;;  %v1284_v1 = vadd.f32 %v1283_v51, %v1281_v14  ;;  %v1315_v14 = vstv %s3630_s11 }
 0x331   :  { %v1289_v40 = vmul.f32 %v1288_v2, %v3258_v38  ;;  %s4043_s13 = sld [smem:[#allocation12 + $0xa]]  ;;  %v4076_v51 = vmax.f32 %v1231_v44, 0.0  ;;  %v1321_v55 = vstv %s3646_s15  ;;  %v4086_v10 = vmul.f32 %v1315_v14, %v3417_v53 }
 0x332   :  { %s4048_s12 = sld [smem:[#allocation12 + $0xb]]  ;;  %v1287_v3 = vadd.f32 %v1286_v22, %v1284_v1  ;;  %v1328_v22 = vmul.f32 %v1327_v36, %v3195_v50  ;;  %v1329_v1 = vstv %s3662_s17 }
 0x333   :  { %s4053_s27 = sld [smem:[#allocation12 + $0xc]]  ;;  %v1330_v15 = vmul.f32 %v1329_v1, %v3207_v58 }
 0x334   :  { %s4058_s5 = sld [smem:[#allocation12 + $0xd]]  ;;  %v1290_v19 = vadd.f32 %v1289_v40, %v1287_v3  ;;  %v1332_v40 = vstv %s3669_s2  ;;  %v1338_v3 = vstv %s3680_s8 }
 0x335   :  { %s4063_s4 = sld [smem:[#allocation12 + $0xe]]  ;;  %v1333_v4 = vmul.f32 %v1332_v40, %v3223_v8  ;;  %v1331_v31 = vadd.f32 %v1330_v15, %v1328_v22 }
 0x336   :  { %s4069_s16 = sld [smem:[#allocation12 + $0xf]]  ;;  %v1293_v13 = vadd.f32 %v1292_v5, %v1290_v19  ;;  %v4107_v5 = vmul.f32 %v1321_v55, %v3435_v6 }
 0x337   :  { %s4074_s0 = sld [smem:[#allocation12 + $0x10]]  ;;  %v1334_v45 = vadd.f32 %v1333_v4, %v1331_v31 }
 0x338   :  { %s4083_s28 = sld [smem:[#allocation12 + $0x11]]  ;;  %v1296_v2 = vadd.f32 %v1295_v7, %v1293_v13  ;;  %v1273_v7 = vadd.f32 %v4017_v20, %v1270_v39 }
 0x339   :  { %s5421_s20 = sld [smem:[#allocation97_spill]] }
 0x33a   :  { %s4092_s21 = sld [smem:[#allocation12 + $0x12]]  ;;  %v1299_v0 = vadd.f32 %v1298_v47, %v1296_v2  ;;  %v1276_v27 = vadd.f32 %v4035_v59, %v1273_v7 }
 0x33b   :  { %s4098_s11 = sld [smem:[#allocation12 + $0x13]] }
 0x33c   :  { %s5423_s14 = sld [smem:[#allocation98_spill]]  ;;  %v1302_v9 = vadd.f32 %v1301_v26, %v1299_v0  ;;  %v1339_v26 = vmul.f32 %v1338_v3, %v3264_v42  ;;  %v1278_v2 = vadd.f32 %v1277_v23, %v1276_v27 }
 0x33d   :  { %s5424_s15 = sld [smem:[#allocation99_spill]] }
 0x33e   :  { %s5425_s10 = sld [smem:[#allocation100_spill]]  ;;  %v1305_v29 = vadd.f32 %v1304_v17, %v1302_v9  ;;  %v1337_v17 = vadd.f32 %v1336_v25, %v1334_v45  ;;  %v4148_v0 = vmax.f32 %v1278_v2, 0.0 }
 0x33f   :  { %s4103_s6 = sld [smem:[#allocation12 + $0x14]]  ;;  %v1341_v32 = vstv %s5421_s20 }
 0x340   :  { %s4111_s17 = sld [smem:[#allocation12 + $0x15]]  ;;  %v1342_v44 = vmul.f32 %v1341_v32, %v3284_v60  ;;  %v1308_v49 = vadd.f32 %v1307_v11, %v1305_v29  ;;  %v1340_v1 = vadd.f32 %v1339_v26, %v1337_v17 }
 0x341   :  { %5422 = sst [smem:[#allocation73_spill]] %s4098_s11 }
 0x342   :  { %s5428_s2 = sld [smem:[#allocation101_spill]]  ;;  %v1344_v47 = vstv %s5423_s14  ;;  %v1311_v22 = vadd.f32 %v1310_v35, %v1308_v49  ;;  %v1343_v16 = vadd.f32 %v1342_v44, %v1340_v1 }
 0x343   :  { %s5429_s29 = sld [smem:[#allocation102_spill]]  ;;  %v1347_v48 = vstv %s5424_s15  ;;  %v1345_v20 = vmul.f32 %v1344_v47, %v3301_v12 }
 0x344   :  { %s4115_s11 = sld [smem:[#allocation12 + $0x16]]  ;;  %v1350_v19 = vstv %s5425_s10  ;;  %v1348_v33 = vmul.f32 %v1347_v48, %v3330_v37  ;;  %v1314_v4 = vadd.f32 %v4080_v21, %v1311_v22 }
 0x345   :  { %5426 = sst [smem:[#allocation33_spill]] %s4103_s6  ;;  %v1351_v55 = vmul.f32 %v1350_v19, %v3345_v52  ;;  %v1346_v47 = vadd.f32 %v1345_v20, %v1343_v16 }
 0x346   :  { %5427 = sst [smem:[#allocation34_spill]] %s4111_s17  ;;  %v1317_v7 = vadd.f32 %v4086_v10, %v1314_v4 }
 0x347   :  { %s4121_s18 = sld [smem:[#allocation12 + $0x17]]  ;;  %v1349_v10 = vadd.f32 %v1348_v33, %v1346_v47 }
 0x348   :  { %s5432_s8 = sld [smem:[#allocation103_spill]]  ;;  %v1353_v13 = vstv %s5428_s2  ;;  %v1320_v44 = vadd.f32 %v4089_v57, %v1317_v7 }
 0x349   :  { %s5433_s20 = sld [smem:[#allocation104_spill]]  ;;  %v1356_v14 = vstv %s5429_s29  ;;  %v1354_v11 = vmul.f32 %v1353_v13, %v3352_v56  ;;  %v1352_v33 = vadd.f32 %v1351_v55, %v1349_v10 }
 0x34a   :  { %5430 = sst [smem:[#allocation35_spill]] %s4115_s11  ;;  %v1357_v40 = vmul.f32 %v1356_v14, %v3381_v24  ;;  %v1323_v57 = vadd.f32 %v4107_v5, %v1320_v44 }
 0x34b   :  { %s5434_s17 = sld [smem:[#allocation105_spill]]  ;;  %v1355_v16 = vadd.f32 %v1354_v11, %v1352_v33 }
 0x34c   :  { %s4125_s6 = sld [smem:[#allocation12 + $0x18]]  ;;  %v1325_v4 = vadd.f32 %v1324_v62, %v1323_v57 }
 0x34d   :  { %5431 = sst [smem:[#allocation36_spill]] %s4121_s18 }
 0x34e   :  { %s4131_s14 = sld [smem:[#allocation12 + $0x19]]  ;;  %v1359_v36 = vstv %s5432_s8  ;;  %v4222_v7 = vmax.f32 %v1325_v4, 0.0 }
 0x34f   :  { %s4135_s15 = sld [smem:[#allocation12 + $0x1a]]  ;;  %v1362_v43 = vstv %s5433_s20  ;;  %v4151_v23 = vmul.f32 %v1359_v36, %v3387_v28 }
 0x350   :  { %s5438_s10 = sld [smem:[#allocation106_spill]]  ;;  %v4154_v15 = vmul.f32 %v1362_v43, %v3417_v53 }
 0x351   :  { %v1365_v59 = vstv %s5434_s17  ;;  %s4142_s18 = sld [smem:[#allocation12 + $0x1b]] }
 0x352   :  { %5435 = sst [smem:[#allocation37_spill]] %s4125_s6  ;;  %v4157_v35 = vmul.f32 %v1365_v59, %v3419_v54 }
 0x353   :  { %s5439_s6 = sld [smem:[#allocation107_spill]] }
 0x354   :  { %5436 = sst [smem:[#allocation74_spill]] %s4131_s14 }
 0x355   :  { %5437 = sst [smem:[#allocation38_spill]] %s4135_s15 }
 0x356   :  { %s5441_s2 = sld [smem:[#allocation108_spill]]  ;;  %v1368_v39 = vstv %s5438_s10 }
 0x357   :  { %5440 = sst [smem:[#allocation39_spill]] %s4142_s18  ;;  %v4188_v13 = vmul.f32 %v1368_v39, %v3435_v6 }
 0x358   :  { %s5442_s29 = sld [smem:[#allocation109_spill]] }
 0x359   :  { %s5443_s14 = sld [smem:[#allocation110_spill]]  ;;  %v1374_v3 = vstv %s5439_s6 }
 0x35a   :  { %s4146_s11 = sld [smem:[#allocation12 + $0x1c]]  ;;  %v1375_v32 = vmul.f32 %v1374_v3, %v3195_v50 }
 0x35b   :  { %s4159_s9 = sld [smem:[#allocation12 + $0x1d]] }
 0x35c   :  { %s5446_s17 = sld [smem:[#allocation137_spill]]  ;;  %v1376_v9 = vstv %s5441_s2 }
 0x35d   :  { %s5447_s8 = sld [smem:[#allocation111_spill]]  ;;  %v1377_v21 = vmul.f32 %v1376_v9, %v3207_v58 }
 0x35e   :  { %s5448_s20 = sld [smem:[#allocation112_spill]]  ;;  %v1379_v31 = vstv %s5442_s29 }
 0x35f   :  { %s5450_s18 = sld [smem:[#allocation113_spill]]  ;;  %v1382_v25 = vstv %s5443_s14  ;;  %v1380_v48 = vmul.f32 %v1379_v31, %v3223_v8  ;;  %v1378_v27 = vadd.f32 %v1377_v21, %v1375_v32  ;;  %v1358_v31 = vadd.f32 %v1357_v40, %v1355_v16 }
 0x360   :  { %5444 = sst [smem:[#allocation75_spill]] %s4146_s11  ;;  %v1383_v29 = vmul.f32 %v1382_v25, %v3258_v38 }
 0x361   :  { %5445 = sst [smem:[#allocation40_spill]] %s4159_s9  ;;  %v1381_v2 = vadd.f32 %v1380_v48, %v1378_v27  ;;  %v1361_v48 = vadd.f32 %v4151_v23, %v1358_v31 }
 0x362   :  { %s4164_s11 = sld [smem:[#allocation12 + $0x1e]]  ;;  %v1371_v19 = vstv %s5446_s17 }
 0x363   :  { %s4170_s15 = sld [smem:[#allocation12 + $0x1f]]  ;;  %v1385_v45 = vstv %s5447_s8  ;;  %v1384_v39 = vadd.f32 %v1383_v29, %v1381_v2 }
 0x364   :  { %s5452_s9 = sld [smem:[#allocation114_spill]]  ;;  %v1388_v26 = vstv %s5448_s20  ;;  %v1386_v14 = vmul.f32 %v1385_v45, %v3264_v42 }
 0x365   :  { %s4175_s10 = sld [smem:[#allocation12 + $0x20]]  ;;  %v1391_v20 = vstv %s5450_s18  ;;  %v1389_v49 = vmul.f32 %v1388_v26, %v3284_v60 }
 0x366   :  { %s5454_s6 = sld [smem:[#allocation115_spill]]  ;;  %v1392_v43 = vmul.f32 %v1391_v20, %v3301_v12  ;;  %v1387_v62 = vadd.f32 %v1386_v14, %v1384_v39  ;;  %v1364_v14 = vadd.f32 %v4154_v15, %v1361_v48 }
 0x367   :  { %s4181_s2 = sld [smem:[#allocation12 + $0x21]] }
 0x368   :  { %5449 = sst [smem:[#allocation41_spill]] %s4164_s11  ;;  %v1390_v29 = vadd.f32 %v1389_v49, %v1387_v62  ;;  %v1367_v15 = vadd.f32 %v4157_v35, %v1364_v14 }
 0x369   :  { %5451 = sst [smem:[#allocation42_spill]] %s4170_s15 }
 0x36a   :  { %s5456_s14 = sld [smem:[#allocation116_spill]]  ;;  %v1394_v17 = vstv %s5452_s9 }
 0x36b   :  { %5453 = sst [smem:[#allocation43_spill]] %s4175_s10  ;;  %v1395_v5 = vmul.f32 %v1394_v17, %v3330_v37  ;;  %v1393_v17 = vadd.f32 %v1392_v43, %v1390_v29  ;;  %v1468_v29 = vstv %s3980_s23 }
 0x36c   :  { %s5457_s29 = sld [smem:[#allocation117_spill]]  ;;  %v1397_v36 = vstv %s5454_s6 }
 0x36d   :  { %5455 = sst [smem:[#allocation44_spill]] %s4181_s2  ;;  %v1398_v55 = vmul.f32 %v1397_v36, %v3345_v52  ;;  %v1396_v36 = vadd.f32 %v1395_v5, %v1393_v17 }
 0x36e   :  { %s5458_s15 = sld [smem:[#allocation118_spill]] }
 0x36f   :  { %s4185_s11 = sld [smem:[#allocation12 + $0x22]]  ;;  %v1399_v4 = vadd.f32 %v1398_v55, %v1396_v36 }
 0x370   :  { %s4193_s8 = sld [smem:[#allocation12 + $0x23]]  ;;  %v1400_v59 = vstv %s5456_s14 }
 0x371   :  { %s5461_s20 = sld [smem:[#allocation119_spill]]  ;;  %v1401_v3 = vmul.f32 %v1400_v59, %v3352_v56 }
 0x372   :  { %s5462_s2 = sld [smem:[#allocation120_spill]]  ;;  %v1403_v22 = vstv %s5457_s29 }
 0x373   :  { %s4197_s18 = sld [smem:[#allocation12 + $0x24]]  ;;  %v1404_v11 = vmul.f32 %v1403_v22, %v3381_v24 }
 0x374   :  { %v1406_v1 = vstv %s5458_s15  ;;  %s5465_s9 = sld [smem:[#allocation122_spill]] }
 0x375   :  { %5459 = sst [smem:[#allocation76_spill]] %s4185_s11  ;;  %v4218_v25 = vmul.f32 %v1406_v1, %v3387_v28  ;;  %v1370_v1 = vadd.f32 %v4188_v13, %v1367_v15 }
 0x376   :  { %5460 = sst [smem:[#allocation45_spill]] %s4193_s8 }
 0x377   :  { %s4203_s11 = sld [smem:[#allocation12 + $0x25]]  ;;  %v1409_v32 = vstv %s5461_s20 }
 0x378   :  { %s4208_s8 = sld [smem:[#allocation12 + $0x26]]  ;;  %v1412_v9 = vstv %s5462_s2  ;;  %v4225_v47 = vmul.f32 %v1409_v32, %v3417_v53  ;;  %v1372_v32 = vadd.f32 %v1371_v19, %v1370_v1 }
 0x379   :  { %5463 = sst [smem:[#allocation77_spill]] %s4197_s18  ;;  %v4228_v21 = vmul.f32 %v1412_v9, %v3419_v54  ;;  %v1402_v9 = vadd.f32 %v1401_v3, %v1399_v4 }
 0x37a   :  { %s5467_s6 = sld [smem:[#allocation121_spill]]  ;;  %v1421_v40 = vstv %s5465_s9 }
 0x37b   :  { %s4214_s14 = sld [smem:[#allocation12 + $0x27]]  ;;  %v1422_v26 = vmul.f32 %v1421_v40, %v3195_v50  ;;  %v1405_v40 = vadd.f32 %v1404_v11, %v1402_v9  ;;  %v1509_v9 = vstv %s4058_s5 }
 0x37c   :  { %s5469_s15 = sld [smem:[#allocation123_spill]] }
 0x37d   :  { %5464 = sst [smem:[#allocation46_spill]] %s4203_s11  ;;  %v1408_v11 = vadd.f32 %v4218_v25, %v1405_v40  ;;  %v1514_v40 = vstv %s4069_s16 }
 0x37e   :  { %5466 = sst [smem:[#allocation47_spill]] %s4208_s8 }
 0x37f   :  { %s5470_s24 = sld [smem:[#allocation124_spill]] }
 0x380   :  { %s5471_s29 = sld [smem:[#allocation125_spill]]  ;;  %v1415_v45 = vstv %s5467_s6 }
 0x381   :  { %5468 = sst [smem:[#allocation48_spill]] %s4214_s14  ;;  %v4250_v50 = vmul.f32 %v1415_v45, %v3435_v6 }
 0x382   :  { %s5472_s11 = sld [smem:[#allocation126_spill]]  ;;  %v1423_v44 = vstv %s5469_s15 }
 0x383   :  { %s4220_s8 = sld [smem:[#allocation12 + $0x28]]  ;;  %v1424_v23 = vmul.f32 %v1423_v44, %v3207_v58 }
 0x384   :  { %s4231_s2 = sld [smem:[#allocation12 + $0x29]] }
 0x385   :  { %s5475_s20 = sld [smem:[#allocation30_spill]]  ;;  %v1426_v10 = vstv %s5470_s24  ;;  %v1425_v58 = vadd.f32 %v1424_v23, %v1422_v26  ;;  %v1470_v26 = vstv %s3984_s26 }
 0x386   :  { %s5476_s14 = sld [smem:[#allocation127_spill]]  ;;  %v1429_v27 = vstv %s5471_s29  ;;  %v1427_v49 = vmul.f32 %v1426_v10, %v3223_v8  ;;  %v1471_v44 = vmul.f32 %v1470_v26, %v3655_v34 }
 0x387   :  { %s5478_s18 = sld [smem:[#allocation128_spill]]  ;;  %v1430_v33 = vmul.f32 %v1429_v27, %v3258_v38  ;;  %v1411_v27 = vadd.f32 %v4225_v47, %v1408_v11  ;;  %v1503_v11 = vstv %s4053_s27 }
 0x388   :  { %v1432_v20 = vstv %s5472_s11  ;;  %s4242_s10 = sld [smem:[#allocation12 + $0x2b]]  ;;  %v1428_v35 = vadd.f32 %v1427_v49, %v1425_v58  ;;  %v1482_v49 = vstv %s4009_s7  ;;  %v1488_v58 = vstv %s4025_s22 }
 0x389   :  { %5473 = sst [smem:[#allocation49_spill]] %s4220_s8  ;;  %v1433_v8 = vmul.f32 %v1432_v20, %v3264_v42  ;;  %v1414_v47 = vadd.f32 %v4228_v21, %v1411_v27  ;;  %v1483_v21 = vmul.f32 %v1482_v49, %v3937_v18  ;;  %v1489_v4 = vmul.f32 %v1488_v58, %v4076_v51 }
 0x38a   :  { %5474 = sst [smem:[#allocation50_spill]] %s4231_s2  ;;  %v1431_v13 = vadd.f32 %v1430_v33, %v1428_v35  ;;  %v1485_v33 = vstv %s4020_s30 }
 0x38b   :  { %s4236_s8 = sld [smem:[#allocation12 + $0x2a]]  ;;  %v1418_v57 = vstv %s5475_s20 }
 0x38c   :  { %s5480_s9 = sld [smem:[#allocation129_spill]]  ;;  %v1435_v2 = vstv %s5476_s14  ;;  %v1434_v19 = vadd.f32 %v1433_v8, %v1431_v13  ;;  %v1494_v8 = vstv %s4038_s19  ;;  %v1511_v13 = vstv %s4063_s4 }
 0x38d   :  { %s5481_s6 = sld [smem:[#allocation130_spill]]  ;;  %v1438_v43 = vstv %s5478_s18  ;;  %v1436_v59 = vmul.f32 %v1435_v2, %v3284_v60 }
 0x38e   :  { %5479 = sst [smem:[#allocation78_spill]] %s4242_s10  ;;  %v1439_v39 = vmul.f32 %v1438_v43, %v3301_v12  ;;  %v1491_v43 = vstv %s4031_s3 }
 0x38f   :  { %s4247_s2 = sld [smem:[#allocation12 + $0x2c]]  ;;  %v1437_v45 = vadd.f32 %v1436_v59, %v1434_v19  ;;  %v1417_v59 = vadd.f32 %v4250_v50, %v1414_v47  ;;  %v1492_v35 = vmul.f32 %v1491_v43, %v4148_v0  ;;  %v1517_v19 = vstv %s4074_s0 }
 0x390   :  { %s5483_s11 = sld [smem:[#allocation131_spill]] }
 0x391   :  { %5477 = sst [smem:[#allocation51_spill]] %s4236_s8  ;;  %v1440_v25 = vadd.f32 %v1439_v39, %v1437_v45  ;;  %v1419_v39 = vadd.f32 %v1418_v57, %v1417_v59 }
 0x392   :  { %s4255_s15 = sld [smem:[#allocation12 + $0x2d]]  ;;  %v1441_v22 = vstv %s5480_s9 }
 0x393   :  { %s5485_s24 = sld [smem:[#allocation132_spill]]  ;;  %v1444_v38 = vstv %s5481_s6  ;;  %v1442_v5 = vmul.f32 %v1441_v22, %v3330_v37 }
 0x394   :  { %s5486_s29 = sld [smem:[#allocation133_spill]]  ;;  %v1445_v55 = vmul.f32 %v1444_v38, %v3345_v52  ;;  %v1486_v38 = vmul.f32 %v1485_v33, %v4011_v46 }
 0x395   :  { %5482 = sst [smem:[#allocation52_spill]] %s4247_s2  ;;  %v1443_v2 = vadd.f32 %v1442_v5, %v1440_v25  ;;  %v1495_v5 = vmul.f32 %v1494_v8, %v4222_v7 }
 0x396   :  { %s4259_s10 = sld [smem:[#allocation12 + $0x2e]]  ;;  %v1447_v16 = vstv %s5483_s11 }
 0x397   :  { %s4265_s2 = sld [smem:[#allocation12 + $0x2f]]  ;;  %v1448_v31 = vmul.f32 %v1447_v16, %v3352_v56  ;;  %v4296_v56 = vmax.f32 %v1372_v32, 0.0  ;;  %v1446_v22 = vadd.f32 %v1445_v55, %v1443_v2  ;;  %v1497_v16 = vstv %s4043_s13 }
 0x398   :  { %5484 = sst [smem:[#allocation53_spill]] %s4255_s15  ;;  %v4361_v55 = vmax.f32 %v1419_v39, 0.0 }
 0x399   :  { %s5487_s14 = sld [smem:[#allocation134_spill]]  ;;  %v1450_v42 = vstv %s5485_s24  ;;  %v1449_v50 = vadd.f32 %v1448_v31, %v1446_v22  ;;  %v1498_v32 = vmul.f32 %v1497_v16, %v4296_v56  ;;  %v1510_v31 = vmul.f32 %v1509_v9, %v3621_v41 }
 0x39a   :  { %s5488_s15 = sld [smem:[#allocation135_spill]]  ;;  %v1453_v60 = vstv %s5486_s29  ;;  %v4284_v12 = vmul.f32 %v1450_v42, %v3381_v24  ;;  %v1500_v42 = vstv %s4048_s12 }
 0x39b   :  { %s4269_s8 = sld [smem:[#allocation12 + $0x30]]  ;;  %v4291_v3 = vmul.f32 %v1453_v60, %v3387_v28  ;;  %v1469_v28 = vmul.f32 %v1468_v29, %v3621_v41 }
 0x39c   :  { %s5489_s18 = sld [smem:[#allocation136_spill]]  ;;  %v1452_v57 = vadd.f32 %v4284_v12, %v1449_v50  ;;  %v1515_v12 = vmul.f32 %v1514_v40, %v3715_v61 }
 0x39d   :  { %s4275_s9 = sld [smem:[#allocation12 + $0x31]]  ;;  %v1472_v17 = vadd.f32 %v1471_v44, %v1469_v28  ;;  %v1518_v44 = vmul.f32 %v1517_v19, %v3791_v63 }
 0x39e   :  { %s4280_s6 = sld [smem:[#allocation12 + $0x32]]  ;;  %v1455_v29 = vadd.f32 %v4291_v3, %v1452_v57 }
 0x39f   :  { %v1456_v37 = vstv %s5487_s14  ;;  %s4288_s11 = sld [smem:[#allocation12 + $0x33]] }
 0x3a0   :  { %v1459_v62 = vstv %s5488_s15  ;;  %s5490_s17 = sld [smem:[#allocation32_spill]]  ;;  %v4299_v24 = vmul.f32 %v1456_v37, %v3417_v53  ;;  %v1473_v53 = vstv %s3990_s1  ;;  %v1512_v37 = vmul.f32 %v1511_v13, %v3655_v34 }
 0x3a1   :  { %s4294_s24 = sld [smem:[#allocation12 + $0x34]]  ;;  %v4302_v48 = vmul.f32 %v1459_v62, %v3419_v54  ;;  %v1479_v54 = vstv %s4003_s25  ;;  %v1474_v14 = vmul.f32 %v1473_v53, %v3715_v61  ;;  %v1523_v53 = vstv %s4092_s21 }
 0x3a2   :  { %v1462_v52 = vstv %s5489_s18  ;;  %s4305_s15 = sld [smem:[#allocation12 + $0x35]]  ;;  %v1513_v45 = vadd.f32 %v1512_v37, %v1510_v31 }
 0x3a3   :  { %s4310_s29 = sld [smem:[#allocation12 + $0x36]]  ;;  %v4320_v20 = vmul.f32 %v1462_v52, %v3435_v6  ;;  %v1480_v6 = vmul.f32 %v1479_v54, %v3863_v30  ;;  %v1475_v36 = vadd.f32 %v1474_v14, %v1472_v17  ;;  %v1520_v52 = vstv %s4083_s28 }
 0x3a4   :  { %s5491_s14 = sld [smem:[#allocation31_spill]]  ;;  %v1516_v54 = vadd.f32 %v1515_v12, %v1513_v45  ;;  %v1521_v3 = vmul.f32 %v1520_v52, %v3863_v30  ;;  %v1501_v14 = vmul.f32 %v1500_v42, %v4361_v55 }
 0x3a5   :  { %s4316_s18 = sld [smem:[#allocation12 + $0x37]] }
 0x3a6   :  { %v1476_v10 = vstv %s5490_s17  ;;  %s4323_s23 = sld [smem:[#allocation12 + $0x38]]  ;;  %v1519_v33 = vadd.f32 %v1518_v44, %v1516_v54 }
 0x3a7   :  { %v1477_v23 = vmul.f32 %v1476_v10, %v3791_v63  ;;  %s4328_s26 = sld [smem:[#allocation12 + $0x39]]  ;;  %v1458_v10 = vadd.f32 %v4299_v24, %v1455_v29  ;;  %v1524_v24 = vmul.f32 %v1523_v53, %v3937_v18 }
 0x3a8   :  { %s4333_s1 = sld [smem:[#allocation14]]  ;;  %v1522_v43 = vadd.f32 %v1521_v3, %v1519_v33 }
 0x3a9   :  { %s4338_s25 = sld [smem:[#allocation12 + $0x3a]]  ;;  %v1478_v1 = vadd.f32 %v1477_v23, %v1475_v36  ;;  %v1461_v49 = vadd.f32 %v4302_v48, %v1458_v10 }
 0x3aa   :  { %v1465_v15 = vstv %s5491_s14  ;;  %s4343_s7 = sld [smem:[#allocation12 + $0x3b]] }
 0x3ab   :  { %s4348_s30 = sld [smem:[#allocation12 + $0x3c]]  ;;  %v1481_v60 = vadd.f32 %v1480_v6, %v1478_v1  ;;  %v1464_v48 = vadd.f32 %v4320_v20, %v1461_v49 }
 0x3ac   :  { %s4354_s22 = sld [smem:[#allocation12 + $0x3d]] }
 0x3ad   :  { %s4359_s3 = sld [smem:[#allocation12 + $0x3e]]  ;;  %v1484_v62 = vadd.f32 %v1483_v21, %v1481_v60 }
 0x3ae   :  { %s4366_s19 = sld [smem:[#allocation12 + $0x3f]]  ;;  %v1506_v26 = vstv %s4333_s1 }
 0x3af   :  { %s5492_s13 = sld [smem:[#allocation73_spill]]  ;;  %v1487_v28 = vadd.f32 %v1486_v38, %v1484_v62 }
 0x3b0   :  { %s4371_s12 = sld [smem:[#allocation12 + $0x40]] }
 0x3b1   :  { %s5494_s5 = sld [smem:[#allocation33_spill]]  ;;  %v1490_v25 = vadd.f32 %v1489_v4, %v1487_v28  ;;  %v1466_v4 = vadd.f32 %v1465_v15, %v1464_v48 }
 0x3b2   :  { %s5495_s4 = sld [smem:[#allocation34_spill]] }
 0x3b3   :  { %s4376_s20 = sld [smem:[#allocation12 + $0x41]]  ;;  %v1493_v2 = vadd.f32 %v1492_v35, %v1490_v25  ;;  %v1525_v35 = vadd.f32 %v1524_v24, %v1522_v43  ;;  %v4424_v60 = vmax.f32 %v1466_v4, 0.0 }
 0x3b4   :  { %s4381_s16 = sld [smem:[#allocation12 + $0x42]] }
 0x3b5   :  { %s5498_s0 = sld [smem:[#allocation35_spill]]  ;;  %v1526_v27 = vstv %s5492_s13  ;;  %v1496_v22 = vadd.f32 %v1495_v5, %v1493_v2  ;;  %v1504_v62 = vmul.f32 %v1503_v11, %v4424_v60 }
 0x3b6   :  { %5493 = sst [smem:[#allocation54_spill]] %s4371_s12  ;;  %v1527_v47 = vmul.f32 %v1526_v27, %v4011_v46 }
 0x3b7   :  { %s5499_s27 = sld [smem:[#allocation36_spill]]  ;;  %v1529_v17 = vstv %s5494_s5  ;;  %v1499_v39 = vadd.f32 %v1498_v32, %v1496_v22 }
 0x3b8   :  { %s4386_s28 = sld [smem:[#allocation12 + $0x43]]  ;;  %v1532_v23 = vstv %s5495_s4  ;;  %v1530_v6 = vmul.f32 %v1529_v17, %v4076_v51  ;;  %v1528_v9 = vadd.f32 %v1527_v47, %v1525_v35 }
 0x3b9   :  { %5496 = sst [smem:[#allocation55_spill]] %s4376_s20  ;;  %v1533_v8 = vmul.f32 %v1532_v23, %v4148_v0  ;;  %v1502_v57 = vadd.f32 %v1501_v14, %v1499_v39 }
 0x3ba   :  { %5497 = sst [smem:[#allocation79_spill]] %s4381_s16  ;;  %v1531_v40 = vadd.f32 %v1530_v6, %v1528_v9 }
 0x3bb   :  { %s5501_s17 = sld [smem:[#allocation37_spill]]  ;;  %v1535_v36 = vstv %s5498_s0  ;;  %v1505_v44 = vadd.f32 %v1504_v62, %v1502_v57  ;;  %v1614_v62 = vstv %s4265_s2 }
 0x3bc   :  { %s4391_s20 = sld [smem:[#allocation12 + $0x44]]  ;;  %v1536_v21 = vmul.f32 %v1535_v36, %v4222_v7  ;;  %v1534_v53 = vadd.f32 %v1533_v8, %v1531_v40 }
 0x3bd   :  { %s5503_s21 = sld [smem:[#allocation74_spill]]  ;;  %v1538_v58 = vstv %s5499_s27  ;;  %v1507_v14 = vadd.f32 %v1506_v26, %v1505_v44  ;;  %v1620_v44 = vstv %s4275_s9 }
 0x3be   :  { %5500 = sst [smem:[#allocation56_spill]] %s4386_s28  ;;  %v1539_v38 = vmul.f32 %v1538_v58, %v4296_v56  ;;  %v1537_v17 = vadd.f32 %v1536_v21, %v1534_v53 }
 0x3bf   :  { %s4396_s16 = sld [smem:[#allocation12 + $0x45]]  ;;  %v4464_v6 = vmax.f32 %v1507_v14, 0.0  ;;  %v1632_v14 = vstv %s4294_s24 }
 0x3c0   :  { %s5505_s13 = sld [smem:[#allocation38_spill]]  ;;  %v1540_v26 = vadd.f32 %v1539_v38, %v1537_v17 }
 0x3c1   :  { %s5506_s5 = sld [smem:[#allocation39_spill]]  ;;  %v1541_v59 = vstv %s5501_s17 }
 0x3c2   :  { %5502 = sst [smem:[#allocation57_spill]] %s4391_s20  ;;  %v1542_v19 = vmul.f32 %v1541_v59, %v4361_v55 }
 0x3c3   :  { %s4401_s4 = sld [smem:[#allocation14 + $0x1]]  ;;  %v1544_v1 = vstv %s5503_s21 }
 0x3c4   :  { %s5507_s20 = sld [smem:[#allocation75_spill]]  ;;  %v1545_v11 = vmul.f32 %v1544_v1, %v4424_v60  ;;  %v1543_v22 = vadd.f32 %v1542_v19, %v1540_v26  ;;  %v1640_v26 = vstv %s4316_s18 }
 0x3c5   :  { %5504 = sst [smem:[#allocation58_spill]] %s4396_s16 }
 0x3c6   :  { %s4406_s28 = sld [smem:[#allocation12 + $0x46]]  ;;  %v1550_v20 = vstv %s5505_s13  ;;  %v1546_v39 = vadd.f32 %v1545_v11, %v1543_v22  ;;  %v1641_v22 = vmul.f32 %v1640_v26, %v3791_v63 }
 0x3c7   :  { %s5508_s16 = sld [smem:[#allocation40_spill]]  ;;  %v1552_v16 = vstv %s5506_s5  ;;  %v1551_v50 = vmul.f32 %v1550_v20, %v3621_v41 }
 0x3c8   :  { %s4411_s0 = sld [smem:[#allocation12 + $0x47]]  ;;  %v1553_v5 = vmul.f32 %v1552_v16, %v3655_v34 }
 0x3c9   :  { %s5510_s27 = sld [smem:[#allocation41_spill]]  ;;  %v1547_v10 = vstv %s4401_s4 }
 0x3ca   :  { %s4417_s12 = sld [smem:[#allocation12 + $0x48]]  ;;  %v1555_v42 = vstv %s5507_s20  ;;  %v1554_v32 = vadd.f32 %v1553_v5, %v1551_v50 }
 0x3cb   :  { %s4422_s17 = sld [smem:[#allocation12 + $0x49]]  ;;  %v1556_v15 = vmul.f32 %v1555_v42, %v3715_v61 }
 0x3cc   :  { %s5513_s21 = sld [smem:[#allocation42_spill]] }
 0x3cd   :  { %s5514_s14 = sld [smem:[#allocation43_spill]]  ;;  %v1558_v13 = vstv %s5508_s16  ;;  %v1557_v29 = vadd.f32 %v1556_v15, %v1554_v32  ;;  %v1548_v32 = vadd.f32 %v1547_v10, %v1546_v39  ;;  %v1652_v39 = vstv %s4343_s7 }
 0x3ce   :  { %5509 = sst [smem:[#allocation59_spill]] %s4411_s0  ;;  %v1559_v31 = vmul.f32 %v1558_v13, %v3791_v63 }
 0x3cf   :  { %s5515_s13 = sld [smem:[#allocation44_spill]]  ;;  %v1561_v37 = vstv %s5510_s27  ;;  %v4509_v53 = vmax.f32 %v1548_v32, 0.0  ;;  %v1658_v32 = vstv %s4354_s22 }
 0x3d0   :  { %5511 = sst [smem:[#allocation60_spill]] %s4417_s12  ;;  %v1562_v52 = vmul.f32 %v1561_v37, %v3863_v30  ;;  %v1560_v54 = vadd.f32 %v1559_v31, %v1557_v29  ;;  %v1611_v37 = vstv %s4259_s10 }
 0x3d1   :  { %5512 = sst [smem:[#allocation80_spill]] %s4422_s17 }
 0x3d2   :  { %s4428_s5 = sld [smem:[#allocation12 + $0x4a]]  ;;  %v1564_v45 = vstv %s5513_s21  ;;  %v1563_v33 = vadd.f32 %v1562_v52, %v1560_v54  ;;  %v1615_v54 = vmul.f32 %v1614_v62, %v4148_v0 }
 0x3d3   :  { %s4432_s20 = sld [smem:[#allocation12 + $0x4b]]  ;;  %v1567_v12 = vstv %s5514_s14  ;;  %v1565_v3 = vmul.f32 %v1564_v45, %v3937_v18 }
 0x3d4   :  { %s5518_s17 = sld [smem:[#allocation76_spill]]  ;;  %v1568_v23 = vmul.f32 %v1567_v12, %v4011_v46  ;;  %v1612_v12 = vmul.f32 %v1611_v37, %v4076_v51  ;;  %v1664_v37 = vstv %s4366_s19 }
 0x3d5   :  { %s5519_s12 = sld [smem:[#allocation45_spill]]  ;;  %v1570_v28 = vstv %s5515_s13  ;;  %v1566_v48 = vadd.f32 %v1565_v3, %v1563_v33 }
 0x3d6   :  { %s4437_s16 = sld [smem:[#allocation12 + $0x4c]]  ;;  %v1571_v49 = vmul.f32 %v1570_v28, %v4076_v51  ;;  %v1617_v28 = vstv %s4269_s8 }
 0x3d7   :  { %s5521_s27 = sld [smem:[#allocation77_spill]]  ;;  %v1569_v4 = vadd.f32 %v1568_v23, %v1566_v48  ;;  %v1618_v3 = vmul.f32 %v1617_v28, %v4222_v7 }
 0x3d8   :  { %5516 = sst [smem:[#allocation61_spill]] %s4428_s5 }
 0x3d9   :  { %5517 = sst [smem:[#allocation62_spill]] %s4432_s20  ;;  %v1572_v9 = vadd.f32 %v1571_v49, %v1569_v4  ;;  %v1626_v49 = vstv %s4288_s11 }
 0x3da   :  { %s4442_s5 = sld [smem:[#allocation12 + $0x4d]]  ;;  %v1573_v27 = vstv %s5518_s17 }
 0x3db   :  { %s5522_s20 = sld [smem:[#allocation46_spill]]  ;;  %v1576_v25 = vstv %s5519_s12  ;;  %v1574_v24 = vmul.f32 %v1573_v27, %v4148_v0  ;;  %v4516_v27 = vmul.f32 %v1620_v44, %v4296_v56 }
 0x3dc   :  { %5520 = sst [smem:[#allocation63_spill]] %s4437_s16  ;;  %v1577_v36 = vmul.f32 %v1576_v25, %v4222_v7  ;;  %v1623_v25 = vstv %s4280_s6 }
 0x3dd   :  { %s4446_s0 = sld [smem:[#allocation14 + $0x2]]  ;;  %v1579_v47 = vstv %s5521_s27  ;;  %v1575_v40 = vadd.f32 %v1574_v24, %v1572_v9  ;;  %v1633_v24 = vmul.f32 %v1632_v14, %v3621_v41 }
 0x3de   :  { %s5523_s16 = sld [smem:[#allocation47_spill]]  ;;  %v1580_v43 = vmul.f32 %v1579_v47, %v4296_v56  ;;  %v1634_v47 = vstv %s4305_s15 }
 0x3df   :  { %s4451_s21 = sld [smem:[#allocation12 + $0x4e]]  ;;  %v1578_v11 = vadd.f32 %v1577_v36, %v1575_v40  ;;  %v1635_v48 = vmul.f32 %v1634_v47, %v3655_v34 }
 0x3e0   :  { %s5525_s14 = sld [smem:[#allocation48_spill]] }
 0x3e1   :  { %s4457_s13 = sld [smem:[#allocation12 + $0x4f]]  ;;  %v1582_v2 = vstv %s5522_s20  ;;  %v1581_v17 = vadd.f32 %v1580_v43, %v1578_v11  ;;  %v1636_v4 = vadd.f32 %v1635_v48, %v1633_v24 }
 0x3e2   :  { %s5527_s4 = sld [smem:[#allocation49_spill]]  ;;  %v1583_v8 = vmul.f32 %v1582_v2, %v4361_v55  ;;  %v1637_v2 = vstv %s4310_s29 }
 0x3e3   :  { %s5528_s17 = sld [smem:[#allocation50_spill]]  ;;  %v1588_v15 = vstv %s4446_s0  ;;  %v1638_v43 = vmul.f32 %v1637_v2, %v3715_v61 }
 0x3e4   :  { %s4462_s12 = sld [smem:[#allocation12 + $0x50]]  ;;  %v1585_v58 = vstv %s5523_s16  ;;  %v1584_v36 = vadd.f32 %v1583_v8, %v1581_v17 }
 0x3e5   :  { %5524 = sst [smem:[#allocation64_spill]] %s4451_s21  ;;  %v1586_v50 = vmul.f32 %v1585_v58, %v4424_v60 }
 0x3e6   :  { %s5530_s1 = sld [smem:[#allocation51_spill]]  ;;  %v1591_v59 = vstv %s5525_s14 }
 0x3e7   :  { %5526 = sst [smem:[#allocation81_spill]] %s4457_s13  ;;  %v1592_v21 = vmul.f32 %v1591_v59, %v3621_v41  ;;  %v1624_v59 = vmul.f32 %v1623_v25, %v4361_v55 }
 0x3e8   :  { %s4468_s21 = sld [smem:[#allocation12 + $0x51]]  ;;  %v1593_v38 = vstv %s5527_s4 }
 0x3e9   :  { %s5531_s13 = sld [smem:[#allocation78_spill]]  ;;  %v1596_v1 = vstv %s5528_s17  ;;  %v1594_v35 = vmul.f32 %v1593_v38, %v3655_v34  ;;  %v1646_v38 = vstv %s4328_s26 }
 0x3ea   :  { %5529 = sst [smem:[#allocation65_spill]] %s4462_s12  ;;  %v1597_v20 = vmul.f32 %v1596_v1, %v3715_v61  ;;  %v1587_v1 = vadd.f32 %v1586_v50, %v1584_v36  ;;  %v1647_v50 = vmul.f32 %v1646_v38, %v3937_v18  ;;  %v1687_v36 = vstv %s4406_s28 }
 0x3eb   :  { %s5532_s27 = sld [smem:[#allocation52_spill]]  ;;  %v1595_v13 = vadd.f32 %v1594_v35, %v1592_v21  ;;  %v1643_v21 = vstv %s4323_s23  ;;  %v1649_v35 = vstv %s4338_s25 }
 0x3ec   :  { %s4473_s20 = sld [smem:[#allocation12 + $0x52]]  ;;  %v1599_v16 = vstv %s5530_s1 }
 0x3ed   :  { %s4478_s12 = sld [smem:[#allocation14 + $0x3]]  ;;  %v1600_v57 = vmul.f32 %v1599_v16, %v3791_v63  ;;  %v1598_v19 = vadd.f32 %v1597_v20, %v1595_v13  ;;  %v1627_v20 = vmul.f32 %v1626_v49, %v4424_v60  ;;  %v1644_v16 = vmul.f32 %v1643_v21, %v3863_v30 }
 0x3ee   :  { %s5533_s16 = sld [smem:[#allocation53_spill]]  ;;  %v1639_v13 = vadd.f32 %v1638_v43, %v1636_v4 }
 0x3ef   :  { %s4483_s14 = sld [smem:[#allocation12 + $0x53]]  ;;  %v1602_v5 = vstv %s5531_s13  ;;  %v1601_v10 = vadd.f32 %v1600_v57, %v1598_v19  ;;  %v1650_v57 = vmul.f32 %v1649_v35, %v4011_v46  ;;  %v1688_v35 = vmul.f32 %v1687_v36, %v3937_v18 }
 0x3f0   :  { %s4488_s4 = sld [smem:[#allocation12 + $0x54]]  ;;  %v1603_v52 = vmul.f32 %v1602_v5, %v3863_v30  ;;  %v1655_v5 = vstv %s4348_s30  ;;  %v1642_v40 = vadd.f32 %v1641_v22, %v1639_v13 }
 0x3f1   :  { %v1605_v42 = vstv %s5532_s27  ;;  %s4492_s17 = sld [smem:[#allocation12 + $0x55]]  ;;  %v1656_v19 = vmul.f32 %v1655_v5, %v4148_v0 }
 0x3f2   :  { %s4497_s1 = sld [smem:[#allocation12 + $0x56]]  ;;  %v1606_v29 = vmul.f32 %v1605_v42, %v3937_v18  ;;  %v1604_v23 = vadd.f32 %v1603_v52, %v1601_v10  ;;  %v1589_v42 = vadd.f32 %v1588_v15, %v1587_v1  ;;  %v1653_v15 = vmul.f32 %v1652_v39, %v4076_v51 }
 0x3f3   :  { %s4501_s0 = sld [smem:[#allocation12 + $0x57]]  ;;  %v1629_v33 = vstv %s4478_s12  ;;  %v1645_v44 = vadd.f32 %v1644_v16, %v1642_v40 }
 0x3f4   :  { %v1608_v31 = vstv %s5533_s16  ;;  %s4507_s10 = sld [smem:[#allocation12 + $0x58]]  ;;  %v1607_v58 = vadd.f32 %v1606_v29, %v1604_v23  ;;  %v4564_v52 = vmax.f32 %v1589_v42, 0.0  ;;  %v1659_v29 = vmul.f32 %v1658_v32, %v4222_v7 }
 0x3f5   :  { %v1609_v45 = vmul.f32 %v1608_v31, %v4011_v46  ;;  %s4512_s2 = sld [smem:[#allocation12 + $0x59]]  ;;  %v1661_v31 = vstv %s4359_s3  ;;  %v1648_v49 = vadd.f32 %v1647_v50, %v1645_v44 }
 0x3f6   :  { %s4520_s8 = sld [smem:[#allocation12 + $0x5a]] }
 0x3f7   :  { %s4524_s9 = sld [smem:[#allocation12 + $0x5b]]  ;;  %v1610_v8 = vadd.f32 %v1609_v45, %v1607_v58  ;;  %v4568_v45 = vmul.f32 %v1661_v31, %v4296_v56  ;;  %v1651_v48 = vadd.f32 %v1650_v57, %v1648_v49  ;;  %v1725_v49 = vstv %s4473_s20 }
 0x3f8   :  { %s4530_s13 = sld [smem:[#allocation12 + $0x5c]]  ;;  %v1726_v36 = vmul.f32 %v1725_v49, %v3863_v30 }
 0x3f9   :  { %s4534_s6 = sld [smem:[#allocation12 + $0x5d]]  ;;  %v1613_v9 = vadd.f32 %v1612_v12, %v1610_v8  ;;  %v4571_v12 = vmul.f32 %v1664_v37, %v4361_v55  ;;  %v1654_v4 = vadd.f32 %v1653_v15, %v1651_v48  ;;  %v1708_v15 = vstv %s4442_s5 }
 0x3fa   :  { %s4540_s11 = sld [smem:[#allocation12 + $0x5e]]  ;;  %v1734_v48 = vstv %s4492_s17 }
 0x3fb   :  { %s4543_s24 = sld [smem:[#allocation14 + $0x4]]  ;;  %v1616_v62 = vadd.f32 %v1615_v54, %v1613_v9  ;;  %v1657_v9 = vadd.f32 %v1656_v19, %v1654_v4  ;;  %v1743_v4 = vstv %s4507_s10 }
 0x3fc   :  { %s4549_s15 = sld [smem:[#allocation12 + $0x5f]] }
 0x3fd   :  { %s4552_s29 = sld [smem:[#allocation12 + $0x60]]  ;;  %v1619_v28 = vadd.f32 %v1618_v3, %v1616_v62  ;;  %v1660_v62 = vadd.f32 %v1659_v29, %v1657_v9  ;;  %v1746_v9 = vstv %s4512_s2 }
 0x3fe   :  { %s5534_s18 = sld [smem:[#allocation54_spill]]  ;;  %v1747_v49 = vmul.f32 %v1746_v9, %v4361_v55 }
 0x3ff   :  { %s5535_s23 = sld [smem:[#allocation55_spill]]  ;;  %v1622_v23 = vadd.f32 %v4516_v27, %v1619_v28 }
 0x400   :  { %s4558_s26 = sld [smem:[#allocation12 + $0x61]] }
 0x401   :  { %s5537_s25 = sld [smem:[#allocation79_spill]]  ;;  %v1670_v47 = vstv %s4543_s24  ;;  %v1625_v58 = vadd.f32 %v1624_v59, %v1622_v23 }
 0x402   :  { %s5538_s7 = sld [smem:[#allocation56_spill]] }
 0x403   :  { %s5539_s30 = sld [smem:[#allocation57_spill]]  ;;  %v1628_v8 = vadd.f32 %v1627_v20, %v1625_v58  ;;  %v1731_v58 = vstv %s4488_s4 }
 0x404   :  { %s4562_s27 = sld [smem:[#allocation12 + $0x62]]  ;;  %v1667_v11 = vstv %s5534_s18 }
 0x405   :  { %s4573_s22 = sld [smem:[#allocation12 + $0x63]]  ;;  %v1673_v10 = vstv %s5535_s23  ;;  %v1668_v22 = vmul.f32 %v1667_v11, %v4424_v60  ;;  %v1630_v57 = vadd.f32 %v1629_v33, %v1628_v8  ;;  %v1722_v11 = vstv %s4468_s21 }
 0x406   :  { %5536 = sst [smem:[#allocation66_spill]] %s4558_s26  ;;  %v1674_v54 = vmul.f32 %v1673_v10, %v3621_v41  ;;  %v1663_v10 = vadd.f32 %v4568_v45, %v1660_v62  ;;  %v1723_v23 = vmul.f32 %v1722_v11, %v3791_v63  ;;  %v1740_v8 = vstv %s4501_s0 }
 0x407   :  { %s5542_s3 = sld [smem:[#allocation58_spill]]  ;;  %v1675_v25 = vstv %s5537_s25  ;;  %v1755_v62 = vstv %s4524_s9 }
 0x408   :  { %s4577_s19 = sld [smem:[#allocation12 + $0x64]]  ;;  %v1678_v14 = vstv %s5538_s7  ;;  %v1676_v3 = vmul.f32 %v1675_v25, %v3655_v34  ;;  %v1666_v45 = vadd.f32 %v4571_v12, %v1663_v10  ;;  %v1737_v12 = vstv %s4497_s1 }
 0x409   :  { %s5544_s16 = sld [smem:[#allocation59_spill]]  ;;  %v1681_v17 = vstv %s5539_s30  ;;  %v1679_v24 = vmul.f32 %v1678_v14, %v3715_v61  ;;  %v4644_v14 = vmax.f32 %v1630_v57, 0.0  ;;  %v1763_v10 = vstv %s4540_s11 }
 0x40a   :  { %5540 = sst [smem:[#allocation82_spill]] %s4562_s27  ;;  %v1682_v2 = vmul.f32 %v1681_v17, %v3791_v63  ;;  %v1677_v27 = vadd.f32 %v1676_v3, %v1674_v54 }
 0x40b   :  { %5541 = sst [smem:[#allocation67_spill]] %s4573_s22 }
 0x40c   :  { %s4583_s27 = sld [smem:[#allocation14 + $0x5]]  ;;  %v1680_v59 = vadd.f32 %v1679_v24, %v1677_v27  ;;  %v1669_v27 = vadd.f32 %v1668_v22, %v1666_v45 }
 0x40d   :  { %s5545_s22 = sld [smem:[#allocation60_spill]]  ;;  %v1684_v26 = vstv %s5542_s3 }
 0x40e   :  { %5543 = sst [smem:[#allocation68_spill]] %s4577_s19  ;;  %v1685_v21 = vmul.f32 %v1684_v26, %v3863_v30  ;;  %v1683_v13 = vadd.f32 %v1682_v2, %v1680_v59  ;;  %v1728_v2 = vstv %s4483_s14  ;;  %v1709_v26 = vmul.f32 %v1708_v15, %v4424_v60 }
 0x40f   :  { %s5546_s18 = sld [smem:[#allocation80_spill]]  ;;  %v1690_v43 = vstv %s5544_s16  ;;  %v1671_v59 = vadd.f32 %v1670_v47, %v1669_v27  ;;  %v1760_v15 = vstv %s4534_s6 }
 0x410   :  { %s4588_s23 = sld [smem:[#allocation12 + $0x65]]  ;;  %v1691_v16 = vmul.f32 %v1690_v43, %v4011_v46  ;;  %v1686_v40 = vadd.f32 %v1685_v21, %v1683_v13  ;;  %v1761_v11 = vmul.f32 %v1760_v15, %v3715_v61 }
 0x411   :  { %s4594_s25 = sld [smem:[#allocation12 + $0x66]]  ;;  %v4687_v57 = vmax.f32 %v1671_v59, 0.0 }
 0x412   :  { %s5548_s7 = sld [smem:[#allocation61_spill]]  ;;  %v1711_v19 = vstv %s4583_s27  ;;  %v1689_v54 = vadd.f32 %v1688_v35, %v1686_v40  ;;  %v1757_v40 = vstv %s4530_s13 }
 0x413   :  { %s5549_s30 = sld [smem:[#allocation62_spill]]  ;;  %v1693_v38 = vstv %s5545_s22 }
 0x414   :  { %s5550_s19 = sld [smem:[#allocation63_spill]]  ;;  %v1694_v20 = vmul.f32 %v1693_v38, %v4076_v51  ;;  %v1692_v3 = vadd.f32 %v1691_v16, %v1689_v54  ;;  %v1729_v38 = vmul.f32 %v1728_v2, %v3937_v18  ;;  %v1735_v16 = vmul.f32 %v1734_v48, %v4076_v51 }
 0x415   :  { %s4597_s26 = sld [smem:[#allocation12 + $0x67]]  ;;  %v1696_v1 = vstv %s5546_s18  ;;  %v1766_v54 = vstv %s4549_s15 }
 0x416   :  { %5547 = sst [smem:[#allocation70_spill]] %s4588_s23  ;;  %v1697_v50 = vmul.f32 %v1696_v1, %v4148_v0  ;;  %v1695_v43 = vadd.f32 %v1694_v20, %v1692_v3  ;;  %v1732_v1 = vmul.f32 %v1731_v58, %v4011_v46  ;;  %v1749_v20 = vstv %s4520_s8 }
 0x417   :  { %s4603_s23 = sld [smem:[#allocation12 + $0x68]]  ;;  %v1750_v45 = vmul.f32 %v1749_v20, %v4424_v60  ;;  %v1767_v3 = vmul.f32 %v1766_v54, %v3863_v30 }
 0x418   :  { %s4606_s28 = sld [smem:[#allocation12 + $0x69]]  ;;  %v1699_v39 = vstv %s5548_s7  ;;  %v1698_v22 = vadd.f32 %v1697_v50, %v1695_v43 }
 0x419   :  { %v1702_v5 = vstv %s5549_s30  ;;  %s4612_s3 = sld [smem:[#allocation12 + $0x6a]]  ;;  %v1700_v32 = vmul.f32 %v1699_v39, %v4222_v7  ;;  %v1738_v39 = vmul.f32 %v1737_v12, %v4148_v0 }
 0x41a   :  { %v1705_v42 = vstv %s5550_s19  ;;  %s5552_s22 = sld [smem:[#allocation64_spill]]  ;;  %v4622_v31 = vmul.f32 %v1702_v5, %v4296_v56  ;;  %v1741_v5 = vmul.f32 %v1740_v8, %v4222_v7 }
 0x41b   :  { %s5553_s16 = sld [smem:[#allocation81_spill]]  ;;  %v4625_v37 = vmul.f32 %v1705_v42, %v4361_v55  ;;  %v4678_v42 = vmul.f32 %v1743_v4, %v4296_v56  ;;  %v1701_v47 = vadd.f32 %v1700_v32, %v1698_v22  ;;  %v1756_v32 = vmul.f32 %v1755_v62, %v3621_v41 }
 0x41c   :  { %s5554_s18 = sld [smem:[#allocation65_spill]]  ;;  %v1787_v22 = vstv %s4594_s25 }
 0x41d   :  { %s4627_s19 = sld [smem:[#allocation12 + $0x6c]] }
 0x41e   :  { %5551 = sst [smem:[#allocation69_spill]] %s4606_s28 }
 0x41f   :  { %s4616_s28 = sld [smem:[#allocation12 + $0x6b]] }
 0x420   :  { %s4631_s7 = sld [smem:[#allocation12 + $0x6d]]  ;;  %v1714_v28 = vstv %s5552_s22 }
 0x421   :  { %v1716_v44 = vstv %s5553_s16  ;;  %s4637_s12 = sld [smem:[#allocation14 + $0x6]]  ;;  %v1715_v25 = vmul.f32 %v1714_v28, %v3621_v41  ;;  %v1704_v28 = vadd.f32 %v4622_v31, %v1701_v47  ;;  %v4742_v47 = vmul.f32 %v1787_v22, %v4361_v55 }
 0x422   :  { %v1719_v33 = vstv %s5554_s18  ;;  %v1717_v29 = vmul.f32 %v1716_v44, %v3655_v34  ;;  %s4642_s5 = sld [smem:[#allocation12 + $0x6e]] }
 0x423   :  { %v1720_v17 = vmul.f32 %v1719_v33, %v3715_v61  ;;  %s4649_s21 = sld [smem:[#allocation12 + $0x6f]]  ;;  %v1758_v33 = vmul.f32 %v1757_v40, %v3655_v34 }
 0x424   :  { %v1718_v24 = vadd.f32 %v1717_v29, %v1715_v25  ;;  %s4653_s30 = sld [smem:[#allocation12 + $0x70]]  ;;  %v1769_v25 = vstv %s4552_s29  ;;  %v1707_v29 = vadd.f32 %v4625_v37, %v1704_v28 }
 0x425   :  { %s4659_s22 = sld [smem:[#allocation12 + $0x71]]  ;;  %v1770_v48 = vmul.f32 %v1769_v25, %v3937_v18 }
 0x426   :  { %v1721_v21 = vadd.f32 %v1720_v17, %v1718_v24  ;;  %s4662_s20 = sld [smem:[#allocation12 + $0x72]]  ;;  %v1759_v17 = vadd.f32 %v1758_v33, %v1756_v32  ;;  %v1710_v37 = vadd.f32 %v1709_v26, %v1707_v29  ;;  %v1804_v32 = vstv %s4616_s28 }
 0x427   :  { %s4668_s14 = sld [smem:[#allocation12 + $0x73]]  ;;  %v1752_v50 = vstv %s4637_s12  ;;  %v1807_v33 = vstv %s4627_s19  ;;  %v1805_v54 = vmul.f32 %v1804_v32, %v3791_v63  ;;  %v1810_v29 = vstv %s4631_s7 }
 0x428   :  { %v1724_v35 = vadd.f32 %v1723_v23, %v1721_v21  ;;  %s4673_s4 = sld [smem:[#allocation12 + $0x74]]  ;;  %v1764_v23 = vmul.f32 %v1763_v10, %v3791_v63  ;;  %v1712_v12 = vadd.f32 %v1711_v19, %v1710_v37  ;;  %v1808_v25 = vmul.f32 %v1807_v33, %v3863_v30 }
 0x429   :  { %s4681_s17 = sld [smem:[#allocation14 + $0x7]] }
 0x42a   :  { %v1727_v13 = vadd.f32 %v1726_v36, %v1724_v35  ;;  %s4685_s1 = sld [smem:[#allocation14 + $0x8]]  ;;  %v1762_v36 = vadd.f32 %v1761_v11, %v1759_v17  ;;  %v4739_v9 = vmax.f32 %v1712_v12, 0.0 }
 0x42b   :  { %s4692_s0 = sld [smem:[#allocation15]] }
 0x42c   :  { %v1730_v44 = vadd.f32 %v1729_v38, %v1727_v13  ;;  %s5555_s10 = sld [smem:[#allocation66_spill]]  ;;  %v1796_v13 = vstv %s4603_s23  ;;  %v1825_v37 = vstv %s4662_s20 }
 0x42d   :  { %s4697_s2 = sld [smem:[#allocation15 + $0x1]]  ;;  %v1797_v40 = vmul.f32 %v1796_v13, %v3621_v41 }
 0x42e   :  { %s5556_s8 = sld [smem:[#allocation82_spill]]  ;;  %v1733_v31 = vadd.f32 %v1732_v1, %v1730_v44  ;;  %v1765_v1 = vadd.f32 %v1764_v23, %v1762_v36  ;;  %v1801_v44 = vstv %s4612_s3 }
 0x42f   :  { %s4703_s9 = sld [smem:[#allocation15 + $0x2]]  ;;  %v1793_v10 = vstv %s4681_s17 }
 0x430   :  { %s5557_s13 = sld [smem:[#allocation67_spill]]  ;;  %v1736_v2 = vadd.f32 %v1735_v16, %v1733_v31  ;;  %v1768_v19 = vadd.f32 %v1767_v3, %v1765_v1  ;;  %v1816_v3 = vstv %s4649_s21 }
 0x431   :  { %s5558_s6 = sld [smem:[#allocation68_spill]] }
 0x432   :  { %s5559_s24 = sld [smem:[#allocation70_spill]]  ;;  %v1772_v24 = vstv %s5555_s10  ;;  %v1739_v38 = vadd.f32 %v1738_v39, %v1736_v2  ;;  %v1790_v39 = vstv %s4597_s26  ;;  %v1771_v62 = vadd.f32 %v1770_v48, %v1768_v19 }
 0x433   :  { %s4707_s16 = sld [smem:[#allocation15 + $0x3]]  ;;  %v1773_v26 = vmul.f32 %v1772_v24, %v4011_v46  ;;  %v4754_v28 = vmul.f32 %v1790_v39, %v4424_v60  ;;  %v1822_v24 = vstv %s4659_s22  ;;  %v1839_v12 = vstv %s4697_s2 }
 0x434   :  { %s4713_s11 = sld [smem:[#allocation15 + $0x4]]  ;;  %v1775_v58 = vstv %s5556_s8  ;;  %v1742_v35 = vadd.f32 %v1741_v5, %v1739_v38 }
 0x435   :  { %s4716_s15 = sld [smem:[#allocation15 + $0x5]]  ;;  %v1776_v8 = vmul.f32 %v1775_v58, %v4076_v51  ;;  %v1817_v58 = vmul.f32 %v1816_v3, %v4076_v51 }
 0x436   :  { %v1778_v27 = vstv %s5557_s13  ;;  %s4722_s29 = sld [smem:[#allocation15 + $0x6]]  ;;  %v1745_v5 = vadd.f32 %v4678_v42, %v1742_v35  ;;  %v1774_v42 = vadd.f32 %v1773_v26, %v1771_v62  ;;  %v1831_v26 = vstv %s4673_s4 }
 0x437   :  { %v1781_v43 = vstv %s5558_s6  ;;  %s5560_s18 = sld [smem:[#allocation69_spill]]  ;;  %v1779_v4 = vmul.f32 %v1778_v27, %v4148_v0  ;;  %v1828_v27 = vstv %s4668_s14  ;;  %v1834_v35 = vstv %s4685_s1 }
 0x438   :  { %v1784_v21 = vstv %s5559_s24  ;;  %s4727_s10 = sld [smem:[#allocation15 + $0x7]]  ;;  %v1782_v59 = vmul.f32 %v1781_v43, %v4222_v7  ;;  %v1748_v11 = vadd.f32 %v1747_v49, %v1745_v5  ;;  %v1777_v17 = vadd.f32 %v1776_v8, %v1774_v42 }
 0x439   :  { %s4733_s8 = sld [smem:[#allocation15 + $0x8]]  ;;  %v1785_v16 = vmul.f32 %v1784_v21, %v4296_v56  ;;  %v1813_v49 = vstv %s4642_s5  ;;  %v1823_v21 = vmul.f32 %v1822_v24, %v4222_v7  ;;  %v4797_v51 = vmul.f32 %v1828_v27, %v4361_v55 }
 0x43a   :  { %s4737_s27 = sld [smem:[#allocation15 + $0x9]]  ;;  %v1751_v31 = vadd.f32 %v1750_v45, %v1748_v11  ;;  %v1780_v2 = vadd.f32 %v1779_v4, %v1777_v17  ;;  %v1811_v45 = vmul.f32 %v1810_v29, %v3937_v18  ;;  %v1814_v36 = vmul.f32 %v1813_v49, %v4011_v46 }
 0x43b   :  { %s4746_s25 = sld [smem:[#allocation15 + $0xa]]  ;;  %v1826_v18 = vmul.f32 %v1825_v37, %v4296_v56  ;;  %v1840_v56 = vmul.f32 %v1839_v12, %v4509_v53  ;;  %v1842_v8 = vstv %s4703_s9  ;;  %v1845_v4 = vstv %s4707_s16 }
 0x43c   :  { %s4751_s26 = sld [smem:[#allocation15 + $0xb]]  ;;  %v1753_v63 = vadd.f32 %v1752_v50, %v1751_v31  ;;  %v1783_v43 = vadd.f32 %v1782_v59, %v1780_v2  ;;  %v1848_v55 = vstv %s4713_s11  ;;  %v1843_v19 = vmul.f32 %v1842_v8, %v4564_v52 }
 0x43d   :  { %v1798_v20 = vstv %s5560_s18  ;;  %s4759_s23 = sld [smem:[#allocation15 + $0xc]]  ;;  %v1846_v39 = vmul.f32 %v1845_v4, %v4644_v14  ;;  %v1851_v13 = vstv %s4716_s15  ;;  %v1832_v62 = vmul.f32 %v1831_v26, %v4424_v60 }
 0x43e   :  { %v1799_v15 = vmul.f32 %v1798_v20, %v3655_v34  ;;  %v1802_v34 = vmul.f32 %v1801_v44, %v3715_v61  ;;  %s4762_s13 = sld [smem:[#allocation15 + $0xd]]  ;;  %v1819_v61 = vstv %s4653_s30  ;;  %v4794_v46 = vmax.f32 %v1753_v63, 0.0 }
 0x43f   :  { %s4768_s28 = sld [smem:[#allocation15 + $0xe]]  ;;  %v1820_v48 = vmul.f32 %v1819_v61, %v4148_v0  ;;  %v1837_v0 = vstv %s4692_s0  ;;  %v1786_v38 = vadd.f32 %v1785_v16, %v1783_v43  ;;  %v1854_v20 = vstv %s4722_s29 }
 0x440   :  { %v1800_v41 = vadd.f32 %v1799_v15, %v1797_v40  ;;  %s4771_s3 = sld [smem:[#allocation15 + $0xf]]  ;;  %v1838_v7 = vmul.f32 %v1837_v0, %v4464_v6  ;;  %v1849_v40 = vmul.f32 %v1848_v55, %v4687_v57  ;;  %v1852_v44 = vmul.f32 %v1851_v13, %v4739_v9 }
 0x441   :  { %s4777_s19 = sld [smem:[#allocation15 + $0x10]]  ;;  %v1789_v59 = vadd.f32 %v4742_v47, %v1786_v38  ;;  %v1855_v32 = vmul.f32 %v1854_v20, %v4794_v46  ;;  %v1857_v33 = vstv %s4727_s10  ;;  %v1866_v42 = vstv %s4737_s27 }
 0x442   :  { %v1803_v23 = vadd.f32 %v1802_v34, %v1800_v41  ;;  %s4782_s7 = sld [smem:[#allocation15 + $0x11]]  ;;  %v1841_v16 = vadd.f32 %v1840_v56, %v1838_v7  ;;  %v1868_v60 = vstv %s4746_s25  ;;  %v1867_v34 = vmul.f32 %v1866_v42, %v4464_v6 }
 0x443   :  { %s4788_s5 = sld [smem:[#allocation15 + $0x12]]  ;;  %v1792_v5 = vadd.f32 %v4754_v28, %v1789_v59  ;;  %v1874_v17 = vstv %s4759_s23  ;;  %v1860_v37 = vstv %s4733_s8 }
 0x444   :  { %v1806_v30 = vadd.f32 %v1805_v54, %v1803_v23  ;;  %s4792_s12 = sld [smem:[#allocation15 + $0x13]]  ;;  %v1844_v15 = vadd.f32 %v1843_v19, %v1841_v16  ;;  %v1869_v54 = vmul.f32 %v1868_v60, %v4509_v53  ;;  %v1875_v3 = vmul.f32 %v1874_v17, %v4644_v14 }
 0x445   :  { %s4801_s21 = sld [smem:[#allocation15 + $0x14]]  ;;  %v1794_v11 = vadd.f32 %v1793_v10, %v1792_v5  ;;  %v1877_v61 = vstv %s4762_s13  ;;  %v1880_v2 = vstv %s4768_s28 }
 0x446   :  { %v1809_v50 = vadd.f32 %v1808_v25, %v1806_v30  ;;  %s4805_s30 = sld [smem:[#allocation15 + $0x15]]  ;;  %v1847_v41 = vadd.f32 %v1846_v39, %v1844_v15  ;;  %v1871_v25 = vstv %s4751_s26  ;;  %v1870_v49 = vadd.f32 %v1869_v54, %v1867_v34 }
 0x447   :  { %s4811_s22 = sld [smem:[#allocation17]]  ;;  %v4844_v29 = vmax.f32 %v1794_v11, 0.0  ;;  %v1872_v31 = vmul.f32 %v1871_v25, %v4564_v52  ;;  %v1881_v43 = vmul.f32 %v1880_v2, %v4739_v9 }
 0x448   :  { %v1812_v1 = vadd.f32 %v1811_v45, %v1809_v50  ;;  %s4816_s20 = sld [smem:[#allocation15 + $0x16]]  ;;  %v1850_v23 = vadd.f32 %v1849_v40, %v1847_v41  ;;  %v1886_v50 = vstv %s4777_s19  ;;  %v1889_v12 = vstv %s4782_s7 }
 0x449   :  { %s4821_s14 = sld [smem:[#allocation15 + $0x17]]  ;;  %v1873_v45 = vadd.f32 %v1872_v31, %v1870_v49  ;;  %v1858_v27 = vmul.f32 %v1857_v33, %v4844_v29  ;;  %v1887_v56 = vmul.f32 %v1886_v50, %v4844_v29 }
 0x44a   :  { %v1815_v22 = vadd.f32 %v1814_v36, %v1812_v1  ;;  %s4826_s4 = sld [smem:[#allocation15 + $0x18]]  ;;  %v1853_v30 = vadd.f32 %v1852_v44, %v1850_v23  ;;  %v1878_v36 = vmul.f32 %v1877_v61, %v4687_v57  ;;  %v1895_v1 = vstv %s4788_s5 }
 0x44b   :  { %s4831_s0 = sld [smem:[#allocation15 + $0x19]]  ;;  %v1900_v26 = vstv %s4801_s21  ;;  %v1896_v8 = vmul.f32 %v1895_v1, %v4464_v6 }
 0x44c   :  { %v1818_v47 = vadd.f32 %v1817_v58, %v1815_v22  ;;  %s4837_s2 = sld [smem:[#allocation15 + $0x1a]]  ;;  %v1883_v58 = vstv %s4771_s3  ;;  %v1901_v59 = vmul.f32 %v1900_v26, %v4564_v52  ;;  %v1903_v22 = vstv %s4805_s30 }
 0x44d   :  { %s4842_s9 = sld [smem:[#allocation15 + $0x1b]]  ;;  %v1863_v63 = vstv %s4811_s22  ;;  %v1884_v0 = vmul.f32 %v1883_v58, %v4794_v46  ;;  %v1904_v20 = vmul.f32 %v1903_v22, %v4644_v14 }
 0x44e   :  { %v1821_v28 = vadd.f32 %v1820_v48, %v1818_v47  ;;  %s4848_s17 = sld [smem:[#allocation15 + $0x1c]]  ;;  %v1906_v19 = vstv %s4816_s20 }
 0x44f   :  { %s4852_s6 = sld [smem:[#allocation15 + $0x1d]]  ;;  %v1909_v47 = vstv %s4821_s14 }
 0x450   :  { %v1824_v10 = vadd.f32 %v1823_v21, %v1821_v28  ;;  %s4857_s24 = sld [smem:[#allocation17 + $0x1]]  ;;  %v1856_v21 = vadd.f32 %v1855_v32, %v1853_v30  ;;  %v1907_v32 = vmul.f32 %v1906_v19, %v4687_v57  ;;  %v1910_v28 = vmul.f32 %v1909_v47, %v4739_v9 }
 0x451   :  { %s4861_s16 = sld [smem:[#allocation15 + $0x1e]] }
 0x452   :  { %v1827_v24 = vadd.f32 %v1826_v18, %v1824_v10  ;;  %s4867_s11 = sld [smem:[#allocation15 + $0x1f]]  ;;  %v1876_v18 = vadd.f32 %v1875_v3, %v1873_v45  ;;  %v1859_v16 = vadd.f32 %v1858_v27, %v1856_v21  ;;  %v1918_v54 = vstv %s4837_s2 }
 0x453   :  { %s4871_s15 = sld [smem:[#allocation15 + $0x20]]  ;;  %v1924_v10 = vstv %s4842_s9 }
 0x454   :  { %v1830_v48 = vadd.f32 %v4797_v51, %v1827_v24  ;;  %v1897_v51 = vstv %s4792_s12  ;;  %s4876_s29 = sld [smem:[#allocation15 + $0x21]]  ;;  %v1879_v7 = vadd.f32 %v1878_v36, %v1876_v18  ;;  %v1926_v31 = vstv %s4848_s17  ;;  %s2760_s17 = smov [#allocation21]  }
 0x455   :  { %v1898_v4 = vmul.f32 %v1897_v51, %v4509_v53  ;;  %s4881_s18 = sld [smem:[#allocation15 + $0x22]]  ;;  %v1929_v17 = vstv %s4852_s6  ;;  %v1925_v3 = vmul.f32 %v1924_v10, %v4464_v6  ;;  %v1927_v61 = vmul.f32 %v1926_v31, %v4509_v53  ;;  %s2062_s6 = sshll.u32 %s2760_s17, 4  ;;  %s2063_s6 = int_to_ptr.vmem [resolvable:$true] %s2062_s6 }
 0x456   :  { %v1833_v38 = vadd.f32 %v1832_v62, %v1830_v48  ;;  %s4888_s10 = sld [smem:[#allocation15 + $0x23]]  ;;  %v1882_v39 = vadd.f32 %v1881_v43, %v1879_v7  ;;  %v1912_v62 = vstv %s4826_s4  ;;  %v1892_v15 = vstv %s4857_s24  ;;  %s2711_s24 = scalar_lea.vmem %s2063_s6, 512 }
 0x457   :  { %v1899_v13 = vadd.f32 %v1898_v4, %v1896_v8  ;;  %s4891_s8 = sld [smem:[#allocation17 + $0x2]]  ;;  %v1913_v42 = vmul.f32 %v1912_v62, %v4794_v46  ;;  %v1932_v2 = vstv %s4861_s16  ;;  %v1928_v58 = vadd.f32 %v1927_v61, %v1925_v3  ;;  %p2712_p8 = scmp.ne.s32.totalorder %s2063_s6, %s2711_s24 }
 0x458   :  { %v1835_v55 = vadd.f32 %v1834_v35, %v1833_v38  ;;  %v1915_v35 = vstv %s4831_s0  ;;  %s4898_s1 = sld [smem:[#allocation17 + $0x3]]  ;;  %v1885_v40 = vadd.f32 %v1884_v0, %v1882_v39  ;;  %v1935_v30 = vstv %s4867_s11  ;;  %p2716_p9 = scmp.lt.s32.totalorder %s2063_s6, %s2063_s6 }
 0x459   :  { %v1902_v44 = vadd.f32 %v1901_v59, %v1899_v13  ;;  %s4902_s27 = sld [smem:[#allocation18]]  ;;  %v1916_v34 = vmul.f32 %v1915_v35, %v4844_v29  ;;  %v1933_v48 = vmul.f32 %v1932_v2, %v4644_v14  ;;  %v1938_v6 = vstv %s4871_s15  ;;  %p2717_p10 = scmp.lt.s32.totalorder %s2711_s24, %s2711_s24 }
 0x45a   :  { %v4893_v5 = vmax.f32 %v1835_v55, 0.0  ;;  %s4908_s25 = sld [smem:[#allocation18 + $0x1]]  ;;  %v1888_v60 = vadd.f32 %v1887_v56, %v1885_v40  ;;  %v1936_v27 = vmul.f32 %v1935_v30, %v4687_v57  ;;  %v1939_v50 = vmul.f32 %v1938_v6, %v4739_v9 }
 0x45b   :  { %v1905_v41 = vadd.f32 %v1904_v20, %v1902_v44  ;;  %s4912_s26 = sld [smem:[#allocation18 + $0x2]]  ;;  %v1941_v21 = vstv %s4876_s29  ;;  %p2718_p11 = por %p2717_p10, %p2716_p9 }
 0x45c   :  { %v1861_v33 = vmul.f32 %v1860_v37, %v4893_v5  ;;  %v1890_v11 = vmul.f32 %v1889_v12, %v4893_v5  ;;  %s4919_s23 = sld [smem:[#allocation18 + $0x8]]  ;;  %v1930_v37 = vmul.f32 %v1929_v17, %v4564_v52  ;;  %v1919_v52 = vmul.f32 %v1918_v54, %v4893_v5 }
 0x45d   :  { %v1908_v49 = vadd.f32 %v1907_v32, %v1905_v41  ;;  %s4926_s13 = sld [smem:[#allocation18 + $0x9]]  ;;  %v1944_v12 = vstv %s4881_s18  ;;  %v1947_v38 = vstv %s4888_s10  ;;  %v1921_v1 = vstv %s4891_s8  ;;  %p2719_p12 = pnand %p2718_p11, %p2712_p8 }
 0x45e   :  { %v1862_v25 = vadd.f32 %v1861_v33, %v1859_v16  ;;  %v1891_v23 = vadd.f32 %v1890_v11, %v1888_v60  ;;  %s4929_s28 = sld [smem:[#allocation18 + $0xa]]  ;;  %v1942_v9 = vmul.f32 %v1941_v21, %v4794_v46  ;;  %v1945_v56 = vmul.f32 %v1944_v12, %v4844_v29 }
 0x45f   :  { %v1911_v36 = vadd.f32 %v1910_v28, %v1908_v49  ;;  %s4932_s3 = sld [smem:[#allocation18 + $0x4]]  ;;  %v1953_v51 = vstv %s4902_s27  ;;  %v1948_v8 = vmul.f32 %v1947_v38, %v4893_v5  ;;  %v1950_v32 = vstv %s4898_s1 }
 0x460   :  { %v1864_v24 = vadd.f32 %v1863_v63, %v1862_v25  ;;  %v1893_v45 = vadd.f32 %v1892_v15, %v1891_v23  ;;  %v1931_v63 = vadd.f32 %v1930_v37, %v1928_v58  ;;  %s4936_s19 = sld [smem:[#allocation18 + $0x5]]  ;;  %v1955_v57 = vstv %s4908_s25 }
 0x461   :  { %v1914_v53 = vadd.f32 %v1913_v42, %v1911_v36  ;;  %s4940_s7 = sld [smem:[#allocation18 + $0x6]]  ;;  %v1958_v46 = vstv %s4912_s26 }
 0x462   :  { %v1865_v43 = vmax.f32 %v1864_v24, 0.0  ;;  %v1894_v14 = vmax.f32 %v1893_v45, 0.0  ;;  %s4942_s5 = sld [smem:[#allocation18 + $0x3]]  ;;  %v1934_v0 = vadd.f32 %v1933_v48, %v1931_v63  ;;  %v1979_v4 = vstv %s4919_s23 }
 0x463   :  { %v1917_v18 = vadd.f32 %v1916_v34, %v1914_v53  ;;  %s4949_s12 = sld [smem:[#allocation18 + $0xc]]  ;;  %v1981_v55 = vstv %s4926_s13 }
 0x464   :  { %v1937_v7 = vadd.f32 %v1936_v27, %v1934_v0  ;;  %s4952_s21 = sld [smem:[#allocation18 + $0xd]]  ;;  %v1954_v19 = vmul.f32 %v1953_v51, %v1865_v43  ;;  %v1956_v16 = vmul.f32 %v1955_v57, %v1894_v14  ;;  %v1980_v39 = vmul.f32 %v1979_v4, %v1865_v43 }
 0x465   :  { %v1920_v26 = vadd.f32 %v1919_v52, %v1917_v18  ;;  %s4958_s30 = sld [smem:[#allocation18 + $0xe]]  ;;  %v1982_v13 = vmul.f32 %v1981_v55, %v1894_v14  ;;  %v1984_v29 = vstv %s4929_s28  ;;  %v1966_v47 = vstv %s4932_s3 }
 0x466   :  { %v1940_v22 = vadd.f32 %v1939_v50, %v1937_v7  ;;  %s4960_s22 = sld [smem:[#allocation18 + $0xb]]  ;;  %v1968_v62 = vstv %s4936_s19  ;;  %v1967_v35 = vmul.f32 %v1966_v47, %v1865_v43  ;;  %v1957_v33 = vadd.f32 %v1956_v16, %v1954_v19 }
 0x467   :  { %v1922_v59 = vadd.f32 %v1921_v1, %v1920_v26  ;;  %s4964_s20 = sld [smem:[#allocation18 + $0x7]]  ;;  %v1969_v40 = vmul.f32 %v1968_v62, %v1894_v14  ;;  %v1971_v15 = vstv %s4940_s7  ;;  %v1983_v28 = vadd.f32 %v1982_v13, %v1980_v39 }
 0x468   :  { %v1943_v5 = vadd.f32 %v1942_v9, %v1940_v22  ;;  %s4968_s14 = sld [smem:[#allocation18 + $0xf]]  ;;  %v1961_v23 = vstv %s4942_s5 }
 0x469   :  { %v1923_v20 = vmax.f32 %v1922_v59, 0.0  ;;  %s4970_s4 = sld [smem:[#allocation20]]  ;;  %v1992_v60 = vstv %s4949_s12  ;;  %v1970_v34 = vadd.f32 %v1969_v40, %v1967_v35 }
 0x46a   :  { %v1946_v44 = vadd.f32 %v1945_v56, %v1943_v5  ;;  %s4974_s0 = sld [smem:[#allocation20 + $0x2]]  ;;  %v1993_v25 = vmul.f32 %v1992_v60, %v1865_v43  ;;  %v1994_v10 = vstv %s4952_s21 }
 0x46b   :  { %v1959_v11 = vmul.f32 %v1958_v46, %v1923_v20  ;;  %v1985_v42 = vmul.f32 %v1984_v29, %v1923_v20  ;;  %s4976_s2 = sld [smem:[#allocation20 + $0x1]]  ;;  %v1972_v54 = vmul.f32 %v1971_v15, %v1923_v20  ;;  %v1997_v31 = vstv %s4958_s30 }
 0x46c   :  { %v1949_v41 = vadd.f32 %v1948_v8, %v1946_v44  ;;  %s4979_s9 = sld [smem:[#allocation20 + $0x3]]  ;;  %v1995_v49 = vmul.f32 %v1994_v10, %v1894_v14  ;;  %v1998_v3 = vmul.f32 %v1997_v31, %v1923_v20  ;;  %v1987_v37 = vstv %s4960_s22 }
 0x46d   :  { %v1960_v61 = vadd.f32 %v1959_v11, %v1957_v33  ;;  %v1986_v24 = vadd.f32 %v1985_v42, %v1983_v28  ;;  %v1974_v2 = vstv %s4964_s20  ;;  %v1973_v45 = vadd.f32 %v1972_v54, %v1970_v34 }
 0x46e   :  { %v1951_v17 = vadd.f32 %v1950_v32, %v1949_v41  ;;  %v1996_v36 = vadd.f32 %v1995_v49, %v1993_v25  ;;  %v2000_v58 = vstv %s4968_s14 }
 0x46f   :  { %v1964_v63 = vstv %s4970_s4 }
 0x470   :  { %v1952_v30 = vmax.f32 %v1951_v17, 0.0  ;;  %v1999_v52 = vadd.f32 %v1998_v3, %v1996_v36  ;;  %v1990_v27 = vstv %s4974_s0 }
 0x471   :  { %v1977_v43 = vstv %s4976_s2 }
 0x472   :  { %v1962_v48 = vmul.f32 %v1961_v23, %v1952_v30  ;;  %v1988_v6 = vmul.f32 %v1987_v37, %v1952_v30  ;;  %v1975_v53 = vmul.f32 %v1974_v2, %v1952_v30  ;;  %v2001_v50 = vmul.f32 %v2000_v58, %v1952_v30 }
 0x473   :  { %v2003_v0 = vstv %s4979_s9 }
 0x474   :  { %v1963_v14 = vadd.f32 %v1962_v48, %v1960_v61  ;;  %v1989_v21 = vadd.f32 %v1988_v6, %v1986_v24  ;;  %v1976_v18 = vadd.f32 %v1975_v53, %v1973_v45  ;;  %v2002_v12 = vadd.f32 %v2001_v50, %v1999_v52 }
 0x476   :  { %v1965_v38 = vadd.f32 %v1964_v63, %v1963_v14  ;;  %v1991_v1 = vadd.f32 %v1990_v27, %v1989_v21  ;;  %v1978_v51 = vadd.f32 %v1977_v43, %v1976_v18  ;;  %v2004_v57 = vadd.f32 %v2003_v0, %v2002_v12 }
 0x478   :  { %v2006_v26 = vsel %vm2005_vm0, %v1965_v38, -inf  ;;  %v2031_v7 = vsel %vm2005_vm0, %v1991_v1, -inf  ;;  %v2018_v9 = vsel %vm2005_vm0, %v1978_v51, -inf  ;;  %v2044_v56 = vsel %vm2005_vm0, %v2004_v57, -inf }
 0x479   :  { %2007 = vmax.xlane.f32.xlu0 %v2006_v26  ;;  %2032 = vmax.xlane.f32.xlu1 %v2031_v7 }
 0x47d   :  { %2019 = vmax.xlane.f32.xlu0 %v2018_v9  ;;  %2045 = vmax.xlane.f32.xlu1 %v2044_v56 }
 0x502   :  { %v2008_v8 = vpop.xlane.xlu0 %2007  ;;  %v2033_v4 = vpop.xlane.xlu1 %2032 }
 0x503   :  { %v2009_v55 = vsub.f32 %v1965_v38, %v2008_v8  ;;  %v2034_v59 = vsub.f32 %v1991_v1, %v2033_v4 }
 0x505   :  { %v2010_v22 = vmul.f32 1.442695, %v2009_v55  ;;  %v2035_v19 = vmul.f32 1.442695, %v2034_v59 }
 0x506   :  { %v2020_v16 = vpop.xlane.xlu0 %2019  ;;  %v2046_v46 = vpop.xlane.xlu1 %2045 }
 0x507   :  { %2559 = vpow2.f32 %v2010_v22  ;;  %v2021_v39 = vsub.f32 %v1978_v51, %v2020_v16  ;;  %v2047_v13 = vsub.f32 %v2004_v57, %v2046_v46 }
 0x508   :  { %2561 = vpow2.f32 %v2035_v19 }
 0x509   :  { %v2022_v29 = vmul.f32 1.442695, %v2021_v39  ;;  %v2048_v20 = vmul.f32 1.442695, %v2047_v13 }
 0x50b   :  { %2563 = vpow2.f32 %v2022_v29 }
 0x50c   :  { %2565 = vpow2.f32 %v2048_v20 }
 0x514   :  { %v2560_v5 = vpop.eup %2559 }
 0x515   :  { %v2562_v47 = vpop.eup %2561  ;;  %v2012_v62 = vsel %vm2005_vm0, %v2560_v5, 0.0 }
 0x516   :  { %2013 = vadd.xlane.f32.xlu0 %v2012_v62  ;;  %v2037_v35 = vsel %vm2005_vm0, %v2562_v47, 0.0 }
 0x518   :  { %v2564_v40 = vpop.eup %2563 }
 0x519   :  { %v2566_v15 = vpop.eup %2565  ;;  %v2024_v44 = vsel %vm2005_vm0, %v2564_v40, 0.0 }
 0x51a   :  { %2038 = vadd.xlane.f32.xlu0 %v2037_v35  ;;  %2025 = vadd.xlane.f32.xlu1 %v2024_v44  ;;  %v2050_v32 = vsel %vm2005_vm0, %v2566_v15, 0.0 }
 0x51e   :  { %2051 = vadd.xlane.f32.xlu1 %v2050_v32 }
 0x59f   :  { %v2014_v33 = vpop.xlane.xlu0 %2013 }
 0x5a0   :  { %2567 = vrcp.f32 %v2014_v33 }
 0x5a3   :  { %v2026_v11 = vpop.xlane.xlu1 %2025  ;;  %v2039_v28 = vpop.xlane.xlu0 %2038 }
 0x5a4   :  { %2569 = vrcp.f32 %v2026_v11 }
 0x5a5   :  { %2571 = vrcp.f32 %v2039_v28 }
 0x5a7   :  { %v2052_v42 = vpop.xlane.xlu1 %2051 }
 0x5a8   :  { %2573 = vrcp.f32 %v2052_v42 }
 0x5ad   :  { %v2568_v60 = vpop.eup %2567 }
 0x5ae   :  { %v2016_v41 = vmul.f32 %v2568_v60, %v2560_v5 }
 0x5b0   :  { %2017 = vst.msk [vmem:[#allocation21] sm:$0xff] %vm2005_vm0, %v2016_v41 }
 0x5b1   :  { %v2570_v34 = vpop.eup %2569 }
 0x5b2   :  { %v2572_v54 = vpop.eup %2571  ;;  %v2028_v25 = vmul.f32 %v2570_v34, %v2564_v40 }
 0x5b3   :  { %v2041_v10 = vmul.f32 %v2572_v54, %v2562_v47 }
 0x5b4   :  { %2030 = vst.msk [vmem:[#allocation21 + $0x8] sm:$0xff] %vm2005_vm0, %v2028_v25 }
 0x5b5   :  { %v2574_v31 = vpop.eup %2573  ;;  %2043 = vst.msk [vmem:[#allocation21 + $0x10] sm:$0xff] %vm2005_vm0, %v2041_v10 }
 0x5b6   :  { %v2054_v17 = vmul.f32 %v2574_v31, %v2566_v15 }
 0x5b8   :  { %2056 = vst.msk [vmem:[#allocation21 + $0x18] sm:$0xff] %vm2005_vm0, %v2054_v17 }
 0x5b9   :  { %2722 = shalt.err (!%p2719_p12)
}
 0x5ba   :  { %s5561_s16 = smov 8   ;;  %s5562_s11 = smov 128  }
 0x5bb   :  { %s5563_s18 = sld [smem:[#allocation138_spill]] }
 0x5c1   :  { %2068 = dma.vmem_to_hbm [thread:$0]  %s2063_s6, 512, %s5563_s18, [#allocation4], %s5562_s11, %s5562_s11, %s5561_s16  }
 0x5c2   :  { %2745 = dma.done.wait [#allocation4], 512  }
 0x5c3   :  { %2746 = vsyncadd [#allocation4], 4294966784 }
 0x5c4   :  { %2072 = vsyncpa [#allocation3], 1 }
 0x5c5   :  { %2073 = vsyncpa [#allocation4], 1 }
 0x5c6   :  { %2074 = vsyncpa [#allocation5], 1 }
 0x5c7   :  { %2075 = vsyncpa [#allocation6], 1 }
 0x5c8   :  { %2076 = vsyncpa [#allocation10], 1 }
 0x5c9   :  { %2077 = vsyncpa [#allocation13], 1 }
 0x5ca   :  { %2078 = vsyncpa [#allocation16], 1 }
 0x5cb   :  { %2079 = vsyncpa [#allocation19], 1 }

</bundles_post_ra>
